<compile_context>
chip_gen: v7x
topology: tpu7x:2x2x1
jax: 0.10.0
libtpu: 0.0.40
codegen_flags: <defaults>
</compile_context>

<pallas_src>
import functools

import numpy as np
import jax
import jax.numpy as jnp
from jax.experimental import pallas as pl
from jax.experimental.pallas import tpu as pltpu


VMEM_LIMIT_BYTES = 32 * 1024 * 1024   # keep <= 32 MiB so the same tiling is safe on v7x
GATE_TN = 2048                        # gate-FC column tile ([tn/2 update | tn/2 rs] per tile)


def _round_up(x, m):
    return (x + m - 1) // m * m


# ----------------------------------------------------------------------------
# Kernel 1: fc7 + LeakyReLU + int8 fused update/rs gate FC + zero-hidden GRU combine
# ----------------------------------------------------------------------------
def _gate_kernel(x_ref, w7_ref, b7_ref, wq_ref, sc_ref, bg_ref, o_ref):
    # fc7 + LeakyReLU(0.01); recomputed per column tile (tiny FLOPs), but the fc7 weight
    # block index is constant across the grid so it is DMA'd only once per core.
    r = jnp.dot(x_ref[...], w7_ref[...], preferred_element_type=jnp.float32) + b7_ref[...]
    r = jnp.where(r >= 0.0, r, 0.01 * r).astype(jnp.bfloat16)

    # int8 weight-only gate FC: dequantize via per-output-column scale in the epilogue
    # (exact: scale factors out of the column dot product), bias added after scaling.
    w = wq_ref[...].astype(jnp.float32).astype(jnp.bfloat16)
    t = jnp.dot(r, w, preferred_element_type=jnp.float32) * sc_ref[...] + bg_ref[...]

    # zero-initial-hidden single-step GRU:
    #   gru = u*h + (1-u)*tanh(t_rs)  with h == 0  =>  (1 - sigmoid(t_u)) * tanh(t_rs)
    #   1 - sigmoid(t) == 0.5*(1 - tanh(t/2))  (numerically stable, EUP-only)
    nh = o_ref.shape[-1]
    o_ref[...] = (0.5 * (1.0 - jnp.tanh(0.5 * t[:, :nh]))) * jnp.tanh(t[:, nh:])


def gate_fc_gru(x_p, params, n_hid):
    mp, kp7 = x_p.shape
    n_fc = params["fc7_w"].shape[1]
    wq = params["gate_wq"]                 # (n_fc, 2*n_hid) int8, tile-interleaved cols
    ncol = wq.shape[1]
    tn = GATE_TN
    assert ncol % tn == 0 and n_hid % (tn // 2) == 0

    return pl.pallas_call(
        _gate_kernel,
        out_shape=jax.ShapeDtypeStruct((mp, n_hid), jnp.float32),
        grid_spec=pltpu.PrefetchScalarGridSpec(
            num_scalar_prefetch=0,
            grid=(ncol // tn,),
            in_specs=[
                pl.BlockSpec((mp, kp7), lambda j: (0, 0)),      # x (loaded once)
                pl.BlockSpec((kp7, n_fc), lambda j: (0, 0)),    # fc7 weight (loaded once)
                pl.BlockSpec((1, n_fc), lambda j: (0, 0)),      # fc7 bias
                pl.BlockSpec((n_fc, tn), lambda j: (0, j)),     # int8 gate weight stream
                pl.BlockSpec((1, tn), lambda j: (0, j)),        # per-column dequant scale
                pl.BlockSpec((1, tn), lambda j: (0, j)),        # gate bias
            ],
            out_specs=pl.BlockSpec((mp, tn // 2), lambda j: (0, j)),
        ),
        compiler_params=pltpu.CompilerParams(
            dimension_semantics=("parallel",),                  # megacore splits the stream
            vmem_limit_bytes=VMEM_LIMIT_BYTES),
    )(x_p, params["fc7_w"], params["fc7_b"], wq, params["gate_scale"], params["gate_b"])


# ----------------------------------------------------------------------------
# Kernel 2: fused head tail — 3x3 reduce conv + ReLU, 2x2 deconv + ReLU, 1x1 predictor
#   input x3[b, kx, i, x, c] = zero-padded, bilinearly resized feature map pre-shifted
#   along kx (built by one tiny XLA einsum); the 3x3 conv is 9 shifted reads of this
#   VMEM-resident slab accumulated into a single (half*half, 128) f32 tile.
# ----------------------------------------------------------------------------
def _tail_kernel(x3_ref, wred_ref, bred_ref, wdec_ref, bdec_ref,
                 wpred_ref, bpred_ref, o_ref, *, half):
    rows = half * half
    c2d = wred_ref.shape[1]

    # 3x3 conv, padding 1 (pad already applied): 9 shifted reads -> 9 MXU dots.
    acc = jnp.zeros((rows, 128), jnp.float32)
    for ky in range(3):
        for kx in range(3):
            blk = x3_ref[0, kx, ky:ky + half, :, :].reshape(rows, c2d)
            acc = acc + jnp.dot(blk, wred_ref[ky * 3 + kx],
                                preferred_element_type=jnp.float32)
    red = jnp.maximum(acc + bred_ref[...], 0.0).astype(jnp.bfloat16)      # (rows, 128)

    # 2x2 stride-2 transposed conv: columns grouped per (ky,kx), 128 lanes per group.
    dec = jnp.dot(red, wdec_ref[...], preferred_element_type=jnp.float32) + bdec_ref[...]
    dec = jnp.maximum(dec, 0.0).astype(jnp.bfloat16)                      # (rows, 4*128)

    # 1x1 predictor applied per (ky,kx) output-pixel group; lane-dense 128-wide stores.
    wp = wpred_ref[...]
    bp = bpred_ref[...]
    for g in range(4):
        pg = jnp.dot(dec[:, g * 128:(g + 1) * 128], wp,
                     preferred_element_type=jnp.float32) + bp
        o_ref[0, g] = pg


def voxel_tail(x3, params, half, c2d):
    B = x3.shape[0]
    rows = half * half
    return pl.pallas_call(
        functools.partial(_tail_kernel, half=half),
        out_shape=jax.ShapeDtypeStruct((B, 4, rows, 128), jnp.float32),
        grid_spec=pltpu.PrefetchScalarGridSpec(
            num_scalar_prefetch=0,
            grid=(B,),
            in_specs=[
                pl.BlockSpec((1, 3, half + 2, half, c2d), lambda b: (b, 0, 0, 0, 0)),
                pl.BlockSpec((9, c2d, 128), lambda b: (0, 0, 0)),
                pl.BlockSpec((1, 128), lambda b: (0, 0)),
                pl.BlockSpec((128, 512), lambda b: (0, 0)),
                pl.BlockSpec((1, 512), lambda b: (0, 0)),
                pl.BlockSpec((128, 128), lambda b: (0, 0)),
                pl.BlockSpec((1, 128), lambda b: (0, 0)),
            ],
            out_specs=pl.BlockSpec((1, 4, rows, 128), lambda b: (b, 0, 0, 0)),
        ),
        compiler_params=pltpu.CompilerParams(
            dimension_semantics=("parallel",),
            vmem_limit_bytes=VMEM_LIMIT_BYTES),
    )(x3, params["red_w"], params["red_b"], params["dec_w"], params["dec_b"],
      params["pred_w"], params["pred_b"])


# ----------------------------------------------------------------------------
# bilinear-resize matrices (PyTorch F.interpolate, mode='bilinear', align_corners=False)
# ----------------------------------------------------------------------------
def _bilinear_matrix(in_size, out_size):
    scale = in_size / out_size
    m = np.zeros((out_size, in_size), np.float32)
    for i in range(out_size):
        src = (i + 0.5) * scale - 0.5
        src = max(src, 0.0)
        i0 = min(int(np.floor(src)), in_size - 1)
        i1 = min(i0 + 1, in_size - 1)
        frac = src - i0
        m[i, i0] += 1.0 - frac
        m[i, i1] += frac
    return m


# ----------------------------------------------------------------------------
# parameters: raw (PyTorch-layout, synthetic) + one-time matmul-ready preparation
# ----------------------------------------------------------------------------
def init_params(key, input_channels, voxel_size, conv_dims,
                n_fc=1024, n_h_feat=128, n_gru_vox=4):
    """Raw parameters in PyTorch layout (mirrors a checkpoint)."""
    keys = jax.random.split(key, 16)

    def nrm(k, shape, scale=0.02):
        return scale * jax.random.normal(k, shape, jnp.float32)

    fc_in = input_channels * 5 * 5
    hvol = n_h_feat * n_gru_vox ** 3
    p = {"fc7_w": nrm(keys[0], (n_fc, fc_in)),
         "fc7_b": nrm(keys[1], (n_fc,))}
    for i, nm in enumerate(("upd", "rst", "rs")):
        p[nm] = {
            "fc_w": nrm(keys[2 + 3 * i], (hvol, n_fc), scale=0.01),
            "conv_w": nrm(keys[3 + 3 * i], (n_h_feat, n_h_feat, 3, 3, 3), scale=0.01),
            "bias": jnp.zeros((1, n_h_feat, 1, 1, 1), jnp.float32),
        }
    p["reduce_w"] = nrm(keys[11], (conv_dims, n_h_feat * n_gru_vox, 3, 3), scale=0.02)
    p["reduce_b"] = jnp.zeros((conv_dims,), jnp.float32)
    p["deconv_w"] = nrm(keys[12], (conv_dims, conv_dims, 2, 2), scale=0.05)
    p["deconv_b"] = jnp.zeros((conv_dims,), jnp.float32)
    p["pred_w"] = nrm(keys[13], (voxel_size, conv_dims, 1, 1), scale=0.001)
    p["pred_b"] = jnp.zeros((voxel_size,), jnp.float32)
    return p


def prepare_params(raw, *, input_channels, voxel_size, conv_dims,
                   n_fc=1024, n_h_feat=128, n_gru_vox=4):
    """One-time relayout: (K, N) orientation, lane-aligned zero-padding, bf16 weight
    streams, and int8 + per-column-scale quantization of the dominant gate FC."""
    vox = n_gru_vox
    vox3 = vox ** 3
    n_hid = n_h_feat * vox3
    fc_in = input_channels * 5 * 5
    half = voxel_size // 2
    c2d = n_h_feat * vox

    assert conv_dims <= 128 and voxel_size <= 128
    assert c2d % 128 == 0 and n_hid % (GATE_TN // 2) == 0

    p = {}

    # fc7: torch (n_fc, fc_in) -> (Kp, n_fc), zero-padded K rows, bf16.
    kp7 = _round_up(fc_in, 128)
    w7 = raw["fc7_w"].T.astype(jnp.bfloat16)
    p["fc7_w"] = jnp.zeros((kp7, n_fc), jnp.bfloat16).at[:fc_in, :].set(w7)
    p["fc7_b"] = raw["fc7_b"].astype(jnp.float32).reshape(1, n_fc)

    # Fused update/rs gate FC.  Columns are interleaved per GATE_TN-wide tile as
    # [tn/2 update cols | tn/2 rs cols] so the GRU combine can run in the matmul
    # epilogue.  Weights are int8 with exact per-output-column dequant scales.
    # NOTE: raw["rst"] (reset gate) and all three Conv3d weights are mathematically dead
    # for this module's forward (h starts at zero, single time step) and are not streamed.
    tn2 = GATE_TN // 2
    nt = n_hid // tn2
    upd = raw["upd"]["fc_w"].T            # (n_fc, n_hid)
    rsw = raw["rs"]["fc_w"].T
    w_cat = jnp.concatenate(
        [upd.reshape(n_fc, nt, tn2), rsw.reshape(n_fc, nt, tn2)], axis=2
    ).reshape(n_fc, 2 * n_hid)
    absmax = jnp.max(jnp.abs(w_cat), axis=0)
    scale = jnp.where(absmax > 0, absmax / 127.0, 1.0)
    p["gate_wq"] = jnp.clip(jnp.round(w_cat / scale), -127, 127).astype(jnp.int8)
    p["gate_scale"] = scale.reshape(1, -1).astype(jnp.float32)
    # bias layout: hvol viewed channel-major (c*vox3 + spatial), matching the head reshape.
    b_upd = jnp.repeat(raw["upd"]["bias"].reshape(-1), vox3)
    b_rs = jnp.repeat(raw["rs"]["bias"].reshape(-1), vox3)
    p["gate_b"] = jnp.concatenate(
        [b_upd.reshape(nt, tn2), b_rs.reshape(nt, tn2)], axis=1
    ).reshape(1, 2 * n_hid).astype(jnp.float32)

    # bilinear resize (vox -> half) + conv zero-pad + kx pre-shift matrices (trace consts).
    mr = _bilinear_matrix(vox, half)                  # (half, vox), same for H and W
    m_pad = np.zeros((half + 2, vox), np.float32)
    m_pad[1:half + 1] = mr
    mw3 = np.zeros((3, half, vox), np.float32)
    for kx in range(3):
        for xx in range(half):
            mw3[kx, xx] = m_pad[xx + kx]
    p["mh_pad"] = jnp.asarray(m_pad)
    p["mw3"] = jnp.asarray(mw3)

    # reduce_dim 3x3 conv: (Cout, Cin, 3, 3) -> (9, Cin, 128) with p = ky*3+kx.
    red = raw["reduce_w"].transpose(2, 3, 1, 0).reshape(9, c2d, conv_dims)
    p["red_w"] = jnp.zeros((9, c2d, 128), jnp.bfloat16).at[:, :, :conv_dims].set(
        red.astype(jnp.bfloat16))
    p["red_b"] = jnp.zeros((1, 128), jnp.float32).at[0, :conv_dims].set(raw["reduce_b"])

    # deconv 2x2 stride 2: (Cin, Cout, 2, 2) -> (128, 4 groups * 128), group g = ky*2+kx.
    dec = raw["deconv_w"].transpose(0, 2, 3, 1).reshape(conv_dims, 4, conv_dims)
    wdec = jnp.zeros((128, 4, 128), jnp.bfloat16).at[:conv_dims, :, :conv_dims].set(
        dec.astype(jnp.bfloat16))
    p["dec_w"] = wdec.reshape(128, 512)
    p["dec_b"] = jnp.zeros((1, 4, 128), jnp.float32).at[0, :, :conv_dims].set(
        jnp.broadcast_to(raw["deconv_b"], (4, conv_dims))).reshape(1, 512)

    # predictor 1x1 conv: (V, Cdim, 1, 1) -> (128, 128), rows/cols zero-padded.
    pred = raw["pred_w"].reshape(voxel_size, conv_dims).T
    p["pred_w"] = jnp.zeros((128, 128), jnp.bfloat16).at[:conv_dims, :voxel_size].set(
        pred.astype(jnp.bfloat16))
    p["pred_b"] = jnp.zeros((1, 128), jnp.float32).at[0, :voxel_size].set(raw["pred_b"])
    return p


# ----------------------------------------------------------------------------
# RecurrentVoxelHead.forward
# ----------------------------------------------------------------------------
def recurrent_voxel_head_forward(x, params, *, voxel_size, conv_dims,
                                 n_h_feat=128, n_gru_vox=4):
    B = x.shape[0]
    V = voxel_size
    half = V // 2
    vox = n_gru_vox
    c2d = n_h_feat * vox
    n_hid = n_h_feat * vox ** 3
    kp7 = params["fc7_w"].shape[0]
    mp = _round_up(max(B, 8), 8)

    # ---- kernel 1: recurrent_layer single step with h == 0 -------------------------------
    # fc7 + LeakyReLU + fused update/rs gate FC (int8) + GRU combine, one pallas_call.
    # TODO(synk): the general multi-step / nonzero-hidden GRU path (reset gate + Conv3d-on-
    # hidden terms) and BN_FCConv3DLayer's time-conditioned batch-norm sublayers (source not
    # provided) are not implemented in this optimized forward.
    x_flat = x.reshape(B, -1).astype(jnp.bfloat16)
    x_p = jnp.zeros((mp, kp7), jnp.bfloat16).at[:B, :x_flat.shape[1]].set(x_flat)
    gru = gate_fc_gru(x_p, params, n_hid)                       # (mp, n_hid) f32

    # ---- tiny XLA glue: reshape + bilinear resize + zero-pad + kx pre-shift (<1 MiB) ------
    # hvol viewed channel-major: (C=128, 4, 4, 4) -> flatten(1,2) -> (512, 4, 4).
    feat = gru[:B].reshape(B, c2d, vox, vox)
    x3 = jnp.einsum("ia,kxw,bcaw->bkixc",
                    params["mh_pad"], params["mw3"], feat).astype(jnp.bfloat16)
    # x3: (B, 3, half+2, half, c2d) == padded-resized slab pre-shifted along kx.

    # ---- kernel 2: reduce conv + ReLU + deconv + ReLU + predictor, one pallas_call --------
    ko = voxel_tail(x3, params, half, c2d)                      # (B, 4, half*half, 128)

    # ---- tiny output reshuffle in XLA ------------------------------------------------------
    out = ko[:, :, :, :V].reshape(B, 2, 2, half, half, V)       # (b, ky, kx, y, x, v)
    out = out.transpose(0, 5, 3, 1, 4, 2).reshape(B, V, 2 * half, 2 * half)
    return out                                                  # (B, V, V, V)


# ----------------------------------------------------------------------------
if __name__ == "__main__":
    key = jax.random.PRNGKey(0)
    B, C = 2, 16            # batch, COMPUTED_INPUT_CHANNELS (encoder output is (B, C, 5, 5))
    V, conv_dims = 16, 32   # VOXEL_SIZE (even), CONV_DIM

    k_x, k_p = jax.random.split(key)
    x = jax.random.normal(k_x, (B, C, 5, 5), jnp.float32)
    raw = init_params(k_p, C, V, conv_dims)
    params = prepare_params(raw, input_channels=C, voxel_size=V, conv_dims=conv_dims)

    fwd = jax.jit(functools.partial(
        recurrent_voxel_head_forward, voxel_size=V, conv_dims=conv_dims))
    out = jax.block_until_ready(fwd(x, params))

    assert out.shape == (B, V, V, V), out.shape
    assert bool(jnp.all(jnp.isfinite(out)))
    print("KERNEL_OK")
</pallas_src>

<mosaic_0001>
module attributes {stable_mosaic.version = 11 : i64} {
  func.func @_gate_kernel(%arg0: i32, %arg1: memref<8x512xbf16, #tpu.memory_space<vmem>>, %arg2: memref<512x1024xbf16, #tpu.memory_space<vmem>>, %arg3: memref<1x1024xf32, #tpu.memory_space<vmem>>, %arg4: memref<1024x2048xi8, #tpu.memory_space<vmem>>, %arg5: memref<1x2048xf32, #tpu.memory_space<vmem>>, %arg6: memref<1x2048xf32, #tpu.memory_space<vmem>>, %arg7: memref<8x1024xf32, #tpu.memory_space<vmem>>) attributes {dimension_semantics = [#tpu.dimension_semantics<parallel>], iteration_bounds = array<i64: 8>, scalar_prefetch = 0 : i64, scratch_operands = 0 : i64, tpu.core_type = #tpu.core_type<tc>, window_params = [{pipeline_mode = #tpu.pipeline_mode<synchronous>, transform_indices = @transform_0, window_bounds = array<i64: 8, 512>}, {pipeline_mode = #tpu.pipeline_mode<synchronous>, transform_indices = @transform_1, window_bounds = array<i64: 512, 1024>}, {pipeline_mode = #tpu.pipeline_mode<synchronous>, transform_indices = @transform_2, window_bounds = array<i64: 1, 1024>}, {transform_indices = @transform_3, window_bounds = array<i64: 1024, 2048>}, {transform_indices = @transform_4, window_bounds = array<i64: 1, 2048>}, {transform_indices = @transform_5, window_bounds = array<i64: 1, 2048>}, {transform_indices = @transform_6, window_bounds = array<i64: 8, 1024>}]} {
    %c0 = arith.constant 0 : index
    %c0_0 = arith.constant 0 : index
    %0 = vector.load %arg1[%c0, %c0_0] : memref<8x512xbf16, #tpu.memory_space<vmem>>, vector<8x512xbf16>
    %c0_1 = arith.constant 0 : index
    %c0_2 = arith.constant 0 : index
    %1 = vector.load %arg2[%c0_1, %c0_2] : memref<512x1024xbf16, #tpu.memory_space<vmem>>, vector<512x1024xbf16>
    %cst = arith.constant dense<0.000000e+00> : vector<8x1024xf32>
    %2 = tpu.matmul %0, %1, %cst {dimension_numbers = #tpu.dot_dimension_numbers<[1], [0], [0], [1], [0, 0, 1, 1], [], []>} : vector<8x512xbf16>, vector<512x1024xbf16>, vector<8x1024xf32> -> vector<8x1024xf32>
    %c0_3 = arith.constant 0 : index
    %c0_4 = arith.constant 0 : index
    %3 = vector.load %arg3[%c0_3, %c0_4] : memref<1x1024xf32, #tpu.memory_space<vmem>>, vector<1x1024xf32>
    %4 = vector.broadcast %3 : vector<1x1024xf32> to vector<8x1024xf32>
    %5 = arith.addf %2, %4 : vector<8x1024xf32>
    %cst_5 = arith.constant 0.000000e+00 : f32
    %6 = vector.broadcast %cst_5 : f32 to vector<8x1024xf32>
    %7 = arith.cmpf oge, %5, %6 : vector<8x1024xf32>
    %cst_6 = arith.constant 0.00999999977 : f32
    %8 = vector.broadcast %cst_6 : f32 to vector<8x1024xf32>
    %9 = arith.mulf %8, %5 : vector<8x1024xf32>
    %10 = arith.select %7, %5, %9 : vector<8x1024xi1>, vector<8x1024xf32>
    %11 = arith.truncf %10 : vector<8x1024xf32> to vector<8x1024xbf16>
    %c0_7 = arith.constant 0 : index
    %c0_8 = arith.constant 0 : index
    %12 = vector.load %arg4[%c0_7, %c0_8] : memref<1024x2048xi8, #tpu.memory_space<vmem>>, vector<1024x2048xi8>
    %13 = arith.sitofp %12 : vector<1024x2048xi8> to vector<1024x2048xf32>
    %14 = arith.truncf %13 : vector<1024x2048xf32> to vector<1024x2048xbf16>
    %cst_9 = arith.constant dense<0.000000e+00> : vector<8x2048xf32>
    %15 = tpu.matmul %11, %14, %cst_9 {dimension_numbers = #tpu.dot_dimension_numbers<[1], [0], [0], [1], [0, 0, 1, 1], [], []>} : vector<8x1024xbf16>, vector<1024x2048xbf16>, vector<8x2048xf32> -> vector<8x2048xf32>
    %c0_10 = arith.constant 0 : index
    %c0_11 = arith.constant 0 : index
    %16 = vector.load %arg5[%c0_10, %c0_11] : memref<1x2048xf32, #tpu.memory_space<vmem>>, vector<1x2048xf32>
    %17 = vector.broadcast %16 : vector<1x2048xf32> to vector<8x2048xf32>
    %18 = arith.mulf %15, %17 : vector<8x2048xf32>
    %c0_12 = arith.constant 0 : index
    %c0_13 = arith.constant 0 : index
    %19 = vector.load %arg6[%c0_12, %c0_13] : memref<1x2048xf32, #tpu.memory_space<vmem>>, vector<1x2048xf32>
    %20 = vector.broadcast %19 : vector<1x2048xf32> to vector<8x2048xf32>
    %21 = arith.addf %18, %20 : vector<8x2048xf32>
    %22 = vector.extract_strided_slice %21 {offsets = [0, 0], sizes = [8, 1024], strides = [1, 1]} : vector<8x2048xf32> to vector<8x1024xf32>
    %cst_14 = arith.constant 5.000000e-01 : f32
    %23 = vector.broadcast %cst_14 : f32 to vector<8x1024xf32>
    %24 = arith.mulf %23, %22 : vector<8x1024xf32>
    %25 = math.tanh %24 : vector<8x1024xf32>
    %cst_15 = arith.constant 1.000000e+00 : f32
    %26 = vector.broadcast %cst_15 : f32 to vector<8x1024xf32>
    %27 = arith.subf %26, %25 : vector<8x1024xf32>
    %cst_16 = arith.constant 5.000000e-01 : f32
    %28 = vector.broadcast %cst_16 : f32 to vector<8x1024xf32>
    %29 = arith.mulf %28, %27 : vector<8x1024xf32>
    %30 = vector.extract_strided_slice %21 {offsets = [0, 1024], sizes = [8, 1024], strides = [1, 1]} : vector<8x2048xf32> to vector<8x1024xf32>
    %31 = math.tanh %30 : vector<8x1024xf32>
    %32 = arith.mulf %29, %31 : vector<8x1024xf32>
    %c0_17 = arith.constant 0 : index
    %c0_18 = arith.constant 0 : index
    %33 = vector.load %arg7[%c0_17, %c0_18] : memref<8x1024xf32, #tpu.memory_space<vmem>>, vector<8x1024xf32>
    tpu.vector_store %arg7[%c0_17, %c0_18], %32 {strides = array<i32>} : memref<8x1024xf32, #tpu.memory_space<vmem>>, vector<8x1024xf32>,
    return
  }
  func.func @transform_0(%arg0: i32) -> (i32, i32) {
    %c0_i32 = arith.constant 0 : i32
    %c0_i32_0 = arith.constant 0 : i32
    %c0_i32_1 = arith.constant 0 : i32
    return %c0_i32, %c0_i32_0 : i32, i32
  }
  func.func @transform_1(%arg0: i32) -> (i32, i32) {
    %c0_i32 = arith.constant 0 : i32
    %c0_i32_0 = arith.constant 0 : i32
    %c0_i32_1 = arith.constant 0 : i32
    return %c0_i32, %c0_i32_0 : i32, i32
  }
  func.func @transform_2(%arg0: i32) -> (i32, i32) {
    %c0_i32 = arith.constant 0 : i32
    %c0_i32_0 = arith.constant 0 : i32
    %c0_i32_1 = arith.constant 0 : i32
    return %c0_i32, %c0_i32_0 : i32, i32
  }
  func.func @transform_3(%arg0: i32) -> (i32, i32) {
    %c0_i32 = arith.constant 0 : i32
    %c0_i32_0 = arith.constant 0 : i32
    return %c0_i32, %arg0 : i32, i32
  }
  func.func @transform_4(%arg0: i32) -> (i32, i32) {
    %c0_i32 = arith.constant 0 : i32
    %c0_i32_0 = arith.constant 0 : i32
    return %c0_i32, %arg0 : i32, i32
  }
  func.func @transform_5(%arg0: i32) -> (i32, i32) {
    %c0_i32 = arith.constant 0 : i32
    %c0_i32_0 = arith.constant 0 : i32
    return %c0_i32, %arg0 : i32, i32
  }
  func.func @transform_6(%arg0: i32) -> (i32, i32) {
    %c0_i32 = arith.constant 0 : i32
    %c0_i32_0 = arith.constant 0 : i32
    return %c0_i32, %arg0 : i32, i32
  }
}

module attributes {stable_mosaic.version = 11 : i64} {
  func.func @_tail_kernel(%arg0: i32, %arg1: memref<1x3x10x8x512xbf16, #tpu.memory_space<vmem>>, %arg2: memref<9x512x128xbf16, #tpu.memory_space<vmem>>, %arg3: memref<1x128xf32, #tpu.memory_space<vmem>>, %arg4: memref<128x512xbf16, #tpu.memory_space<vmem>>, %arg5: memref<1x512xf32, #tpu.memory_space<vmem>>, %arg6: memref<128x128xbf16, #tpu.memory_space<vmem>>, %arg7: memref<1x128xf32, #tpu.memory_space<vmem>>, %arg8: memref<1x4x64x128xf32, #tpu.memory_space<vmem>>) attributes {dimension_semantics = [#tpu.dimension_semantics<parallel>], iteration_bounds = array<i64: 2>, scalar_prefetch = 0 : i64, scratch_operands = 0 : i64, tpu.core_type = #tpu.core_type<tc>, window_params = [{transform_indices = @transform_0, window_bounds = array<i64: 1, 3, 10, 8, 512>}, {pipeline_mode = #tpu.pipeline_mode<synchronous>, transform_indices = @transform_1, window_bounds = array<i64: 9, 512, 128>}, {pipeline_mode = #tpu.pipeline_mode<synchronous>, transform_indices = @transform_2, window_bounds = array<i64: 1, 128>}, {pipeline_mode = #tpu.pipeline_mode<synchronous>, transform_indices = @transform_3, window_bounds = array<i64: 128, 512>}, {pipeline_mode = #tpu.pipeline_mode<synchronous>, transform_indices = @transform_4, window_bounds = array<i64: 1, 512>}, {pipeline_mode = #tpu.pipeline_mode<synchronous>, transform_indices = @transform_5, window_bounds = array<i64: 128, 128>}, {pipeline_mode = #tpu.pipeline_mode<synchronous>, transform_indices = @transform_6, window_bounds = array<i64: 1, 128>}, {transform_indices = @transform_7, window_bounds = array<i64: 1, 4, 64, 128>}]} {
    %cst = arith.constant 0.000000e+00 : f32
    %0 = vector.broadcast %cst : f32 to vector<64x128xf32>
    %c0 = arith.constant 0 : index
    %c0_0 = arith.constant 0 : index
    %c0_1 = arith.constant 0 : index
    %c0_2 = arith.constant 0 : index
    %c0_3 = arith.constant 0 : index
    %1 = vector.load %arg1[%c0, %c0_0, %c0_1, %c0_2, %c0_3] : memref<1x3x10x8x512xbf16, #tpu.memory_space<vmem>>, vector<1x1x8x8x512xbf16>
    %2 = vector.shape_cast %1 : vector<1x1x8x8x512xbf16> to vector<8x8x512xbf16>
    %3 = vector.shape_cast %2 : vector<8x8x512xbf16> to vector<64x512xbf16>
    %c0_4 = arith.constant 0 : index
    %c0_5 = arith.constant 0 : index
    %c0_6 = arith.constant 0 : index
    %4 = vector.load %arg2[%c0_4, %c0_5, %c0_6] : memref<9x512x128xbf16, #tpu.memory_space<vmem>>, vector<1x512x128xbf16>
    %5 = vector.shape_cast %4 : vector<1x512x128xbf16> to vector<512x128xbf16>
    %cst_7 = arith.constant dense<0.000000e+00> : vector<64x128xf32>
    %6 = tpu.matmul %3, %5, %cst_7 {dimension_numbers = #tpu.dot_dimension_numbers<[1], [0], [0], [1], [0, 0, 1, 1], [], []>} : vector<64x512xbf16>, vector<512x128xbf16>, vector<64x128xf32> -> vector<64x128xf32>
    %7 = arith.addf %0, %6 : vector<64x128xf32>
    %c0_8 = arith.constant 0 : index
    %c1 = arith.constant 1 : index
    %c0_9 = arith.constant 0 : index
    %c0_10 = arith.constant 0 : index
    %c0_11 = arith.constant 0 : index
    %8 = vector.load %arg1[%c0_8, %c1, %c0_9, %c0_10, %c0_11] : memref<1x3x10x8x512xbf16, #tpu.memory_space<vmem>>, vector<1x1x8x8x512xbf16>
    %9 = vector.shape_cast %8 : vector<1x1x8x8x512xbf16> to vector<8x8x512xbf16>
    %10 = vector.shape_cast %9 : vector<8x8x512xbf16> to vector<64x512xbf16>
    %c1_12 = arith.constant 1 : index
    %c0_13 = arith.constant 0 : index
    %c0_14 = arith.constant 0 : index
    %11 = vector.load %arg2[%c1_12, %c0_13, %c0_14] : memref<9x512x128xbf16, #tpu.memory_space<vmem>>, vector<1x512x128xbf16>
    %12 = vector.shape_cast %11 : vector<1x512x128xbf16> to vector<512x128xbf16>
    %cst_15 = arith.constant dense<0.000000e+00> : vector<64x128xf32>
    %13 = tpu.matmul %10, %12, %cst_15 {dimension_numbers = #tpu.dot_dimension_numbers<[1], [0], [0], [1], [0, 0, 1, 1], [], []>} : vector<64x512xbf16>, vector<512x128xbf16>, vector<64x128xf32> -> vector<64x128xf32>
    %14 = arith.addf %7, %13 : vector<64x128xf32>
    %c0_16 = arith.constant 0 : index
    %c2 = arith.constant 2 : index
    %c0_17 = arith.constant 0 : index
    %c0_18 = arith.constant 0 : index
    %c0_19 = arith.constant 0 : index
    %15 = vector.load %arg1[%c0_16, %c2, %c0_17, %c0_18, %c0_19] : memref<1x3x10x8x512xbf16, #tpu.memory_space<vmem>>, vector<1x1x8x8x512xbf16>
    %16 = vector.shape_cast %15 : vector<1x1x8x8x512xbf16> to vector<8x8x512xbf16>
    %17 = vector.shape_cast %16 : vector<8x8x512xbf16> to vector<64x512xbf16>
    %c2_20 = arith.constant 2 : index
    %c0_21 = arith.constant 0 : index
    %c0_22 = arith.constant 0 : index
    %18 = vector.load %arg2[%c2_20, %c0_21, %c0_22] : memref<9x512x128xbf16, #tpu.memory_space<vmem>>, vector<1x512x128xbf16>
    %19 = vector.shape_cast %18 : vector<1x512x128xbf16> to vector<512x128xbf16>
    %cst_23 = arith.constant dense<0.000000e+00> : vector<64x128xf32>
    %20 = tpu.matmul %17, %19, %cst_23 {dimension_numbers = #tpu.dot_dimension_numbers<[1], [0], [0], [1], [0, 0, 1, 1], [], []>} : vector<64x512xbf16>, vector<512x128xbf16>, vector<64x128xf32> -> vector<64x128xf32>
    %21 = arith.addf %14, %20 : vector<64x128xf32>
    %c0_24 = arith.constant 0 : index
    %c0_25 = arith.constant 0 : index
    %c1_26 = arith.constant 1 : index
    %c0_27 = arith.constant 0 : index
    %c0_28 = arith.constant 0 : index
    %22 = vector.load %arg1[%c0_24, %c0_25, %c1_26, %c0_27, %c0_28] : memref<1x3x10x8x512xbf16, #tpu.memory_space<vmem>>, vector<1x1x8x8x512xbf16>
    %23 = vector.shape_cast %22 : vector<1x1x8x8x512xbf16> to vector<8x8x512xbf16>
    %24 = vector.shape_cast %23 : vector<8x8x512xbf16> to vector<64x512xbf16>
    %c3 = arith.constant 3 : index
    %c0_29 = arith.constant 0 : index
    %c0_30 = arith.constant 0 : index
    %25 = vector.load %arg2[%c3, %c0_29, %c0_30] : memref<9x512x128xbf16, #tpu.memory_space<vmem>>, vector<1x512x128xbf16>
    %26 = vector.shape_cast %25 : vector<1x512x128xbf16> to vector<512x128xbf16>
    %cst_31 = arith.constant dense<0.000000e+00> : vector<64x128xf32>
    %27 = tpu.matmul %24, %26, %cst_31 {dimension_numbers = #tpu.dot_dimension_numbers<[1], [0], [0], [1], [0, 0, 1, 1], [], []>} : vector<64x512xbf16>, vector<512x128xbf16>, vector<64x128xf32> -> vector<64x128xf32>
    %28 = arith.addf %21, %27 : vector<64x128xf32>
    %c0_32 = arith.constant 0 : index
    %c1_33 = arith.constant 1 : index
    %c1_34 = arith.constant 1 : index
    %c0_35 = arith.constant 0 : index
    %c0_36 = arith.constant 0 : index
    %29 = vector.load %arg1[%c0_32, %c1_33, %c1_34, %c0_35, %c0_36] : memref<1x3x10x8x512xbf16, #tpu.memory_space<vmem>>, vector<1x1x8x8x512xbf16>
    %30 = vector.shape_cast %29 : vector<1x1x8x8x512xbf16> to vector<8x8x512xbf16>
    %31 = vector.shape_cast %30 : vector<8x8x512xbf16> to vector<64x512xbf16>
    %c4 = arith.constant 4 : index
    %c0_37 = arith.constant 0 : index
    %c0_38 = arith.constant 0 : index
    %32 = vector.load %arg2[%c4, %c0_37, %c0_38] : memref<9x512x128xbf16, #tpu.memory_space<vmem>>, vector<1x512x128xbf16>
    %33 = vector.shape_cast %32 : vector<1x512x128xbf16> to vector<512x128xbf16>
    %cst_39 = arith.constant dense<0.000000e+00> : vector<64x128xf32>
    %34 = tpu.matmul %31, %33, %cst_39 {dimension_numbers = #tpu.dot_dimension_numbers<[1], [0], [0], [1], [0, 0, 1, 1], [], []>} : vector<64x512xbf16>, vector<512x128xbf16>, vector<64x128xf32> -> vector<64x128xf32>
    %35 = arith.addf %28, %34 : vector<64x128xf32>
    %c0_40 = arith.constant 0 : index
    %c2_41 = arith.constant 2 : index
    %c1_42 = arith.constant 1 : index
    %c0_43 = arith.constant 0 : index
    %c0_44 = arith.constant 0 : index
    %36 = vector.load %arg1[%c0_40, %c2_41, %c1_42, %c0_43, %c0_44] : memref<1x3x10x8x512xbf16, #tpu.memory_space<vmem>>, vector<1x1x8x8x512xbf16>
    %37 = vector.shape_cast %36 : vector<1x1x8x8x512xbf16> to vector<8x8x512xbf16>
    %38 = vector.shape_cast %37 : vector<8x8x512xbf16> to vector<64x512xbf16>
    %c5 = arith.constant 5 : index
    %c0_45 = arith.constant 0 : index
    %c0_46 = arith.constant 0 : index
    %39 = vector.load %arg2[%c5, %c0_45, %c0_46] : memref<9x512x128xbf16, #tpu.memory_space<vmem>>, vector<1x512x128xbf16>
    %40 = vector.shape_cast %39 : vector<1x512x128xbf16> to vector<512x128xbf16>
    %cst_47 = arith.constant dense<0.000000e+00> : vector<64x128xf32>
    %41 = tpu.matmul %38, %40, %cst_47 {dimension_numbers = #tpu.dot_dimension_numbers<[1], [0], [0], [1], [0, 0, 1, 1], [], []>} : vector<64x512xbf16>, vector<512x128xbf16>, vector<64x128xf32> -> vector<64x128xf32>
    %42 = arith.addf %35, %41 : vector<64x128xf32>
    %c0_48 = arith.constant 0 : index
    %c0_49 = arith.constant 0 : index
    %c2_50 = arith.constant 2 : index
    %c0_51 = arith.constant 0 : index
    %c0_52 = arith.constant 0 : index
    %43 = vector.load %arg1[%c0_48, %c0_49, %c2_50, %c0_51, %c0_52] : memref<1x3x10x8x512xbf16, #tpu.memory_space<vmem>>, vector<1x1x8x8x512xbf16>
    %44 = vector.shape_cast %43 : vector<1x1x8x8x512xbf16> to vector<8x8x512xbf16>
    %45 = vector.shape_cast %44 : vector<8x8x512xbf16> to vector<64x512xbf16>
    %c6 = arith.constant 6 : index
    %c0_53 = arith.constant 0 : index
    %c0_54 = arith.constant 0 : index
    %46 = vector.load %arg2[%c6, %c0_53, %c0_54] : memref<9x512x128xbf16, #tpu.memory_space<vmem>>, vector<1x512x128xbf16>
    %47 = vector.shape_cast %46 : vector<1x512x128xbf16> to vector<512x128xbf16>
    %cst_55 = arith.constant dense<0.000000e+00> : vector<64x128xf32>
    %48 = tpu.matmul %45, %47, %cst_55 {dimension_numbers = #tpu.dot_dimension_numbers<[1], [0], [0], [1], [0, 0, 1, 1], [], []>} : vector<64x512xbf16>, vector<512x128xbf16>, vector<64x128xf32> -> vector<64x128xf32>
    %49 = arith.addf %42, %48 : vector<64x128xf32>
    %c0_56 = arith.constant 0 : index
    %c1_57 = arith.constant 1 : index
    %c2_58 = arith.constant 2 : index
    %c0_59 = arith.constant 0 : index
    %c0_60 = arith.constant 0 : index
    %50 = vector.load %arg1[%c0_56, %c1_57, %c2_58, %c0_59, %c0_60] : memref<1x3x10x8x512xbf16, #tpu.memory_space<vmem>>, vector<1x1x8x8x512xbf16>
    %51 = vector.shape_cast %50 : vector<1x1x8x8x512xbf16> to vector<8x8x512xbf16>
    %52 = vector.shape_cast %51 : vector<8x8x512xbf16> to vector<64x512xbf16>
    %c7 = arith.constant 7 : index
    %c0_61 = arith.constant 0 : index
    %c0_62 = arith.constant 0 : index
    %53 = vector.load %arg2[%c7, %c0_61, %c0_62] : memref<9x512x128xbf16, #tpu.memory_space<vmem>>, vector<1x512x128xbf16>
    %54 = vector.shape_cast %53 : vector<1x512x128xbf16> to vector<512x128xbf16>
    %cst_63 = arith.constant dense<0.000000e+00> : vector<64x128xf32>
    %55 = tpu.matmul %52, %54, %cst_63 {dimension_numbers = #tpu.dot_dimension_numbers<[1], [0], [0], [1], [0, 0, 1, 1], [], []>} : vector<64x512xbf16>, vector<512x128xbf16>, vector<64x128xf32> -> vector<64x128xf32>
    %56 = arith.addf %49, %55 : vector<64x128xf32>
    %c0_64 = arith.constant 0 : index
    %c2_65 = arith.constant 2 : index
    %c2_66 = arith.constant 2 : index
    %c0_67 = arith.constant 0 : index
    %c0_68 = arith.constant 0 : index
    %57 = vector.load %arg1[%c0_64, %c2_65, %c2_66, %c0_67, %c0_68] : memref<1x3x10x8x512xbf16, #tpu.memory_space<vmem>>, vector<1x1x8x8x512xbf16>
    %58 = vector.shape_cast %57 : vector<1x1x8x8x512xbf16> to vector<8x8x512xbf16>
    %59 = vector.shape_cast %58 : vector<8x8x512xbf16> to vector<64x512xbf16>
    %c8 = arith.constant 8 : index
    %c0_69 = arith.constant 0 : index
    %c0_70 = arith.constant 0 : index
    %60 = vector.load %arg2[%c8, %c0_69, %c0_70] : memref<9x512x128xbf16, #tpu.memory_space<vmem>>, vector<1x512x128xbf16>
    %61 = vector.shape_cast %60 : vector<1x512x128xbf16> to vector<512x128xbf16>
    %cst_71 = arith.constant dense<0.000000e+00> : vector<64x128xf32>
    %62 = tpu.matmul %59, %61, %cst_71 {dimension_numbers = #tpu.dot_dimension_numbers<[1], [0], [0], [1], [0, 0, 1, 1], [], []>} : vector<64x512xbf16>, vector<512x128xbf16>, vector<64x128xf32> -> vector<64x128xf32>
    %63 = arith.addf %56, %62 : vector<64x128xf32>
    %c0_72 = arith.constant 0 : index
    %c0_73 = arith.constant 0 : index
    %64 = vector.load %arg3[%c0_72, %c0_73] : memref<1x128xf32, #tpu.memory_space<vmem>>, vector<1x128xf32>
    %65 = vector.broadcast %64 : vector<1x128xf32> to vector<64x128xf32>
    %66 = arith.addf %63, %65 : vector<64x128xf32>
    %cst_74 = arith.constant 0.000000e+00 : f32
    %67 = vector.broadcast %cst_74 : f32 to vector<64x128xf32>
    %68 = arith.maximumf %66, %67 : vector<64x128xf32>
    %69 = arith.truncf %68 : vector<64x128xf32> to vector<64x128xbf16>
    %c0_75 = arith.constant 0 : index
    %c0_76 = arith.constant 0 : index
    %70 = vector.load %arg4[%c0_75, %c0_76] : memref<128x512xbf16, #tpu.memory_space<vmem>>, vector<128x512xbf16>
    %cst_77 = arith.constant dense<0.000000e+00> : vector<64x512xf32>
    %71 = tpu.matmul %69, %70, %cst_77 {dimension_numbers = #tpu.dot_dimension_numbers<[1], [0], [0], [1], [0, 0, 1, 1], [], []>} : vector<64x128xbf16>, vector<128x512xbf16>, vector<64x512xf32> -> vector<64x512xf32>
    %c0_78 = arith.constant 0 : index
    %c0_79 = arith.constant 0 : index
    %72 = vector.load %arg5[%c0_78, %c0_79] : memref<1x512xf32, #tpu.memory_space<vmem>>, vector<1x512xf32>
    %73 = vector.broadcast %72 : vector<1x512xf32> to vector<64x512xf32>
    %74 = arith.addf %71, %73 : vector<64x512xf32>
    %cst_80 = arith.constant 0.000000e+00 : f32
    %75 = vector.broadcast %cst_80 : f32 to vector<64x512xf32>
    %76 = arith.maximumf %74, %75 : vector<64x512xf32>
    %77 = arith.truncf %76 : vector<64x512xf32> to vector<64x512xbf16>
    %c0_81 = arith.constant 0 : index
    %c0_82 = arith.constant 0 : index
    %78 = vector.load %arg6[%c0_81, %c0_82] : memref<128x128xbf16, #tpu.memory_space<vmem>>, vector<128x128xbf16>
    %c0_83 = arith.constant 0 : index
    %c0_84 = arith.constant 0 : index
    %79 = vector.load %arg7[%c0_83, %c0_84] : memref<1x128xf32, #tpu.memory_space<vmem>>, vector<1x128xf32>
    %80 = vector.extract_strided_slice %77 {offsets = [0, 0], sizes = [64, 128], strides = [1, 1]} : vector<64x512xbf16> to vector<64x128xbf16>
    %cst_85 = arith.constant dense<0.000000e+00> : vector<64x128xf32>
    %81 = tpu.matmul %80, %78, %cst_85 {dimension_numbers = #tpu.dot_dimension_numbers<[1], [0], [0], [1], [0, 0, 1, 1], [], []>} : vector<64x128xbf16>, vector<128x128xbf16>, vector<64x128xf32> -> vector<64x128xf32>
    %82 = vector.broadcast %79 : vector<1x128xf32> to vector<64x128xf32>
    %83 = arith.addf %81, %82 : vector<64x128xf32>
    %c0_86 = arith.constant 0 : index
    %c0_87 = arith.constant 0 : index
    %c0_88 = arith.constant 0 : index
    %c0_89 = arith.constant 0 : index
    %84 = vector.load %arg8[%c0_86, %c0_87, %c0_88, %c0_89] : memref<1x4x64x128xf32, #tpu.memory_space<vmem>>, vector<1x1x64x128xf32>
    %85 = vector.shape_cast %84 : vector<1x1x64x128xf32> to vector<64x128xf32>
    %86 = vector.shape_cast %83 : vector<64x128xf32> to vector<1x1x64x128xf32>
    tpu.vector_store %arg8[%c0_86, %c0_87, %c0_88, %c0_89], %86 {strides = array<i32>} : memref<1x4x64x128xf32, #tpu.memory_space<vmem>>, vector<1x1x64x128xf32>,
    %87 = vector.extract_strided_slice %77 {offsets = [0, 128], sizes = [64, 128], strides = [1, 1]} : vector<64x512xbf16> to vector<64x128xbf16>
    %cst_90 = arith.constant dense<0.000000e+00> : vector<64x128xf32>
    %88 = tpu.matmul %87, %78, %cst_90 {dimension_numbers = #tpu.dot_dimension_numbers<[1], [0], [0], [1], [0, 0, 1, 1], [], []>} : vector<64x128xbf16>, vector<128x128xbf16>, vector<64x128xf32> -> vector<64x128xf32>
    %89 = vector.broadcast %79 : vector<1x128xf32> to vector<64x128xf32>
    %90 = arith.addf %88, %89 : vector<64x128xf32>
    %c0_91 = arith.constant 0 : index
    %c1_92 = arith.constant 1 : index
    %c0_93 = arith.constant 0 : index
    %c0_94 = arith.constant 0 : index
    %91 = vector.load %arg8[%c0_91, %c1_92, %c0_93, %c0_94] : memref<1x4x64x128xf32, #tpu.memory_space<vmem>>, vector<1x1x64x128xf32>
    %92 = vector.shape_cast %91 : vector<1x1x64x128xf32> to vector<64x128xf32>
    %93 = vector.shape_cast %90 : vector<64x128xf32> to vector<1x1x64x128xf32>
    tpu.vector_store %arg8[%c0_91, %c1_92, %c0_93, %c0_94], %93 {strides = array<i32>} : memref<1x4x64x128xf32, #tpu.memory_space<vmem>>, vector<1x1x64x128xf32>,
    %94 = vector.extract_strided_slice %77 {offsets = [0, 256], sizes = [64, 128], strides = [1, 1]} : vector<64x512xbf16> to vector<64x128xbf16>
    %cst_95 = arith.constant dense<0.000000e+00> : vector<64x128xf32>
    %95 = tpu.matmul %94, %78, %cst_95 {dimension_numbers = #tpu.dot_dimension_numbers<[1], [0], [0], [1], [0, 0, 1, 1], [], []>} : vector<64x128xbf16>, vector<128x128xbf16>, vector<64x128xf32> -> vector<64x128xf32>
    %96 = vector.broadcast %79 : vector<1x128xf32> to vector<64x128xf32>
    %97 = arith.addf %95, %96 : vector<64x128xf32>
    %c0_96 = arith.constant 0 : index
    %c2_97 = arith.constant 2 : index
    %c0_98 = arith.constant 0 : index
    %c0_99 = arith.constant 0 : index
    %98 = vector.load %arg8[%c0_96, %c2_97, %c0_98, %c0_99] : memref<1x4x64x128xf32, #tpu.memory_space<vmem>>, vector<1x1x64x128xf32>
    %99 = vector.shape_cast %98 : vector<1x1x64x128xf32> to vector<64x128xf32>
    %100 = vector.shape_cast %97 : vector<64x128xf32> to vector<1x1x64x128xf32>
    tpu.vector_store %arg8[%c0_96, %c2_97, %c0_98, %c0_99], %100 {strides = array<i32>} : memref<1x4x64x128xf32, #tpu.memory_space<vmem>>, vector<1x1x64x128xf32>,
    %101 = vector.extract_strided_slice %77 {offsets = [0, 384], sizes = [64, 128], strides = [1, 1]} : vector<64x512xbf16> to vector<64x128xbf16>
    %cst_100 = arith.constant dense<0.000000e+00> : vector<64x128xf32>
    %102 = tpu.matmul %101, %78, %cst_100 {dimension_numbers = #tpu.dot_dimension_numbers<[1], [0], [0], [1], [0, 0, 1, 1], [], []>} : vector<64x128xbf16>, vector<128x128xbf16>, vector<64x128xf32> -> vector<64x128xf32>
    %103 = vector.broadcast %79 : vector<1x128xf32> to vector<64x128xf32>
    %104 = arith.addf %102, %103 : vector<64x128xf32>
    %c0_101 = arith.constant 0 : index
    %c3_102 = arith.constant 3 : index
    %c0_103 = arith.constant 0 : index
    %c0_104 = arith.constant 0 : index
    %105 = vector.load %arg8[%c0_101, %c3_102, %c0_103, %c0_104] : memref<1x4x64x128xf32, #tpu.memory_space<vmem>>, vector<1x1x64x128xf32>
    %106 = vector.shape_cast %105 : vector<1x1x64x128xf32> to vector<64x128xf32>
    %107 = vector.shape_cast %104 : vector<64x128xf32> to vector<1x1x64x128xf32>
    tpu.vector_store %arg8[%c0_101, %c3_102, %c0_103, %c0_104], %107 {strides = array<i32>} : memref<1x4x64x128xf32, #tpu.memory_space<vmem>>, vector<1x1x64x128xf32>,
    return
  }
  func.func @transform_0(%arg0: i32) -> (i32, i32, i32, i32, i32) {
    %c0_i32 = arith.constant 0 : i32
    %c0_i32_0 = arith.constant 0 : i32
    %c0_i32_1 = arith.constant 0 : i32
    %c0_i32_2 = arith.constant 0 : i32
    %c0_i32_3 = arith.constant 0 : i32
    return %arg0, %c0_i32, %c0_i32_0, %c0_i32_1, %c0_i32_2 : i32, i32, i32, i32, i32
  }
  func.func @transform_1(%arg0: i32) -> (i32, i32, i32) {
    %c0_i32 = arith.constant 0 : i32
    %c0_i32_0 = arith.constant 0 : i32
    %c0_i32_1 = arith.constant 0 : i32
    %c0_i32_2 = arith.constant 0 : i32
    return %c0_i32, %c0_i32_0, %c0_i32_1 : i32, i32, i32
  }
  func.func @transform_2(%arg0: i32) -> (i32, i32) {
    %c0_i32 = arith.constant 0 : i32
    %c0_i32_0 = arith.constant 0 : i32
    %c0_i32_1 = arith.constant 0 : i32
    return %c0_i32, %c0_i32_0 : i32, i32
  }
  func.func @transform_3(%arg0: i32) -> (i32, i32) {
    %c0_i32 = arith.constant 0 : i32
    %c0_i32_0 = arith.constant 0 : i32
    %c0_i32_1 = arith.constant 0 : i32
    return %c0_i32, %c0_i32_0 : i32, i32
  }
  func.func @transform_4(%arg0: i32) -> (i32, i32) {
    %c0_i32 = arith.constant 0 : i32
    %c0_i32_0 = arith.constant 0 : i32
    %c0_i32_1 = arith.constant 0 : i32
    return %c0_i32, %c0_i32_0 : i32, i32
  }
  func.func @transform_5(%arg0: i32) -> (i32, i32) {
    %c0_i32 = arith.constant 0 : i32
    %c0_i32_0 = arith.constant 0 : i32
    %c0_i32_1 = arith.constant 0 : i32
    return %c0_i32, %c0_i32_0 : i32, i32
  }
  func.func @transform_6(%arg0: i32) -> (i32, i32) {
    %c0_i32 = arith.constant 0 : i32
    %c0_i32_0 = arith.constant 0 : i32
    %c0_i32_1 = arith.constant 0 : i32
    return %c0_i32, %c0_i32_0 : i32, i32
  }
  func.func @transform_7(%arg0: i32) -> (i32, i32, i32, i32) {
    %c0_i32 = arith.constant 0 : i32
    %c0_i32_0 = arith.constant 0 : i32
    %c0_i32_1 = arith.constant 0 : i32
    %c0_i32_2 = arith.constant 0 : i32
    return %arg0, %c0_i32, %c0_i32_0, %c0_i32_1 : i32, i32, i32, i32
  }
}

</mosaic_0001>

<bundles_post_ra>
// kernel: recurrent_voxel_head_forward.2
= control target key start
LH: loop header
LB: loop body
LE: loop exit
PB: predicated region body
PF: predicated region fallthrough
CT: control target
= control target key end

     0   :  { %s7378_s0 = inlined_call_operand.vmem [shape: bf16[8,512], index: 0, kind: input, shape index: {}]   ;;  %s7379_s1 = inlined_call_operand.hbm [shape: bf16[512,1024], index: 1, kind: input, shape index: {}]   ;;  %s7380_s2 = inlined_call_operand.hbm [shape: f32[1,1024], index: 2, kind: input, shape index: {}]   ;;  %s7381_s3 = inlined_call_operand.hbm [shape: s8[1024,16384], index: 3, kind: input, shape index: {}]   ;;  %s7382_s4 = inlined_call_operand.hbm [shape: f32[1,16384], index: 4, kind: input, shape index: {}]   ;;  %s7383_s5 = inlined_call_operand.hbm [shape: f32[1,16384], index: 5, kind: input, shape index: {}]   ;;  %s7384_s6 = inlined_call_operand.vmem [shape: f32[8,8192], index: 6, kind: output, shape index: {}]  }
   0x1   :  { %7395 = sst [smem:[#allocation13_spill]] %s7379_s1 }
   0x2   :  { %11 = vsyncpa [#allocation3], 0 }
   0x3   :  { %12 = vsyncpa [#allocation5], 0  ;;  %s6310_s21 = smov 0   ;;  %s6312_s22 = smov 0  }
   0x4   :  { %s6314_s23 = smov 0   ;;  %s6316_s24 = smov 0  }
   0x5 LB: > { %s6329_s25 = sadd.s32 4294967295, %s6263_s24   ;;  %s6332_s26 = sadd.s32 1, %s6263_s24   ;;  %s6263_s24 = sphi %s6316_s24, %s7423_s24   ;;  %s6259_s23 = sphi %s6314_s23, %s7422_s23   ;;  %s6255_s22 = sphi %s6312_s22, %s7421_s22   ;;  %s6251_s21 = sphi %s6310_s21, %s7420_s21  }
   0x6   : > { %s85_s27 = ssub.s32 %s6263_s24, %s6332_s26  ;;  %s88_s28 = sadd.s32 1, %s6259_s23 }
   0x7   : > { %p86_p0 = scmp.eq.s32.totalorder %s85_s27, 0  ;;  %p95_p1 = scmp.ne.s32.totalorder %s6259_s23, %s6255_s22 }
   0x8   : > { %p96_p2 = scmp.eq.s32.totalorder %s6263_s24, 0  ;;  %p101_p3 = scmp.ne.s32.totalorder %s6255_s22, %s6251_s21 }
   0x9   : > { %s6342_s29 = scalar_select %p86_p0, %s6259_s23, %s88_s28  }
   0xa   : > { %p6344_p4 = por %p96_p2, %p95_p1  ;;  %p7385_p5 = scmp.eq.s32.totalorder %s6329_s25, 0 }
   0xb   : > { %7396 = sst [smem:[#allocation12_spill]] %s6342_s29  ;;  %p5557_p6 = scmp.ge.s32.totalorder %s6263_s24, 1 }
   0xc   : > { %p190_p7 = scmp.lt.s32.totalorder %s6263_s24, 9  ;;  %p6353_p8 = por %p7385_p5, %p101_p3 }
   0xd   : > { %s6265_s9 = smov [#allocation2]   ;;  %p5996_p12 = scmp.lt.s32.totalorder %s6263_s24, 8 }
   0xe   : > { %s7398_s7 = scalar_select %p6353_p8, 1, 0 }
   0xf   : > { %p6357_p9 = pnand %p5557_p6, %p190_p7  ;;  %s205_s10 = sshll.u32 %s6265_s9, 4  ;;  %s206_s10 = int_to_ptr.vmem [resolvable:$true] %s205_s10 }
  0x10   : > { %s232_s13 = sand.u32 1, %s6259_s23   ;;  %p6374_p13 = pnand %p5996_p12, %p6344_p4 }
  0x11   : > { %s7399_s8 = scalar_select %p6357_p9, 1, 0 }
  0x12   : > { %p5977_p10 = pneg %p6357_p9  ;;  %s7402_s1 = sld [smem:[#allocation13_spill]] }
  0x13   : > { %s7401_s14 = scalar_select %p6374_p13, 1, 0 }
  0x14   : > { %p6365_p11 = pnand %p5977_p10, %p7385_p5 }
  0x16   : > { %s7400_s11 = scalar_select %p6365_p11, 1, 0 }
  0x17   : > { %p7389_p1 = pneg %p6365_p11 }
  0x18   : > { %s6075_s17 = scalar_lea.hbm %s7402_s1, 32768 }
  0x19   : > { %p6076_p0 = scmp.ne.s32.totalorder %s7402_s1, %s6075_s17  ;;  %p6082_p4 = scmp.lt.u32.totalorder %s6075_s17, %s7402_s1 }
  0x1b   : > { %p6078_p2 = pnand %p7389_p1, %p6076_p0 }
  0x1d   : > { %p6079_p3 = pneg %p6078_p2 }
  0x1f   : > { %p6084_p6 = pnand %p6082_p4, %p6079_p3 }
  0x21   : > { %6087 = shalt.err (!%p6084_p6)
}
  0x22   : > { %s6088_s27 = scalar_lea.vmem %s206_s10, 32768  ;;  %p6096_p5 = scmp.lt.s32.totalorder %s206_s10, %s206_s10 }
  0x23   : > { %p6089_p7 = scmp.ne.s32.totalorder %s206_s10, %s6088_s27  ;;  %p6097_p8 = scmp.lt.s32.totalorder %s6088_s27, %s6088_s27 }
  0x25   : > { %p6091_p10 = pnand %p6089_p7, %p7389_p1  ;;  %p6098_p9 = por %p6097_p8, %p6096_p5 }
  0x27   : > { %p6092_p12 = pneg %p6091_p10 }
  0x29   : > { %p6099_p13 = pnand %p6098_p9, %p6092_p12 }
  0x2b   : > { %6102 = shalt.err (!%p6099_p13)
}
  0x2c   : > { %s6266_s28 = smov 512   ;;  %s6267_s30 = smov 32  }
  0x2d   : > { %5980 = dma.hbm_to_vmem [thread:$0]  (!%p6365_p11), %s7402_s1, 32768, %s206_s10, [#allocation3], %s6266_s28, %s6266_s28, %s6267_s30  }
  0x2e   : > { %s5561_s16 = sshll.u32 %s232_s13, 12  ;;  %s5840_s17 = sshll.u32 %s6263_s24, 11 }
  0x2f   : > { %s6404_s20 = scalar_lea.hbm %s7381_s3, %s5840_s17  ;;  %s234_s21 = scalar_lea.vmem [#allocation6], %s5561_s16 }
  0x30   : > { %s241_s27 = sshll.u32 %s234_s21, 4  ;;  %s6408_s12 = sshll.u32 %s232_s13, 4  ;;  %s6406_s27 = int_to_ptr.vmem [resolvable:$true] %s241_s27 }
  0x31   : > { %s7403_s29 = sand.u32 1, %s6263_s24   ;;  %s6103_s10 = scalar_lea.hbm %s6404_s20, 65536 }
  0x32   : > { %s6412_s9 = scalar_lea.sflag [#allocation3], %s7403_s29  ;;  %p6104_p5 = scmp.ne.s32.totalorder %s6404_s20, %s6103_s10 }
  0x33   : > { %p7404_p8 = scmp.ne.s32.totalorder %s7401_s14, 0  ;;  %s6108_s16 = scalar_lea.hbm %s7381_s3, 524288 }
  0x34   : > { %p6109_p2 = scmp.lt.u32.totalorder %s6404_s20, %s7381_s3  ;;  %p6110_p3 = scmp.lt.u32.totalorder %s6108_s16, %s6103_s10 }
  0x35   : > { %p6418_p9 = pneg %p7404_p8  ;;  %p6112_p6 = scmp.lt.u32.totalorder %s6103_s10, %s6404_s20 }
  0x36   : > { %p6111_p4 = por %p6110_p3, %p6109_p2 }
  0x37   : > { %s7405_s28 = scalar_select %p6418_p9, 1, 0 }
  0x38   : > { %p6106_p13 = pnand %p6418_p9, %p6104_p5  ;;  %p6113_p7 = por %p6112_p6, %p6111_p4 }
  0x3a   : > { %p6107_p0 = pneg %p6106_p13 }
  0x3c   : > { %p6114_p10 = pnand %p6113_p7, %p6107_p0 }
  0x3e   : > { %6117 = shalt.err (!%p6114_p10)
}
  0x3f   : > { %s6118_s29 = scalar_lea.vmem %s6406_s27, 65536  ;;  %s6268_s18 = smov [#allocation6]  }
  0x40   : > { %p6119_p12 = scmp.ne.s32.totalorder %s6406_s27, %s6118_s29  ;;  %s6123_s19 = sshll.u32 %s6268_s18, 4  ;;  %s6124_s19 = int_to_ptr.vmem [resolvable:$false] %s6123_s19 }
  0x41   : > { %s6125_s21 = scalar_lea.vmem %s6124_s19, 131072  ;;  %p6126_p1 = scmp.lt.s32.totalorder %s6406_s27, %s6124_s19 }
  0x42   : > { %p6121_p5 = pnand %p6119_p12, %p6418_p9  ;;  %p6127_p11 = scmp.lt.s32.totalorder %s6125_s21, %s6118_s29 }
  0x44   : > { %p6122_p13 = pneg %p6121_p5  ;;  %p6128_p2 = por %p6127_p11, %p6126_p1 }
  0x46   : > { %p6129_p3 = pnand %p6128_p2, %p6122_p13 }
  0x48   : > { %6132 = shalt.err (!%p6129_p3)
}
  0x49   : > { %s6269_s10 = smov 16384   ;;  %s6270_s30 = smov 2048  }
  0x4a   : > { %s6271_s15 = smov 128   ;;  %s5841_s16 = sshll.u32 %s6263_s24, 8 }
  0x4b   : > { %5987 = dma.hbm_to_vmem [thread:$0]  (!%p7404_p8), %s6404_s20, 65536, %s6406_s27, %s6412_s9, %s6269_s10, %s6270_s30, %s6271_s15  }
  0x4c   : > { %s6448_s29 = scalar_lea.hbm %s7382_s4, %s5841_s16  ;;  %s255_s18 = scalar_lea.vmem [#allocation7], %s6408_s12 }
  0x4d   : > { %s263_s19 = sshll.u32 %s255_s18, 4  ;;  %s6133_s21 = scalar_lea.hbm %s6448_s29, 256  ;;  %s264_s19 = int_to_ptr.vmem [resolvable:$true] %s263_s19 }
  0x4e   : > { %p6134_p11 = scmp.ne.s32.totalorder %s6448_s29, %s6133_s21  ;;  %s6138_s10 = scalar_lea.hbm %s7382_s4, 2048 }
  0x4f   : > { %p6139_p4 = scmp.lt.u32.totalorder %s6448_s29, %s7382_s4  ;;  %p6140_p6 = scmp.lt.u32.totalorder %s6138_s10, %s6133_s21 }
  0x50   : > { %p6136_p1 = pnand %p6134_p11, %p6418_p9  ;;  %p6142_p10 = scmp.lt.u32.totalorder %s6133_s21, %s6448_s29 }
  0x51   : > { %p6141_p7 = por %p6140_p6, %p6139_p4 }
  0x52   : > { %p6137_p0 = pneg %p6136_p1 }
  0x53   : > { %p6143_p12 = por %p6142_p10, %p6141_p7 }
  0x55   : > { %p6144_p5 = pnand %p6143_p12, %p6137_p0 }
  0x57   : > { %6147 = shalt.err (!%p6144_p5)
}
  0x58   : > { %s6148_s13 = scalar_lea.vmem %s264_s19, 256  ;;  %s6272_s17 = smov [#allocation7]  }
  0x59   : > { %p6149_p13 = scmp.ne.s32.totalorder %s264_s19, %s6148_s13  ;;  %s6153_s18 = sshll.u32 %s6272_s17, 4  ;;  %s6154_s18 = int_to_ptr.vmem [resolvable:$false] %s6153_s18 }
  0x5a   : > { %s6155_s20 = scalar_lea.vmem %s6154_s18, 512  ;;  %p6156_p11 = scmp.lt.s32.totalorder %s264_s19, %s6154_s18 }
  0x5b   : > { %p6151_p2 = pnand %p6149_p13, %p6418_p9  ;;  %p6157_p1 = scmp.lt.s32.totalorder %s6155_s20, %s6148_s13 }
  0x5d   : > { %p6152_p3 = pneg %p6151_p2  ;;  %p6158_p8 = por %p6157_p1, %p6156_p11 }
  0x5f   : > { %p6159_p4 = pnand %p6158_p8, %p6152_p3 }
  0x61   : > { %6162 = shalt.err (!%p6159_p4)
}
  0x62   : > { %p7406_p6 = scmp.ne.s32.totalorder %s7401_s14, 0  ;;  %s6273_s21 = smov [#allocation4]  }
  0x63   : > { %s219_s27 = sshll.u32 %s6273_s21, 4  ;;  %s6474_s15 = scalar_lea.hbm %s7383_s5, %s5841_s16  ;;  %s220_s27 = int_to_ptr.vmem [resolvable:$true] %s219_s27 }
  0x64   : > { %5990 = dma.hbm_to_vmem [thread:$0]  (!%p7406_p6), %s6448_s29, 256, %s264_s19, %s6412_s9  }
  0x65   : > { %s6163_s18 = scalar_lea.hbm %s7380_s2, 128  ;;  %p7407_p0 = scmp.ne.s32.totalorder %s7400_s11, 0 }
  0x66   : > { %p6164_p8 = scmp.ne.s32.totalorder %s7380_s2, %s6163_s18  ;;  %p6170_p5 = scmp.lt.u32.totalorder %s6163_s18, %s7380_s2 }
  0x67   : > { %p7408_p7 = pneg %p7407_p0 }
  0x69   : > { %p6166_p10 = pnand %p6164_p8, %p7408_p7 }
  0x6b   : > { %p6167_p12 = pneg %p6166_p10 }
  0x6d   : > { %p6172_p13 = pnand %p6170_p5, %p6167_p12 }
  0x6f   : > { %6175 = shalt.err (!%p6172_p13)
}
  0x70   : > { %s6176_s24 = scalar_lea.vmem %s220_s27, 128  ;;  %p7409_p3 = pmov %p7408_p7 }
  0x71   : > { %p6177_p2 = scmp.ne.s32.totalorder %s220_s27, %s6176_s24  ;;  %p6184_p4 = scmp.lt.s32.totalorder %s220_s27, %s220_s27 }
  0x72   : > { %p6185_p6 = scmp.lt.s32.totalorder %s6176_s24, %s6176_s24 }
  0x73   : > { %p6179_p11 = pnand %p6177_p2, %p7409_p3 }
  0x74   : > { %p6186_p9 = por %p6185_p6, %p6184_p4 }
  0x75   : > { %p6180_p1 = pneg %p6179_p11 }
  0x77   : > { %p6187_p7 = pnand %p6186_p9, %p6180_p1 }
  0x79   : > { %6190 = shalt.err (!%p6187_p7)
}
  0x7a   : > { %5983 = dma.hbm_to_vmem [thread:$0]  (!%p7407_p0), %s7380_s2, 128, %s220_s27, [#allocation5]  }
  0x7b   : > { %s274_s21 = scalar_lea.vmem [#allocation8], %s6408_s12  ;;  %s6191_s30 = scalar_lea.hbm %s6474_s15, 256 }
  0x7c   : > { %s282_s10 = sshll.u32 %s274_s21, 4  ;;  %p6192_p8 = scmp.ne.s32.totalorder %s6474_s15, %s6191_s30  ;;  %s283_s10 = int_to_ptr.vmem [resolvable:$true] %s282_s10 }
  0x7d   : > { %p7410_p6 = scmp.ne.s32.totalorder %s7405_s28, 0  ;;  %s6196_s17 = scalar_lea.hbm %s7383_s5, 2048 }
  0x7e   : > { %p6197_p12 = scmp.lt.u32.totalorder %s6474_s15, %s7383_s5  ;;  %p6198_p5 = scmp.lt.u32.totalorder %s6196_s17, %s6191_s30 }
  0x7f   : > { %p6194_p9 = pnand %p6192_p8, %p7410_p6  ;;  %p6200_p2 = scmp.lt.u32.totalorder %s6191_s30, %s6474_s15 }
  0x80   : > { %p6199_p13 = por %p6198_p5, %p6197_p12 }
  0x81   : > { %p6195_p10 = pneg %p6194_p9 }
  0x82   : > { %p6201_p0 = por %p6200_p2, %p6199_p13 }
  0x84   : > { %p6202_p3 = pnand %p6201_p0, %p6195_p10 }
  0x86   : > { %6205 = shalt.err (!%p6202_p3)
}
  0x87   : > { %s6206_s12 = scalar_lea.vmem %s283_s10, 256  ;;  %s6274_s27 = smov [#allocation8]  }
  0x88   : > { %p6207_p11 = scmp.ne.s32.totalorder %s283_s10, %s6206_s12  ;;  %s6211_s29 = sshll.u32 %s6274_s27, 4  ;;  %s6212_s29 = int_to_ptr.vmem [resolvable:$false] %s6211_s29 }
  0x89   : > { %s6213_s19 = scalar_lea.vmem %s6212_s29, 512  ;;  %p6214_p7 = scmp.lt.s32.totalorder %s283_s10, %s6212_s29 }
  0x8a   : > { %p6209_p1 = pnand %p6207_p11, %p7410_p6  ;;  %p6215_p8 = scmp.lt.s32.totalorder %s6213_s19, %s6206_s12 }
  0x8c   : > { %p6210_p4 = pneg %p6209_p1  ;;  %p6216_p9 = por %p6215_p8, %p6214_p7 }
  0x8e   : > { %p6217_p5 = pnand %p6216_p9, %p6210_p4 }
  0x90   : > { %6220 = shalt.err (!%p6217_p5)
}
  0x91   : > { %p7411_p12 = scmp.ne.s32.totalorder %s7401_s14, 0  ;;  %p7412_p10 = scmp.ne.s32.totalorder %s7399_s8, 0 }
  0x92   : > { %p7413_p6 = scmp.eq.s32.totalorder (!%p7412_p10), %s6329_s25, 0 }
  0x93   : > { %5993 = dma.hbm_to_vmem [thread:$0]  (!%p7411_p12), %s6474_s15, 256, %s283_s10, %s6412_s9  }
  0x94   : > { %291 = sbr.rel (%p7412_p10) target bundleno = 1710 (0x6ae), region = 44 }
  0x9b   : > { %6238 = dma.done.wait (%p7413_p6), [#allocation3], 32768   ;;  %p7414_p13 = pmov %p7413_p6 }
  0x9c   : > { %p7415_p2 = pmov %p7413_p6 }
  0x9d   : > { %6240 = vsyncadd (%p7414_p13), [#allocation3], 4294934528 }
  0x9e   : > { %6242 = dma.done.wait (%p7415_p2), [#allocation5], 128   ;;  %p7416_p0 = pmov %p7415_p2 }
  0x9f   : > { %s301_s14 = sand.u32 1, %s6329_s25   ;;  %s303_s9 = sand.u32 1, %s6255_s22  }
  0xa0   : > { %6244 = vsyncadd (%p7416_p0), [#allocation5], 4294967168  ;;  %s5573_s8 = sshll.u32 %s303_s9, 12  ;;  %s302_s28 = scalar_lea.sflag [#allocation3], %s301_s14 }
  0xa1   : > { %s6529_s15 = scalar_lea.vmem [#allocation6], %s5573_s8  ;;  %p7417_p3 = scmp.ne.s32.totalorder %s7398_s7, 0 }
  0xa3   : > { %6246 = dma.done.wait (%p7417_p3), %s302_s28, 66048  }
  0xa4   : > { %6248 = vsyncadd (%p7417_p3), %s302_s28, 4294901248  ;;  %v373_v0 = vld [vmem:[#allocation2] sm:$0xff]  ;;  %v374_v2 = vld [vmem:[#allocation2 + $0x8] sm:$0xff]  ;;  %s7207_s21 = sshll.u32 %s303_s9, 4  ;;  %s5576_s13 = sshll.u32 %s6329_s25, 3 }
  0xa5   : > { %v377_v1 = vld [vmem:[#allocation2 + $0x20] sm:$0xff]  ;;  %v378_v4 = vld [vmem:[#allocation2 + $0x28] sm:$0xff]  ;;  %v6538_v53 = vld [vmem:[%s7378_s0] sm:$0xff]  ;;  %s314_s10 = scalar_lea.vmem [#allocation7], %s7207_s21  ;;  %s323_s30 = scalar_lea.vmem [#allocation8], %s7207_s21 }
  0xa6   : > { %v5583_v3 = vcombine.high %v373_v0, %v377_v1  ;;  %v5582_v5 = vcombine.low %v373_v0, %v377_v1  ;;  %v381_v6 = vld [vmem:[#allocation2 + $0x40] sm:$0xff]  ;;  %v5585_v8 = vcombine.high %v374_v2, %v378_v4  ;;  %v5584_v9 = vcombine.low %v374_v2, %v378_v4  ;;  %v382_v11 = vld [vmem:[#allocation2 + $0x48] sm:$0xff]  ;;  %p7289_p11 = scmp.lt.s32.totalorder %s5576_s13, 63 }
  0xa7   : > { %v385_v7 = vld [vmem:[#allocation2 + $0x60] sm:$0xff]  ;;  %v386_v12 = vld [vmem:[#allocation2 + $0x68] sm:$0xff]  ;;  %v6542_v57 = vcombine.high %v6538_v53, %v6538_v53 }
  0xa8   : > { %v5591_v10 = vcombine.high %v381_v6, %v385_v7  ;;  %v389_v13 = vld [vmem:[#allocation2 + $0x80] sm:$0xff]  ;;  %1965 = vmatprep.subr.bf16.mxu0 %v5583_v3  ;;  %v5593_v14 = vcombine.high %v382_v11, %v386_v12  ;;  %v390_v16 = vld [vmem:[#allocation2 + $0x88] sm:$0xff]  ;;  %2047 = vmatprep.subr.bf16.mxu1 %v5585_v8  ;;  %v5590_v18 = vcombine.low %v381_v6, %v385_v7  ;;  %s7425_s13 = smov (!%p7289_p11, %s5576_s13), 63 }
  0xa9   : > { %v393_v15 = vld [vmem:[#allocation2 + $0xa0] sm:$0xff]  ;;  %v394_v17 = vld [vmem:[#allocation2 + $0xa8] sm:$0xff]  ;;  %1966 = vmatpush1.bf16.msra.mxu0 %v5582_v5  ;;  %2048 = vmatpush1.bf16.msra.mxu1 %v5584_v9  ;;  %v5592_v19 = vcombine.low %v382_v11, %v386_v12  ;;  %s5577_s17 = sshll.u32 %s7425_s13, 3 }
  0xaa   : > { %1967 = vmatprep.subr.bf16.mxu0 %v5591_v10  ;;  %v5599_v20 = vcombine.high %v389_v13, %v393_v15  ;;  %2049 = vmatprep.subr.bf16.mxu1 %v5593_v14  ;;  %v5601_v21 = vcombine.high %v390_v16, %v394_v17  ;;  %v397_v22 = vld [vmem:[#allocation2 + $0xc0] sm:$0xff]  ;;  %v398_v24 = vld [vmem:[#allocation2 + $0xc8] sm:$0xff]  ;;  %v5598_v26 = vcombine.low %v389_v13, %v393_v15  ;;  %s7307_s20 = scalar_lea.vmem %s7384_s6, %s5577_s17 }
  0xab   : > { %v401_v23 = vld [vmem:[#allocation2 + $0xe0] sm:$0xff]  ;;  %v402_v25 = vld [vmem:[#allocation2 + $0xe8] sm:$0xff]  ;;  %v5600_v27 = vcombine.low %v390_v16, %v394_v17  ;;  %1997 = vmatprep.mubr.bf16.mxu0 %v6542_v57  ;;  %2079 = vmatprep.mubr.bf16.mxu1 %v6542_v57 }
  0xac   : > { %v5607_v28 = vcombine.high %v397_v22, %v401_v23  ;;  %v5609_v29 = vcombine.high %v398_v24, %v402_v25  ;;  %v405_v30 = vld [vmem:[#allocation2 + $0x100] sm:$0xff]  ;;  %v406_v32 = vld [vmem:[#allocation2 + $0x108] sm:$0xff]  ;;  %v5606_v34 = vcombine.low %v397_v22, %v401_v23  ;;  %v5608_v35 = vcombine.low %v398_v24, %v402_v25 }
  0xad   : > { %1968 = vmatpush1.bf16.msra.mxu0 %v5590_v18  ;;  %2050 = vmatpush1.bf16.msra.mxu1 %v5592_v19  ;;  %v409_v31 = vld [vmem:[#allocation2 + $0x120] sm:$0xff]  ;;  %v410_v33 = vld [vmem:[#allocation2 + $0x128] sm:$0xff] }
  0xae   : > { %1969 = vmatprep.subr.bf16.mxu0 %v5599_v20  ;;  %2051 = vmatprep.subr.bf16.mxu1 %v5601_v21  ;;  %v5615_v36 = vcombine.high %v405_v30, %v409_v31  ;;  %v5617_v37 = vcombine.high %v406_v32, %v410_v33  ;;  %v413_v38 = vld [vmem:[#allocation2 + $0x140] sm:$0xff]  ;;  %v414_v40 = vld [vmem:[#allocation2 + $0x148] sm:$0xff]  ;;  %v5614_v42 = vcombine.low %v405_v30, %v409_v31 }
  0xaf   : > { %v417_v39 = vld [vmem:[#allocation2 + $0x160] sm:$0xff]  ;;  %v418_v41 = vld [vmem:[#allocation2 + $0x168] sm:$0xff]  ;;  %v5616_v43 = vcombine.low %v406_v32, %v410_v33 }
  0xb0   : > { %v5623_v44 = vcombine.high %v413_v38, %v417_v39  ;;  %v5625_v45 = vcombine.high %v414_v40, %v418_v41  ;;  %v421_v46 = vld [vmem:[#allocation2 + $0x180] sm:$0xff]  ;;  %v422_v48 = vld [vmem:[#allocation2 + $0x188] sm:$0xff]  ;;  %v5622_v50 = vcombine.low %v413_v38, %v417_v39  ;;  %v5624_v51 = vcombine.low %v414_v40, %v418_v41 }
  0xb1   : > { %1970 = vmatpush1.bf16.msra.mxu0 %v5598_v26  ;;  %2052 = vmatpush1.bf16.msra.mxu1 %v5600_v27  ;;  %v425_v47 = vld [vmem:[#allocation2 + $0x1a0] sm:$0xff]  ;;  %v426_v49 = vld [vmem:[#allocation2 + $0x1a8] sm:$0xff] }
  0xb2   : > { %1971 = vmatprep.subr.bf16.mxu0 %v5607_v28  ;;  %2053 = vmatprep.subr.bf16.mxu1 %v5609_v29  ;;  %v5631_v52 = vcombine.high %v421_v46, %v425_v47  ;;  %v5633_v54 = vcombine.high %v422_v48, %v426_v49  ;;  %v429_v55 = vld [vmem:[#allocation2 + $0x1c0] sm:$0xff]  ;;  %v430_v58 = vld [vmem:[#allocation2 + $0x1c8] sm:$0xff]  ;;  %v5630_v60 = vcombine.low %v421_v46, %v425_v47 }
  0xb3   : > { %v433_v56 = vld [vmem:[#allocation2 + $0x1e0] sm:$0xff]  ;;  %v434_v59 = vld [vmem:[#allocation2 + $0x1e8] sm:$0xff]  ;;  %v5632_v61 = vcombine.low %v422_v48, %v426_v49 }
  0xb4   : > { %v5639_v62 = vcombine.high %v429_v55, %v433_v56  ;;  %v5641_v63 = vcombine.high %v430_v58, %v434_v59  ;;  %v437_v0 = vld [vmem:[#allocation2 + $0x200] sm:$0xff]  ;;  %v438_v2 = vld [vmem:[#allocation2 + $0x208] sm:$0xff]  ;;  %v5638_v4 = vcombine.low %v429_v55, %v433_v56  ;;  %v5640_v5 = vcombine.low %v430_v58, %v434_v59 }
  0xb5   : > { %1972 = vmatpush1.bf16.msra.mxu0 %v5606_v34  ;;  %2054 = vmatpush1.bf16.msra.mxu1 %v5608_v35  ;;  %v441_v1 = vld [vmem:[#allocation2 + $0x220] sm:$0xff]  ;;  %v442_v3 = vld [vmem:[#allocation2 + $0x228] sm:$0xff] }
  0xb6   : > { %1973 = vmatprep.subr.bf16.mxu0 %v5615_v36  ;;  %2055 = vmatprep.subr.bf16.mxu1 %v5617_v37  ;;  %v5647_v6 = vcombine.high %v437_v0, %v441_v1  ;;  %v5649_v7 = vcombine.high %v438_v2, %v442_v3  ;;  %v445_v8 = vld [vmem:[#allocation2 + $0x240] sm:$0xff]  ;;  %v446_v10 = vld [vmem:[#allocation2 + $0x248] sm:$0xff]  ;;  %v5646_v12 = vcombine.low %v437_v0, %v441_v1 }
  0xb7   : > { %v449_v9 = vld [vmem:[#allocation2 + $0x260] sm:$0xff]  ;;  %v450_v11 = vld [vmem:[#allocation2 + $0x268] sm:$0xff]  ;;  %v5648_v13 = vcombine.low %v438_v2, %v442_v3 }
  0xb8   : > { %v5655_v14 = vcombine.high %v445_v8, %v449_v9  ;;  %v5657_v15 = vcombine.high %v446_v10, %v450_v11  ;;  %v453_v16 = vld [vmem:[#allocation2 + $0x280] sm:$0xff]  ;;  %v454_v18 = vld [vmem:[#allocation2 + $0x288] sm:$0xff]  ;;  %v5654_v20 = vcombine.low %v445_v8, %v449_v9  ;;  %v5656_v21 = vcombine.low %v446_v10, %v450_v11 }
  0xb9   : > { %1974 = vmatpush1.bf16.msra.mxu0 %v5614_v42  ;;  %2056 = vmatpush1.bf16.msra.mxu1 %v5616_v43  ;;  %v457_v17 = vld [vmem:[#allocation2 + $0x2a0] sm:$0xff]  ;;  %v458_v19 = vld [vmem:[#allocation2 + $0x2a8] sm:$0xff] }
  0xba   : > { %1975 = vmatprep.subr.bf16.mxu0 %v5623_v44  ;;  %2057 = vmatprep.subr.bf16.mxu1 %v5625_v45  ;;  %v5663_v22 = vcombine.high %v453_v16, %v457_v17  ;;  %v5665_v23 = vcombine.high %v454_v18, %v458_v19  ;;  %v461_v24 = vld [vmem:[#allocation2 + $0x2c0] sm:$0xff]  ;;  %v462_v26 = vld [vmem:[#allocation2 + $0x2c8] sm:$0xff]  ;;  %v5662_v28 = vcombine.low %v453_v16, %v457_v17 }
  0xbb   : > { %v465_v25 = vld [vmem:[#allocation2 + $0x2e0] sm:$0xff]  ;;  %v466_v27 = vld [vmem:[#allocation2 + $0x2e8] sm:$0xff]  ;;  %v5664_v29 = vcombine.low %v454_v18, %v458_v19 }
  0xbc   : > { %v5671_v30 = vcombine.high %v461_v24, %v465_v25  ;;  %v5673_v31 = vcombine.high %v462_v26, %v466_v27  ;;  %v469_v32 = vld [vmem:[#allocation2 + $0x300] sm:$0xff]  ;;  %v470_v34 = vld [vmem:[#allocation2 + $0x308] sm:$0xff]  ;;  %v5670_v36 = vcombine.low %v461_v24, %v465_v25  ;;  %v5672_v37 = vcombine.low %v462_v26, %v466_v27 }
  0xbd   : > { %1976 = vmatpush1.bf16.msra.mxu0 %v5622_v50  ;;  %2058 = vmatpush1.bf16.msra.mxu1 %v5624_v51  ;;  %v473_v33 = vld [vmem:[#allocation2 + $0x320] sm:$0xff]  ;;  %v474_v35 = vld [vmem:[#allocation2 + $0x328] sm:$0xff] }
  0xbe   : > { %1977 = vmatprep.subr.bf16.mxu0 %v5631_v52  ;;  %2059 = vmatprep.subr.bf16.mxu1 %v5633_v54  ;;  %v5679_v38 = vcombine.high %v469_v32, %v473_v33  ;;  %v5681_v39 = vcombine.high %v470_v34, %v474_v35  ;;  %v477_v40 = vld [vmem:[#allocation2 + $0x340] sm:$0xff]  ;;  %v478_v42 = vld [vmem:[#allocation2 + $0x348] sm:$0xff]  ;;  %v5678_v44 = vcombine.low %v469_v32, %v473_v33 }
  0xbf   : > { %v481_v41 = vld [vmem:[#allocation2 + $0x360] sm:$0xff]  ;;  %v482_v43 = vld [vmem:[#allocation2 + $0x368] sm:$0xff]  ;;  %v5680_v45 = vcombine.low %v470_v34, %v474_v35 }
  0xc0   : > { %v5687_v46 = vcombine.high %v477_v40, %v481_v41  ;;  %v5689_v47 = vcombine.high %v478_v42, %v482_v43  ;;  %v485_v48 = vld [vmem:[#allocation2 + $0x380] sm:$0xff]  ;;  %v486_v50 = vld [vmem:[#allocation2 + $0x388] sm:$0xff]  ;;  %v5686_v52 = vcombine.low %v477_v40, %v481_v41  ;;  %v5688_v54 = vcombine.low %v478_v42, %v482_v43 }
  0xc1   : > { %1978 = vmatpush1.bf16.msra.mxu0 %v5630_v60  ;;  %2060 = vmatpush1.bf16.msra.mxu1 %v5632_v61  ;;  %v489_v49 = vld [vmem:[#allocation2 + $0x3a0] sm:$0xff]  ;;  %v490_v51 = vld [vmem:[#allocation2 + $0x3a8] sm:$0xff] }
  0xc2   : > { %1979 = vmatprep.subr.bf16.mxu0 %v5639_v62  ;;  %2061 = vmatprep.subr.bf16.mxu1 %v5641_v63  ;;  %v5695_v55 = vcombine.high %v485_v48, %v489_v49  ;;  %v5697_v56 = vcombine.high %v486_v50, %v490_v51  ;;  %v493_v58 = vld [vmem:[#allocation2 + $0x3c0] sm:$0xff]  ;;  %v494_v60 = vld [vmem:[#allocation2 + $0x3c8] sm:$0xff]  ;;  %v5694_v62 = vcombine.low %v485_v48, %v489_v49 }
  0xc3   : > { %v497_v59 = vld [vmem:[#allocation2 + $0x3e0] sm:$0xff]  ;;  %v498_v61 = vld [vmem:[#allocation2 + $0x3e8] sm:$0xff]  ;;  %v5696_v63 = vcombine.low %v486_v50, %v490_v51 }
  0xc4   : > { %v5703_v0 = vcombine.high %v493_v58, %v497_v59  ;;  %v5705_v1 = vcombine.high %v494_v60, %v498_v61  ;;  %v501_v2 = vld [vmem:[#allocation2 + $0x400] sm:$0xff] }
  0xc5   : > { %1980 = vmatpush1.bf16.msra.mxu0 %v5638_v4  ;;  %2062 = vmatpush1.bf16.msra.mxu1 %v5640_v5  ;;  %v505_v3 = vld [vmem:[#allocation2 + $0x420] sm:$0xff]  ;;  %v502_v4 = vld [vmem:[#allocation2 + $0x408] sm:$0xff] }
  0xc6   : > { %1981 = vmatprep.subr.bf16.mxu0 %v5647_v6  ;;  %2063 = vmatprep.subr.bf16.mxu1 %v5649_v7  ;;  %v506_v5 = vld [vmem:[#allocation2 + $0x428] sm:$0xff]  ;;  %v5702_v6 = vcombine.low %v493_v58, %v497_v59  ;;  %v5704_v7 = vcombine.low %v494_v60, %v498_v61  ;;  %v5711_v8 = vcombine.high %v501_v2, %v505_v3  ;;  %v509_v10 = vld [vmem:[#allocation2 + $0x440] sm:$0xff] }
  0xc7   : > { %v5713_v9 = vcombine.high %v502_v4, %v506_v5  ;;  %v513_v11 = vld [vmem:[#allocation2 + $0x460] sm:$0xff]  ;;  %v5710_v16 = vcombine.low %v501_v2, %v505_v3  ;;  %v5712_v17 = vcombine.low %v502_v4, %v506_v5 }
  0xc8   : > { %v5719_v18 = vcombine.high %v509_v10, %v513_v11  ;;  %v5718_v24 = vcombine.low %v509_v10, %v513_v11 }
  0xc9   : > { %1982 = vmatpush1.bf16.msra.mxu0 %v5646_v12  ;;  %2064 = vmatpush1.bf16.msra.mxu1 %v5648_v13  ;;  %v6548_v12 = vcombine.low %v6538_v53, %v6538_v53  ;;  %v510_v13 = vld [vmem:[#allocation2 + $0x448] sm:$0xff] }
  0xca   : > { %1983 = vmatprep.subr.bf16.mxu0 %v5655_v14  ;;  %2065 = vmatprep.subr.bf16.mxu1 %v5657_v15  ;;  %v514_v14 = vld [vmem:[#allocation2 + $0x468] sm:$0xff]  ;;  %v6553_v15 = vld [vmem:[%s7378_s0 + $0x8] sm:$0xff] }
  0xcb   : > { %v5721_v19 = vcombine.high %v510_v13, %v514_v14  ;;  %v6557_v53 = vcombine.high %v6553_v15, %v6553_v15  ;;  %v5720_v25 = vcombine.low %v510_v13, %v514_v14 }
  0xcd   : > { %1984 = vmatpush1.bf16.msra.mxu0 %v5654_v20  ;;  %2066 = vmatpush1.bf16.msra.mxu1 %v5656_v21  ;;  %v517_v20 = vld [vmem:[#allocation2 + $0x480] sm:$0xff] }
  0xce   : > { %1985 = vmatprep.subr.bf16.mxu0 %v5663_v22  ;;  %2067 = vmatprep.subr.bf16.mxu1 %v5665_v23  ;;  %v521_v21 = vld [vmem:[#allocation2 + $0x4a0] sm:$0xff]  ;;  %v518_v22 = vld [vmem:[#allocation2 + $0x488] sm:$0xff] }
  0xcf   : > { %v522_v23 = vld [vmem:[#allocation2 + $0x4a8] sm:$0xff]  ;;  %v5727_v26 = vcombine.high %v517_v20, %v521_v21  ;;  %v5726_v32 = vcombine.low %v517_v20, %v521_v21 }
  0xd0   : > { %v5729_v27 = vcombine.high %v518_v22, %v522_v23  ;;  %v5728_v33 = vcombine.low %v518_v22, %v522_v23 }
  0xd1   : > { %1986 = vmatpush1.bf16.msra.mxu0 %v5662_v28  ;;  %2068 = vmatpush1.bf16.msra.mxu1 %v5664_v29  ;;  %v525_v28 = vld [vmem:[#allocation2 + $0x4c0] sm:$0xff] }
  0xd2   : > { %1987 = vmatprep.subr.bf16.mxu0 %v5671_v30  ;;  %2069 = vmatprep.subr.bf16.mxu1 %v5673_v31  ;;  %v529_v29 = vld [vmem:[#allocation2 + $0x4e0] sm:$0xff]  ;;  %v526_v30 = vld [vmem:[#allocation2 + $0x4c8] sm:$0xff] }
  0xd3   : > { %v530_v31 = vld [vmem:[#allocation2 + $0x4e8] sm:$0xff]  ;;  %v5735_v34 = vcombine.high %v525_v28, %v529_v29  ;;  %v5734_v40 = vcombine.low %v525_v28, %v529_v29 }
  0xd4   : > { %v5737_v35 = vcombine.high %v526_v30, %v530_v31  ;;  %v5736_v41 = vcombine.low %v526_v30, %v530_v31 }
  0xd5   : > { %1988 = vmatpush1.bf16.msra.mxu0 %v5670_v36  ;;  %2070 = vmatpush1.bf16.msra.mxu1 %v5672_v37  ;;  %v533_v36 = vld [vmem:[#allocation2 + $0x500] sm:$0xff] }
  0xd6   : > { %1989 = vmatprep.subr.bf16.mxu0 %v5679_v38  ;;  %2071 = vmatprep.subr.bf16.mxu1 %v5681_v39  ;;  %v537_v37 = vld [vmem:[#allocation2 + $0x520] sm:$0xff]  ;;  %v534_v38 = vld [vmem:[#allocation2 + $0x508] sm:$0xff] }
  0xd7   : > { %v538_v39 = vld [vmem:[#allocation2 + $0x528] sm:$0xff]  ;;  %v5743_v42 = vcombine.high %v533_v36, %v537_v37  ;;  %v5742_v48 = vcombine.low %v533_v36, %v537_v37 }
  0xd8   : > { %v5745_v43 = vcombine.high %v534_v38, %v538_v39  ;;  %v5744_v49 = vcombine.low %v534_v38, %v538_v39 }
  0xd9   : > { %1990 = vmatpush1.bf16.msra.mxu0 %v5678_v44  ;;  %2072 = vmatpush1.bf16.msra.mxu1 %v5680_v45  ;;  %v541_v44 = vld [vmem:[#allocation2 + $0x540] sm:$0xff] }
  0xda   : > { %1991 = vmatprep.subr.bf16.mxu0 %v5687_v46  ;;  %2073 = vmatprep.subr.bf16.mxu1 %v5689_v47  ;;  %v545_v45 = vld [vmem:[#allocation2 + $0x560] sm:$0xff]  ;;  %v542_v46 = vld [vmem:[#allocation2 + $0x548] sm:$0xff] }
  0xdb   : > { %v546_v47 = vld [vmem:[#allocation2 + $0x568] sm:$0xff]  ;;  %v5751_v50 = vcombine.high %v541_v44, %v545_v45  ;;  %v5750_v58 = vcombine.low %v541_v44, %v545_v45 }
  0xdc   : > { %v5753_v51 = vcombine.high %v542_v46, %v546_v47  ;;  %v5752_v59 = vcombine.low %v542_v46, %v546_v47 }
  0xdd   : > { %1992 = vmatpush1.bf16.msra.mxu0 %v5686_v52  ;;  %2074 = vmatpush1.bf16.msra.mxu1 %v5688_v54  ;;  %v549_v52 = vld [vmem:[#allocation2 + $0x580] sm:$0xff] }
  0xde   : > { %1993 = vmatprep.subr.bf16.mxu0 %v5695_v55  ;;  %2075 = vmatprep.subr.bf16.mxu1 %v5697_v56  ;;  %v553_v54 = vld [vmem:[#allocation2 + $0x5a0] sm:$0xff]  ;;  %v550_v55 = vld [vmem:[#allocation2 + $0x588] sm:$0xff] }
  0xdf   : > { %v554_v56 = vld [vmem:[#allocation2 + $0x5a8] sm:$0xff]  ;;  %v5759_v60 = vcombine.high %v549_v52, %v553_v54  ;;  %v5758_v2 = vcombine.low %v549_v52, %v553_v54 }
  0xe0   : > { %v5761_v61 = vcombine.high %v550_v55, %v554_v56  ;;  %v5760_v3 = vcombine.low %v550_v55, %v554_v56 }
  0xe1   : > { %1994 = vmatpush1.bf16.msra.mxu0 %v5694_v62  ;;  %2076 = vmatpush1.bf16.msra.mxu1 %v5696_v63  ;;  %v557_v62 = vld [vmem:[#allocation2 + $0x5c0] sm:$0xff] }
  0xe2   : > { %1995 = vmatprep.subr.bf16.mxu0 %v5703_v0  ;;  %2077 = vmatprep.subr.bf16.mxu1 %v5705_v1  ;;  %v561_v63 = vld [vmem:[#allocation2 + $0x5e0] sm:$0xff]  ;;  %v558_v0 = vld [vmem:[#allocation2 + $0x5c8] sm:$0xff] }
  0xe3   : > { %v562_v1 = vld [vmem:[#allocation2 + $0x5e8] sm:$0xff]  ;;  %v5767_v4 = vcombine.high %v557_v62, %v561_v63  ;;  %v5766_v10 = vcombine.low %v557_v62, %v561_v63 }
  0xe4   : > { %v5769_v5 = vcombine.high %v558_v0, %v562_v1  ;;  %v5768_v11 = vcombine.low %v558_v0, %v562_v1 }
  0xe5   : > { %1996 = vmatpush1.bf16.msra.mxu0 %v5702_v6  ;;  %2078 = vmatpush1.bf16.msra.mxu1 %v5704_v7  ;;  %v565_v6 = vld [vmem:[#allocation2 + $0x600] sm:$0xff] }
  0xe6   : > { %2006 = vmatprep.subr.bf16.mxu0 %v5711_v8  ;;  %2088 = vmatprep.subr.bf16.mxu1 %v5713_v9  ;;  %v569_v7 = vld [vmem:[#allocation2 + $0x620] sm:$0xff]  ;;  %v566_v8 = vld [vmem:[#allocation2 + $0x608] sm:$0xff] }
  0xe7   : > { %v570_v9 = vld [vmem:[#allocation2 + $0x628] sm:$0xff]  ;;  %v5775_v13 = vcombine.high %v565_v6, %v569_v7  ;;  %v5774_v20 = vcombine.low %v565_v6, %v569_v7 }
  0xe8   : > { %1998 = vmatmul.mubr.bf16.vlgmr.msra.gmra.mrb[0].mxu0 %v6548_v12  ;;  %2080 = vmatmul.mubr.bf16.vlgmr.msra.gmra.mrb[0].mxu1 %v6548_v12  ;;  %v5777_v14 = vcombine.high %v566_v8, %v570_v9  ;;  %v5776_v21 = vcombine.low %v566_v8, %v570_v9 }
  0xe9   : > { %2007 = vmatpush1.bf16.msra.mxu0 %v5710_v16  ;;  %2089 = vmatpush1.bf16.msra.mxu1 %v5712_v17  ;;  %v573_v16 = vld [vmem:[#allocation2 + $0x640] sm:$0xff] }
  0xea   : > { %2008 = vmatprep.subr.bf16.mxu0 %v5719_v18  ;;  %2090 = vmatprep.subr.bf16.mxu1 %v5721_v19  ;;  %v577_v17 = vld [vmem:[#allocation2 + $0x660] sm:$0xff]  ;;  %v574_v18 = vld [vmem:[#allocation2 + $0x648] sm:$0xff] }
  0xeb   : > { %2038 = vmatprep.mubr.bf16.mxu0 %v6557_v53  ;;  %2120 = vmatprep.mubr.bf16.mxu1 %v6557_v53  ;;  %v578_v19 = vld [vmem:[#allocation2 + $0x668] sm:$0xff]  ;;  %v5783_v22 = vcombine.high %v573_v16, %v577_v17  ;;  %v5782_v28 = vcombine.low %v573_v16, %v577_v17 }
  0xec   : > { %v5785_v23 = vcombine.high %v574_v18, %v578_v19  ;;  %v5784_v29 = vcombine.low %v574_v18, %v578_v19 }
  0xed   : > { %2009 = vmatpush1.bf16.msra.mxu0 %v5718_v24  ;;  %2091 = vmatpush1.bf16.msra.mxu1 %v5720_v25  ;;  %v581_v24 = vld [vmem:[#allocation2 + $0x680] sm:$0xff] }
  0xee   : > { %2010 = vmatprep.subr.bf16.mxu0 %v5727_v26  ;;  %2092 = vmatprep.subr.bf16.mxu1 %v5729_v27  ;;  %v585_v25 = vld [vmem:[#allocation2 + $0x6a0] sm:$0xff]  ;;  %v582_v26 = vld [vmem:[#allocation2 + $0x688] sm:$0xff] }
  0xef   : > { %v586_v27 = vld [vmem:[#allocation2 + $0x6a8] sm:$0xff]  ;;  %v5791_v30 = vcombine.high %v581_v24, %v585_v25  ;;  %v5790_v36 = vcombine.low %v581_v24, %v585_v25  ;;  %v388_v24 = vld [vmem:[#allocation2 + $0x78] sm:$0xff] }
  0xf0   : > { %v5793_v31 = vcombine.high %v582_v26, %v586_v27  ;;  %v5792_v37 = vcombine.low %v582_v26, %v586_v27 }
  0xf1   : > { %2011 = vmatpush1.bf16.msra.mxu0 %v5726_v32  ;;  %2093 = vmatpush1.bf16.msra.mxu1 %v5728_v33  ;;  %v589_v32 = vld [vmem:[#allocation2 + $0x6c0] sm:$0xff] }
  0xf2   : > { %2012 = vmatprep.subr.bf16.mxu0 %v5735_v34  ;;  %2094 = vmatprep.subr.bf16.mxu1 %v5737_v35  ;;  %v593_v33 = vld [vmem:[#allocation2 + $0x6e0] sm:$0xff]  ;;  %v590_v34 = vld [vmem:[#allocation2 + $0x6c8] sm:$0xff] }
  0xf3   : > { %v594_v35 = vld [vmem:[#allocation2 + $0x6e8] sm:$0xff]  ;;  %v5799_v38 = vcombine.high %v589_v32, %v593_v33  ;;  %v5798_v44 = vcombine.low %v589_v32, %v593_v33  ;;  %v396_v32 = vld [vmem:[#allocation2 + $0xb8] sm:$0xff] }
  0xf4   : > { %v5801_v39 = vcombine.high %v590_v34, %v594_v35  ;;  %v5800_v45 = vcombine.low %v590_v34, %v594_v35 }
  0xf5   : > { %2013 = vmatpush1.bf16.msra.mxu0 %v5734_v40  ;;  %2095 = vmatpush1.bf16.msra.mxu1 %v5736_v41  ;;  %v597_v40 = vld [vmem:[#allocation2 + $0x700] sm:$0xff] }
  0xf6   : > { %2014 = vmatprep.subr.bf16.mxu0 %v5743_v42  ;;  %2096 = vmatprep.subr.bf16.mxu1 %v5745_v43  ;;  %v601_v41 = vld [vmem:[#allocation2 + $0x720] sm:$0xff]  ;;  %v598_v42 = vld [vmem:[#allocation2 + $0x708] sm:$0xff] }
  0xf7   : > { %v602_v43 = vld [vmem:[#allocation2 + $0x728] sm:$0xff]  ;;  %v5807_v46 = vcombine.high %v597_v40, %v601_v41  ;;  %v5806_v52 = vcombine.low %v597_v40, %v601_v41 }
  0xf8   : > { %v5809_v47 = vcombine.high %v598_v42, %v602_v43  ;;  %v5808_v54 = vcombine.low %v598_v42, %v602_v43 }
  0xf9   : > { %2015 = vmatpush1.bf16.msra.mxu0 %v5742_v48  ;;  %2097 = vmatpush1.bf16.msra.mxu1 %v5744_v49  ;;  %v605_v48 = vld [vmem:[#allocation2 + $0x740] sm:$0xff] }
  0xfa   : > { %2016 = vmatprep.subr.bf16.mxu0 %v5751_v50  ;;  %2098 = vmatprep.subr.bf16.mxu1 %v5753_v51  ;;  %v609_v49 = vld [vmem:[#allocation2 + $0x760] sm:$0xff]  ;;  %v606_v50 = vld [vmem:[#allocation2 + $0x748] sm:$0xff] }
  0xfb   : > { %v610_v51 = vld [vmem:[#allocation2 + $0x768] sm:$0xff]  ;;  %v5815_v55 = vcombine.high %v605_v48, %v609_v49  ;;  %v5814_v62 = vcombine.low %v605_v48, %v609_v49 }
  0xfc   : > { %v5817_v56 = vcombine.high %v606_v50, %v610_v51  ;;  %v5816_v63 = vcombine.low %v606_v50, %v610_v51  ;;  %v415_v51 = vld [vmem:[#allocation2 + $0x150] sm:$0xff] }
  0xfd   : > { %2017 = vmatpush1.bf16.msra.mxu0 %v5750_v58  ;;  %2099 = vmatpush1.bf16.msra.mxu1 %v5752_v59  ;;  %v613_v58 = vld [vmem:[#allocation2 + $0x780] sm:$0xff] }
  0xfe   : > { %2018 = vmatprep.subr.bf16.mxu0 %v5759_v60  ;;  %2100 = vmatprep.subr.bf16.mxu1 %v5761_v61  ;;  %v617_v59 = vld [vmem:[#allocation2 + $0x7a0] sm:$0xff]  ;;  %v614_v60 = vld [vmem:[#allocation2 + $0x788] sm:$0xff] }
  0xff   : > { %v618_v61 = vld [vmem:[#allocation2 + $0x7a8] sm:$0xff]  ;;  %v5823_v0 = vcombine.high %v613_v58, %v617_v59  ;;  %v5822_v6 = vcombine.low %v613_v58, %v617_v59 }
 0x100   : > { %v5825_v1 = vcombine.high %v614_v60, %v618_v61  ;;  %v5824_v7 = vcombine.low %v614_v60, %v618_v61  ;;  %v423_v61 = vld [vmem:[#allocation2 + $0x190] sm:$0xff] }
 0x101   : > { %2019 = vmatpush1.bf16.msra.mxu0 %v5758_v2  ;;  %2101 = vmatpush1.bf16.msra.mxu1 %v5760_v3  ;;  %v621_v2 = vld [vmem:[#allocation2 + $0x7c0] sm:$0xff] }
 0x102   : > { %2020 = vmatprep.subr.bf16.mxu0 %v5767_v4  ;;  %2102 = vmatprep.subr.bf16.mxu1 %v5769_v5  ;;  %v625_v3 = vld [vmem:[#allocation2 + $0x7e0] sm:$0xff]  ;;  %v622_v4 = vld [vmem:[#allocation2 + $0x7c8] sm:$0xff] }
 0x103   : > { %v626_v5 = vld [vmem:[#allocation2 + $0x7e8] sm:$0xff]  ;;  %v5831_v8 = vcombine.high %v621_v2, %v625_v3  ;;  %v5830_v16 = vcombine.low %v621_v2, %v625_v3 }
 0x104   : > { %v5833_v9 = vcombine.high %v622_v4, %v626_v5  ;;  %v5832_v17 = vcombine.low %v622_v4, %v626_v5  ;;  %v431_v5 = vld [vmem:[#allocation2 + $0x1d0] sm:$0xff] }
 0x105   : > { %2021 = vmatpush1.bf16.msra.mxu0 %v5766_v10  ;;  %2103 = vmatpush1.bf16.msra.mxu1 %v5768_v11  ;;  %v375_v10 = vld [vmem:[#allocation2 + $0x10] sm:$0xff] }
 0x106   : > { %2022 = vmatprep.subr.bf16.mxu0 %v5775_v13  ;;  %2104 = vmatprep.subr.bf16.mxu1 %v5777_v14  ;;  %v379_v11 = vld [vmem:[#allocation2 + $0x30] sm:$0xff]  ;;  %v376_v13 = vld [vmem:[#allocation2 + $0x18] sm:$0xff] }
 0x107   : > { %v380_v14 = vld [vmem:[#allocation2 + $0x38] sm:$0xff]  ;;  %v5587_v18 = vcombine.high %v375_v10, %v379_v11  ;;  %v5586_v25 = vcombine.low %v375_v10, %v379_v11 }
 0x108   : > { %v5589_v19 = vcombine.high %v376_v13, %v380_v14  ;;  %v5588_v26 = vcombine.low %v376_v13, %v380_v14  ;;  %v439_v14 = vld [vmem:[#allocation2 + $0x210] sm:$0xff] }
 0x109   : > { %2023 = vmatpush1.bf16.msra.mxu0 %v5774_v20  ;;  %2105 = vmatpush1.bf16.msra.mxu1 %v5776_v21  ;;  %v383_v20 = vld [vmem:[#allocation2 + $0x50] sm:$0xff] }
 0x10a   : > { %2024 = vmatprep.subr.bf16.mxu0 %v5783_v22  ;;  %2106 = vmatprep.subr.bf16.mxu1 %v5785_v23  ;;  %v387_v21 = vld [vmem:[#allocation2 + $0x70] sm:$0xff]  ;;  %v6565_v22 = vcombine.low %v6553_v15, %v6553_v15  ;;  %v384_v23 = vld [vmem:[#allocation2 + $0x58] sm:$0xff] }
 0x10b   : > { %v5595_v27 = vcombine.high %v383_v20, %v387_v21  ;;  %v5594_v15 = vcombine.low %v383_v20, %v387_v21  ;;  %v5596_v33 = vcombine.low %v384_v23, %v388_v24 }
 0x10d   : > { %2025 = vmatpush1.bf16.msra.mxu0 %v5782_v28  ;;  %2107 = vmatpush1.bf16.msra.mxu1 %v5784_v29  ;;  %v5597_v28 = vcombine.high %v384_v23, %v388_v24  ;;  %v391_v29 = vld [vmem:[#allocation2 + $0x90] sm:$0xff] }
 0x10e   : > { %2026 = vmatprep.subr.bf16.mxu0 %v5791_v30  ;;  %2108 = vmatprep.subr.bf16.mxu1 %v5793_v31  ;;  %v395_v30 = vld [vmem:[#allocation2 + $0xb0] sm:$0xff]  ;;  %v392_v31 = vld [vmem:[#allocation2 + $0x98] sm:$0xff] }
 0x10f   : > { %v5603_v34 = vcombine.high %v391_v29, %v395_v30  ;;  %v5605_v35 = vcombine.high %v392_v31, %v396_v32  ;;  %v5602_v40 = vcombine.low %v391_v29, %v395_v30  ;;  %v5604_v41 = vcombine.low %v392_v31, %v396_v32  ;;  %v447_v24 = vld [vmem:[#allocation2 + $0x250] sm:$0xff] }
 0x110   : > { %v455_v32 = vld [vmem:[#allocation2 + $0x290] sm:$0xff] }
 0x111   : > { %2027 = vmatpush1.bf16.msra.mxu0 %v5790_v36  ;;  %2109 = vmatpush1.bf16.msra.mxu1 %v5792_v37  ;;  %v399_v36 = vld [vmem:[#allocation2 + $0xd0] sm:$0xff] }
 0x112   : > { %2028 = vmatprep.subr.bf16.mxu0 %v5799_v38  ;;  %2110 = vmatprep.subr.bf16.mxu1 %v5801_v39  ;;  %v403_v37 = vld [vmem:[#allocation2 + $0xf0] sm:$0xff]  ;;  %v400_v38 = vld [vmem:[#allocation2 + $0xd8] sm:$0xff] }
 0x113   : > { %v404_v39 = vld [vmem:[#allocation2 + $0xf8] sm:$0xff]  ;;  %v5611_v42 = vcombine.high %v399_v36, %v403_v37  ;;  %v5610_v48 = vcombine.low %v399_v36, %v403_v37 }
 0x114   : > { %v5613_v43 = vcombine.high %v400_v38, %v404_v39  ;;  %v5612_v49 = vcombine.low %v400_v38, %v404_v39  ;;  %v463_v39 = vld [vmem:[#allocation2 + $0x2d0] sm:$0xff] }
 0x115   : > { %2029 = vmatpush1.bf16.msra.mxu0 %v5798_v44  ;;  %2111 = vmatpush1.bf16.msra.mxu1 %v5800_v45  ;;  %v407_v44 = vld [vmem:[#allocation2 + $0x110] sm:$0xff] }
 0x116   : > { %2030 = vmatprep.subr.bf16.mxu0 %v5807_v46  ;;  %2112 = vmatprep.subr.bf16.mxu1 %v5809_v47  ;;  %v411_v45 = vld [vmem:[#allocation2 + $0x130] sm:$0xff]  ;;  %v408_v46 = vld [vmem:[#allocation2 + $0x118] sm:$0xff] }
 0x117   : > { %v412_v47 = vld [vmem:[#allocation2 + $0x138] sm:$0xff]  ;;  %v5619_v50 = vcombine.high %v407_v44, %v411_v45 }
 0x118   : > { %v5620_v58 = vcombine.low %v408_v46, %v412_v47 }
 0x119   : > { %2031 = vmatpush1.bf16.msra.mxu0 %v5806_v52  ;;  %2113 = vmatpush1.bf16.msra.mxu1 %v5808_v54  ;;  %v419_v52 = vld [vmem:[#allocation2 + $0x170] sm:$0xff]  ;;  %v416_v54 = vld [vmem:[#allocation2 + $0x158] sm:$0xff] }
 0x11a   : > { %2032 = vmatprep.subr.bf16.mxu0 %v5815_v55  ;;  %2114 = vmatprep.subr.bf16.mxu1 %v5817_v56  ;;  %v420_v55 = vld [vmem:[#allocation2 + $0x178] sm:$0xff]  ;;  %v5618_v56 = vcombine.low %v407_v44, %v411_v45  ;;  %v5627_v59 = vcombine.high %v415_v51, %v419_v52 }
 0x11b   : > { %v5629_v60 = vcombine.high %v416_v54, %v420_v55  ;;  %v5628_v2 = vcombine.low %v416_v54, %v420_v55  ;;  %v479_v55 = vld [vmem:[#allocation2 + $0x350] sm:$0xff] }
 0x11d   : > { %2033 = vmatpush1.bf16.msra.mxu0 %v5814_v62  ;;  %2115 = vmatpush1.bf16.msra.mxu1 %v5816_v63  ;;  %v427_v62 = vld [vmem:[#allocation2 + $0x1b0] sm:$0xff]  ;;  %v424_v63 = vld [vmem:[#allocation2 + $0x198] sm:$0xff] }
 0x11e   : > { %2034 = vmatprep.subr.bf16.mxu0 %v5823_v0  ;;  %2116 = vmatprep.subr.bf16.mxu1 %v5825_v1  ;;  %v428_v0 = vld [vmem:[#allocation2 + $0x1b8] sm:$0xff]  ;;  %v5626_v1 = vcombine.low %v415_v51, %v419_v52  ;;  %v5635_v3 = vcombine.high %v423_v61, %v427_v62 }
 0x11f   : > { %v5637_v4 = vcombine.high %v424_v63, %v428_v0  ;;  %v5636_v10 = vcombine.low %v424_v63, %v428_v0  ;;  %v487_v0 = vld [vmem:[#allocation2 + $0x390] sm:$0xff] }
 0x121   : > { %2035 = vmatpush1.bf16.msra.mxu0 %v5822_v6  ;;  %2117 = vmatpush1.bf16.msra.mxu1 %v5824_v7  ;;  %v435_v6 = vld [vmem:[#allocation2 + $0x1f0] sm:$0xff]  ;;  %v432_v7 = vld [vmem:[#allocation2 + $0x1d8] sm:$0xff] }
 0x122   : > { %2036 = vmatprep.subr.bf16.mxu0 %v5831_v8  ;;  %2118 = vmatprep.subr.bf16.mxu1 %v5833_v9  ;;  %v436_v8 = vld [vmem:[#allocation2 + $0x1f8] sm:$0xff]  ;;  %v5634_v9 = vcombine.low %v423_v61, %v427_v62  ;;  %v5643_v11 = vcombine.high %v431_v5, %v435_v6 }
 0x123   : > { %v5645_v13 = vcombine.high %v432_v7, %v436_v8  ;;  %v5644_v20 = vcombine.low %v432_v7, %v436_v8  ;;  %v495_v8 = vld [vmem:[#allocation2 + $0x3d0] sm:$0xff] }
 0x125   : > { %2037 = vmatpush1.bf16.msra.mxu0 %v5830_v16  ;;  %2119 = vmatpush1.bf16.msra.mxu1 %v5832_v17  ;;  %v443_v16 = vld [vmem:[#allocation2 + $0x230] sm:$0xff]  ;;  %v440_v17 = vld [vmem:[#allocation2 + $0x218] sm:$0xff] }
 0x126   : > { %2129 = vmatprep.subr.bf16.mxu0 %v5587_v18  ;;  %2211 = vmatprep.subr.bf16.mxu1 %v5589_v19  ;;  %v444_v18 = vld [vmem:[#allocation2 + $0x238] sm:$0xff]  ;;  %v5642_v19 = vcombine.low %v431_v5, %v435_v6  ;;  %v5651_v21 = vcombine.high %v439_v14, %v443_v16 }
 0x127   : > { %v5653_v23 = vcombine.high %v440_v17, %v444_v18  ;;  %v5652_v29 = vcombine.low %v440_v17, %v444_v18  ;;  %v503_v18 = vld [vmem:[#allocation2 + $0x410] sm:$0xff] }
 0x128   : > { %2039 = vmatmul.mubr.bf16.vlgmr.msra.gmra.mrb[0].mxu0 %v6565_v22  ;;  %2121 = vmatmul.mubr.bf16.vlgmr.msra.gmra.mrb[0].mxu1 %v6565_v22 }
 0x129   : > { %2130 = vmatpush1.bf16.msra.mxu0 %v5586_v25  ;;  %2212 = vmatpush1.bf16.msra.mxu1 %v5588_v26  ;;  %v451_v25 = vld [vmem:[#allocation2 + $0x270] sm:$0xff]  ;;  %v448_v26 = vld [vmem:[#allocation2 + $0x258] sm:$0xff] }
 0x12a   : > { %2131 = vmatprep.subr.bf16.mxu0 %v5595_v27  ;;  %2213 = vmatprep.subr.bf16.mxu1 %v5597_v28  ;;  %v452_v27 = vld [vmem:[#allocation2 + $0x278] sm:$0xff]  ;;  %v5650_v28 = vcombine.low %v439_v14, %v443_v16  ;;  %v5659_v30 = vcombine.high %v447_v24, %v451_v25 }
 0x12b   : > { %2161 = vmatprep.mubr.bf16.mxu0 %v6542_v57  ;;  %2243 = vmatprep.mubr.bf16.mxu1 %v6542_v57  ;;  %v5621_v57 = vcombine.high %v408_v46, %v412_v47  ;;  %v5661_v31 = vcombine.high %v448_v26, %v452_v27  ;;  %v5660_v36 = vcombine.low %v448_v26, %v452_v27  ;;  %v471_v47 = vld [vmem:[#allocation2 + $0x310] sm:$0xff] }
 0x12c   : > { %v511_v27 = vld [vmem:[#allocation2 + $0x450] sm:$0xff] }
 0x12d   : > { %2132 = vmatpush1.bf16.msra.mxu0 %v5594_v15  ;;  %2214 = vmatpush1.bf16.msra.mxu1 %v5596_v33  ;;  %v459_v15 = vld [vmem:[#allocation2 + $0x2b0] sm:$0xff]  ;;  %v456_v33 = vld [vmem:[#allocation2 + $0x298] sm:$0xff] }
 0x12e   : > { %2133 = vmatprep.subr.bf16.mxu0 %v5603_v34  ;;  %2215 = vmatprep.subr.bf16.mxu1 %v5605_v35  ;;  %v460_v34 = vld [vmem:[#allocation2 + $0x2b8] sm:$0xff]  ;;  %v5658_v35 = vcombine.low %v447_v24, %v451_v25  ;;  %v5667_v37 = vcombine.high %v455_v32, %v459_v15 }
 0x12f   : > { %v5669_v38 = vcombine.high %v456_v33, %v460_v34  ;;  %v5668_v44 = vcombine.low %v456_v33, %v460_v34  ;;  %v519_v34 = vld [vmem:[#allocation2 + $0x490] sm:$0xff] }
 0x131   : > { %2134 = vmatpush1.bf16.msra.mxu0 %v5602_v40  ;;  %2216 = vmatpush1.bf16.msra.mxu1 %v5604_v41  ;;  %v467_v40 = vld [vmem:[#allocation2 + $0x2f0] sm:$0xff]  ;;  %v464_v41 = vld [vmem:[#allocation2 + $0x2d8] sm:$0xff] }
 0x132   : > { %2135 = vmatprep.subr.bf16.mxu0 %v5611_v42  ;;  %2217 = vmatprep.subr.bf16.mxu1 %v5613_v43  ;;  %v468_v42 = vld [vmem:[#allocation2 + $0x2f8] sm:$0xff]  ;;  %v5666_v43 = vcombine.low %v455_v32, %v459_v15  ;;  %v5675_v45 = vcombine.high %v463_v39, %v467_v40 }
 0x133   : > { %v5677_v46 = vcombine.high %v464_v41, %v468_v42  ;;  %v5676_v51 = vcombine.low %v464_v41, %v468_v42  ;;  %v527_v42 = vld [vmem:[#allocation2 + $0x4d0] sm:$0xff] }
 0x135   : > { %2136 = vmatpush1.bf16.msra.mxu0 %v5610_v48  ;;  %2218 = vmatpush1.bf16.msra.mxu1 %v5612_v49  ;;  %v475_v48 = vld [vmem:[#allocation2 + $0x330] sm:$0xff]  ;;  %v472_v49 = vld [vmem:[#allocation2 + $0x318] sm:$0xff] }
 0x136   : > { %2137 = vmatprep.subr.bf16.mxu0 %v5619_v50  ;;  %2219 = vmatprep.subr.bf16.mxu1 %v5621_v57  ;;  %v476_v50 = vld [vmem:[#allocation2 + $0x338] sm:$0xff]  ;;  %v5674_v57 = vcombine.low %v463_v39, %v467_v40  ;;  %v5683_v52 = vcombine.high %v471_v47, %v475_v48 }
 0x137   : > { %v5685_v54 = vcombine.high %v472_v49, %v476_v50  ;;  %v5684_v61 = vcombine.low %v472_v49, %v476_v50  ;;  %v535_v49 = vld [vmem:[#allocation2 + $0x510] sm:$0xff] }
 0x138   : > { %v539_v50 = vld [vmem:[#allocation2 + $0x530] sm:$0xff] }
 0x139   : > { %2138 = vmatpush1.bf16.msra.mxu0 %v5618_v56  ;;  %2220 = vmatpush1.bf16.msra.mxu1 %v5620_v58  ;;  %v483_v56 = vld [vmem:[#allocation2 + $0x370] sm:$0xff]  ;;  %v480_v58 = vld [vmem:[#allocation2 + $0x358] sm:$0xff] }
 0x13a   : > { %2139 = vmatprep.subr.bf16.mxu0 %v5627_v59  ;;  %2221 = vmatprep.subr.bf16.mxu1 %v5629_v60  ;;  %v484_v59 = vld [vmem:[#allocation2 + $0x378] sm:$0xff]  ;;  %v5682_v60 = vcombine.low %v471_v47, %v475_v48  ;;  %v5691_v62 = vcombine.high %v479_v55, %v483_v56 }
 0x13b   : > { %v5693_v63 = vcombine.high %v480_v58, %v484_v59  ;;  %v5692_v5 = vcombine.low %v480_v58, %v484_v59  ;;  %v547_v58 = vld [vmem:[#allocation2 + $0x570] sm:$0xff]  ;;  %v544_v59 = vld [vmem:[#allocation2 + $0x558] sm:$0xff] }
 0x13d   : > { %2140 = vmatpush1.bf16.msra.mxu0 %v5626_v1  ;;  %2222 = vmatpush1.bf16.msra.mxu1 %v5628_v2  ;;  %v491_v1 = vld [vmem:[#allocation2 + $0x3b0] sm:$0xff]  ;;  %v488_v2 = vld [vmem:[#allocation2 + $0x398] sm:$0xff] }
 0x13e   : > { %2141 = vmatprep.subr.bf16.mxu0 %v5635_v3  ;;  %2223 = vmatprep.subr.bf16.mxu1 %v5637_v4  ;;  %v492_v3 = vld [vmem:[#allocation2 + $0x3b8] sm:$0xff]  ;;  %v5690_v4 = vcombine.low %v479_v55, %v483_v56  ;;  %v5699_v6 = vcombine.high %v487_v0, %v491_v1  ;;  %v5747_v55 = vcombine.high %v535_v49, %v539_v50  ;;  %v543_v56 = vld [vmem:[#allocation2 + $0x550] sm:$0xff] }
 0x13f   : > { %v5701_v7 = vcombine.high %v488_v2, %v492_v3  ;;  %v5700_v14 = vcombine.low %v488_v2, %v492_v3  ;;  %v555_v2 = vld [vmem:[#allocation2 + $0x5b0] sm:$0xff]  ;;  %v552_v3 = vld [vmem:[#allocation2 + $0x598] sm:$0xff] }
 0x141   : > { %2142 = vmatpush1.bf16.msra.mxu0 %v5634_v9  ;;  %2224 = vmatpush1.bf16.msra.mxu1 %v5636_v10  ;;  %v499_v9 = vld [vmem:[#allocation2 + $0x3f0] sm:$0xff]  ;;  %v496_v10 = vld [vmem:[#allocation2 + $0x3d8] sm:$0xff] }
 0x142   : > { %2143 = vmatprep.subr.bf16.mxu0 %v5643_v11  ;;  %2225 = vmatprep.subr.bf16.mxu1 %v5645_v13  ;;  %v500_v11 = vld [vmem:[#allocation2 + $0x3f8] sm:$0xff]  ;;  %v5698_v13 = vcombine.low %v487_v0, %v491_v1  ;;  %v5707_v16 = vcombine.high %v495_v8, %v499_v9  ;;  %v551_v1 = vld [vmem:[#allocation2 + $0x590] sm:$0xff] }
 0x143   : > { %v5709_v17 = vcombine.high %v496_v10, %v500_v11  ;;  %v5708_v24 = vcombine.low %v496_v10, %v500_v11  ;;  %v563_v10 = vld [vmem:[#allocation2 + $0x5f0] sm:$0xff]  ;;  %v560_v11 = vld [vmem:[#allocation2 + $0x5d8] sm:$0xff] }
 0x145   : > { %2144 = vmatpush1.bf16.msra.mxu0 %v5642_v19  ;;  %2226 = vmatpush1.bf16.msra.mxu1 %v5644_v20  ;;  %v507_v19 = vld [vmem:[#allocation2 + $0x430] sm:$0xff]  ;;  %v504_v20 = vld [vmem:[#allocation2 + $0x418] sm:$0xff] }
 0x146   : > { %2145 = vmatprep.subr.bf16.mxu0 %v5651_v21  ;;  %2227 = vmatprep.subr.bf16.mxu1 %v5653_v23  ;;  %v508_v21 = vld [vmem:[#allocation2 + $0x438] sm:$0xff]  ;;  %v5706_v23 = vcombine.low %v495_v8, %v499_v9  ;;  %v5715_v25 = vcombine.high %v503_v18, %v507_v19  ;;  %v559_v9 = vld [vmem:[#allocation2 + $0x5d0] sm:$0xff] }
 0x147   : > { %v5717_v26 = vcombine.high %v504_v20, %v508_v21  ;;  %v5716_v32 = vcombine.low %v504_v20, %v508_v21  ;;  %v571_v20 = vld [vmem:[#allocation2 + $0x630] sm:$0xff]  ;;  %v568_v21 = vld [vmem:[#allocation2 + $0x618] sm:$0xff] }
 0x149   : > { %2146 = vmatpush1.bf16.msra.mxu0 %v5650_v28  ;;  %2228 = vmatpush1.bf16.msra.mxu1 %v5652_v29  ;;  %v515_v28 = vld [vmem:[#allocation2 + $0x470] sm:$0xff]  ;;  %v512_v29 = vld [vmem:[#allocation2 + $0x458] sm:$0xff] }
 0x14a   : > { %2147 = vmatprep.subr.bf16.mxu0 %v5659_v30  ;;  %2229 = vmatprep.subr.bf16.mxu1 %v5661_v31  ;;  %v516_v30 = vld [vmem:[#allocation2 + $0x478] sm:$0xff]  ;;  %v5714_v31 = vcombine.low %v503_v18, %v507_v19  ;;  %v5723_v15 = vcombine.high %v511_v27, %v515_v28  ;;  %v567_v19 = vld [vmem:[#allocation2 + $0x610] sm:$0xff] }
 0x14b   : > { %v5725_v33 = vcombine.high %v512_v29, %v516_v30  ;;  %v5724_v39 = vcombine.low %v512_v29, %v516_v30  ;;  %v579_v29 = vld [vmem:[#allocation2 + $0x670] sm:$0xff]  ;;  %v576_v30 = vld [vmem:[#allocation2 + $0x658] sm:$0xff] }
 0x14d   : > { %2148 = vmatpush1.bf16.msra.mxu0 %v5658_v35  ;;  %2230 = vmatpush1.bf16.msra.mxu1 %v5660_v36  ;;  %v523_v35 = vld [vmem:[#allocation2 + $0x4b0] sm:$0xff]  ;;  %v520_v36 = vld [vmem:[#allocation2 + $0x498] sm:$0xff] }
 0x14e   : > { %2149 = vmatprep.subr.bf16.mxu0 %v5667_v37  ;;  %2231 = vmatprep.subr.bf16.mxu1 %v5669_v38  ;;  %v524_v37 = vld [vmem:[#allocation2 + $0x4b8] sm:$0xff]  ;;  %v5722_v38 = vcombine.low %v511_v27, %v515_v28  ;;  %v5731_v40 = vcombine.high %v519_v34, %v523_v35  ;;  %v575_v28 = vld [vmem:[#allocation2 + $0x650] sm:$0xff] }
 0x14f   : > { %v5733_v41 = vcombine.high %v520_v36, %v524_v37 }
 0x151   : > { %2150 = vmatpush1.bf16.msra.mxu0 %v5666_v43  ;;  %2232 = vmatpush1.bf16.msra.mxu1 %v5668_v44  ;;  %v531_v43 = vld [vmem:[#allocation2 + $0x4f0] sm:$0xff]  ;;  %v528_v44 = vld [vmem:[#allocation2 + $0x4d8] sm:$0xff] }
 0x152   : > { %2151 = vmatprep.subr.bf16.mxu0 %v5675_v45  ;;  %2233 = vmatprep.subr.bf16.mxu1 %v5677_v46  ;;  %v532_v45 = vld [vmem:[#allocation2 + $0x4f8] sm:$0xff]  ;;  %v5730_v46 = vcombine.low %v519_v34, %v523_v35  ;;  %v5739_v47 = vcombine.high %v527_v42, %v531_v43  ;;  %v583_v35 = vld [vmem:[#allocation2 + $0x690] sm:$0xff] }
 0x153   : > { %v5741_v48 = vcombine.high %v528_v44, %v532_v45 }
 0x155   : > { %2152 = vmatpush1.bf16.msra.mxu0 %v5674_v57  ;;  %2234 = vmatpush1.bf16.msra.mxu1 %v5676_v51  ;;  %v536_v57 = vld [vmem:[#allocation2 + $0x518] sm:$0xff] }
 0x156   : > { %2153 = vmatprep.subr.bf16.mxu0 %v5683_v52  ;;  %2235 = vmatprep.subr.bf16.mxu1 %v5685_v54  ;;  %v540_v51 = vld [vmem:[#allocation2 + $0x538] sm:$0xff]  ;;  %v5738_v52 = vcombine.low %v527_v42, %v531_v43  ;;  %v5740_v54 = vcombine.low %v528_v44, %v532_v45  ;;  %v591_v43 = vld [vmem:[#allocation2 + $0x6d0] sm:$0xff] }
 0x157   : > { %v595_v44 = vld [vmem:[#allocation2 + $0x6f0] sm:$0xff]  ;;  %v592_v45 = vld [vmem:[#allocation2 + $0x6d8] sm:$0xff] }
 0x159   : > { %2154 = vmatpush1.bf16.msra.mxu0 %v5682_v60  ;;  %2236 = vmatpush1.bf16.msra.mxu1 %v5684_v61  ;;  %v548_v60 = vld [vmem:[#allocation2 + $0x578] sm:$0xff]  ;;  %v5746_v61 = vcombine.low %v535_v49, %v539_v50  ;;  %v599_v50 = vld [vmem:[#allocation2 + $0x710] sm:$0xff] }
 0x15a   : > { %2155 = vmatprep.subr.bf16.mxu0 %v5691_v62  ;;  %2237 = vmatprep.subr.bf16.mxu1 %v5693_v63  ;;  %v5748_v62 = vcombine.low %v536_v57, %v540_v51  ;;  %v5755_v63 = vcombine.high %v543_v56, %v547_v58  ;;  %v5757_v0 = vcombine.high %v544_v59, %v548_v60 }
 0x15d   : > { %2156 = vmatpush1.bf16.msra.mxu0 %v5690_v4  ;;  %2238 = vmatpush1.bf16.msra.mxu1 %v5692_v5  ;;  %v556_v4 = vld [vmem:[#allocation2 + $0x5b8] sm:$0xff]  ;;  %v5754_v5 = vcombine.low %v543_v56, %v547_v58  ;;  %v607_v58 = vld [vmem:[#allocation2 + $0x750] sm:$0xff] }
 0x15e   : > { %2157 = vmatprep.subr.bf16.mxu0 %v5699_v6  ;;  %2239 = vmatprep.subr.bf16.mxu1 %v5701_v7  ;;  %v5756_v6 = vcombine.low %v544_v59, %v548_v60  ;;  %v5763_v7 = vcombine.high %v551_v1, %v555_v2  ;;  %v5765_v8 = vcombine.high %v552_v3, %v556_v4  ;;  %v611_v59 = vld [vmem:[#allocation2 + $0x770] sm:$0xff]  ;;  %v608_v60 = vld [vmem:[#allocation2 + $0x758] sm:$0xff] }
 0x161   : > { %2158 = vmatpush1.bf16.msra.mxu0 %v5698_v13  ;;  %2240 = vmatpush1.bf16.msra.mxu1 %v5700_v14  ;;  %v564_v13 = vld [vmem:[#allocation2 + $0x5f8] sm:$0xff]  ;;  %v5762_v14 = vcombine.low %v551_v1, %v555_v2  ;;  %v615_v2 = vld [vmem:[#allocation2 + $0x790] sm:$0xff] }
 0x162   : > { %2159 = vmatprep.subr.bf16.mxu0 %v5707_v16  ;;  %2241 = vmatprep.subr.bf16.mxu1 %v5709_v17  ;;  %v5764_v16 = vcombine.low %v552_v3, %v556_v4  ;;  %v5771_v17 = vcombine.high %v559_v9, %v563_v10  ;;  %v5773_v18 = vcombine.high %v560_v11, %v564_v13  ;;  %v619_v3 = vld [vmem:[#allocation2 + $0x7b0] sm:$0xff]  ;;  %v616_v4 = vld [vmem:[#allocation2 + $0x798] sm:$0xff] }
 0x165   : > { %2160 = vmatpush1.bf16.msra.mxu0 %v5706_v23  ;;  %2242 = vmatpush1.bf16.msra.mxu1 %v5708_v24  ;;  %v572_v23 = vld [vmem:[#allocation2 + $0x638] sm:$0xff]  ;;  %v5770_v24 = vcombine.low %v559_v9, %v563_v10  ;;  %v623_v10 = vld [vmem:[#allocation2 + $0x7d0] sm:$0xff] }
 0x166   : > { %2170 = vmatprep.subr.bf16.mxu0 %v5715_v25  ;;  %2252 = vmatprep.subr.bf16.mxu1 %v5717_v26  ;;  %v5772_v25 = vcombine.low %v560_v11, %v564_v13  ;;  %v5779_v26 = vcombine.high %v567_v19, %v571_v20  ;;  %v5781_v27 = vcombine.high %v568_v21, %v572_v23  ;;  %v627_v11 = vld [vmem:[#allocation2 + $0x7f0] sm:$0xff]  ;;  %v624_v13 = vld [vmem:[#allocation2 + $0x7d8] sm:$0xff] }
 0x168   : > { %2162 = vmatmul.mubr.bf16.vlgmr.msra.gmra.mrb[4].mxu0 %v6548_v12  ;;  %2244 = vmatmul.mubr.bf16.vlgmr.msra.gmra.mrb[4].mxu1 %v6548_v12  ;;  %v5732_v12 = vcombine.low %v520_v36, %v524_v37  ;;  %v587_v36 = vld [vmem:[#allocation2 + $0x6b0] sm:$0xff]  ;;  %v584_v37 = vld [vmem:[#allocation2 + $0x698] sm:$0xff] }
 0x169   : > { %2171 = vmatpush1.bf16.msra.mxu0 %v5714_v31  ;;  %2253 = vmatpush1.bf16.msra.mxu1 %v5716_v32  ;;  %v580_v31 = vld [vmem:[#allocation2 + $0x678] sm:$0xff]  ;;  %v5778_v32 = vcombine.low %v567_v19, %v571_v20  ;;  %v2326_v20 = vld [vmem:[%s6529_s15 + $0x8] sm:$0xff] }
 0x16a   : > { %2172 = vmatprep.subr.bf16.mxu0 %v5723_v15  ;;  %2254 = vmatprep.subr.bf16.mxu1 %v5725_v33  ;;  %v5780_v15 = vcombine.low %v568_v21, %v572_v23  ;;  %v5787_v33 = vcombine.high %v575_v28, %v579_v29  ;;  %v5789_v34 = vcombine.high %v576_v30, %v580_v31  ;;  %v2328_v21 = vld [vmem:[%s6529_s15 + $0x18] sm:$0xff] }
 0x16b   : > { %2202 = vmatprep.mubr.bf16.mxu0 %v6557_v53  ;;  %2284 = vmatprep.mubr.bf16.mxu1 %v6557_v53  ;;  %v5749_v53 = vcombine.high %v536_v57, %v540_v51  ;;  %v603_v57 = vld [vmem:[#allocation2 + $0x730] sm:$0xff]  ;;  %v600_v51 = vld [vmem:[#allocation2 + $0x718] sm:$0xff]  ;;  %v5834_v23 = vcombine.low %v623_v10, %v627_v11 }
 0x16d   : > { %2173 = vmatpush1.bf16.msra.mxu0 %v5722_v38  ;;  %2255 = vmatpush1.bf16.msra.mxu1 %v5724_v39  ;;  %v588_v38 = vld [vmem:[#allocation2 + $0x6b8] sm:$0xff]  ;;  %v5786_v39 = vcombine.low %v575_v28, %v579_v29 }
 0x16e   : > { %2174 = vmatprep.subr.bf16.mxu0 %v5731_v40  ;;  %2256 = vmatprep.subr.bf16.mxu1 %v5733_v41  ;;  %v5788_v40 = vcombine.low %v576_v30, %v580_v31  ;;  %v5795_v41 = vcombine.high %v583_v35, %v587_v36  ;;  %v5797_v42 = vcombine.high %v584_v37, %v588_v38  ;;  %v2327_v28 = vld [vmem:[%s6529_s15 + $0x10] sm:$0xff]  ;;  %v2854_v31 = vunpack.c.h.s8.bf16 %v2326_v20 }
 0x16f   : > { %v2839_v30 = vunpack.c.l.s8.bf16 %v2327_v28 }
 0x171   : > { %2175 = vmatpush1.bf16.msra.mxu0 %v5730_v46  ;;  %2257 = vmatpush1.bf16.msra.mxu1 %v5732_v12  ;;  %v596_v46 = vld [vmem:[#allocation2 + $0x6f8] sm:$0xff]  ;;  %v5794_v12 = vcombine.low %v583_v35, %v587_v36  ;;  %v2855_v35 = vunpack.c.h.s8.bf16 %v2327_v28 }
 0x172   : > { %2176 = vmatprep.subr.bf16.mxu0 %v5739_v47  ;;  %2258 = vmatprep.subr.bf16.mxu1 %v5741_v48  ;;  %v5796_v47 = vcombine.low %v584_v37, %v588_v38  ;;  %v5803_v48 = vcombine.high %v591_v43, %v595_v44  ;;  %v5805_v49 = vcombine.high %v592_v45, %v596_v46  ;;  %v2341_v37 = vld [vmem:[%s6529_s15 + $0x80] sm:$0xff] }
 0x175   : > { %2177 = vmatpush1.bf16.msra.mxu0 %v5738_v52  ;;  %2259 = vmatpush1.bf16.msra.mxu1 %v5740_v54  ;;  %v604_v52 = vld [vmem:[#allocation2 + $0x738] sm:$0xff]  ;;  %v5802_v54 = vcombine.low %v591_v43, %v595_v44  ;;  %v2358_v43 = vld [vmem:[%s6529_s15 + $0x108] sm:$0xff]  ;;  %v2360_v44 = vld [vmem:[%s6529_s15 + $0x118] sm:$0xff] }
 0x176   : > { %2178 = vmatprep.subr.bf16.mxu0 %v5747_v55  ;;  %2260 = vmatprep.subr.bf16.mxu1 %v5749_v53  ;;  %v5804_v55 = vcombine.low %v592_v45, %v596_v46  ;;  %v5811_v53 = vcombine.high %v599_v50, %v603_v57  ;;  %v5813_v56 = vcombine.high %v600_v51, %v604_v52  ;;  %v2885_v45 = vunpack.c.h.s8.bf16 %v2341_v37 }
 0x179   : > { %2179 = vmatpush1.bf16.msra.mxu0 %v5746_v61  ;;  %2261 = vmatpush1.bf16.msra.mxu1 %v5748_v62  ;;  %v612_v61 = vld [vmem:[#allocation2 + $0x778] sm:$0xff]  ;;  %v5810_v62 = vcombine.low %v599_v50, %v603_v57 }
 0x17a   : > { %2180 = vmatprep.subr.bf16.mxu0 %v5755_v63  ;;  %2262 = vmatprep.subr.bf16.mxu1 %v5757_v0  ;;  %v5812_v63 = vcombine.low %v600_v51, %v604_v52  ;;  %v5819_v0 = vcombine.high %v607_v58, %v611_v59  ;;  %v5821_v1 = vcombine.high %v608_v60, %v612_v61  ;;  %v2918_v51 = vunpack.c.h.s8.bf16 %v2358_v43 }
 0x17b   : > { %v2920_v52 = vunpack.c.h.s8.bf16 %v2360_v44 }
 0x17d   : > { %2181 = vmatpush1.bf16.msra.mxu0 %v5754_v5  ;;  %2263 = vmatpush1.bf16.msra.mxu1 %v5756_v6  ;;  %v620_v5 = vld [vmem:[#allocation2 + $0x7b8] sm:$0xff]  ;;  %v5818_v6 = vcombine.low %v607_v58, %v611_v59  ;;  %v2373_v59 = vld [vmem:[%s6529_s15 + $0x180] sm:$0xff] }
 0x17e   : > { %2182 = vmatprep.subr.bf16.mxu0 %v5763_v7  ;;  %2264 = vmatprep.subr.bf16.mxu1 %v5765_v8  ;;  %v5820_v7 = vcombine.low %v608_v60, %v612_v61  ;;  %v5827_v8 = vcombine.high %v615_v2, %v619_v3  ;;  %v5829_v9 = vcombine.high %v616_v4, %v620_v5  ;;  %v2375_v61 = vld [vmem:[%s6529_s15 + $0x190] sm:$0xff] }
 0x181   : > { %2183 = vmatpush1.bf16.msra.mxu0 %v5762_v14  ;;  %2265 = vmatpush1.bf16.msra.mxu1 %v5764_v16  ;;  %v628_v14 = vld [vmem:[#allocation2 + $0x7f8] sm:$0xff]  ;;  %v5826_v16 = vcombine.low %v615_v2, %v619_v3  ;;  %v2390_v2 = vld [vmem:[%s6529_s15 + $0x208] sm:$0xff]  ;;  %v2392_v3 = vld [vmem:[%s6529_s15 + $0x218] sm:$0xff] }
 0x182   : > { %2184 = vmatprep.subr.bf16.mxu0 %v5771_v17  ;;  %2266 = vmatprep.subr.bf16.mxu1 %v5773_v18  ;;  %v5828_v17 = vcombine.low %v616_v4, %v620_v5  ;;  %v5835_v18 = vcombine.high %v623_v10, %v627_v11  ;;  %v5837_v19 = vcombine.high %v624_v13, %v628_v14  ;;  %v2949_v4 = vunpack.c.h.s8.bf16 %v2373_v59 }
 0x183   : > { %v2951_v5 = vunpack.c.h.s8.bf16 %v2375_v61 }
 0x185   : > { %2185 = vmatpush1.bf16.msra.mxu0 %v5770_v24  ;;  %2267 = vmatpush1.bf16.msra.mxu1 %v5772_v25  ;;  %v5836_v24 = vcombine.low %v624_v13, %v628_v14  ;;  %v2838_v25 = vunpack.c.l.s8.bf16 %v2326_v20  ;;  %v2982_v13 = vunpack.c.h.s8.bf16 %v2390_v2  ;;  %v2984_v14 = vunpack.c.h.s8.bf16 %v2392_v3 }
 0x186   : > { %2186 = vmatprep.subr.bf16.mxu0 %v5779_v26  ;;  %2268 = vmatprep.subr.bf16.mxu1 %v5781_v27  ;;  %v2325_v26 = vld [vmem:[%s6529_s15] sm:$0xff]  ;;  %v2840_v27 = vunpack.c.l.s8.bf16 %v2328_v21 }
 0x187   : > { %v2837_v29 = vunpack.c.l.s8.bf16 %v2325_v26 }
 0x189   : > { %2187 = vmatpush1.bf16.msra.mxu0 %v5778_v32  ;;  %2269 = vmatpush1.bf16.msra.mxu1 %v5780_v15  ;;  %v2856_v32 = vunpack.c.h.s8.bf16 %v2328_v21  ;;  %v2342_v15 = vld [vmem:[%s6529_s15 + $0x88] sm:$0xff]  ;;  %v2405_v21 = vld [vmem:[%s6529_s15 + $0x280] sm:$0xff] }
 0x18a   : > { %2188 = vmatprep.subr.bf16.mxu0 %v5787_v33  ;;  %2270 = vmatprep.subr.bf16.mxu1 %v5789_v34  ;;  %v2344_v33 = vld [vmem:[%s6529_s15 + $0x98] sm:$0xff]  ;;  %v2853_v34 = vunpack.c.h.s8.bf16 %v2325_v26  ;;  %v2870_v36 = vunpack.c.l.s8.bf16 %v2342_v15 }
 0x18b   : > { %v2872_v38 = vunpack.c.l.s8.bf16 %v2344_v33 }
 0x18d   : > { %2189 = vmatpush1.bf16.msra.mxu0 %v5786_v39  ;;  %2271 = vmatpush1.bf16.msra.mxu1 %v5788_v40  ;;  %v2343_v39 = vld [vmem:[%s6529_s15 + $0x90] sm:$0xff]  ;;  %v2869_v40 = vunpack.c.l.s8.bf16 %v2341_v37 }
 0x18e   : > { %2190 = vmatprep.subr.bf16.mxu0 %v5795_v41  ;;  %2272 = vmatprep.subr.bf16.mxu1 %v5797_v42  ;;  %v2871_v41 = vunpack.c.l.s8.bf16 %v2343_v39  ;;  %v2888_v42 = vunpack.c.h.s8.bf16 %v2344_v33  ;;  %v2887_v46 = vunpack.c.h.s8.bf16 %v2343_v39  ;;  %v2421_v33 = vld [vmem:[%s6529_s15 + $0x300] sm:$0xff] }
 0x191   : > { %2191 = vmatpush1.bf16.msra.mxu0 %v5794_v12  ;;  %2273 = vmatpush1.bf16.msra.mxu1 %v5796_v47  ;;  %v2902_v12 = vunpack.c.l.s8.bf16 %v2358_v43  ;;  %v2357_v47 = vld [vmem:[%s6529_s15 + $0x100] sm:$0xff] }
 0x192   : > { %2192 = vmatprep.subr.bf16.mxu0 %v5803_v48  ;;  %2274 = vmatprep.subr.bf16.mxu1 %v5805_v49  ;;  %v2904_v48 = vunpack.c.l.s8.bf16 %v2360_v44  ;;  %v2359_v49 = vld [vmem:[%s6529_s15 + $0x110] sm:$0xff]  ;;  %v2901_v50 = vunpack.c.l.s8.bf16 %v2357_v47  ;;  %v2437_v44 = vld [vmem:[%s6529_s15 + $0x380] sm:$0xff] }
 0x193   : > { %v2903_v57 = vunpack.c.l.s8.bf16 %v2359_v49 }
 0x195   : > { %2193 = vmatpush1.bf16.msra.mxu0 %v5802_v54  ;;  %2275 = vmatpush1.bf16.msra.mxu1 %v5804_v55  ;;  %v2374_v54 = vld [vmem:[%s6529_s15 + $0x188] sm:$0xff]  ;;  %v2376_v55 = vld [vmem:[%s6529_s15 + $0x198] sm:$0xff] }
 0x196   : > { %2194 = vmatprep.subr.bf16.mxu0 %v5811_v53  ;;  %2276 = vmatprep.subr.bf16.mxu1 %v5813_v56  ;;  %v2917_v53 = vunpack.c.h.s8.bf16 %v2357_v47  ;;  %v2919_v56 = vunpack.c.h.s8.bf16 %v2359_v49  ;;  %v2934_v58 = vunpack.c.l.s8.bf16 %v2374_v54  ;;  %v2936_v60 = vunpack.c.l.s8.bf16 %v2376_v55 }
 0x199   : > { %2195 = vmatpush1.bf16.msra.mxu0 %v5810_v62  ;;  %2277 = vmatpush1.bf16.msra.mxu1 %v5812_v63  ;;  %v2933_v62 = vunpack.c.l.s8.bf16 %v2373_v59  ;;  %v2935_v63 = vunpack.c.l.s8.bf16 %v2375_v61  ;;  %v6622_v59 = vld [vmem:[#allocation4] sm:$0xff] }
 0x19a   : > { %2196 = vmatprep.subr.bf16.mxu0 %v5819_v0  ;;  %2278 = vmatprep.subr.bf16.mxu1 %v5821_v1  ;;  %v2950_v0 = vunpack.c.h.s8.bf16 %v2374_v54  ;;  %v2952_v1 = vunpack.c.h.s8.bf16 %v2376_v55 }
 0x19d   : > { %2197 = vmatpush1.bf16.msra.mxu0 %v5818_v6  ;;  %2279 = vmatpush1.bf16.msra.mxu1 %v5820_v7  ;;  %v2966_v6 = vunpack.c.l.s8.bf16 %v2390_v2  ;;  %v2389_v7 = vld [vmem:[%s6529_s15 + $0x200] sm:$0xff] }
 0x19e   : > { %2198 = vmatprep.subr.bf16.mxu0 %v5827_v8  ;;  %2280 = vmatprep.subr.bf16.mxu1 %v5829_v9  ;;  %v2968_v8 = vunpack.c.l.s8.bf16 %v2392_v3  ;;  %v2391_v9 = vld [vmem:[%s6529_s15 + $0x210] sm:$0xff]  ;;  %v2965_v10 = vunpack.c.l.s8.bf16 %v2389_v7 }
 0x19f   : > { %v2967_v11 = vunpack.c.l.s8.bf16 %v2391_v9 }
 0x1a1   : > { %2199 = vmatpush1.bf16.msra.mxu0 %v5826_v16  ;;  %2281 = vmatpush1.bf16.msra.mxu1 %v5828_v17  ;;  %v2406_v16 = vld [vmem:[%s6529_s15 + $0x288] sm:$0xff]  ;;  %v2408_v17 = vld [vmem:[%s6529_s15 + $0x298] sm:$0xff] }
 0x1a2   : > { %2200 = vmatprep.subr.bf16.mxu0 %v5835_v18  ;;  %2282 = vmatprep.subr.bf16.mxu1 %v5837_v19  ;;  %v2981_v18 = vunpack.c.h.s8.bf16 %v2389_v7  ;;  %v2983_v19 = vunpack.c.h.s8.bf16 %v2391_v9  ;;  %v2998_v20 = vunpack.c.l.s8.bf16 %v2406_v16  ;;  %v3016_v28 = vunpack.c.h.s8.bf16 %v2408_v17 }
 0x1a5   : > { %2201 = vmatpush1.bf16.msra.mxu0 %v5834_v23  ;;  %2283 = vmatpush1.bf16.msra.mxu1 %v5836_v24  ;;  %v3000_v23 = vunpack.c.l.s8.bf16 %v2408_v17  ;;  %v2407_v24 = vld [vmem:[%s6529_s15 + $0x290] sm:$0xff] }
 0x1a6   : > { %3861 = vmatprep.subr.bf16.mxu0 %v2838_v25  ;;  %4025 = vmatprep.subr.bf16.mxu1 %v2840_v27  ;;  %v2997_v25 = vunpack.c.l.s8.bf16 %v2405_v21  ;;  %v2999_v26 = vunpack.c.l.s8.bf16 %v2407_v24  ;;  %v3014_v27 = vunpack.c.h.s8.bf16 %v2406_v16  ;;  %v2455_v16 = vld [vmem:[%s6529_s15 + $0x410] sm:$0xff] }
 0x1a8   : > { %2203 = vmatmul.mubr.bf16.vlgmr.msra.gmra.mrb[4].mxu0 %v6565_v22  ;;  %2285 = vmatmul.mubr.bf16.vlgmr.msra.gmra.mrb[4].mxu1 %v6565_v22  ;;  %v2886_v22 = vunpack.c.h.s8.bf16 %v2342_v15 }
 0x1a9   : > { %3862 = vmatpush1.bf16.msra.mxu0 %v2837_v29  ;;  %4026 = vmatpush1.bf16.msra.mxu1 %v2839_v30  ;;  %v2422_v29 = vld [vmem:[%s6529_s15 + $0x308] sm:$0xff]  ;;  %v2424_v30 = vld [vmem:[%s6529_s15 + $0x318] sm:$0xff] }
 0x1aa   : > { %3863 = vmatprep.subr.bf16.mxu0 %v2854_v31  ;;  %4027 = vmatprep.subr.bf16.mxu1 %v2856_v32  ;;  %v3013_v31 = vunpack.c.h.s8.bf16 %v2405_v21  ;;  %v3015_v32 = vunpack.c.h.s8.bf16 %v2407_v24  ;;  %v3030_v15 = vunpack.c.l.s8.bf16 %v2422_v29  ;;  %v3048_v39 = vunpack.c.h.s8.bf16 %v2424_v30 }
 0x1ad   : > { %3864 = vmatpush1.bf16.msra.mxu0 %v2853_v34  ;;  %4028 = vmatpush1.bf16.msra.mxu1 %v2855_v35  ;;  %v3032_v34 = vunpack.c.l.s8.bf16 %v2424_v30  ;;  %v2423_v35 = vld [vmem:[%s6529_s15 + $0x310] sm:$0xff]  ;;  %v2472_v30 = vld [vmem:[%s6529_s15 + $0x498] sm:$0xff] }
 0x1ae   : > { %3865 = vmatprep.subr.bf16.mxu0 %v2870_v36  ;;  %4029 = vmatprep.subr.bf16.mxu1 %v2872_v38  ;;  %v3029_v36 = vunpack.c.l.s8.bf16 %v2421_v33  ;;  %v3031_v37 = vunpack.c.l.s8.bf16 %v2423_v35  ;;  %v3046_v38 = vunpack.c.h.s8.bf16 %v2422_v29  ;;  %v2470_v29 = vld [vmem:[%s6529_s15 + $0x488] sm:$0xff] }
 0x1b1   : > { %3866 = vmatpush1.bf16.msra.mxu0 %v2869_v40  ;;  %4030 = vmatpush1.bf16.msra.mxu1 %v2871_v41  ;;  %v2438_v40 = vld [vmem:[%s6529_s15 + $0x388] sm:$0xff]  ;;  %v2440_v41 = vld [vmem:[%s6529_s15 + $0x398] sm:$0xff] }
 0x1b2   : > { %3867 = vmatprep.subr.bf16.mxu0 %v2886_v22  ;;  %4031 = vmatprep.subr.bf16.mxu1 %v2888_v42  ;;  %v3045_v22 = vunpack.c.h.s8.bf16 %v2421_v33  ;;  %v3047_v42 = vunpack.c.h.s8.bf16 %v2423_v35  ;;  %v3062_v43 = vunpack.c.l.s8.bf16 %v2438_v40  ;;  %v3080_v49 = vunpack.c.h.s8.bf16 %v2440_v41  ;;  %v2469_v35 = vld [vmem:[%s6529_s15 + $0x480] sm:$0xff] }
 0x1b3   : > { %v3126_v33 = vunpack.c.l.s8.bf16 %v2470_v29 }
 0x1b5   : > { %3868 = vmatpush1.bf16.msra.mxu0 %v2885_v45  ;;  %4032 = vmatpush1.bf16.msra.mxu1 %v2887_v46  ;;  %v3064_v45 = vunpack.c.l.s8.bf16 %v2440_v41  ;;  %v2439_v46 = vld [vmem:[%s6529_s15 + $0x390] sm:$0xff]  ;;  %v2486_v41 = vld [vmem:[%s6529_s15 + $0x508] sm:$0xff] }
 0x1b6   : > { %3869 = vmatprep.subr.bf16.mxu0 %v2902_v12  ;;  %4033 = vmatprep.subr.bf16.mxu1 %v2904_v48  ;;  %v3061_v12 = vunpack.c.l.s8.bf16 %v2437_v44  ;;  %v3063_v47 = vunpack.c.l.s8.bf16 %v2439_v46  ;;  %v3078_v48 = vunpack.c.h.s8.bf16 %v2438_v40  ;;  %v3144_v40 = vunpack.c.h.s8.bf16 %v2472_v30 }
 0x1b9   : > { %3870 = vmatpush1.bf16.msra.mxu0 %v2901_v50  ;;  %4034 = vmatpush1.bf16.msra.mxu1 %v2903_v57  ;;  %v6610_v50 = vld [vmem:[%s6529_s15 + $0x408] sm:$0xff]  ;;  %v6613_v57 = vld [vmem:[%s6529_s15 + $0x418] sm:$0xff] }
 0x1ba   : > { %3871 = vmatprep.subr.bf16.mxu0 %v2918_v51  ;;  %4035 = vmatprep.subr.bf16.mxu1 %v2920_v52  ;;  %v3077_v51 = vunpack.c.h.s8.bf16 %v2437_v44  ;;  %v3079_v52 = vunpack.c.h.s8.bf16 %v2439_v46  ;;  %v3094_v54 = vunpack.c.l.s8.bf16 %v6610_v50  ;;  %v3096_v55 = vunpack.c.l.s8.bf16 %v6613_v57  ;;  %v2485_v46 = vld [vmem:[%s6529_s15 + $0x500] sm:$0xff] }
 0x1bb   : > { %v3158_v44 = vunpack.c.l.s8.bf16 %v2486_v41 }
 0x1bd   : > { %3872 = vmatpush1.bf16.msra.mxu0 %v2917_v53  ;;  %4036 = vmatpush1.bf16.msra.mxu1 %v2919_v56  ;;  %v631_v53 = vlaneseq }
 0x1be   : > { %3873 = vmatprep.subr.bf16.mxu0 %v2934_v58  ;;  %4037 = vmatprep.subr.bf16.mxu1 %v2936_v60 }
 0x1bf   : > { %v6617_v56 = vshrl.u32 %v631_v53, 7 }
 0x1c1   : > { %3874 = vmatpush1.bf16.msra.mxu0 %v2933_v62  ;;  %4038 = vmatpush1.bf16.msra.mxu1 %v2935_v63  ;;  %v6620_v58 = vsub.s32 0, %v6617_v56  ;;  %v6625_v60 = vsub.s32 1, %v6617_v56  ;;  %v6628_v61 = vsub.s32 3, %v6617_v56 }
 0x1c2   : > { %3875 = vmatprep.subr.bf16.mxu0 %v2950_v0  ;;  %4039 = vmatprep.subr.bf16.mxu1 %v2952_v1 }
 0x1c3   : > { %v634_v62 = vrot.slane %v6622_v59, %v6620_v58  ;;  %v638_v63 = vrot.slane %v6622_v59, %v6625_v60  ;;  %v646_v0 = vrot.slane %v6622_v59, %v6628_v61 }
 0x1c5   : > { %3876 = vmatpush1.bf16.msra.mxu0 %v2949_v4  ;;  %4040 = vmatpush1.bf16.msra.mxu1 %v2951_v5 }
 0x1c6   : > { %3877 = vmatprep.subr.bf16.mxu0 %v2966_v6  ;;  %4041 = vmatprep.subr.bf16.mxu1 %v2968_v8 }
 0x1c9   : > { %3878 = vmatpush1.bf16.msra.mxu0 %v2965_v10  ;;  %4042 = vmatpush1.bf16.msra.mxu1 %v2967_v11 }
 0x1ca   : > { %3879 = vmatprep.subr.bf16.mxu0 %v2982_v13  ;;  %4043 = vmatprep.subr.bf16.mxu1 %v2984_v14  ;;  %v2453_v14 = vld [vmem:[%s6529_s15 + $0x400] sm:$0xff] }
 0x1cb   : > { %v3093_v24 = vunpack.c.l.s8.bf16 %v2453_v14 }
 0x1cd   : > { %3880 = vmatpush1.bf16.msra.mxu0 %v2981_v18  ;;  %4044 = vmatpush1.bf16.msra.mxu1 %v2983_v19 }
 0x1ce   : > { %3881 = vmatprep.subr.bf16.mxu0 %v2998_v20  ;;  %4045 = vmatprep.subr.bf16.mxu1 %v3000_v23 }
 0x1d1   : > { %3882 = vmatpush1.bf16.msra.mxu0 %v2997_v25  ;;  %4046 = vmatpush1.bf16.msra.mxu1 %v2999_v26  ;;  %v3095_v25 = vunpack.c.l.s8.bf16 %v2455_v16 }
 0x1d2   : > { %3883 = vmatprep.subr.bf16.mxu0 %v3014_v27  ;;  %4047 = vmatprep.subr.bf16.mxu1 %v3016_v28  ;;  %v3110_v27 = vunpack.c.h.s8.bf16 %v6610_v50  ;;  %v3112_v28 = vunpack.c.h.s8.bf16 %v6613_v57  ;;  %v2502_v57 = vld [vmem:[%s6529_s15 + $0x588] sm:$0xff] }
 0x1d5   : > { %3884 = vmatpush1.bf16.msra.mxu0 %v3013_v31  ;;  %4048 = vmatpush1.bf16.msra.mxu1 %v3015_v32  ;;  %v3109_v32 = vunpack.c.h.s8.bf16 %v2453_v14 }
 0x1d6   : > { %3885 = vmatprep.subr.bf16.mxu0 %v3030_v15  ;;  %4049 = vmatprep.subr.bf16.mxu1 %v3032_v34  ;;  %v3111_v15 = vunpack.c.h.s8.bf16 %v2455_v16  ;;  %v3128_v34 = vunpack.c.l.s8.bf16 %v2472_v30 }
 0x1d9   : > { %3886 = vmatpush1.bf16.msra.mxu0 %v3029_v36  ;;  %4050 = vmatpush1.bf16.msra.mxu1 %v3031_v37  ;;  %v2471_v36 = vld [vmem:[%s6529_s15 + $0x490] sm:$0xff]  ;;  %v3125_v37 = vunpack.c.l.s8.bf16 %v2469_v35 }
 0x1da   : > { %3887 = vmatprep.subr.bf16.mxu0 %v3046_v38  ;;  %4051 = vmatprep.subr.bf16.mxu1 %v3048_v39  ;;  %v3127_v38 = vunpack.c.l.s8.bf16 %v2471_v36  ;;  %v3142_v39 = vunpack.c.h.s8.bf16 %v2470_v29  ;;  %v2535_v29 = vld [vmem:[%s6529_s15 + $0x690] sm:$0xff] }
 0x1dd   : > { %3888 = vmatpush1.bf16.msra.mxu0 %v3045_v22  ;;  %4052 = vmatpush1.bf16.msra.mxu1 %v3047_v42  ;;  %v2488_v22 = vld [vmem:[%s6529_s15 + $0x518] sm:$0xff]  ;;  %v3141_v42 = vunpack.c.h.s8.bf16 %v2469_v35 }
 0x1de   : > { %3889 = vmatprep.subr.bf16.mxu0 %v3062_v43  ;;  %4053 = vmatprep.subr.bf16.mxu1 %v3064_v45  ;;  %v3143_v43 = vunpack.c.h.s8.bf16 %v2471_v36  ;;  %v3160_v45 = vunpack.c.l.s8.bf16 %v2488_v22  ;;  %v3176_v50 = vunpack.c.h.s8.bf16 %v2488_v22  ;;  %v2552_v35 = vld [vmem:[%s6529_s15 + $0x718] sm:$0xff]  ;;  %v6679_v22 = vsub.s32 2, %v6617_v56 }
 0x1e1   : > { %3890 = vmatpush1.bf16.msra.mxu0 %v3061_v12  ;;  %4054 = vmatpush1.bf16.msra.mxu1 %v3063_v47  ;;  %v2487_v12 = vld [vmem:[%s6529_s15 + $0x510] sm:$0xff]  ;;  %v3157_v47 = vunpack.c.l.s8.bf16 %v2485_v46 }
 0x1e2   : > { %3891 = vmatprep.subr.bf16.mxu0 %v3078_v48  ;;  %4055 = vmatprep.subr.bf16.mxu1 %v3080_v49  ;;  %v3159_v48 = vunpack.c.l.s8.bf16 %v2487_v12  ;;  %v3174_v49 = vunpack.c.h.s8.bf16 %v2486_v41  ;;  %v2551_v41 = vld [vmem:[%s6529_s15 + $0x710] sm:$0xff] }
 0x1e5   : > { %3892 = vmatpush1.bf16.msra.mxu0 %v3077_v51  ;;  %4056 = vmatpush1.bf16.msra.mxu1 %v3079_v52  ;;  %v2504_v51 = vld [vmem:[%s6529_s15 + $0x598] sm:$0xff]  ;;  %v3173_v52 = vunpack.c.h.s8.bf16 %v2485_v46  ;;  %v642_v46 = vrot.slane %v6622_v59, %v6679_v22 }
 0x1e6   : > { %3902 = vmatprep.subr.bf16.mxu0 %v3094_v54  ;;  %4066 = vmatprep.subr.bf16.mxu1 %v3096_v55  ;;  %v3175_v54 = vunpack.c.h.s8.bf16 %v2487_v12  ;;  %v3190_v55 = vunpack.c.l.s8.bf16 %v2502_v57  ;;  %v3192_v53 = vunpack.c.l.s8.bf16 %v2504_v51  ;;  %v2566_v12 = vld [vmem:[%s6529_s15 + $0x788] sm:$0xff] }
 0x1fb   : > { %v2040_v1 = vpop.f32.mrb[0].mxu0  ;;  %v6636_v3 = vpop.f32.mrb[0].mxu1 }
 0x1fc   : > { %v5843_v2 = vadd.f32 %v2040_v1, %v634_v62  ;;  %v2042_v4 = vpop.f32.mrb[1].mxu0  ;;  %v2124_v6 = vpop.f32.mrb[1].mxu1  ;;  %v2501_v62 = vld [vmem:[%s6529_s15 + $0x580] sm:$0xff] }
 0x1fd   : > { %v5844_v5 = vadd.f32 %v2042_v4, %v638_v63  ;;  %v2044_v7 = vpop.f32.mrb[2].mxu0  ;;  %v5846_v9 = vadd.f32 %v2124_v6, %v646_v0  ;;  %v2126_v10 = vpop.f32.mrb[2].mxu1  ;;  %v2503_v63 = vld [vmem:[%s6529_s15 + $0x590] sm:$0xff]  ;;  %v3189_v0 = vunpack.c.l.s8.bf16 %v2501_v62  ;;  %v3208_v4 = vunpack.c.h.s8.bf16 %v2504_v51  ;;  %v2520_v6 = vld [vmem:[%s6529_s15 + $0x618] sm:$0xff]  ;;  %v2565_v51 = vld [vmem:[%s6529_s15 + $0x780] sm:$0xff] }
 0x1fe   : > { %vm2293_vm0 = vcmp.ge.f32.partialorder %v5843_v2, 0.0  ;;  %v2301_v8 = vmul.f32 0.01, %v5843_v2  ;;  %v2045_v11 = vpop.f32.mrb[3].mxu0  ;;  %v2127_v19 = vpop.f32.mrb[3].mxu1  ;;  %v3191_v1 = vunpack.c.l.s8.bf16 %v2503_v63  ;;  %v3205_v7 = vunpack.c.h.s8.bf16 %v2501_v62 }
 0x1ff   : > { %vm2294_vm1 = vcmp.ge.f32.partialorder %v5844_v5, 0.0  ;;  %v2302_v13 = vmul.f32 0.01, %v5844_v5  ;;  %vm2296_vm2 = vcmp.ge.f32.partialorder %v5846_v9, 0.0  ;;  %v2304_v18 = vmul.f32 0.01, %v5846_v9 }
 0x200   : > { %v2309_v17 = vsel %vm2293_vm0, %v5843_v2, %v2301_v8  ;;  %v3206_v2 = vunpack.c.h.s8.bf16 %v2502_v57  ;;  %v3207_v8 = vunpack.c.h.s8.bf16 %v2503_v63  ;;  %v3224_v10 = vunpack.c.l.s8.bf16 %v2520_v6  ;;  %v2517_v11 = vld [vmem:[%s6529_s15 + $0x600] sm:$0xff]  ;;  %v2534_v19 = vld [vmem:[%s6529_s15 + $0x688] sm:$0xff] }
 0x201   : > { %v2310_v20 = vsel %vm2294_vm1, %v5844_v5, %v2302_v13  ;;  %v2312_v23 = vsel %vm2296_vm2, %v5846_v9, %v2304_v18  ;;  %v6642_v26 = vpack.c.bf16 %v2309_v17, %v2309_v17  ;;  %v2518_v5 = vld [vmem:[%s6529_s15 + $0x608] sm:$0xff]  ;;  %v2519_v13 = vld [vmem:[%s6529_s15 + $0x610] sm:$0xff]  ;;  %v3221_v14 = vunpack.c.l.s8.bf16 %v2517_v11 }
 0x202   : > { %v6640_v21 = vpack.c.bf16 %v2310_v20, %v2310_v20  ;;  %v6650_v31 = vpack.c.bf16 %v2312_v23, %v2312_v23  ;;  %v3222_v9 = vunpack.c.l.s8.bf16 %v2518_v5  ;;  %v3223_v16 = vunpack.c.l.s8.bf16 %v2519_v13  ;;  %v2536_v20 = vld [vmem:[%s6529_s15 + $0x698] sm:$0xff] }
 0x203   : > { %v3238_v17 = vunpack.c.h.s8.bf16 %v2518_v5  ;;  %v3240_v18 = vunpack.c.h.s8.bf16 %v2520_v6  ;;  %v3237_v23 = vunpack.c.h.s8.bf16 %v2517_v11  ;;  %v3334_v62 = vunpack.c.h.s8.bf16 %v2566_v12 }
 0x204   : > { %3893 = vmatprep.mubr.bf16.mxu0 %v6640_v21  ;;  %4057 = vmatprep.mubr.bf16.mxu1 %v6640_v21 }
 0x205   : > { %3894 = vmatmul.mubr.bf16.vlgmr.msra.gmra.mrb[8].mxu0 %v6642_v26  ;;  %4058 = vmatmul.mubr.bf16.vlgmr.msra.gmra.mrb[8].mxu1 %v6642_v26 }
 0x206   : > { %3903 = vmatpush1.bf16.msra.mxu0 %v3093_v24  ;;  %4067 = vmatpush1.bf16.msra.mxu1 %v3095_v25  ;;  %v3239_v24 = vunpack.c.h.s8.bf16 %v2519_v13  ;;  %v3254_v25 = vunpack.c.l.s8.bf16 %v2534_v19 }
 0x207   : > { %3934 = vmatprep.mubr.bf16.mxu0 %v6650_v31  ;;  %4098 = vmatprep.mubr.bf16.mxu1 %v6650_v31 }
 0x208   : > { %3904 = vmatprep.subr.bf16.mxu0 %v3110_v27  ;;  %4068 = vmatprep.subr.bf16.mxu1 %v3112_v28  ;;  %v3256_v27 = vunpack.c.l.s8.bf16 %v2536_v20  ;;  %v2533_v28 = vld [vmem:[%s6529_s15 + $0x680] sm:$0xff] }
 0x209   : > { %v3253_v30 = vunpack.c.l.s8.bf16 %v2533_v28  ;;  %v3269_v36 = vunpack.c.h.s8.bf16 %v2533_v28 }
 0x20a   : > { %3905 = vmatpush1.bf16.msra.mxu0 %v3109_v32  ;;  %4069 = vmatpush1.bf16.msra.mxu1 %v3111_v15  ;;  %v3255_v32 = vunpack.c.l.s8.bf16 %v2535_v29  ;;  %v3270_v15 = vunpack.c.h.s8.bf16 %v2534_v19 }
 0x20b   : > { %3906 = vmatprep.subr.bf16.mxu0 %v3126_v33  ;;  %4070 = vmatprep.subr.bf16.mxu1 %v3128_v34  ;;  %v3272_v33 = vunpack.c.h.s8.bf16 %v2536_v20  ;;  %v2550_v34 = vld [vmem:[%s6529_s15 + $0x708] sm:$0xff] }
 0x20e   : > { %3907 = vmatpush1.bf16.msra.mxu0 %v3125_v37  ;;  %4071 = vmatpush1.bf16.msra.mxu1 %v3127_v38  ;;  %v3271_v37 = vunpack.c.h.s8.bf16 %v2535_v29  ;;  %v3286_v38 = vunpack.c.l.s8.bf16 %v2550_v34 }
 0x20f   : > { %3908 = vmatprep.subr.bf16.mxu0 %v3142_v39  ;;  %4072 = vmatprep.subr.bf16.mxu1 %v3144_v40  ;;  %v3288_v39 = vunpack.c.l.s8.bf16 %v2552_v35  ;;  %v2549_v40 = vld [vmem:[%s6529_s15 + $0x700] sm:$0xff] }
 0x212   : > { %3909 = vmatpush1.bf16.msra.mxu0 %v3141_v42  ;;  %4073 = vmatpush1.bf16.msra.mxu1 %v3143_v43  ;;  %v3285_v42 = vunpack.c.l.s8.bf16 %v2549_v40  ;;  %v3287_v43 = vunpack.c.l.s8.bf16 %v2551_v41 }
 0x213   : > { %3910 = vmatprep.subr.bf16.mxu0 %v3158_v44  ;;  %4074 = vmatprep.subr.bf16.mxu1 %v3160_v45  ;;  %v3302_v44 = vunpack.c.h.s8.bf16 %v2550_v34  ;;  %v3304_v45 = vunpack.c.h.s8.bf16 %v2552_v35 }
 0x216   : > { %3911 = vmatpush1.bf16.msra.mxu0 %v3157_v47  ;;  %4075 = vmatpush1.bf16.msra.mxu1 %v3159_v48  ;;  %v2568_v47 = vld [vmem:[%s6529_s15 + $0x798] sm:$0xff]  ;;  %v3301_v48 = vunpack.c.h.s8.bf16 %v2549_v40 }
 0x217   : > { %3912 = vmatprep.subr.bf16.mxu0 %v3174_v49  ;;  %4076 = vmatprep.subr.bf16.mxu1 %v3176_v50  ;;  %v3303_v49 = vunpack.c.h.s8.bf16 %v2551_v41  ;;  %v3318_v50 = vunpack.c.l.s8.bf16 %v2566_v12  ;;  %v3320_v57 = vunpack.c.l.s8.bf16 %v2568_v47  ;;  %v3336_v63 = vunpack.c.h.s8.bf16 %v2568_v47 }
 0x21a   : > { %3913 = vmatpush1.bf16.msra.mxu0 %v3173_v52  ;;  %4077 = vmatpush1.bf16.msra.mxu1 %v3175_v54  ;;  %v2567_v52 = vld [vmem:[%s6529_s15 + $0x790] sm:$0xff]  ;;  %v5845_v54 = vadd.f32 %v6636_v3, %v642_v46 }
 0x21b   : > { %3914 = vmatprep.subr.bf16.mxu0 %v3190_v55  ;;  %4078 = vmatprep.subr.bf16.mxu1 %v3192_v53  ;;  %v3317_v55 = vunpack.c.l.s8.bf16 %v2565_v51  ;;  %v3319_v53 = vunpack.c.l.s8.bf16 %v2567_v52  ;;  %v3335_v5 = vunpack.c.h.s8.bf16 %v2567_v52 }
 0x21c   : > { %vm2295_vm3 = vcmp.ge.f32.partialorder %v5845_v54, 0.0 }
 0x21e   : > { %3915 = vmatpush1.bf16.msra.mxu0 %v3189_v0  ;;  %4079 = vmatpush1.bf16.msra.mxu1 %v3191_v1  ;;  %v2303_v0 = vmul.f32 0.01, %v5845_v54  ;;  %v2582_v1 = vld [vmem:[%s6529_s15 + $0x808] sm:$0xff] }
 0x21f   : > { %3916 = vmatprep.subr.bf16.mxu0 %v3206_v2  ;;  %4080 = vmatprep.subr.bf16.mxu1 %v3208_v4  ;;  %v2584_v2 = vld [vmem:[%s6529_s15 + $0x818] sm:$0xff]  ;;  %v3333_v4 = vunpack.c.h.s8.bf16 %v2565_v51  ;;  %v3350_v3 = vunpack.c.l.s8.bf16 %v2582_v1 }
 0x220   : > { %v3352_v6 = vunpack.c.l.s8.bf16 %v2584_v2 }
 0x222   : > { %3917 = vmatpush1.bf16.msra.mxu0 %v3205_v7  ;;  %4081 = vmatpush1.bf16.msra.mxu1 %v3207_v8  ;;  %v2581_v7 = vld [vmem:[%s6529_s15 + $0x800] sm:$0xff]  ;;  %v2583_v8 = vld [vmem:[%s6529_s15 + $0x810] sm:$0xff] }
 0x223   : > { %3918 = vmatprep.subr.bf16.mxu0 %v3222_v9  ;;  %4082 = vmatprep.subr.bf16.mxu1 %v3224_v10  ;;  %v2311_v9 = vsel %vm2295_vm3, %v5845_v54, %v2303_v0  ;;  %v3349_v10 = vunpack.c.l.s8.bf16 %v2581_v7  ;;  %v3351_v11 = vunpack.c.l.s8.bf16 %v2583_v8  ;;  %v3365_v19 = vunpack.c.h.s8.bf16 %v2581_v7 }
 0x224   : > { %v6692_v13 = vpack.c.bf16 %v2311_v9, %v2311_v9  ;;  %v3367_v20 = vunpack.c.h.s8.bf16 %v2583_v8  ;;  %v2662_v8 = vld [vmem:[%s6529_s15 + $0xa88] sm:$0xff]  ;;  %v2664_v9 = vld [vmem:[%s6529_s15 + $0xa98] sm:$0xff] }
 0x226   : > { %3919 = vmatpush1.bf16.msra.mxu0 %v3221_v14  ;;  %4083 = vmatpush1.bf16.msra.mxu1 %v3223_v16  ;;  %v3366_v14 = vunpack.c.h.s8.bf16 %v2582_v1  ;;  %v3368_v16 = vunpack.c.h.s8.bf16 %v2584_v2  ;;  %v2645_v2 = vld [vmem:[%s6529_s15 + $0xa00] sm:$0xff] }
 0x227   : > { %3920 = vmatprep.subr.bf16.mxu0 %v3238_v17  ;;  %4084 = vmatprep.subr.bf16.mxu1 %v3240_v18  ;;  %v2598_v17 = vld [vmem:[%s6529_s15 + $0x888] sm:$0xff]  ;;  %v2600_v18 = vld [vmem:[%s6529_s15 + $0x898] sm:$0xff] }
 0x22a   : > { %3921 = vmatpush1.bf16.msra.mxu0 %v3237_v23  ;;  %4085 = vmatpush1.bf16.msra.mxu1 %v3239_v24  ;;  %v3382_v23 = vunpack.c.l.s8.bf16 %v2598_v17  ;;  %v3384_v24 = vunpack.c.l.s8.bf16 %v2600_v18 }
 0x22b   : > { %3922 = vmatprep.subr.bf16.mxu0 %v3254_v25  ;;  %4086 = vmatprep.subr.bf16.mxu1 %v3256_v27  ;;  %v2597_v25 = vld [vmem:[%s6529_s15 + $0x880] sm:$0xff]  ;;  %v2599_v27 = vld [vmem:[%s6529_s15 + $0x890] sm:$0xff] }
 0x22c   : > { %v3381_v28 = vunpack.c.l.s8.bf16 %v2597_v25  ;;  %v3383_v29 = vunpack.c.l.s8.bf16 %v2599_v27  ;;  %v3397_v34 = vunpack.c.h.s8.bf16 %v2597_v25  ;;  %v3399_v35 = vunpack.c.h.s8.bf16 %v2599_v27  ;;  %v2678_v25 = vld [vmem:[%s6529_s15 + $0xb08] sm:$0xff]  ;;  %v2680_v27 = vld [vmem:[%s6529_s15 + $0xb18] sm:$0xff] }
 0x22e   : > { %3923 = vmatpush1.bf16.msra.mxu0 %v3253_v30  ;;  %4087 = vmatpush1.bf16.msra.mxu1 %v3255_v32  ;;  %v3398_v30 = vunpack.c.h.s8.bf16 %v2598_v17  ;;  %v3400_v32 = vunpack.c.h.s8.bf16 %v2600_v18  ;;  %v2661_v17 = vld [vmem:[%s6529_s15 + $0xa80] sm:$0xff]  ;;  %v2663_v18 = vld [vmem:[%s6529_s15 + $0xa90] sm:$0xff] }
 0x22f   : > { %3924 = vmatprep.subr.bf16.mxu0 %v3270_v15  ;;  %4088 = vmatprep.subr.bf16.mxu1 %v3272_v33  ;;  %v2614_v15 = vld [vmem:[%s6529_s15 + $0x908] sm:$0xff]  ;;  %v2616_v33 = vld [vmem:[%s6529_s15 + $0x918] sm:$0xff] }
 0x232   : > { %3925 = vmatpush1.bf16.msra.mxu0 %v3269_v36  ;;  %4089 = vmatpush1.bf16.msra.mxu1 %v3271_v37  ;;  %v3414_v36 = vunpack.c.l.s8.bf16 %v2614_v15  ;;  %v3416_v37 = vunpack.c.l.s8.bf16 %v2616_v33 }
 0x233   : > { %3926 = vmatprep.subr.bf16.mxu0 %v3286_v38  ;;  %4090 = vmatprep.subr.bf16.mxu1 %v3288_v39  ;;  %v2613_v38 = vld [vmem:[%s6529_s15 + $0x900] sm:$0xff]  ;;  %v2615_v39 = vld [vmem:[%s6529_s15 + $0x910] sm:$0xff] }
 0x234   : > { %v3413_v40 = vunpack.c.l.s8.bf16 %v2613_v38  ;;  %v3415_v41 = vunpack.c.l.s8.bf16 %v2615_v39  ;;  %v3429_v46 = vunpack.c.h.s8.bf16 %v2613_v38  ;;  %v3431_v12 = vunpack.c.h.s8.bf16 %v2615_v39  ;;  %v2694_v39 = vld [vmem:[%s6529_s15 + $0xb88] sm:$0xff] }
 0x235   : > { %v6721_v38 = vsub.s32 4, %v6617_v56 }
 0x236   : > { %3927 = vmatpush1.bf16.msra.mxu0 %v3285_v42  ;;  %4091 = vmatpush1.bf16.msra.mxu1 %v3287_v43  ;;  %v3430_v42 = vunpack.c.h.s8.bf16 %v2614_v15  ;;  %v3432_v43 = vunpack.c.h.s8.bf16 %v2616_v33  ;;  %v2677_v15 = vld [vmem:[%s6529_s15 + $0xb00] sm:$0xff]  ;;  %v2679_v33 = vld [vmem:[%s6529_s15 + $0xb10] sm:$0xff] }
 0x237   : > { %3928 = vmatprep.subr.bf16.mxu0 %v3302_v44  ;;  %4092 = vmatprep.subr.bf16.mxu1 %v3304_v45  ;;  %v2630_v44 = vld [vmem:[%s6529_s15 + $0x988] sm:$0xff]  ;;  %v2632_v45 = vld [vmem:[%s6529_s15 + $0x998] sm:$0xff] }
 0x238   : > { %v3446_v47 = vunpack.c.l.s8.bf16 %v2630_v44  ;;  %v3462_v52 = vunpack.c.h.s8.bf16 %v2630_v44  ;;  %v3464_v54 = vunpack.c.h.s8.bf16 %v2632_v45  ;;  %v6729_v44 = vsub.s32 7, %v6617_v56 }
 0x23a   : > { %3929 = vmatpush1.bf16.msra.mxu0 %v3301_v48  ;;  %4093 = vmatpush1.bf16.msra.mxu1 %v3303_v49  ;;  %v3448_v48 = vunpack.c.l.s8.bf16 %v2632_v45  ;;  %v2629_v49 = vld [vmem:[%s6529_s15 + $0x980] sm:$0xff]  ;;  %v3574_v45 = vunpack.c.l.s8.bf16 %v2694_v39 }
 0x23b   : > { %3930 = vmatprep.subr.bf16.mxu0 %v3318_v50  ;;  %4094 = vmatprep.subr.bf16.mxu1 %v3320_v57  ;;  %v2631_v50 = vld [vmem:[%s6529_s15 + $0x990] sm:$0xff]  ;;  %v3445_v57 = vunpack.c.l.s8.bf16 %v2629_v49 }
 0x23c   : > { %v3447_v51 = vunpack.c.l.s8.bf16 %v2631_v50 }
 0x23e   : > { %3931 = vmatpush1.bf16.msra.mxu0 %v3317_v55  ;;  %4095 = vmatpush1.bf16.msra.mxu1 %v3319_v53  ;;  %v2646_v55 = vld [vmem:[%s6529_s15 + $0xa08] sm:$0xff]  ;;  %v2648_v53 = vld [vmem:[%s6529_s15 + $0xa18] sm:$0xff] }
 0x23f   : > { %3932 = vmatprep.subr.bf16.mxu0 %v3334_v62  ;;  %4096 = vmatprep.subr.bf16.mxu1 %v3336_v63  ;;  %v3461_v62 = vunpack.c.h.s8.bf16 %v2629_v49  ;;  %v3463_v63 = vunpack.c.h.s8.bf16 %v2631_v50  ;;  %v3478_v0 = vunpack.c.l.s8.bf16 %v2646_v55  ;;  %v3480_v1 = vunpack.c.l.s8.bf16 %v2648_v53 }
 0x240   : > { %v3496_v7 = vunpack.c.h.s8.bf16 %v2648_v53  ;;  %v662_v50 = vrot.slane %v6622_v59, %v6729_v44 }
 0x242   : > { %3933 = vmatpush1.bf16.msra.mxu0 %v3333_v4  ;;  %4097 = vmatpush1.bf16.msra.mxu1 %v3335_v5  ;;  %v2647_v4 = vld [vmem:[%s6529_s15 + $0xa10] sm:$0xff]  ;;  %v3477_v5 = vunpack.c.l.s8.bf16 %v2645_v2 }
 0x243   : > { %3943 = vmatprep.subr.bf16.mxu0 %v3350_v3  ;;  %4107 = vmatprep.subr.bf16.mxu1 %v3352_v6  ;;  %v3479_v3 = vunpack.c.l.s8.bf16 %v2647_v4  ;;  %v3494_v6 = vunpack.c.h.s8.bf16 %v2646_v55 }
 0x245   : > { %3935 = vmatmul.mubr.bf16.vlgmr.msra.gmra.mrb[8].mxu0 %v6692_v13  ;;  %4099 = vmatmul.mubr.bf16.vlgmr.msra.gmra.mrb[8].mxu1 %v6692_v13 }
 0x246   : > { %3944 = vmatpush1.bf16.msra.mxu0 %v3349_v10  ;;  %4108 = vmatpush1.bf16.msra.mxu1 %v3351_v11  ;;  %v3493_v10 = vunpack.c.h.s8.bf16 %v2645_v2  ;;  %v3495_v11 = vunpack.c.h.s8.bf16 %v2647_v4 }
 0x247   : > { %3945 = vmatprep.subr.bf16.mxu0 %v3366_v14  ;;  %4109 = vmatprep.subr.bf16.mxu1 %v3368_v16  ;;  %v3510_v14 = vunpack.c.l.s8.bf16 %v2662_v8  ;;  %v3512_v16 = vunpack.c.l.s8.bf16 %v2664_v9 }
 0x24a   : > { %3946 = vmatpush1.bf16.msra.mxu0 %v3365_v19  ;;  %4110 = vmatpush1.bf16.msra.mxu1 %v3367_v20  ;;  %v3509_v19 = vunpack.c.l.s8.bf16 %v2661_v17  ;;  %v3511_v20 = vunpack.c.l.s8.bf16 %v2663_v18 }
 0x24b   : > { %3947 = vmatprep.subr.bf16.mxu0 %v3382_v23  ;;  %4111 = vmatprep.subr.bf16.mxu1 %v3384_v24  ;;  %v3526_v23 = vunpack.c.h.s8.bf16 %v2662_v8  ;;  %v3528_v24 = vunpack.c.h.s8.bf16 %v2664_v9 }
 0x24e   : > { %3948 = vmatpush1.bf16.msra.mxu0 %v3381_v28  ;;  %4112 = vmatpush1.bf16.msra.mxu1 %v3383_v29  ;;  %v3525_v28 = vunpack.c.h.s8.bf16 %v2661_v17  ;;  %v3527_v29 = vunpack.c.h.s8.bf16 %v2663_v18  ;;  %v2711_v17 = vld [vmem:[%s6529_s15 + $0xc10] sm:$0xff] }
 0x24f   : > { %3949 = vmatprep.subr.bf16.mxu0 %v3398_v30  ;;  %4113 = vmatprep.subr.bf16.mxu1 %v3400_v32  ;;  %v3542_v30 = vunpack.c.l.s8.bf16 %v2678_v25  ;;  %v3544_v32 = vunpack.c.l.s8.bf16 %v2680_v27 }
 0x252   : > { %3950 = vmatpush1.bf16.msra.mxu0 %v3397_v34  ;;  %4114 = vmatpush1.bf16.msra.mxu1 %v3399_v35  ;;  %v3541_v34 = vunpack.c.l.s8.bf16 %v2677_v15  ;;  %v3543_v35 = vunpack.c.l.s8.bf16 %v2679_v33 }
 0x253   : > { %3951 = vmatprep.subr.bf16.mxu0 %v3414_v36  ;;  %4115 = vmatprep.subr.bf16.mxu1 %v3416_v37  ;;  %v3558_v36 = vunpack.c.h.s8.bf16 %v2678_v25  ;;  %v3560_v37 = vunpack.c.h.s8.bf16 %v2680_v27 }
 0x256   : > { %3952 = vmatpush1.bf16.msra.mxu0 %v3413_v40  ;;  %4116 = vmatpush1.bf16.msra.mxu1 %v3415_v41  ;;  %v2696_v40 = vld [vmem:[%s6529_s15 + $0xb98] sm:$0xff]  ;;  %v6726_v41 = vsub.s32 5, %v6617_v56 }
 0x257   : > { %3953 = vmatprep.subr.bf16.mxu0 %v3430_v42  ;;  %4117 = vmatprep.subr.bf16.mxu1 %v3432_v43  ;;  %v3557_v42 = vunpack.c.h.s8.bf16 %v2677_v15  ;;  %v3559_v43 = vunpack.c.h.s8.bf16 %v2679_v33  ;;  %v3592_v55 = vunpack.c.h.s8.bf16 %v2696_v40  ;;  %v2726_v15 = vld [vmem:[%s6529_s15 + $0xc88] sm:$0xff]  ;;  %v2728_v33 = vld [vmem:[%s6529_s15 + $0xc98] sm:$0xff] }
 0x258   : > { %v654_v49 = vrot.slane %v6622_v59, %v6726_v41 }
 0x25a   : > { %3954 = vmatpush1.bf16.msra.mxu0 %v3429_v46  ;;  %4118 = vmatpush1.bf16.msra.mxu1 %v3431_v12  ;;  %v3576_v46 = vunpack.c.l.s8.bf16 %v2696_v40  ;;  %v2693_v12 = vld [vmem:[%s6529_s15 + $0xb80] sm:$0xff] }
 0x25b   : > { %3955 = vmatprep.subr.bf16.mxu0 %v3446_v47  ;;  %4119 = vmatprep.subr.bf16.mxu1 %v3448_v48  ;;  %v2695_v47 = vld [vmem:[%s6529_s15 + $0xb90] sm:$0xff]  ;;  %v650_v48 = vrot.slane %v6622_v59, %v6721_v38  ;;  %v2725_v40 = vld [vmem:[%s6529_s15 + $0xc80] sm:$0xff] }
 0x25c   : > { %v3591_v9 = vunpack.c.h.s8.bf16 %v2695_v47 }
 0x25e   : > { %3956 = vmatpush1.bf16.msra.mxu0 %v3445_v57  ;;  %4120 = vmatpush1.bf16.msra.mxu1 %v3447_v51  ;;  %v3573_v57 = vunpack.c.l.s8.bf16 %v2693_v12  ;;  %v3575_v51 = vunpack.c.l.s8.bf16 %v2695_v47  ;;  %v2742_v47 = vld [vmem:[%s6529_s15 + $0xd08] sm:$0xff] }
 0x25f   : > { %3957 = vmatprep.subr.bf16.mxu0 %v3462_v52  ;;  %4121 = vmatprep.subr.bf16.mxu1 %v3464_v54  ;;  %v3590_v54 = vunpack.c.h.s8.bf16 %v2694_v39  ;;  %v3640_v39 = vunpack.c.l.s8.bf16 %v2728_v33 }
 0x262   : > { %3958 = vmatpush1.bf16.msra.mxu0 %v3461_v62  ;;  %4122 = vmatpush1.bf16.msra.mxu1 %v3463_v63 }
 0x263   : > { %3959 = vmatprep.subr.bf16.mxu0 %v3478_v0  ;;  %4123 = vmatprep.subr.bf16.mxu1 %v3480_v1  ;;  %v2710_v0 = vld [vmem:[%s6529_s15 + $0xc08] sm:$0xff]  ;;  %v2712_v1 = vld [vmem:[%s6529_s15 + $0xc18] sm:$0xff] }
 0x266   : > { %3960 = vmatpush1.bf16.msra.mxu0 %v3477_v5  ;;  %4124 = vmatpush1.bf16.msra.mxu1 %v3479_v3  ;;  %v3589_v3 = vunpack.c.h.s8.bf16 %v2693_v12  ;;  %v3656_v12 = vunpack.c.h.s8.bf16 %v2728_v33  ;;  %v2792_v33 = vld [vmem:[%s6529_s15 + $0xe98] sm:$0xff] }
 0x267   : > { %3961 = vmatprep.subr.bf16.mxu0 %v3494_v6  ;;  %4125 = vmatprep.subr.bf16.mxu1 %v3496_v7 }
 0x26a   : > { %3962 = vmatpush1.bf16.msra.mxu0 %v3493_v10  ;;  %4126 = vmatpush1.bf16.msra.mxu1 %v3495_v11  ;;  %v3606_v11 = vunpack.c.l.s8.bf16 %v2710_v0 }
 0x26b   : > { %3963 = vmatprep.subr.bf16.mxu0 %v3510_v14  ;;  %4127 = vmatprep.subr.bf16.mxu1 %v3512_v16  ;;  %v3608_v14 = vunpack.c.l.s8.bf16 %v2712_v1  ;;  %v2709_v16 = vld [vmem:[%s6529_s15 + $0xc00] sm:$0xff] }
 0x26c   : > { %v3605_v27 = vunpack.c.l.s8.bf16 %v2709_v16 }
 0x26e   : > { %3964 = vmatpush1.bf16.msra.mxu0 %v3509_v19  ;;  %4128 = vmatpush1.bf16.msra.mxu1 %v3511_v20 }
 0x26f   : > { %3965 = vmatprep.subr.bf16.mxu0 %v3526_v23  ;;  %4129 = vmatprep.subr.bf16.mxu1 %v3528_v24 }
 0x272   : > { %3966 = vmatpush1.bf16.msra.mxu0 %v3525_v28  ;;  %4130 = vmatpush1.bf16.msra.mxu1 %v3527_v29  ;;  %v3607_v28 = vunpack.c.l.s8.bf16 %v2711_v17 }
 0x273   : > { %3967 = vmatprep.subr.bf16.mxu0 %v3542_v30  ;;  %4131 = vmatprep.subr.bf16.mxu1 %v3544_v32  ;;  %v3622_v30 = vunpack.c.h.s8.bf16 %v2710_v0  ;;  %v3624_v32 = vunpack.c.h.s8.bf16 %v2712_v1  ;;  %v2758_v1 = vld [vmem:[%s6529_s15 + $0xd88] sm:$0xff] }
 0x276   : > { %3968 = vmatpush1.bf16.msra.mxu0 %v3541_v34  ;;  %4132 = vmatpush1.bf16.msra.mxu1 %v3543_v35  ;;  %v3621_v35 = vunpack.c.h.s8.bf16 %v2709_v16  ;;  %v2776_v16 = vld [vmem:[%s6529_s15 + $0xe18] sm:$0xff] }
 0x277   : > { %3969 = vmatprep.subr.bf16.mxu0 %v3558_v36  ;;  %4133 = vmatprep.subr.bf16.mxu1 %v3560_v37  ;;  %v3623_v36 = vunpack.c.h.s8.bf16 %v2711_v17  ;;  %v3638_v37 = vunpack.c.l.s8.bf16 %v2726_v15 }
 0x27a   : > { %3970 = vmatpush1.bf16.msra.mxu0 %v3557_v42  ;;  %4134 = vmatpush1.bf16.msra.mxu1 %v3559_v43  ;;  %v2727_v42 = vld [vmem:[%s6529_s15 + $0xc90] sm:$0xff]  ;;  %v3637_v43 = vunpack.c.l.s8.bf16 %v2725_v40 }
 0x27b   : > { %v2204_v52 = vpop.f32.mrb[4].mxu0  ;;  %3971 = vmatprep.subr.bf16.mxu0 %v3574_v45  ;;  %4135 = vmatprep.subr.bf16.mxu1 %v3576_v46  ;;  %v6739_v62 = vpop.f32.mrb[4].mxu1  ;;  %v3639_v45 = vunpack.c.l.s8.bf16 %v2727_v42  ;;  %v3654_v46 = vunpack.c.h.s8.bf16 %v2726_v15  ;;  %v2790_v15 = vld [vmem:[%s6529_s15 + $0xe88] sm:$0xff] }
 0x27c   : > { %v5847_v53 = vadd.f32 %v2204_v52, %v650_v48  ;;  %v2206_v63 = vpop.f32.mrb[5].mxu0  ;;  %v2288_v4 = vpop.f32.mrb[5].mxu1  ;;  %v2744_v48 = vld [vmem:[%s6529_s15 + $0xd18] sm:$0xff]  ;;  %v2741_v52 = vld [vmem:[%s6529_s15 + $0xd00] sm:$0xff] }
 0x27d   : > { %v5848_v2 = vadd.f32 %v2206_v63, %v654_v49  ;;  %v2208_v5 = vpop.f32.mrb[6].mxu0  ;;  %v5850_v6 = vadd.f32 %v2288_v4, %v662_v50  ;;  %v2290_v7 = vpop.f32.mrb[6].mxu1  ;;  %v3653_v49 = vunpack.c.h.s8.bf16 %v2725_v40  ;;  %v3655_v50 = vunpack.c.h.s8.bf16 %v2727_v42  ;;  %v2789_v40 = vld [vmem:[%s6529_s15 + $0xe80] sm:$0xff]  ;;  %v2791_v42 = vld [vmem:[%s6529_s15 + $0xe90] sm:$0xff] }
 0x27e   : > { %vm2297_vm4 = vcmp.ge.f32.partialorder %v5847_v53, 0.0  ;;  %v2305_v59 = vmul.f32 0.01, %v5847_v53  ;;  %3972 = vmatpush1.bf16.msra.mxu0 %v3573_v57  ;;  %4136 = vmatpush1.bf16.msra.mxu1 %v3575_v51  ;;  %v2209_v8 = vpop.f32.mrb[7].mxu0  ;;  %v2291_v20 = vpop.f32.mrb[7].mxu1  ;;  %v3670_v57 = vunpack.c.l.s8.bf16 %v2742_v47  ;;  %v3672_v51 = vunpack.c.l.s8.bf16 %v2744_v48  ;;  %v2759_v7 = vld [vmem:[%s6529_s15 + $0xd90] sm:$0xff] }
 0x27f   : > { %vm2298_vm5 = vcmp.ge.f32.partialorder %v5848_v2, 0.0  ;;  %v2306_v10 = vmul.f32 0.01, %v5848_v2  ;;  %3973 = vmatprep.subr.bf16.mxu0 %v3590_v54  ;;  %4137 = vmatprep.subr.bf16.mxu1 %v3592_v55  ;;  %vm2300_vm6 = vcmp.ge.f32.partialorder %v5850_v6, 0.0  ;;  %v2308_v19 = vmul.f32 0.01, %v5850_v6 }
 0x280   : > { %v2313_v18 = vsel %vm2297_vm4, %v5847_v53, %v2305_v59  ;;  %v2743_v54 = vld [vmem:[%s6529_s15 + $0xd10] sm:$0xff]  ;;  %v3669_v55 = vunpack.c.l.s8.bf16 %v2741_v52  ;;  %v3686_v63 = vunpack.c.h.s8.bf16 %v2742_v47  ;;  %v3688_v0 = vunpack.c.h.s8.bf16 %v2744_v48  ;;  %v2806_v47 = vld [vmem:[%s6529_s15 + $0xf08] sm:$0xff]  ;;  %v2808_v48 = vld [vmem:[%s6529_s15 + $0xf18] sm:$0xff] }
 0x281   : > { %v2314_v23 = vsel %vm2298_vm5, %v5848_v2, %v2306_v10  ;;  %v2316_v25 = vsel %vm2300_vm6, %v5850_v6, %v2308_v19  ;;  %v6748_v29 = vpack.c.bf16 %v2313_v18, %v2313_v18  ;;  %v3671_v53 = vunpack.c.l.s8.bf16 %v2743_v54  ;;  %v2760_v2 = vld [vmem:[%s6529_s15 + $0xd98] sm:$0xff]  ;;  %v2757_v6 = vld [vmem:[%s6529_s15 + $0xd80] sm:$0xff] }
 0x282   : > { %v6746_v24 = vpack.c.bf16 %v2314_v23, %v2314_v23  ;;  %3974 = vmatpush1.bf16.msra.mxu0 %v3589_v3  ;;  %4138 = vmatpush1.bf16.msra.mxu1 %v3591_v9  ;;  %v6754_v34 = vpack.c.bf16 %v2316_v25, %v2316_v25  ;;  %v3685_v4 = vunpack.c.h.s8.bf16 %v2741_v52  ;;  %v3687_v5 = vunpack.c.h.s8.bf16 %v2743_v54  ;;  %v2773_v23 = vld [vmem:[%s6529_s15 + $0xe00] sm:$0xff]  ;;  %v2775_v25 = vld [vmem:[%s6529_s15 + $0xe10] sm:$0xff] }
 0x283   : > { %3984 = vmatprep.subr.bf16.mxu0 %v3606_v11  ;;  %4148 = vmatprep.subr.bf16.mxu1 %v3608_v14  ;;  %v3702_v3 = vunpack.c.l.s8.bf16 %v2758_v1  ;;  %v3704_v59 = vunpack.c.l.s8.bf16 %v2760_v2  ;;  %v3701_v8 = vunpack.c.l.s8.bf16 %v2757_v6  ;;  %v3703_v9 = vunpack.c.l.s8.bf16 %v2759_v7  ;;  %v2774_v14 = vld [vmem:[%s6529_s15 + $0xe08] sm:$0xff]  ;;  %v2805_v52 = vld [vmem:[%s6529_s15 + $0xf00] sm:$0xff]  ;;  %v2807_v54 = vld [vmem:[%s6529_s15 + $0xf10] sm:$0xff] }
 0x284   : > { %3975 = vmatprep.mubr.bf16.mxu0 %v6746_v24  ;;  %4139 = vmatprep.mubr.bf16.mxu1 %v6746_v24  ;;  %v3718_v10 = vunpack.c.h.s8.bf16 %v2758_v1  ;;  %v3720_v11 = vunpack.c.h.s8.bf16 %v2760_v2  ;;  %v3717_v17 = vunpack.c.h.s8.bf16 %v2757_v6  ;;  %v3719_v18 = vunpack.c.h.s8.bf16 %v2759_v7  ;;  %v6074_v2 = vld [vmem:[#allocation4] sm:$0xff] }
 0x285   : > { %3976 = vmatmul.mubr.bf16.vlgmr.msra.gmra.mrb[8].mxu0 %v6748_v29  ;;  %4140 = vmatmul.mubr.bf16.vlgmr.msra.gmra.mrb[8].mxu1 %v6748_v29  ;;  %v3734_v19 = vunpack.c.l.s8.bf16 %v2774_v14  ;;  %v3736_v20 = vunpack.c.l.s8.bf16 %v2776_v16  ;;  %v3816_v1 = vunpack.c.h.s8.bf16 %v2808_v48 }
 0x286   : > { %3985 = vmatpush1.bf16.msra.mxu0 %v3605_v27  ;;  %4149 = vmatpush1.bf16.msra.mxu1 %v3607_v28  ;;  %v3733_v27 = vunpack.c.l.s8.bf16 %v2773_v23  ;;  %v3735_v28 = vunpack.c.l.s8.bf16 %v2775_v25 }
 0x287   : > { %4016 = vmatprep.mubr.bf16.mxu0 %v6754_v34  ;;  %4180 = vmatprep.mubr.bf16.mxu1 %v6754_v34 }
 0x288   : > { %3986 = vmatprep.subr.bf16.mxu0 %v3622_v30  ;;  %4150 = vmatprep.subr.bf16.mxu1 %v3624_v32  ;;  %v3750_v30 = vunpack.c.h.s8.bf16 %v2774_v14  ;;  %v3752_v32 = vunpack.c.h.s8.bf16 %v2776_v16 }
 0x28a   : > { %3987 = vmatpush1.bf16.msra.mxu0 %v3621_v35  ;;  %4151 = vmatpush1.bf16.msra.mxu1 %v3623_v36  ;;  %v3749_v35 = vunpack.c.h.s8.bf16 %v2773_v23  ;;  %v3751_v36 = vunpack.c.h.s8.bf16 %v2775_v25 }
 0x28b   : > { %3988 = vmatprep.subr.bf16.mxu0 %v3638_v37  ;;  %4152 = vmatprep.subr.bf16.mxu1 %v3640_v39  ;;  %v3766_v37 = vunpack.c.l.s8.bf16 %v2790_v15  ;;  %v3768_v39 = vunpack.c.l.s8.bf16 %v2792_v33 }
 0x28e   : > { %3989 = vmatpush1.bf16.msra.mxu0 %v3637_v43  ;;  %4153 = vmatpush1.bf16.msra.mxu1 %v3639_v45  ;;  %v3765_v43 = vunpack.c.l.s8.bf16 %v2789_v40  ;;  %v3767_v45 = vunpack.c.l.s8.bf16 %v2791_v42 }
 0x28f   : > { %3990 = vmatprep.subr.bf16.mxu0 %v3654_v46  ;;  %4154 = vmatprep.subr.bf16.mxu1 %v3656_v12  ;;  %v3782_v46 = vunpack.c.h.s8.bf16 %v2790_v15  ;;  %v3784_v12 = vunpack.c.h.s8.bf16 %v2792_v33 }
 0x292   : > { %3991 = vmatpush1.bf16.msra.mxu0 %v3653_v49  ;;  %4155 = vmatpush1.bf16.msra.mxu1 %v3655_v50  ;;  %v3781_v49 = vunpack.c.h.s8.bf16 %v2789_v40  ;;  %v3783_v50 = vunpack.c.h.s8.bf16 %v2791_v42  ;;  %v2348_v40 = vld [vmem:[%s6529_s15 + $0xb8] sm:$0xff] }
 0x293   : > { %3992 = vmatprep.subr.bf16.mxu0 %v3670_v57  ;;  %4156 = vmatprep.subr.bf16.mxu1 %v3672_v51  ;;  %v3798_v57 = vunpack.c.l.s8.bf16 %v2806_v47  ;;  %v3800_v51 = vunpack.c.l.s8.bf16 %v2808_v48 }
 0x296   : > { %3993 = vmatpush1.bf16.msra.mxu0 %v3669_v55  ;;  %4157 = vmatpush1.bf16.msra.mxu1 %v3671_v53  ;;  %v6783_v55 = vsub.s32 6, %v6617_v56  ;;  %v3797_v53 = vunpack.c.l.s8.bf16 %v2805_v52  ;;  %v3815_v56 = vunpack.c.h.s8.bf16 %v2807_v54 }
 0x297   : > { %3994 = vmatprep.subr.bf16.mxu0 %v3686_v63  ;;  %4158 = vmatprep.subr.bf16.mxu1 %v3688_v0  ;;  %v3799_v63 = vunpack.c.l.s8.bf16 %v2807_v54  ;;  %v3814_v0 = vunpack.c.h.s8.bf16 %v2806_v47  ;;  %v2347_v47 = vld [vmem:[%s6529_s15 + $0xb0] sm:$0xff] }
 0x29a   : > { %3995 = vmatpush1.bf16.msra.mxu0 %v3685_v4  ;;  %4159 = vmatpush1.bf16.msra.mxu1 %v3687_v5  ;;  %v658_v4 = vrot.slane %v6074_v2, %v6783_v55  ;;  %v2822_v5 = vld [vmem:[%s6529_s15 + $0xf88] sm:$0xff]  ;;  %v2363_v2 = vld [vmem:[%s6529_s15 + $0x130] sm:$0xff] }
 0x29b   : > { %3996 = vmatprep.subr.bf16.mxu0 %v3702_v3  ;;  %4160 = vmatprep.subr.bf16.mxu1 %v3704_v59  ;;  %v2824_v3 = vld [vmem:[%s6529_s15 + $0xf98] sm:$0xff]  ;;  %v3813_v59 = vunpack.c.h.s8.bf16 %v2805_v52  ;;  %v3830_v6 = vunpack.c.l.s8.bf16 %v2822_v5  ;;  %v3846_v16 = vunpack.c.h.s8.bf16 %v2822_v5  ;;  %v2907_v5 = vunpack.c.l.s8.bf16 %v2363_v2 }
 0x29c   : > { %v3832_v7 = vunpack.c.l.s8.bf16 %v2824_v3  ;;  %v2364_v52 = vld [vmem:[%s6529_s15 + $0x138] sm:$0xff] }
 0x29e   : > { %3997 = vmatpush1.bf16.msra.mxu0 %v3701_v8  ;;  %4161 = vmatpush1.bf16.msra.mxu1 %v3703_v9  ;;  %v2821_v8 = vld [vmem:[%s6529_s15 + $0xf80] sm:$0xff]  ;;  %v2823_v9 = vld [vmem:[%s6529_s15 + $0xf90] sm:$0xff] }
 0x29f   : > { %3998 = vmatprep.subr.bf16.mxu0 %v3718_v10  ;;  %4162 = vmatprep.subr.bf16.mxu1 %v3720_v11  ;;  %v5849_v10 = vadd.f32 %v6739_v62, %v658_v4  ;;  %v3829_v11 = vunpack.c.l.s8.bf16 %v2821_v8  ;;  %v3831_v14 = vunpack.c.l.s8.bf16 %v2823_v9  ;;  %v3845_v23 = vunpack.c.h.s8.bf16 %v2821_v8 }
 0x2a0   : > { %v3847_v25 = vunpack.c.h.s8.bf16 %v2823_v9  ;;  %v2923_v8 = vunpack.c.h.s8.bf16 %v2363_v2  ;;  %v2427_v2 = vld [vmem:[%s6529_s15 + $0x330] sm:$0xff] }
 0x2a1   : > { %vm2299_vm7 = vcmp.ge.f32.partialorder %v5849_v10, 0.0 }
 0x2a2   : > { %3999 = vmatpush1.bf16.msra.mxu0 %v3717_v17  ;;  %4163 = vmatpush1.bf16.msra.mxu1 %v3719_v18  ;;  %v3848_v17 = vunpack.c.h.s8.bf16 %v2824_v3  ;;  %v2307_v18 = vmul.f32 0.01, %v5849_v10 }
 0x2a3   : > { %4000 = vmatprep.subr.bf16.mxu0 %v3734_v19  ;;  %4164 = vmatprep.subr.bf16.mxu1 %v3736_v20  ;;  %v2330_v19 = vld [vmem:[%s6529_s15 + $0x28] sm:$0xff]  ;;  %v2332_v20 = vld [vmem:[%s6529_s15 + $0x38] sm:$0xff] }
 0x2a4   : > { %v2842_v62 = vunpack.c.l.s8.bf16 %v2330_v19 }
 0x2a6   : > { %4001 = vmatpush1.bf16.msra.mxu0 %v3733_v27  ;;  %4165 = vmatpush1.bf16.msra.mxu1 %v3735_v28  ;;  %v2844_v27 = vunpack.c.l.s8.bf16 %v2332_v20  ;;  %v2329_v28 = vld [vmem:[%s6529_s15 + $0x20] sm:$0xff] }
 0x2a7   : > { %4002 = vmatprep.subr.bf16.mxu0 %v3750_v30  ;;  %4166 = vmatprep.subr.bf16.mxu1 %v3752_v32  ;;  %v2315_v30 = vsel %vm2299_vm7, %v5849_v10, %v2307_v18  ;;  %v2331_v32 = vld [vmem:[%s6529_s15 + $0x30] sm:$0xff]  ;;  %v2841_v15 = vunpack.c.l.s8.bf16 %v2329_v28  ;;  %v2857_v42 = vunpack.c.h.s8.bf16 %v2329_v28  ;;  %v2377_v10 = vld [vmem:[%s6529_s15 + $0x1a0] sm:$0xff] }
 0x2a8   : > { %v6795_v33 = vpack.c.bf16 %v2315_v30, %v2315_v30  ;;  %v2393_v28 = vld [vmem:[%s6529_s15 + $0x220] sm:$0xff] }
 0x2aa   : > { %4003 = vmatpush1.bf16.msra.mxu0 %v3749_v35  ;;  %4167 = vmatpush1.bf16.msra.mxu1 %v3751_v36  ;;  %v2843_v35 = vunpack.c.l.s8.bf16 %v2331_v32  ;;  %v2858_v36 = vunpack.c.h.s8.bf16 %v2330_v19 }
 0x2ab   : > { %4004 = vmatprep.subr.bf16.mxu0 %v3766_v37  ;;  %4168 = vmatprep.subr.bf16.mxu1 %v3768_v39  ;;  %v2860_v37 = vunpack.c.h.s8.bf16 %v2332_v20  ;;  %v2346_v39 = vld [vmem:[%s6529_s15 + $0xa8] sm:$0xff] }
 0x2ac   : > { %v2394_v20 = vld [vmem:[%s6529_s15 + $0x228] sm:$0xff] }
 0x2ae   : > { %4005 = vmatpush1.bf16.msra.mxu0 %v3765_v43  ;;  %4169 = vmatpush1.bf16.msra.mxu1 %v3767_v45  ;;  %v2859_v43 = vunpack.c.h.s8.bf16 %v2331_v32  ;;  %v2874_v45 = vunpack.c.l.s8.bf16 %v2346_v39  ;;  %v2395_v32 = vld [vmem:[%s6529_s15 + $0x230] sm:$0xff] }
 0x2af   : > { %4006 = vmatprep.subr.bf16.mxu0 %v3782_v46  ;;  %4170 = vmatprep.subr.bf16.mxu1 %v3784_v12  ;;  %v2345_v46 = vld [vmem:[%s6529_s15 + $0xa0] sm:$0xff]  ;;  %v2876_v12 = vunpack.c.l.s8.bf16 %v2348_v40 }
 0x2b0   : > { %v2873_v48 = vunpack.c.l.s8.bf16 %v2345_v46  ;;  %v2889_v54 = vunpack.c.h.s8.bf16 %v2345_v46  ;;  %v2409_v46 = vld [vmem:[%s6529_s15 + $0x2a0] sm:$0xff] }
 0x2b2   : > { %4007 = vmatpush1.bf16.msra.mxu0 %v3781_v49  ;;  %4171 = vmatpush1.bf16.msra.mxu1 %v3783_v50  ;;  %v2875_v49 = vunpack.c.l.s8.bf16 %v2347_v47  ;;  %v2890_v50 = vunpack.c.h.s8.bf16 %v2346_v39  ;;  %v2410_v39 = vld [vmem:[%s6529_s15 + $0x2a8] sm:$0xff] }
 0x2b3   : > { %4008 = vmatprep.subr.bf16.mxu0 %v3798_v57  ;;  %4172 = vmatprep.subr.bf16.mxu1 %v3800_v51  ;;  %v2892_v57 = vunpack.c.h.s8.bf16 %v2348_v40  ;;  %v2362_v51 = vld [vmem:[%s6529_s15 + $0x128] sm:$0xff]  ;;  %v2412_v40 = vld [vmem:[%s6529_s15 + $0x2b8] sm:$0xff] }
 0x2b4   : > { %v2922_v3 = vunpack.c.h.s8.bf16 %v2362_v51 }
 0x2b6   : > { %4009 = vmatpush1.bf16.msra.mxu0 %v3797_v53  ;;  %4173 = vmatpush1.bf16.msra.mxu1 %v3799_v63  ;;  %v2891_v53 = vunpack.c.h.s8.bf16 %v2347_v47  ;;  %v2906_v63 = vunpack.c.l.s8.bf16 %v2362_v51  ;;  %v2411_v47 = vld [vmem:[%s6529_s15 + $0x2b0] sm:$0xff]  ;;  %v2426_v51 = vld [vmem:[%s6529_s15 + $0x328] sm:$0xff] }
 0x2b7   : > { %4010 = vmatprep.subr.bf16.mxu0 %v3814_v0  ;;  %4174 = vmatprep.subr.bf16.mxu1 %v3816_v1  ;;  %v2361_v0 = vld [vmem:[%s6529_s15 + $0x120] sm:$0xff]  ;;  %v2908_v1 = vunpack.c.l.s8.bf16 %v2364_v52 }
 0x2b8   : > { %v2905_v4 = vunpack.c.l.s8.bf16 %v2361_v0 }
 0x2ba   : > { %4011 = vmatpush1.bf16.msra.mxu0 %v3813_v59  ;;  %4175 = vmatpush1.bf16.msra.mxu1 %v3815_v56  ;;  %v2924_v59 = vunpack.c.h.s8.bf16 %v2364_v52  ;;  %v2378_v56 = vld [vmem:[%s6529_s15 + $0x1a8] sm:$0xff]  ;;  %v2428_v52 = vld [vmem:[%s6529_s15 + $0x338] sm:$0xff] }
 0x2bb   : > { %4012 = vmatprep.subr.bf16.mxu0 %v3830_v6  ;;  %4176 = vmatprep.subr.bf16.mxu1 %v3832_v7  ;;  %v2380_v6 = vld [vmem:[%s6529_s15 + $0x1b8] sm:$0xff]  ;;  %v2921_v7 = vunpack.c.h.s8.bf16 %v2361_v0  ;;  %v2938_v9 = vunpack.c.l.s8.bf16 %v2378_v56  ;;  %v2954_v18 = vunpack.c.h.s8.bf16 %v2378_v56  ;;  %v2425_v0 = vld [vmem:[%s6529_s15 + $0x320] sm:$0xff]  ;;  %v2442_v56 = vld [vmem:[%s6529_s15 + $0x3a8] sm:$0xff] }
 0x2bc   : > { %v2956_v19 = vunpack.c.h.s8.bf16 %v2380_v6 }
 0x2be   : > { %4013 = vmatpush1.bf16.msra.mxu0 %v3829_v11  ;;  %4177 = vmatpush1.bf16.msra.mxu1 %v3831_v14  ;;  %v2940_v11 = vunpack.c.l.s8.bf16 %v2380_v6  ;;  %v2379_v14 = vld [vmem:[%s6529_s15 + $0x1b0] sm:$0xff]  ;;  %v2444_v6 = vld [vmem:[%s6529_s15 + $0x3b8] sm:$0xff] }
 0x2bf   : > { %4014 = vmatprep.subr.bf16.mxu0 %v3846_v16  ;;  %4178 = vmatprep.subr.bf16.mxu1 %v3848_v17  ;;  %v2937_v16 = vunpack.c.l.s8.bf16 %v2377_v10  ;;  %v2939_v17 = vunpack.c.l.s8.bf16 %v2379_v14 }
 0x2c2   : > { %4015 = vmatpush1.bf16.msra.mxu0 %v3845_v23  ;;  %4179 = vmatpush1.bf16.msra.mxu1 %v3847_v25  ;;  %v2396_v23 = vld [vmem:[%s6529_s15 + $0x238] sm:$0xff]  ;;  %v2953_v25 = vunpack.c.h.s8.bf16 %v2377_v10  ;;  %v2441_v10 = vld [vmem:[%s6529_s15 + $0x3a0] sm:$0xff] }
 0x2c3   : > { %4189 = vmatprep.subr.bf16.mxu0 %v2842_v62  ;;  %4353 = vmatprep.subr.bf16.mxu1 %v2844_v27  ;;  %v2955_v62 = vunpack.c.h.s8.bf16 %v2379_v14  ;;  %v2970_v27 = vunpack.c.l.s8.bf16 %v2394_v20  ;;  %v2972_v30 = vunpack.c.l.s8.bf16 %v2396_v23  ;;  %v2443_v14 = vld [vmem:[%s6529_s15 + $0x3b0] sm:$0xff] }
 0x2c5   : > { %4017 = vmatmul.mubr.bf16.vlgmr.msra.gmra.mrb[8].mxu0 %v6795_v33  ;;  %4181 = vmatmul.mubr.bf16.vlgmr.msra.gmra.mrb[8].mxu1 %v6795_v33 }
 0x2c6   : > { %4190 = vmatpush1.bf16.msra.mxu0 %v2841_v15  ;;  %4221 = vmatprep.mubr.bf16.mxu0 %v6640_v21  ;;  %v2969_v15 = vunpack.c.l.s8.bf16 %v2393_v28 }
 0x2c7   : > { %4354 = vmatpush1.bf16.msra.mxu1 %v2843_v35  ;;  %4385 = vmatprep.mubr.bf16.mxu1 %v6640_v21  ;;  %v2971_v35 = vunpack.c.l.s8.bf16 %v2395_v32 }
 0x2c8   : > { %4191 = vmatprep.subr.bf16.mxu0 %v2858_v36  ;;  %4355 = vmatprep.subr.bf16.mxu1 %v2860_v37  ;;  %v2986_v36 = vunpack.c.h.s8.bf16 %v2394_v20  ;;  %v2988_v37 = vunpack.c.h.s8.bf16 %v2396_v23  ;;  %v2458_v20 = vld [vmem:[%s6529_s15 + $0x428] sm:$0xff]  ;;  %v2460_v23 = vld [vmem:[%s6529_s15 + $0x438] sm:$0xff] }
 0x2ca   : > { %4192 = vmatpush1.bf16.msra.mxu0 %v2857_v42  ;;  %v2985_v42 = vunpack.c.h.s8.bf16 %v2393_v28  ;;  %v2457_v28 = vld [vmem:[%s6529_s15 + $0x420] sm:$0xff] }
 0x2cb   : > { %4356 = vmatpush1.bf16.msra.mxu1 %v2859_v43  ;;  %4193 = vmatprep.subr.bf16.mxu0 %v2874_v45  ;;  %v2987_v43 = vunpack.c.h.s8.bf16 %v2395_v32  ;;  %v3002_v45 = vunpack.c.l.s8.bf16 %v2410_v39  ;;  %v2459_v32 = vld [vmem:[%s6529_s15 + $0x430] sm:$0xff] }
 0x2cc   : > { %4357 = vmatprep.subr.bf16.mxu1 %v2876_v12  ;;  %v3004_v12 = vunpack.c.l.s8.bf16 %v2412_v40 }
 0x2ce   : > { %4194 = vmatpush1.bf16.msra.mxu0 %v2873_v48  ;;  %v3001_v48 = vunpack.c.l.s8.bf16 %v2409_v46 }
 0x2cf   : > { %4358 = vmatpush1.bf16.msra.mxu1 %v2875_v49  ;;  %4195 = vmatprep.subr.bf16.mxu0 %v2890_v50  ;;  %v3003_v49 = vunpack.c.l.s8.bf16 %v2411_v47  ;;  %v3018_v50 = vunpack.c.h.s8.bf16 %v2410_v39  ;;  %v3116_v39 = vunpack.c.h.s8.bf16 %v2460_v23 }
 0x2d0   : > { %4359 = vmatprep.subr.bf16.mxu1 %v2892_v57  ;;  %v3020_v57 = vunpack.c.h.s8.bf16 %v2412_v40  ;;  %v2476_v40 = vld [vmem:[%s6529_s15 + $0x4b8] sm:$0xff] }
 0x2d2   : > { %4196 = vmatpush1.bf16.msra.mxu0 %v2889_v54  ;;  %v3017_v54 = vunpack.c.h.s8.bf16 %v2409_v46  ;;  %v2473_v46 = vld [vmem:[%s6529_s15 + $0x4a0] sm:$0xff] }
 0x2d3   : > { %4360 = vmatpush1.bf16.msra.mxu1 %v2891_v53  ;;  %4197 = vmatprep.subr.bf16.mxu0 %v2906_v63  ;;  %v3019_v53 = vunpack.c.h.s8.bf16 %v2411_v47  ;;  %v3034_v63 = vunpack.c.l.s8.bf16 %v2426_v51  ;;  %v2475_v47 = vld [vmem:[%s6529_s15 + $0x4b0] sm:$0xff] }
 0x2d4   : > { %4361 = vmatprep.subr.bf16.mxu1 %v2908_v1  ;;  %v3036_v1 = vunpack.c.l.s8.bf16 %v2428_v52 }
 0x2d6   : > { %4198 = vmatpush1.bf16.msra.mxu0 %v2905_v4  ;;  %v3033_v4 = vunpack.c.l.s8.bf16 %v2425_v0 }
 0x2d7   : > { %4362 = vmatpush1.bf16.msra.mxu1 %v2907_v5  ;;  %4199 = vmatprep.subr.bf16.mxu0 %v2922_v3  ;;  %v3035_v5 = vunpack.c.l.s8.bf16 %v2427_v2  ;;  %v3050_v3 = vunpack.c.h.s8.bf16 %v2426_v51  ;;  %v2490_v51 = vld [vmem:[%s6529_s15 + $0x528] sm:$0xff] }
 0x2d8   : > { %4363 = vmatprep.subr.bf16.mxu1 %v2924_v59  ;;  %v3052_v59 = vunpack.c.h.s8.bf16 %v2428_v52  ;;  %v2492_v52 = vld [vmem:[%s6529_s15 + $0x538] sm:$0xff] }
 0x2da   : > { %4200 = vmatpush1.bf16.msra.mxu0 %v2921_v7  ;;  %v3049_v7 = vunpack.c.h.s8.bf16 %v2425_v0  ;;  %v2489_v0 = vld [vmem:[%s6529_s15 + $0x520] sm:$0xff] }
 0x2db   : > { %4364 = vmatpush1.bf16.msra.mxu1 %v2923_v8  ;;  %4201 = vmatprep.subr.bf16.mxu0 %v2938_v9  ;;  %v3051_v8 = vunpack.c.h.s8.bf16 %v2427_v2  ;;  %v3066_v9 = vunpack.c.l.s8.bf16 %v2442_v56  ;;  %v2491_v2 = vld [vmem:[%s6529_s15 + $0x530] sm:$0xff] }
 0x2dc   : > { %4365 = vmatprep.subr.bf16.mxu1 %v2940_v11  ;;  %v3068_v11 = vunpack.c.l.s8.bf16 %v2444_v6 }
 0x2de   : > { %4202 = vmatpush1.bf16.msra.mxu0 %v2937_v16  ;;  %v3065_v16 = vunpack.c.l.s8.bf16 %v2441_v10 }
 0x2df   : > { %4366 = vmatpush1.bf16.msra.mxu1 %v2939_v17  ;;  %4203 = vmatprep.subr.bf16.mxu0 %v2954_v18  ;;  %v3067_v17 = vunpack.c.l.s8.bf16 %v2443_v14  ;;  %v3082_v18 = vunpack.c.h.s8.bf16 %v2442_v56  ;;  %v2506_v56 = vld [vmem:[%s6529_s15 + $0x5a8] sm:$0xff] }
 0x2e0   : > { %4367 = vmatprep.subr.bf16.mxu1 %v2956_v19  ;;  %v3084_v19 = vunpack.c.h.s8.bf16 %v2444_v6  ;;  %v2508_v6 = vld [vmem:[%s6529_s15 + $0x5b8] sm:$0xff] }
 0x2e2   : > { %4204 = vmatpush1.bf16.msra.mxu0 %v2953_v25  ;;  %v3081_v25 = vunpack.c.h.s8.bf16 %v2441_v10  ;;  %v2505_v10 = vld [vmem:[%s6529_s15 + $0x5a0] sm:$0xff] }
 0x2e3   : > { %4368 = vmatpush1.bf16.msra.mxu1 %v2955_v62  ;;  %4205 = vmatprep.subr.bf16.mxu0 %v2970_v27  ;;  %v3083_v62 = vunpack.c.h.s8.bf16 %v2443_v14  ;;  %v3098_v27 = vunpack.c.l.s8.bf16 %v2458_v20  ;;  %v2507_v14 = vld [vmem:[%s6529_s15 + $0x5b0] sm:$0xff] }
 0x2e4   : > { %4369 = vmatprep.subr.bf16.mxu1 %v2972_v30  ;;  %v3100_v30 = vunpack.c.l.s8.bf16 %v2460_v23  ;;  %v2524_v23 = vld [vmem:[%s6529_s15 + $0x638] sm:$0xff] }
 0x2e6   : > { %4206 = vmatpush1.bf16.msra.mxu0 %v2969_v15  ;;  %v3097_v15 = vunpack.c.l.s8.bf16 %v2457_v28 }
 0x2e7   : > { %4370 = vmatpush1.bf16.msra.mxu1 %v2971_v35  ;;  %4207 = vmatprep.subr.bf16.mxu0 %v2986_v36  ;;  %v3099_v35 = vunpack.c.l.s8.bf16 %v2459_v32  ;;  %v3114_v36 = vunpack.c.h.s8.bf16 %v2458_v20  ;;  %v2522_v20 = vld [vmem:[%s6529_s15 + $0x628] sm:$0xff] }
 0x2e8   : > { %4371 = vmatprep.subr.bf16.mxu1 %v2988_v37  ;;  %v2474_v37 = vld [vmem:[%s6529_s15 + $0x4a8] sm:$0xff] }
 0x2ea   : > { %4208 = vmatpush1.bf16.msra.mxu0 %v2985_v42  ;;  %v3113_v42 = vunpack.c.h.s8.bf16 %v2457_v28  ;;  %v2521_v28 = vld [vmem:[%s6529_s15 + $0x620] sm:$0xff] }
 0x2eb   : > { %4372 = vmatpush1.bf16.msra.mxu1 %v2987_v43  ;;  %4209 = vmatprep.subr.bf16.mxu0 %v3002_v45  ;;  %v3115_v43 = vunpack.c.h.s8.bf16 %v2459_v32  ;;  %v3130_v45 = vunpack.c.l.s8.bf16 %v2474_v37  ;;  %v2523_v32 = vld [vmem:[%s6529_s15 + $0x630] sm:$0xff] }
 0x2ec   : > { %4373 = vmatprep.subr.bf16.mxu1 %v3004_v12  ;;  %v3132_v12 = vunpack.c.l.s8.bf16 %v2476_v40 }
 0x2ee   : > { %4210 = vmatpush1.bf16.msra.mxu0 %v3001_v48  ;;  %v3129_v48 = vunpack.c.l.s8.bf16 %v2473_v46 }
 0x2ef   : > { %4374 = vmatpush1.bf16.msra.mxu1 %v3003_v49  ;;  %4211 = vmatprep.subr.bf16.mxu0 %v3018_v50  ;;  %v3131_v49 = vunpack.c.l.s8.bf16 %v2475_v47  ;;  %v3146_v50 = vunpack.c.h.s8.bf16 %v2474_v37  ;;  %v3244_v37 = vunpack.c.h.s8.bf16 %v2524_v23 }
 0x2f0   : > { %4375 = vmatprep.subr.bf16.mxu1 %v3020_v57  ;;  %v3148_v57 = vunpack.c.h.s8.bf16 %v2476_v40  ;;  %v2540_v40 = vld [vmem:[%s6529_s15 + $0x6b8] sm:$0xff] }
 0x2f2   : > { %4212 = vmatpush1.bf16.msra.mxu0 %v3017_v54  ;;  %v3145_v54 = vunpack.c.h.s8.bf16 %v2473_v46  ;;  %v2537_v46 = vld [vmem:[%s6529_s15 + $0x6a0] sm:$0xff] }
 0x2f3   : > { %4376 = vmatpush1.bf16.msra.mxu1 %v3019_v53  ;;  %4213 = vmatprep.subr.bf16.mxu0 %v3034_v63  ;;  %v3147_v53 = vunpack.c.h.s8.bf16 %v2475_v47  ;;  %v3162_v63 = vunpack.c.l.s8.bf16 %v2490_v51  ;;  %v2539_v47 = vld [vmem:[%s6529_s15 + $0x6b0] sm:$0xff] }
 0x2f4   : > { %4377 = vmatprep.subr.bf16.mxu1 %v3036_v1  ;;  %v3164_v1 = vunpack.c.l.s8.bf16 %v2492_v52 }
 0x2f6   : > { %4214 = vmatpush1.bf16.msra.mxu0 %v3033_v4  ;;  %v3161_v4 = vunpack.c.l.s8.bf16 %v2489_v0 }
 0x2f7   : > { %4378 = vmatpush1.bf16.msra.mxu1 %v3035_v5  ;;  %4215 = vmatprep.subr.bf16.mxu0 %v3050_v3  ;;  %v3163_v5 = vunpack.c.l.s8.bf16 %v2491_v2  ;;  %v3178_v3 = vunpack.c.h.s8.bf16 %v2490_v51  ;;  %v2554_v51 = vld [vmem:[%s6529_s15 + $0x728] sm:$0xff] }
 0x2f8   : > { %4379 = vmatprep.subr.bf16.mxu1 %v3052_v59  ;;  %v3180_v59 = vunpack.c.h.s8.bf16 %v2492_v52  ;;  %v2556_v52 = vld [vmem:[%s6529_s15 + $0x738] sm:$0xff] }
 0x2fa   : > { %4216 = vmatpush1.bf16.msra.mxu0 %v3049_v7  ;;  %v3177_v7 = vunpack.c.h.s8.bf16 %v2489_v0  ;;  %v2553_v0 = vld [vmem:[%s6529_s15 + $0x720] sm:$0xff] }
 0x2fb   : > { %4380 = vmatpush1.bf16.msra.mxu1 %v3051_v8  ;;  %4217 = vmatprep.subr.bf16.mxu0 %v3066_v9  ;;  %v3179_v8 = vunpack.c.h.s8.bf16 %v2491_v2  ;;  %v3194_v9 = vunpack.c.l.s8.bf16 %v2506_v56  ;;  %v2555_v2 = vld [vmem:[%s6529_s15 + $0x730] sm:$0xff] }
 0x2fc   : > { %4381 = vmatprep.subr.bf16.mxu1 %v3068_v11  ;;  %v3196_v11 = vunpack.c.l.s8.bf16 %v2508_v6 }
 0x2fe   : > { %4218 = vmatpush1.bf16.msra.mxu0 %v3065_v16  ;;  %v3193_v16 = vunpack.c.l.s8.bf16 %v2505_v10 }
 0x2ff   : > { %4382 = vmatpush1.bf16.msra.mxu1 %v3067_v17  ;;  %4219 = vmatprep.subr.bf16.mxu0 %v3082_v18  ;;  %v3195_v17 = vunpack.c.l.s8.bf16 %v2507_v14  ;;  %v3210_v18 = vunpack.c.h.s8.bf16 %v2506_v56  ;;  %v2570_v56 = vld [vmem:[%s6529_s15 + $0x7a8] sm:$0xff] }
 0x300   : > { %4383 = vmatprep.subr.bf16.mxu1 %v3084_v19  ;;  %v3212_v19 = vunpack.c.h.s8.bf16 %v2508_v6  ;;  %v2572_v6 = vld [vmem:[%s6529_s15 + $0x7b8] sm:$0xff] }
 0x302   : > { %4220 = vmatpush1.bf16.msra.mxu0 %v3081_v25  ;;  %v3209_v25 = vunpack.c.h.s8.bf16 %v2505_v10  ;;  %v2569_v10 = vld [vmem:[%s6529_s15 + $0x7a0] sm:$0xff] }
 0x303   : > { %4384 = vmatpush1.bf16.msra.mxu1 %v3083_v62  ;;  %4230 = vmatprep.subr.bf16.mxu0 %v3098_v27  ;;  %v3211_v62 = vunpack.c.h.s8.bf16 %v2507_v14  ;;  %v3226_v27 = vunpack.c.l.s8.bf16 %v2522_v20  ;;  %v2571_v14 = vld [vmem:[%s6529_s15 + $0x7b0] sm:$0xff] }
 0x304   : > { %4394 = vmatprep.subr.bf16.mxu1 %v3100_v30  ;;  %v3228_v30 = vunpack.c.l.s8.bf16 %v2524_v23  ;;  %v2588_v23 = vld [vmem:[%s6529_s15 + $0x838] sm:$0xff] }
 0x305   : > { %4222 = vmatmul.mubr.bf16.vlgmr.msra.gmra.mrb[12].mxu0 %v6642_v26 }
 0x306   : > { %4386 = vmatmul.mubr.bf16.vlgmr.msra.gmra.mrb[12].mxu1 %v6642_v26  ;;  %4231 = vmatpush1.bf16.msra.mxu0 %v3097_v15  ;;  %v3225_v15 = vunpack.c.l.s8.bf16 %v2521_v28 }
 0x307   : > { %4262 = vmatprep.mubr.bf16.mxu0 %v6650_v31  ;;  %4395 = vmatpush1.bf16.msra.mxu1 %v3099_v35  ;;  %v3227_v35 = vunpack.c.l.s8.bf16 %v2523_v32 }
 0x308   : > { %4426 = vmatprep.mubr.bf16.mxu1 %v6650_v31  ;;  %4232 = vmatprep.subr.bf16.mxu0 %v3114_v36  ;;  %v3242_v36 = vunpack.c.h.s8.bf16 %v2522_v20  ;;  %v2586_v20 = vld [vmem:[%s6529_s15 + $0x828] sm:$0xff] }
 0x309   : > { %4396 = vmatprep.subr.bf16.mxu1 %v3116_v39  ;;  %v2538_v39 = vld [vmem:[%s6529_s15 + $0x6a8] sm:$0xff] }
 0x30a   : > { %4233 = vmatpush1.bf16.msra.mxu0 %v3113_v42  ;;  %v3241_v42 = vunpack.c.h.s8.bf16 %v2521_v28  ;;  %v2585_v28 = vld [vmem:[%s6529_s15 + $0x820] sm:$0xff] }
 0x30b   : > { %4397 = vmatpush1.bf16.msra.mxu1 %v3115_v43  ;;  %4234 = vmatprep.subr.bf16.mxu0 %v3130_v45  ;;  %v3243_v43 = vunpack.c.h.s8.bf16 %v2523_v32  ;;  %v3258_v45 = vunpack.c.l.s8.bf16 %v2538_v39  ;;  %v2587_v32 = vld [vmem:[%s6529_s15 + $0x830] sm:$0xff] }
 0x30c   : > { %4398 = vmatprep.subr.bf16.mxu1 %v3132_v12  ;;  %v3260_v12 = vunpack.c.l.s8.bf16 %v2540_v40 }
 0x30e   : > { %4235 = vmatpush1.bf16.msra.mxu0 %v3129_v48  ;;  %v3257_v48 = vunpack.c.l.s8.bf16 %v2537_v46 }
 0x30f   : > { %4399 = vmatpush1.bf16.msra.mxu1 %v3131_v49  ;;  %4236 = vmatprep.subr.bf16.mxu0 %v3146_v50  ;;  %v3259_v49 = vunpack.c.l.s8.bf16 %v2539_v47  ;;  %v3274_v50 = vunpack.c.h.s8.bf16 %v2538_v39  ;;  %v3372_v39 = vunpack.c.h.s8.bf16 %v2588_v23 }
 0x310   : > { %4400 = vmatprep.subr.bf16.mxu1 %v3148_v57  ;;  %v3276_v57 = vunpack.c.h.s8.bf16 %v2540_v40  ;;  %v2604_v40 = vld [vmem:[%s6529_s15 + $0x8b8] sm:$0xff] }
 0x312   : > { %4237 = vmatpush1.bf16.msra.mxu0 %v3145_v54  ;;  %v3273_v54 = vunpack.c.h.s8.bf16 %v2537_v46  ;;  %v2601_v46 = vld [vmem:[%s6529_s15 + $0x8a0] sm:$0xff] }
 0x313   : > { %4401 = vmatpush1.bf16.msra.mxu1 %v3147_v53  ;;  %4238 = vmatprep.subr.bf16.mxu0 %v3162_v63  ;;  %v3275_v53 = vunpack.c.h.s8.bf16 %v2539_v47  ;;  %v3290_v63 = vunpack.c.l.s8.bf16 %v2554_v51  ;;  %v2603_v47 = vld [vmem:[%s6529_s15 + $0x8b0] sm:$0xff] }
 0x314   : > { %4402 = vmatprep.subr.bf16.mxu1 %v3164_v1  ;;  %v3292_v1 = vunpack.c.l.s8.bf16 %v2556_v52 }
 0x316   : > { %4239 = vmatpush1.bf16.msra.mxu0 %v3161_v4  ;;  %v3289_v4 = vunpack.c.l.s8.bf16 %v2553_v0 }
 0x317   : > { %4403 = vmatpush1.bf16.msra.mxu1 %v3163_v5  ;;  %4240 = vmatprep.subr.bf16.mxu0 %v3178_v3  ;;  %v3291_v5 = vunpack.c.l.s8.bf16 %v2555_v2  ;;  %v3306_v3 = vunpack.c.h.s8.bf16 %v2554_v51  ;;  %v2618_v51 = vld [vmem:[%s6529_s15 + $0x928] sm:$0xff] }
 0x318   : > { %4404 = vmatprep.subr.bf16.mxu1 %v3180_v59  ;;  %v3308_v59 = vunpack.c.h.s8.bf16 %v2556_v52  ;;  %v2620_v52 = vld [vmem:[%s6529_s15 + $0x938] sm:$0xff] }
 0x31a   : > { %4241 = vmatpush1.bf16.msra.mxu0 %v3177_v7  ;;  %v3305_v7 = vunpack.c.h.s8.bf16 %v2553_v0  ;;  %v2617_v0 = vld [vmem:[%s6529_s15 + $0x920] sm:$0xff] }
 0x31b   : > { %4405 = vmatpush1.bf16.msra.mxu1 %v3179_v8  ;;  %4242 = vmatprep.subr.bf16.mxu0 %v3194_v9  ;;  %v3307_v8 = vunpack.c.h.s8.bf16 %v2555_v2  ;;  %v3322_v9 = vunpack.c.l.s8.bf16 %v2570_v56  ;;  %v2619_v2 = vld [vmem:[%s6529_s15 + $0x930] sm:$0xff] }
 0x31c   : > { %4406 = vmatprep.subr.bf16.mxu1 %v3196_v11  ;;  %v3324_v11 = vunpack.c.l.s8.bf16 %v2572_v6 }
 0x31e   : > { %4243 = vmatpush1.bf16.msra.mxu0 %v3193_v16  ;;  %v3321_v16 = vunpack.c.l.s8.bf16 %v2569_v10 }
 0x31f   : > { %4407 = vmatpush1.bf16.msra.mxu1 %v3195_v17  ;;  %4244 = vmatprep.subr.bf16.mxu0 %v3210_v18  ;;  %v3323_v17 = vunpack.c.l.s8.bf16 %v2571_v14  ;;  %v3338_v18 = vunpack.c.h.s8.bf16 %v2570_v56  ;;  %v2634_v56 = vld [vmem:[%s6529_s15 + $0x9a8] sm:$0xff] }
 0x320   : > { %4408 = vmatprep.subr.bf16.mxu1 %v3212_v19  ;;  %v3340_v19 = vunpack.c.h.s8.bf16 %v2572_v6  ;;  %v2636_v6 = vld [vmem:[%s6529_s15 + $0x9b8] sm:$0xff] }
 0x322   : > { %4245 = vmatpush1.bf16.msra.mxu0 %v3209_v25  ;;  %v3337_v25 = vunpack.c.h.s8.bf16 %v2569_v10  ;;  %v2633_v10 = vld [vmem:[%s6529_s15 + $0x9a0] sm:$0xff] }
 0x323   : > { %4409 = vmatpush1.bf16.msra.mxu1 %v3211_v62  ;;  %4246 = vmatprep.subr.bf16.mxu0 %v3226_v27  ;;  %v3339_v62 = vunpack.c.h.s8.bf16 %v2571_v14  ;;  %v3354_v27 = vunpack.c.l.s8.bf16 %v2586_v20  ;;  %v2635_v14 = vld [vmem:[%s6529_s15 + $0x9b0] sm:$0xff] }
 0x324   : > { %4410 = vmatprep.subr.bf16.mxu1 %v3228_v30  ;;  %v3356_v30 = vunpack.c.l.s8.bf16 %v2588_v23  ;;  %v2652_v23 = vld [vmem:[%s6529_s15 + $0xa38] sm:$0xff] }
 0x326   : > { %4247 = vmatpush1.bf16.msra.mxu0 %v3225_v15  ;;  %v3353_v15 = vunpack.c.l.s8.bf16 %v2585_v28 }
 0x327   : > { %4411 = vmatpush1.bf16.msra.mxu1 %v3227_v35  ;;  %4248 = vmatprep.subr.bf16.mxu0 %v3242_v36  ;;  %v3355_v35 = vunpack.c.l.s8.bf16 %v2587_v32  ;;  %v3370_v36 = vunpack.c.h.s8.bf16 %v2586_v20  ;;  %v2650_v20 = vld [vmem:[%s6529_s15 + $0xa28] sm:$0xff] }
 0x328   : > { %4412 = vmatprep.subr.bf16.mxu1 %v3244_v37  ;;  %v2602_v37 = vld [vmem:[%s6529_s15 + $0x8a8] sm:$0xff] }
 0x32a   : > { %4249 = vmatpush1.bf16.msra.mxu0 %v3241_v42  ;;  %v3369_v42 = vunpack.c.h.s8.bf16 %v2585_v28  ;;  %v2649_v28 = vld [vmem:[%s6529_s15 + $0xa20] sm:$0xff] }
 0x32b   : > { %4413 = vmatpush1.bf16.msra.mxu1 %v3243_v43  ;;  %4250 = vmatprep.subr.bf16.mxu0 %v3258_v45  ;;  %v3371_v43 = vunpack.c.h.s8.bf16 %v2587_v32  ;;  %v3386_v45 = vunpack.c.l.s8.bf16 %v2602_v37  ;;  %v2651_v32 = vld [vmem:[%s6529_s15 + $0xa30] sm:$0xff] }
 0x32c   : > { %4414 = vmatprep.subr.bf16.mxu1 %v3260_v12  ;;  %v3388_v12 = vunpack.c.l.s8.bf16 %v2604_v40 }
 0x32e   : > { %4251 = vmatpush1.bf16.msra.mxu0 %v3257_v48  ;;  %v3385_v48 = vunpack.c.l.s8.bf16 %v2601_v46 }
 0x32f   : > { %4415 = vmatpush1.bf16.msra.mxu1 %v3259_v49  ;;  %4252 = vmatprep.subr.bf16.mxu0 %v3274_v50  ;;  %v3387_v49 = vunpack.c.l.s8.bf16 %v2603_v47  ;;  %v3402_v50 = vunpack.c.h.s8.bf16 %v2602_v37  ;;  %v3500_v37 = vunpack.c.h.s8.bf16 %v2652_v23 }
 0x330   : > { %4416 = vmatprep.subr.bf16.mxu1 %v3276_v57  ;;  %v3404_v57 = vunpack.c.h.s8.bf16 %v2604_v40  ;;  %v2668_v40 = vld [vmem:[%s6529_s15 + $0xab8] sm:$0xff] }
 0x332   : > { %4253 = vmatpush1.bf16.msra.mxu0 %v3273_v54  ;;  %v3401_v54 = vunpack.c.h.s8.bf16 %v2601_v46  ;;  %v2665_v46 = vld [vmem:[%s6529_s15 + $0xaa0] sm:$0xff] }
 0x333   : > { %4417 = vmatpush1.bf16.msra.mxu1 %v3275_v53  ;;  %4254 = vmatprep.subr.bf16.mxu0 %v3290_v63  ;;  %v3403_v53 = vunpack.c.h.s8.bf16 %v2603_v47  ;;  %v3418_v63 = vunpack.c.l.s8.bf16 %v2618_v51  ;;  %v2667_v47 = vld [vmem:[%s6529_s15 + $0xab0] sm:$0xff] }
 0x334   : > { %4418 = vmatprep.subr.bf16.mxu1 %v3292_v1  ;;  %v3420_v1 = vunpack.c.l.s8.bf16 %v2620_v52 }
 0x336   : > { %4255 = vmatpush1.bf16.msra.mxu0 %v3289_v4  ;;  %v3417_v4 = vunpack.c.l.s8.bf16 %v2617_v0 }
 0x337   : > { %4419 = vmatpush1.bf16.msra.mxu1 %v3291_v5  ;;  %4256 = vmatprep.subr.bf16.mxu0 %v3306_v3  ;;  %v3419_v5 = vunpack.c.l.s8.bf16 %v2619_v2  ;;  %v3434_v3 = vunpack.c.h.s8.bf16 %v2618_v51  ;;  %v2682_v51 = vld [vmem:[%s6529_s15 + $0xb28] sm:$0xff] }
 0x338   : > { %4420 = vmatprep.subr.bf16.mxu1 %v3308_v59  ;;  %v3436_v59 = vunpack.c.h.s8.bf16 %v2620_v52  ;;  %v2684_v52 = vld [vmem:[%s6529_s15 + $0xb38] sm:$0xff] }
 0x33a   : > { %4257 = vmatpush1.bf16.msra.mxu0 %v3305_v7  ;;  %v3433_v7 = vunpack.c.h.s8.bf16 %v2617_v0  ;;  %v2681_v0 = vld [vmem:[%s6529_s15 + $0xb20] sm:$0xff] }
 0x33b   : > { %4421 = vmatpush1.bf16.msra.mxu1 %v3307_v8  ;;  %4258 = vmatprep.subr.bf16.mxu0 %v3322_v9  ;;  %v3435_v8 = vunpack.c.h.s8.bf16 %v2619_v2  ;;  %v3450_v9 = vunpack.c.l.s8.bf16 %v2634_v56  ;;  %v2683_v2 = vld [vmem:[%s6529_s15 + $0xb30] sm:$0xff] }
 0x33c   : > { %4422 = vmatprep.subr.bf16.mxu1 %v3324_v11  ;;  %v3452_v11 = vunpack.c.l.s8.bf16 %v2636_v6 }
 0x33e   : > { %4259 = vmatpush1.bf16.msra.mxu0 %v3321_v16  ;;  %v3449_v16 = vunpack.c.l.s8.bf16 %v2633_v10 }
 0x33f   : > { %4423 = vmatpush1.bf16.msra.mxu1 %v3323_v17  ;;  %4260 = vmatprep.subr.bf16.mxu0 %v3338_v18  ;;  %v3451_v17 = vunpack.c.l.s8.bf16 %v2635_v14  ;;  %v3466_v18 = vunpack.c.h.s8.bf16 %v2634_v56  ;;  %v2698_v56 = vld [vmem:[%s6529_s15 + $0xba8] sm:$0xff] }
 0x340   : > { %4424 = vmatprep.subr.bf16.mxu1 %v3340_v19  ;;  %v3468_v19 = vunpack.c.h.s8.bf16 %v2636_v6  ;;  %v2700_v6 = vld [vmem:[%s6529_s15 + $0xbb8] sm:$0xff] }
 0x342   : > { %4261 = vmatpush1.bf16.msra.mxu0 %v3337_v25  ;;  %v3465_v25 = vunpack.c.h.s8.bf16 %v2633_v10  ;;  %v2697_v10 = vld [vmem:[%s6529_s15 + $0xba0] sm:$0xff] }
 0x343   : > { %4425 = vmatpush1.bf16.msra.mxu1 %v3339_v62  ;;  %4271 = vmatprep.subr.bf16.mxu0 %v3354_v27  ;;  %v3467_v62 = vunpack.c.h.s8.bf16 %v2635_v14  ;;  %v3482_v27 = vunpack.c.l.s8.bf16 %v2650_v20  ;;  %v2699_v14 = vld [vmem:[%s6529_s15 + $0xbb0] sm:$0xff] }
 0x344   : > { %4435 = vmatprep.subr.bf16.mxu1 %v3356_v30  ;;  %v3484_v30 = vunpack.c.l.s8.bf16 %v2652_v23  ;;  %v2716_v23 = vld [vmem:[%s6529_s15 + $0xc38] sm:$0xff] }
 0x345   : > { %4263 = vmatmul.mubr.bf16.vlgmr.msra.gmra.mrb[12].mxu0 %v6692_v13 }
 0x346   : > { %4427 = vmatmul.mubr.bf16.vlgmr.msra.gmra.mrb[12].mxu1 %v6692_v13  ;;  %4272 = vmatpush1.bf16.msra.mxu0 %v3353_v15  ;;  %v3481_v15 = vunpack.c.l.s8.bf16 %v2649_v28 }
 0x347   : > { %4303 = vmatprep.mubr.bf16.mxu0 %v6746_v24  ;;  %4436 = vmatpush1.bf16.msra.mxu1 %v3355_v35  ;;  %v3483_v35 = vunpack.c.l.s8.bf16 %v2651_v32 }
 0x348   : > { %4467 = vmatprep.mubr.bf16.mxu1 %v6746_v24  ;;  %4273 = vmatprep.subr.bf16.mxu0 %v3370_v36  ;;  %v3498_v36 = vunpack.c.h.s8.bf16 %v2650_v20  ;;  %v2714_v20 = vld [vmem:[%s6529_s15 + $0xc28] sm:$0xff] }
 0x349   : > { %4437 = vmatprep.subr.bf16.mxu1 %v3372_v39  ;;  %v2666_v39 = vld [vmem:[%s6529_s15 + $0xaa8] sm:$0xff] }
 0x34a   : > { %4274 = vmatpush1.bf16.msra.mxu0 %v3369_v42  ;;  %v3497_v42 = vunpack.c.h.s8.bf16 %v2649_v28  ;;  %v2713_v28 = vld [vmem:[%s6529_s15 + $0xc20] sm:$0xff] }
 0x34b   : > { %4438 = vmatpush1.bf16.msra.mxu1 %v3371_v43  ;;  %4275 = vmatprep.subr.bf16.mxu0 %v3386_v45  ;;  %v3499_v43 = vunpack.c.h.s8.bf16 %v2651_v32  ;;  %v3514_v45 = vunpack.c.l.s8.bf16 %v2666_v39  ;;  %v2715_v32 = vld [vmem:[%s6529_s15 + $0xc30] sm:$0xff] }
 0x34c   : > { %4439 = vmatprep.subr.bf16.mxu1 %v3388_v12  ;;  %v3516_v12 = vunpack.c.l.s8.bf16 %v2668_v40 }
 0x34e   : > { %4276 = vmatpush1.bf16.msra.mxu0 %v3385_v48  ;;  %v3513_v48 = vunpack.c.l.s8.bf16 %v2665_v46 }
 0x34f   : > { %4440 = vmatpush1.bf16.msra.mxu1 %v3387_v49  ;;  %4277 = vmatprep.subr.bf16.mxu0 %v3402_v50  ;;  %v3515_v49 = vunpack.c.l.s8.bf16 %v2667_v47  ;;  %v3530_v50 = vunpack.c.h.s8.bf16 %v2666_v39  ;;  %v3628_v39 = vunpack.c.h.s8.bf16 %v2716_v23 }
 0x350   : > { %4441 = vmatprep.subr.bf16.mxu1 %v3404_v57  ;;  %v3532_v57 = vunpack.c.h.s8.bf16 %v2668_v40  ;;  %v2732_v40 = vld [vmem:[%s6529_s15 + $0xcb8] sm:$0xff] }
 0x352   : > { %4278 = vmatpush1.bf16.msra.mxu0 %v3401_v54  ;;  %v3529_v54 = vunpack.c.h.s8.bf16 %v2665_v46  ;;  %v2729_v46 = vld [vmem:[%s6529_s15 + $0xca0] sm:$0xff] }
 0x353   : > { %4442 = vmatpush1.bf16.msra.mxu1 %v3403_v53  ;;  %4279 = vmatprep.subr.bf16.mxu0 %v3418_v63  ;;  %v3531_v53 = vunpack.c.h.s8.bf16 %v2667_v47  ;;  %v3546_v63 = vunpack.c.l.s8.bf16 %v2682_v51  ;;  %v2731_v47 = vld [vmem:[%s6529_s15 + $0xcb0] sm:$0xff] }
 0x354   : > { %4443 = vmatprep.subr.bf16.mxu1 %v3420_v1  ;;  %v3548_v1 = vunpack.c.l.s8.bf16 %v2684_v52 }
 0x356   : > { %4280 = vmatpush1.bf16.msra.mxu0 %v3417_v4  ;;  %v3545_v4 = vunpack.c.l.s8.bf16 %v2681_v0 }
 0x357   : > { %4444 = vmatpush1.bf16.msra.mxu1 %v3419_v5  ;;  %4281 = vmatprep.subr.bf16.mxu0 %v3434_v3  ;;  %v3547_v5 = vunpack.c.l.s8.bf16 %v2683_v2  ;;  %v3562_v3 = vunpack.c.h.s8.bf16 %v2682_v51  ;;  %v2746_v51 = vld [vmem:[%s6529_s15 + $0xd28] sm:$0xff] }
 0x358   : > { %4445 = vmatprep.subr.bf16.mxu1 %v3436_v59  ;;  %v3564_v59 = vunpack.c.h.s8.bf16 %v2684_v52  ;;  %v2748_v52 = vld [vmem:[%s6529_s15 + $0xd38] sm:$0xff] }
 0x35a   : > { %4282 = vmatpush1.bf16.msra.mxu0 %v3433_v7  ;;  %v3561_v7 = vunpack.c.h.s8.bf16 %v2681_v0  ;;  %v2745_v0 = vld [vmem:[%s6529_s15 + $0xd20] sm:$0xff] }
 0x35b   : > { %4446 = vmatpush1.bf16.msra.mxu1 %v3435_v8  ;;  %4283 = vmatprep.subr.bf16.mxu0 %v3450_v9  ;;  %v3563_v8 = vunpack.c.h.s8.bf16 %v2683_v2  ;;  %v3578_v9 = vunpack.c.l.s8.bf16 %v2698_v56  ;;  %v2747_v2 = vld [vmem:[%s6529_s15 + $0xd30] sm:$0xff] }
 0x35c   : > { %4447 = vmatprep.subr.bf16.mxu1 %v3452_v11  ;;  %v3580_v11 = vunpack.c.l.s8.bf16 %v2700_v6 }
 0x35e   : > { %4284 = vmatpush1.bf16.msra.mxu0 %v3449_v16  ;;  %v3577_v16 = vunpack.c.l.s8.bf16 %v2697_v10 }
 0x35f   : > { %4448 = vmatpush1.bf16.msra.mxu1 %v3451_v17  ;;  %4285 = vmatprep.subr.bf16.mxu0 %v3466_v18  ;;  %v3579_v17 = vunpack.c.l.s8.bf16 %v2699_v14  ;;  %v3594_v18 = vunpack.c.h.s8.bf16 %v2698_v56  ;;  %v2762_v56 = vld [vmem:[%s6529_s15 + $0xda8] sm:$0xff] }
 0x360   : > { %4449 = vmatprep.subr.bf16.mxu1 %v3468_v19  ;;  %v3596_v19 = vunpack.c.h.s8.bf16 %v2700_v6  ;;  %v2764_v6 = vld [vmem:[%s6529_s15 + $0xdb8] sm:$0xff] }
 0x362   : > { %4286 = vmatpush1.bf16.msra.mxu0 %v3465_v25  ;;  %v3593_v25 = vunpack.c.h.s8.bf16 %v2697_v10  ;;  %v2761_v10 = vld [vmem:[%s6529_s15 + $0xda0] sm:$0xff] }
 0x363   : > { %4450 = vmatpush1.bf16.msra.mxu1 %v3467_v62  ;;  %4287 = vmatprep.subr.bf16.mxu0 %v3482_v27  ;;  %v3595_v62 = vunpack.c.h.s8.bf16 %v2699_v14  ;;  %v3610_v27 = vunpack.c.l.s8.bf16 %v2714_v20 }
 0x364   : > { %4451 = vmatprep.subr.bf16.mxu1 %v3484_v30  ;;  %v3612_v30 = vunpack.c.l.s8.bf16 %v2716_v23 }
 0x366   : > { %4288 = vmatpush1.bf16.msra.mxu0 %v3481_v15  ;;  %v3609_v15 = vunpack.c.l.s8.bf16 %v2713_v28 }
 0x367   : > { %4452 = vmatpush1.bf16.msra.mxu1 %v3483_v35  ;;  %4289 = vmatprep.subr.bf16.mxu0 %v3498_v36  ;;  %v3611_v35 = vunpack.c.l.s8.bf16 %v2715_v32  ;;  %v3626_v36 = vunpack.c.h.s8.bf16 %v2714_v20 }
 0x368   : > { %4453 = vmatprep.subr.bf16.mxu1 %v3500_v37  ;;  %v2730_v37 = vld [vmem:[%s6529_s15 + $0xca8] sm:$0xff] }
 0x36a   : > { %4290 = vmatpush1.bf16.msra.mxu0 %v3497_v42  ;;  %v3625_v42 = vunpack.c.h.s8.bf16 %v2713_v28 }
 0x36b   : > { %4454 = vmatpush1.bf16.msra.mxu1 %v3499_v43  ;;  %4291 = vmatprep.subr.bf16.mxu0 %v3514_v45  ;;  %v3627_v43 = vunpack.c.h.s8.bf16 %v2715_v32  ;;  %v3642_v45 = vunpack.c.l.s8.bf16 %v2730_v37  ;;  %v3724_v32 = vunpack.c.h.s8.bf16 %v2764_v6 }
 0x36c   : > { %4455 = vmatprep.subr.bf16.mxu1 %v3516_v12  ;;  %v3644_v12 = vunpack.c.l.s8.bf16 %v2732_v40 }
 0x36e   : > { %4292 = vmatpush1.bf16.msra.mxu0 %v3513_v48  ;;  %v3641_v48 = vunpack.c.l.s8.bf16 %v2729_v46 }
 0x36f   : > { %4456 = vmatpush1.bf16.msra.mxu1 %v3515_v49  ;;  %4293 = vmatprep.subr.bf16.mxu0 %v3530_v50  ;;  %v3643_v49 = vunpack.c.l.s8.bf16 %v2731_v47  ;;  %v3658_v50 = vunpack.c.h.s8.bf16 %v2730_v37 }
 0x370   : > { %4457 = vmatprep.subr.bf16.mxu1 %v3532_v57  ;;  %v3660_v57 = vunpack.c.h.s8.bf16 %v2732_v40  ;;  %v2777_v40 = vld [vmem:[%s6529_s15 + $0xe20] sm:$0xff] }
 0x372   : > { %4294 = vmatpush1.bf16.msra.mxu0 %v3529_v54  ;;  %v3657_v54 = vunpack.c.h.s8.bf16 %v2729_v46 }
 0x373   : > { %4458 = vmatpush1.bf16.msra.mxu1 %v3531_v53  ;;  %4295 = vmatprep.subr.bf16.mxu0 %v3546_v63  ;;  %v3659_v53 = vunpack.c.h.s8.bf16 %v2731_v47  ;;  %v3674_v63 = vunpack.c.l.s8.bf16 %v2746_v51 }
 0x374   : > { %4459 = vmatprep.subr.bf16.mxu1 %v3548_v1  ;;  %v3676_v1 = vunpack.c.l.s8.bf16 %v2748_v52 }
 0x376   : > { %4296 = vmatpush1.bf16.msra.mxu0 %v3545_v4  ;;  %v3673_v4 = vunpack.c.l.s8.bf16 %v2745_v0 }
 0x377   : > { %4460 = vmatpush1.bf16.msra.mxu1 %v3547_v5  ;;  %4297 = vmatprep.subr.bf16.mxu0 %v3562_v3  ;;  %v3675_v5 = vunpack.c.l.s8.bf16 %v2747_v2  ;;  %v3690_v3 = vunpack.c.h.s8.bf16 %v2746_v51 }
 0x378   : > { %4461 = vmatprep.subr.bf16.mxu1 %v3564_v59  ;;  %v3692_v59 = vunpack.c.h.s8.bf16 %v2748_v52  ;;  %v2793_v52 = vld [vmem:[%s6529_s15 + $0xea0] sm:$0xff] }
 0x37a   : > { %4298 = vmatpush1.bf16.msra.mxu0 %v3561_v7  ;;  %v3689_v7 = vunpack.c.h.s8.bf16 %v2745_v0 }
 0x37b   : > { %4462 = vmatpush1.bf16.msra.mxu1 %v3563_v8  ;;  %4299 = vmatprep.subr.bf16.mxu0 %v3578_v9  ;;  %v3691_v8 = vunpack.c.h.s8.bf16 %v2747_v2  ;;  %v3706_v9 = vunpack.c.l.s8.bf16 %v2762_v56 }
 0x37c   : > { %4463 = vmatprep.subr.bf16.mxu1 %v3580_v11 }
 0x37e   : > { %4300 = vmatpush1.bf16.msra.mxu0 %v3577_v16  ;;  %v3708_v16 = vunpack.c.l.s8.bf16 %v2764_v6  ;;  %v2809_v6 = vld [vmem:[%s6529_s15 + $0xf20] sm:$0xff] }
 0x37f   : > { %4464 = vmatpush1.bf16.msra.mxu1 %v3579_v17  ;;  %4301 = vmatprep.subr.bf16.mxu0 %v3594_v18  ;;  %v2763_v17 = vld [vmem:[%s6529_s15 + $0xdb0] sm:$0xff] }
 0x380   : > { %4465 = vmatprep.subr.bf16.mxu1 %v3596_v19  ;;  %v3707_v28 = vunpack.c.l.s8.bf16 %v2763_v17  ;;  %v3723_v37 = vunpack.c.h.s8.bf16 %v2763_v17 }
 0x382   : > { %4302 = vmatpush1.bf16.msra.mxu0 %v3593_v25  ;;  %v3705_v25 = vunpack.c.l.s8.bf16 %v2761_v10 }
 0x383   : > { %4466 = vmatpush1.bf16.msra.mxu1 %v3595_v62  ;;  %4312 = vmatprep.subr.bf16.mxu0 %v3610_v27 }
 0x384   : > { %4476 = vmatprep.subr.bf16.mxu1 %v3612_v30  ;;  %v3722_v30 = vunpack.c.h.s8.bf16 %v2762_v56 }
 0x385   : > { %4304 = vmatmul.mubr.bf16.vlgmr.msra.gmra.mrb[12].mxu0 %v6748_v29 }
 0x386   : > { %4468 = vmatmul.mubr.bf16.vlgmr.msra.gmra.mrb[12].mxu1 %v6748_v29  ;;  %4313 = vmatpush1.bf16.msra.mxu0 %v3609_v15  ;;  %v2778_v15 = vld [vmem:[%s6529_s15 + $0xe28] sm:$0xff] }
 0x387   : > { %4344 = vmatprep.mubr.bf16.mxu0 %v6754_v34  ;;  %4477 = vmatpush1.bf16.msra.mxu1 %v3611_v35  ;;  %v2780_v35 = vld [vmem:[%s6529_s15 + $0xe38] sm:$0xff] }
 0x388   : > { %4508 = vmatprep.mubr.bf16.mxu1 %v6754_v34  ;;  %4314 = vmatprep.subr.bf16.mxu0 %v3626_v36  ;;  %v3721_v36 = vunpack.c.h.s8.bf16 %v2761_v10  ;;  %v3756_v47 = vunpack.c.h.s8.bf16 %v2780_v35 }
 0x389   : > { %4478 = vmatprep.subr.bf16.mxu1 %v3628_v39  ;;  %v3738_v39 = vunpack.c.l.s8.bf16 %v2778_v15 }
 0x38a   : > { %4315 = vmatpush1.bf16.msra.mxu0 %v3625_v42  ;;  %v3740_v42 = vunpack.c.l.s8.bf16 %v2780_v35 }
 0x38b   : > { %4479 = vmatpush1.bf16.msra.mxu1 %v3627_v43  ;;  %4316 = vmatprep.subr.bf16.mxu0 %v3642_v45  ;;  %v2779_v43 = vld [vmem:[%s6529_s15 + $0xe30] sm:$0xff]  ;;  %v3737_v45 = vunpack.c.l.s8.bf16 %v2777_v40 }
 0x38c   : > { %4480 = vmatprep.subr.bf16.mxu1 %v3644_v12  ;;  %v3739_v46 = vunpack.c.l.s8.bf16 %v2779_v43  ;;  %v3754_v12 = vunpack.c.h.s8.bf16 %v2778_v15 }
 0x38e   : > { %4317 = vmatpush1.bf16.msra.mxu0 %v3641_v48  ;;  %v2794_v48 = vld [vmem:[%s6529_s15 + $0xea8] sm:$0xff] }
 0x38f   : > { %4481 = vmatpush1.bf16.msra.mxu1 %v3643_v49  ;;  %4318 = vmatprep.subr.bf16.mxu0 %v3658_v50  ;;  %v2796_v49 = vld [vmem:[%s6529_s15 + $0xeb8] sm:$0xff]  ;;  %v3753_v50 = vunpack.c.h.s8.bf16 %v2777_v40  ;;  %v3770_v51 = vunpack.c.l.s8.bf16 %v2794_v48 }
 0x390   : > { %4482 = vmatprep.subr.bf16.mxu1 %v3660_v57  ;;  %v3755_v57 = vunpack.c.h.s8.bf16 %v2779_v43  ;;  %v3788_v2 = vunpack.c.h.s8.bf16 %v2796_v49  ;;  %v2336_v40 = vld [vmem:[%s6529_s15 + $0x58] sm:$0xff] }
 0x392   : > { %4319 = vmatpush1.bf16.msra.mxu0 %v3657_v54  ;;  %v3772_v54 = vunpack.c.l.s8.bf16 %v2796_v49 }
 0x393   : > { %4483 = vmatpush1.bf16.msra.mxu1 %v3659_v53  ;;  %4320 = vmatprep.subr.bf16.mxu0 %v3674_v63  ;;  %v2795_v53 = vld [vmem:[%s6529_s15 + $0xeb0] sm:$0xff]  ;;  %v3769_v63 = vunpack.c.l.s8.bf16 %v2793_v52 }
 0x394   : > { %4484 = vmatprep.subr.bf16.mxu1 %v3676_v1  ;;  %v3771_v0 = vunpack.c.l.s8.bf16 %v2795_v53  ;;  %v3786_v1 = vunpack.c.h.s8.bf16 %v2794_v48 }
 0x396   : > { %4321 = vmatpush1.bf16.msra.mxu0 %v3673_v4  ;;  %v2810_v4 = vld [vmem:[%s6529_s15 + $0xf28] sm:$0xff] }
 0x397   : > { %4485 = vmatpush1.bf16.msra.mxu1 %v3675_v5  ;;  %4322 = vmatprep.subr.bf16.mxu0 %v3690_v3  ;;  %v2812_v5 = vld [vmem:[%s6529_s15 + $0xf38] sm:$0xff]  ;;  %v3785_v3 = vunpack.c.h.s8.bf16 %v2793_v52  ;;  %v3802_v56 = vunpack.c.l.s8.bf16 %v2810_v4 }
 0x398   : > { %v6920_v11 = vpop.f32.mrb[8].mxu0  ;;  %v6922_v14 = vpop.f32.mrb[8].mxu1  ;;  %4486 = vmatprep.subr.bf16.mxu1 %v3692_v59  ;;  %v3787_v59 = vunpack.c.h.s8.bf16 %v2795_v53  ;;  %v3820_v17 = vunpack.c.h.s8.bf16 %v2812_v5  ;;  %v2352_v52 = vld [vmem:[%s6529_s15 + $0xd8] sm:$0xff] }
 0x399   : > { %v6925_v18 = vpop.f32.mrb[9].mxu0  ;;  %v6927_v19 = vpop.f32.mrb[9].mxu1 }
 0x39a   : > { %v4022_v20 = vpop.f32.mrb[10].mxu0  ;;  %v4186_v23 = vpop.f32.mrb[10].mxu1  ;;  %4323 = vmatpush1.bf16.msra.mxu0 %v3689_v7  ;;  %v3804_v7 = vunpack.c.l.s8.bf16 %v2812_v5 }
 0x39b   : > { %4487 = vmatpush1.bf16.msra.mxu1 %v3691_v8  ;;  %v4023_v62 = vpop.f32.mrb[11].mxu0  ;;  %v4187_v27 = vpop.f32.mrb[11].mxu1  ;;  %4324 = vmatprep.subr.bf16.mxu0 %v3706_v9  ;;  %v2811_v8 = vld [vmem:[%s6529_s15 + $0xf30] sm:$0xff]  ;;  %v3801_v9 = vunpack.c.l.s8.bf16 %v2809_v6  ;;  %v2826_v20 = vld [vmem:[%s6529_s15 + $0xfa8] sm:$0xff]  ;;  %v2828_v23 = vld [vmem:[%s6529_s15 + $0xfb8] sm:$0xff] }
 0x39c   : > { %4488 = vmatprep.subr.bf16.mxu1 %v3708_v16  ;;  %v3803_v10 = vunpack.c.l.s8.bf16 %v2811_v8  ;;  %v3818_v16 = vunpack.c.h.s8.bf16 %v2810_v4  ;;  %v3819_v62 = vunpack.c.h.s8.bf16 %v2811_v8  ;;  %v3834_v27 = vunpack.c.l.s8.bf16 %v2826_v20 }
 0x39e   : > { %4325 = vmatpush1.bf16.msra.mxu0 %v3705_v25  ;;  %v3817_v25 = vunpack.c.h.s8.bf16 %v2809_v6  ;;  %v2368_v6 = vld [vmem:[%s6529_s15 + $0x158] sm:$0xff] }
 0x39f   : > { %4489 = vmatpush1.bf16.msra.mxu1 %v3707_v28  ;;  %4326 = vmatprep.subr.bf16.mxu0 %v3722_v30  ;;  %v2825_v28 = vld [vmem:[%s6529_s15 + $0xfa0] sm:$0xff]  ;;  %v3836_v30 = vunpack.c.l.s8.bf16 %v2828_v23 }
 0x3a0   : > { %4490 = vmatprep.subr.bf16.mxu1 %v3724_v32  ;;  %v2827_v32 = vld [vmem:[%s6529_s15 + $0xfb0] sm:$0xff]  ;;  %v3833_v15 = vunpack.c.l.s8.bf16 %v2825_v28 }
 0x3a1   : > { %v3835_v35 = vunpack.c.l.s8.bf16 %v2827_v32  ;;  %v3851_v43 = vunpack.c.h.s8.bf16 %v2827_v32 }
 0x3a2   : > { %4327 = vmatpush1.bf16.msra.mxu0 %v3721_v36  ;;  %v3850_v36 = vunpack.c.h.s8.bf16 %v2826_v20 }
 0x3a3   : > { %4491 = vmatpush1.bf16.msra.mxu1 %v3723_v37  ;;  %4328 = vmatprep.subr.bf16.mxu0 %v3738_v39  ;;  %v3852_v37 = vunpack.c.h.s8.bf16 %v2828_v23  ;;  %v2334_v39 = vld [vmem:[%s6529_s15 + $0x48] sm:$0xff] }
 0x3a4   : > { %4492 = vmatprep.subr.bf16.mxu1 %v3740_v42  ;;  %v3849_v42 = vunpack.c.h.s8.bf16 %v2825_v28  ;;  %v2384_v28 = vld [vmem:[%s6529_s15 + $0x1d8] sm:$0xff] }
 0x3a6   : > { %4329 = vmatpush1.bf16.msra.mxu0 %v3737_v45  ;;  %v2846_v45 = vunpack.c.l.s8.bf16 %v2334_v39 }
 0x3a7   : > { %4493 = vmatpush1.bf16.msra.mxu1 %v3739_v46  ;;  %4330 = vmatprep.subr.bf16.mxu0 %v3754_v12  ;;  %v2333_v46 = vld [vmem:[%s6529_s15 + $0x40] sm:$0xff]  ;;  %v2848_v12 = vunpack.c.l.s8.bf16 %v2336_v40 }
 0x3a8   : > { %4494 = vmatprep.subr.bf16.mxu1 %v3756_v47  ;;  %v2335_v47 = vld [vmem:[%s6529_s15 + $0x50] sm:$0xff]  ;;  %v2845_v48 = vunpack.c.l.s8.bf16 %v2333_v46 }
 0x3a9   : > { %v2847_v49 = vunpack.c.l.s8.bf16 %v2335_v47  ;;  %v2863_v53 = vunpack.c.h.s8.bf16 %v2335_v47 }
 0x3aa   : > { %4331 = vmatpush1.bf16.msra.mxu0 %v3753_v50  ;;  %v2862_v50 = vunpack.c.h.s8.bf16 %v2334_v39 }
 0x3ab   : > { %4495 = vmatpush1.bf16.msra.mxu1 %v3755_v57  ;;  %4332 = vmatprep.subr.bf16.mxu0 %v3770_v51  ;;  %v2350_v57 = vld [vmem:[%s6529_s15 + $0xc8] sm:$0xff]  ;;  %v2864_v51 = vunpack.c.h.s8.bf16 %v2336_v40 }
 0x3ac   : > { %4496 = vmatprep.subr.bf16.mxu1 %v3772_v54  ;;  %v2861_v54 = vunpack.c.h.s8.bf16 %v2333_v46  ;;  %v2400_v46 = vld [vmem:[%s6529_s15 + $0x258] sm:$0xff] }
 0x3ae   : > { %4333 = vmatpush1.bf16.msra.mxu0 %v3769_v63  ;;  %v2878_v63 = vunpack.c.l.s8.bf16 %v2350_v57 }
 0x3af   : > { %4497 = vmatpush1.bf16.msra.mxu1 %v3771_v0  ;;  %4334 = vmatprep.subr.bf16.mxu0 %v3786_v1  ;;  %v2349_v0 = vld [vmem:[%s6529_s15 + $0xc0] sm:$0xff]  ;;  %v2880_v1 = vunpack.c.l.s8.bf16 %v2352_v52 }
 0x3b0   : > { %4498 = vmatprep.subr.bf16.mxu1 %v3788_v2  ;;  %v2351_v2 = vld [vmem:[%s6529_s15 + $0xd0] sm:$0xff]  ;;  %v2877_v4 = vunpack.c.l.s8.bf16 %v2349_v0 }
 0x3b1   : > { %v2879_v5 = vunpack.c.l.s8.bf16 %v2351_v2  ;;  %v2895_v8 = vunpack.c.h.s8.bf16 %v2351_v2 }
 0x3b2   : > { %4335 = vmatpush1.bf16.msra.mxu0 %v3785_v3  ;;  %v2894_v3 = vunpack.c.h.s8.bf16 %v2350_v57  ;;  %v2399_v57 = vld [vmem:[%s6529_s15 + $0x250] sm:$0xff] }
 0x3b3   : > { %4499 = vmatpush1.bf16.msra.mxu1 %v3787_v59  ;;  %4336 = vmatprep.subr.bf16.mxu0 %v3802_v56  ;;  %v2896_v59 = vunpack.c.h.s8.bf16 %v2352_v52  ;;  %v2366_v56 = vld [vmem:[%s6529_s15 + $0x148] sm:$0xff]  ;;  %v2975_v52 = vunpack.c.l.s8.bf16 %v2399_v57  ;;  %v2991_v2 = vunpack.c.h.s8.bf16 %v2399_v57 }
 0x3b4   : > { %4500 = vmatprep.subr.bf16.mxu1 %v3804_v7  ;;  %v2893_v7 = vunpack.c.h.s8.bf16 %v2349_v0  ;;  %v2416_v0 = vld [vmem:[%s6529_s15 + $0x2d8] sm:$0xff] }
 0x3b6   : > { %4337 = vmatpush1.bf16.msra.mxu0 %v3801_v9  ;;  %v2910_v9 = vunpack.c.l.s8.bf16 %v2366_v56 }
 0x3b7   : > { %4501 = vmatpush1.bf16.msra.mxu1 %v3803_v10  ;;  %4338 = vmatprep.subr.bf16.mxu0 %v3818_v16  ;;  %v2365_v10 = vld [vmem:[%s6529_s15 + $0x140] sm:$0xff]  ;;  %v2912_v16 = vunpack.c.l.s8.bf16 %v2368_v6 }
 0x3b8   : > { %4502 = vmatprep.subr.bf16.mxu1 %v3820_v17  ;;  %v2367_v17 = vld [vmem:[%s6529_s15 + $0x150] sm:$0xff]  ;;  %v2909_v20 = vunpack.c.l.s8.bf16 %v2365_v10 }
 0x3b9   : > { %v2911_v23 = vunpack.c.l.s8.bf16 %v2367_v17  ;;  %v2927_v32 = vunpack.c.h.s8.bf16 %v2367_v17 }
 0x3ba   : > { %4339 = vmatpush1.bf16.msra.mxu0 %v3817_v25  ;;  %v2926_v25 = vunpack.c.h.s8.bf16 %v2366_v56 }
 0x3bb   : > { %4503 = vmatpush1.bf16.msra.mxu1 %v3819_v62  ;;  %4340 = vmatprep.subr.bf16.mxu0 %v3834_v27  ;;  %v2928_v62 = vunpack.c.h.s8.bf16 %v2368_v6  ;;  %v2382_v27 = vld [vmem:[%s6529_s15 + $0x1c8] sm:$0xff] }
 0x3bc   : > { %4504 = vmatprep.subr.bf16.mxu1 %v3836_v30  ;;  %v2925_v30 = vunpack.c.h.s8.bf16 %v2365_v10  ;;  %v2432_v10 = vld [vmem:[%s6529_s15 + $0x358] sm:$0xff] }
 0x3be   : > { %4341 = vmatpush1.bf16.msra.mxu0 %v3833_v15  ;;  %v2942_v15 = vunpack.c.l.s8.bf16 %v2382_v27 }
 0x3bf   : > { %4505 = vmatpush1.bf16.msra.mxu1 %v3835_v35  ;;  %4342 = vmatprep.subr.bf16.mxu0 %v3850_v36  ;;  %v2381_v35 = vld [vmem:[%s6529_s15 + $0x1c0] sm:$0xff]  ;;  %v2944_v36 = vunpack.c.l.s8.bf16 %v2384_v28 }
 0x3c0   : > { %4506 = vmatprep.subr.bf16.mxu1 %v3852_v37  ;;  %v2383_v37 = vld [vmem:[%s6529_s15 + $0x1d0] sm:$0xff]  ;;  %v2941_v39 = vunpack.c.l.s8.bf16 %v2381_v35 }
 0x3c1   : > { %v2943_v40 = vunpack.c.l.s8.bf16 %v2383_v37  ;;  %v2959_v47 = vunpack.c.h.s8.bf16 %v2383_v37 }
 0x3c2   : > { %4343 = vmatpush1.bf16.msra.mxu0 %v3849_v42  ;;  %v2958_v42 = vunpack.c.h.s8.bf16 %v2382_v27 }
 0x3c3   : > { %4507 = vmatpush1.bf16.msra.mxu1 %v3851_v43  ;;  %4517 = vmatprep.subr.bf16.mxu0 %v2846_v45  ;;  %v2960_v43 = vunpack.c.h.s8.bf16 %v2384_v28  ;;  %v2398_v45 = vld [vmem:[%s6529_s15 + $0x248] sm:$0xff] }
 0x3c4   : > { %4681 = vmatprep.subr.bf16.mxu1 %v2848_v12  ;;  %v2957_v12 = vunpack.c.h.s8.bf16 %v2381_v35  ;;  %v2448_v35 = vld [vmem:[%s6529_s15 + $0x3d8] sm:$0xff] }
 0x3c5   : > { %4345 = vmatmul.mubr.bf16.vlgmr.msra.gmra.mrb[12].mxu0 %v6795_v33 }
 0x3c6   : > { %4509 = vmatmul.mubr.bf16.vlgmr.msra.gmra.mrb[12].mxu1 %v6795_v33  ;;  %4518 = vmatpush1.bf16.msra.mxu0 %v2845_v48  ;;  %v2974_v48 = vunpack.c.l.s8.bf16 %v2398_v45 }
 0x3c7   : > { %4549 = vmatprep.mubr.bf16.mxu0 %v6640_v21  ;;  %4682 = vmatpush1.bf16.msra.mxu1 %v2847_v49  ;;  %v2397_v49 = vld [vmem:[%s6529_s15 + $0x240] sm:$0xff] }
 0x3c8   : > { %4713 = vmatprep.mubr.bf16.mxu1 %v6640_v21  ;;  %4519 = vmatprep.subr.bf16.mxu0 %v2862_v50  ;;  %v2976_v50 = vunpack.c.l.s8.bf16 %v2400_v46 }
 0x3c9   : > { %4683 = vmatprep.subr.bf16.mxu1 %v2864_v51  ;;  %v2973_v51 = vunpack.c.l.s8.bf16 %v2397_v49 }
 0x3ca   : > { %4520 = vmatpush1.bf16.msra.mxu0 %v2861_v54  ;;  %v2990_v54 = vunpack.c.h.s8.bf16 %v2398_v45 }
 0x3cb   : > { %4684 = vmatpush1.bf16.msra.mxu1 %v2863_v53  ;;  %4521 = vmatprep.subr.bf16.mxu0 %v2878_v63  ;;  %v2992_v53 = vunpack.c.h.s8.bf16 %v2400_v46  ;;  %v2414_v63 = vld [vmem:[%s6529_s15 + $0x2c8] sm:$0xff] }
 0x3cc   : > { %4685 = vmatprep.subr.bf16.mxu1 %v2880_v1  ;;  %v2989_v1 = vunpack.c.h.s8.bf16 %v2397_v49  ;;  %v2464_v49 = vld [vmem:[%s6529_s15 + $0x458] sm:$0xff] }
 0x3ce   : > { %4522 = vmatpush1.bf16.msra.mxu0 %v2877_v4  ;;  %v3006_v4 = vunpack.c.l.s8.bf16 %v2414_v63 }
 0x3cf   : > { %4686 = vmatpush1.bf16.msra.mxu1 %v2879_v5  ;;  %4523 = vmatprep.subr.bf16.mxu0 %v2894_v3  ;;  %v2413_v5 = vld [vmem:[%s6529_s15 + $0x2c0] sm:$0xff]  ;;  %v3008_v3 = vunpack.c.l.s8.bf16 %v2416_v0 }
 0x3d0   : > { %4687 = vmatprep.subr.bf16.mxu1 %v2896_v59  ;;  %v2415_v59 = vld [vmem:[%s6529_s15 + $0x2d0] sm:$0xff]  ;;  %v3005_v56 = vunpack.c.l.s8.bf16 %v2413_v5 }
 0x3d1   : > { %v3007_v6 = vunpack.c.l.s8.bf16 %v2415_v59  ;;  %v3023_v17 = vunpack.c.h.s8.bf16 %v2415_v59 }
 0x3d2   : > { %4524 = vmatpush1.bf16.msra.mxu0 %v2893_v7  ;;  %v3022_v7 = vunpack.c.h.s8.bf16 %v2414_v63 }
 0x3d3   : > { %4688 = vmatpush1.bf16.msra.mxu1 %v2895_v8  ;;  %4525 = vmatprep.subr.bf16.mxu0 %v2910_v9  ;;  %v3024_v8 = vunpack.c.h.s8.bf16 %v2416_v0  ;;  %v2430_v9 = vld [vmem:[%s6529_s15 + $0x348] sm:$0xff] }
 0x3d4   : > { %4689 = vmatprep.subr.bf16.mxu1 %v2912_v16  ;;  %v3021_v16 = vunpack.c.h.s8.bf16 %v2413_v5  ;;  %v2480_v5 = vld [vmem:[%s6529_s15 + $0x4d8] sm:$0xff] }
 0x3d6   : > { %4526 = vmatpush1.bf16.msra.mxu0 %v2909_v20  ;;  %v3038_v20 = vunpack.c.l.s8.bf16 %v2430_v9 }
 0x3d7   : > { %4690 = vmatpush1.bf16.msra.mxu1 %v2911_v23  ;;  %4527 = vmatprep.subr.bf16.mxu0 %v2926_v25  ;;  %v2429_v23 = vld [vmem:[%s6529_s15 + $0x340] sm:$0xff]  ;;  %v3040_v25 = vunpack.c.l.s8.bf16 %v2432_v10 }
 0x3d8   : > { %4691 = vmatprep.subr.bf16.mxu1 %v2928_v62  ;;  %v2431_v62 = vld [vmem:[%s6529_s15 + $0x350] sm:$0xff]  ;;  %v3037_v27 = vunpack.c.l.s8.bf16 %v2429_v23 }
 0x3d9   : > { %v3039_v28 = vunpack.c.l.s8.bf16 %v2431_v62  ;;  %v3055_v37 = vunpack.c.h.s8.bf16 %v2431_v62 }
 0x3da   : > { %4528 = vmatpush1.bf16.msra.mxu0 %v2925_v30  ;;  %v3054_v30 = vunpack.c.h.s8.bf16 %v2430_v9 }
 0x3db   : > { %4692 = vmatpush1.bf16.msra.mxu1 %v2927_v32  ;;  %4529 = vmatprep.subr.bf16.mxu0 %v2942_v15  ;;  %v3056_v32 = vunpack.c.h.s8.bf16 %v2432_v10  ;;  %v2446_v15 = vld [vmem:[%s6529_s15 + $0x3c8] sm:$0xff] }
 0x3dc   : > { %4693 = vmatprep.subr.bf16.mxu1 %v2944_v36  ;;  %v3053_v36 = vunpack.c.h.s8.bf16 %v2429_v23  ;;  %v2496_v23 = vld [vmem:[%s6529_s15 + $0x558] sm:$0xff] }
 0x3de   : > { %4530 = vmatpush1.bf16.msra.mxu0 %v2941_v39  ;;  %v3070_v39 = vunpack.c.l.s8.bf16 %v2446_v15 }
 0x3df   : > { %4694 = vmatpush1.bf16.msra.mxu1 %v2943_v40  ;;  %4531 = vmatprep.subr.bf16.mxu0 %v2958_v42  ;;  %v2445_v40 = vld [vmem:[%s6529_s15 + $0x3c0] sm:$0xff]  ;;  %v3072_v42 = vunpack.c.l.s8.bf16 %v2448_v35 }
 0x3e0   : > { %4695 = vmatprep.subr.bf16.mxu1 %v2960_v43  ;;  %v2447_v43 = vld [vmem:[%s6529_s15 + $0x3d0] sm:$0xff]  ;;  %v3069_v45 = vunpack.c.l.s8.bf16 %v2445_v40 }
 0x3e1   : > { %v3071_v46 = vunpack.c.l.s8.bf16 %v2447_v43  ;;  %v3087_v57 = vunpack.c.h.s8.bf16 %v2447_v43 }
 0x3e2   : > { %4532 = vmatpush1.bf16.msra.mxu0 %v2957_v12  ;;  %v3086_v12 = vunpack.c.h.s8.bf16 %v2446_v15 }
 0x3e3   : > { %4696 = vmatpush1.bf16.msra.mxu1 %v2959_v47  ;;  %4533 = vmatprep.subr.bf16.mxu0 %v2974_v48  ;;  %v3088_v47 = vunpack.c.h.s8.bf16 %v2448_v35  ;;  %v2462_v48 = vld [vmem:[%s6529_s15 + $0x448] sm:$0xff] }
 0x3e4   : > { %4697 = vmatprep.subr.bf16.mxu1 %v2976_v50  ;;  %v3085_v50 = vunpack.c.h.s8.bf16 %v2445_v40  ;;  %v2512_v40 = vld [vmem:[%s6529_s15 + $0x5d8] sm:$0xff] }
 0x3e6   : > { %4534 = vmatpush1.bf16.msra.mxu0 %v2973_v51  ;;  %v3102_v51 = vunpack.c.l.s8.bf16 %v2462_v48 }
 0x3e7   : > { %4698 = vmatpush1.bf16.msra.mxu1 %v2975_v52  ;;  %4535 = vmatprep.subr.bf16.mxu0 %v2990_v54  ;;  %v2461_v52 = vld [vmem:[%s6529_s15 + $0x440] sm:$0xff]  ;;  %v3104_v54 = vunpack.c.l.s8.bf16 %v2464_v49 }
 0x3e8   : > { %4699 = vmatprep.subr.bf16.mxu1 %v2992_v53  ;;  %v2463_v53 = vld [vmem:[%s6529_s15 + $0x450] sm:$0xff]  ;;  %v3101_v63 = vunpack.c.l.s8.bf16 %v2461_v52 }
 0x3e9   : > { %v3103_v0 = vunpack.c.l.s8.bf16 %v2463_v53  ;;  %v3119_v59 = vunpack.c.h.s8.bf16 %v2463_v53 }
 0x3ea   : > { %4536 = vmatpush1.bf16.msra.mxu0 %v2989_v1  ;;  %v3118_v1 = vunpack.c.h.s8.bf16 %v2462_v48 }
 0x3eb   : > { %4700 = vmatpush1.bf16.msra.mxu1 %v2991_v2  ;;  %4537 = vmatprep.subr.bf16.mxu0 %v3006_v4  ;;  %v2478_v2 = vld [vmem:[%s6529_s15 + $0x4c8] sm:$0xff]  ;;  %v3120_v4 = vunpack.c.h.s8.bf16 %v2464_v49 }
 0x3ec   : > { %4701 = vmatprep.subr.bf16.mxu1 %v3008_v3  ;;  %v3117_v3 = vunpack.c.h.s8.bf16 %v2461_v52  ;;  %v2528_v52 = vld [vmem:[%s6529_s15 + $0x658] sm:$0xff] }
 0x3ee   : > { %4538 = vmatpush1.bf16.msra.mxu0 %v3005_v56  ;;  %v3134_v56 = vunpack.c.l.s8.bf16 %v2478_v2 }
 0x3ef   : > { %4702 = vmatpush1.bf16.msra.mxu1 %v3007_v6  ;;  %4539 = vmatprep.subr.bf16.mxu0 %v3022_v7  ;;  %v2477_v6 = vld [vmem:[%s6529_s15 + $0x4c0] sm:$0xff]  ;;  %v3136_v7 = vunpack.c.l.s8.bf16 %v2480_v5 }
 0x3f0   : > { %4703 = vmatprep.subr.bf16.mxu1 %v3024_v8  ;;  %v2479_v8 = vld [vmem:[%s6529_s15 + $0x4d0] sm:$0xff]  ;;  %v3133_v9 = vunpack.c.l.s8.bf16 %v2477_v6 }
 0x3f1   : > { %v3135_v10 = vunpack.c.l.s8.bf16 %v2479_v8  ;;  %v3151_v62 = vunpack.c.h.s8.bf16 %v2479_v8 }
 0x3f2   : > { %4540 = vmatpush1.bf16.msra.mxu0 %v3021_v16  ;;  %v3150_v16 = vunpack.c.h.s8.bf16 %v2478_v2  ;;  %v2527_v2 = vld [vmem:[%s6529_s15 + $0x650] sm:$0xff] }
 0x3f3   : > { %4704 = vmatpush1.bf16.msra.mxu1 %v3023_v17  ;;  %4541 = vmatprep.subr.bf16.mxu0 %v3038_v20  ;;  %v3152_v17 = vunpack.c.h.s8.bf16 %v2480_v5  ;;  %v2494_v20 = vld [vmem:[%s6529_s15 + $0x548] sm:$0xff]  ;;  %v3231_v5 = vunpack.c.l.s8.bf16 %v2527_v2  ;;  %v3247_v8 = vunpack.c.h.s8.bf16 %v2527_v2 }
 0x3f4   : > { %4705 = vmatprep.subr.bf16.mxu1 %v3040_v25  ;;  %v3149_v25 = vunpack.c.h.s8.bf16 %v2477_v6  ;;  %v2544_v6 = vld [vmem:[%s6529_s15 + $0x6d8] sm:$0xff] }
 0x3f6   : > { %4542 = vmatpush1.bf16.msra.mxu0 %v3037_v27  ;;  %v3166_v27 = vunpack.c.l.s8.bf16 %v2494_v20 }
 0x3f7   : > { %4706 = vmatpush1.bf16.msra.mxu1 %v3039_v28  ;;  %4543 = vmatprep.subr.bf16.mxu0 %v3054_v30  ;;  %v2493_v28 = vld [vmem:[%s6529_s15 + $0x540] sm:$0xff]  ;;  %v3168_v30 = vunpack.c.l.s8.bf16 %v2496_v23 }
 0x3f8   : > { %4707 = vmatprep.subr.bf16.mxu1 %v3056_v32  ;;  %v2495_v32 = vld [vmem:[%s6529_s15 + $0x550] sm:$0xff]  ;;  %v3165_v15 = vunpack.c.l.s8.bf16 %v2493_v28 }
 0x3f9   : > { %v3167_v35 = vunpack.c.l.s8.bf16 %v2495_v32  ;;  %v3183_v43 = vunpack.c.h.s8.bf16 %v2495_v32 }
 0x3fa   : > { %4544 = vmatpush1.bf16.msra.mxu0 %v3053_v36  ;;  %v3182_v36 = vunpack.c.h.s8.bf16 %v2494_v20 }
 0x3fb   : > { %4708 = vmatpush1.bf16.msra.mxu1 %v3055_v37  ;;  %4545 = vmatprep.subr.bf16.mxu0 %v3070_v39  ;;  %v3184_v37 = vunpack.c.h.s8.bf16 %v2496_v23  ;;  %v2510_v39 = vld [vmem:[%s6529_s15 + $0x5c8] sm:$0xff] }
 0x3fc   : > { %4709 = vmatprep.subr.bf16.mxu1 %v3072_v42  ;;  %v3181_v42 = vunpack.c.h.s8.bf16 %v2493_v28  ;;  %v2560_v28 = vld [vmem:[%s6529_s15 + $0x758] sm:$0xff] }
 0x3fe   : > { %4546 = vmatpush1.bf16.msra.mxu0 %v3069_v45  ;;  %v3198_v45 = vunpack.c.l.s8.bf16 %v2510_v39 }
 0x3ff   : > { %4710 = vmatpush1.bf16.msra.mxu1 %v3071_v46  ;;  %4547 = vmatprep.subr.bf16.mxu0 %v3086_v12  ;;  %v2509_v46 = vld [vmem:[%s6529_s15 + $0x5c0] sm:$0xff]  ;;  %v3200_v12 = vunpack.c.l.s8.bf16 %v2512_v40 }
 0x400   : > { %4711 = vmatprep.subr.bf16.mxu1 %v3088_v47  ;;  %v2511_v47 = vld [vmem:[%s6529_s15 + $0x5d0] sm:$0xff]  ;;  %v3197_v48 = vunpack.c.l.s8.bf16 %v2509_v46 }
 0x401   : > { %v3199_v49 = vunpack.c.l.s8.bf16 %v2511_v47  ;;  %v3215_v53 = vunpack.c.h.s8.bf16 %v2511_v47 }
 0x402   : > { %4548 = vmatpush1.bf16.msra.mxu0 %v3085_v50  ;;  %v3214_v50 = vunpack.c.h.s8.bf16 %v2510_v39 }
 0x403   : > { %4712 = vmatpush1.bf16.msra.mxu1 %v3087_v57  ;;  %4558 = vmatprep.subr.bf16.mxu0 %v3102_v51  ;;  %v3216_v57 = vunpack.c.h.s8.bf16 %v2512_v40  ;;  %v2526_v51 = vld [vmem:[%s6529_s15 + $0x648] sm:$0xff] }
 0x404   : > { %4722 = vmatprep.subr.bf16.mxu1 %v3104_v54  ;;  %v3213_v54 = vunpack.c.h.s8.bf16 %v2509_v46  ;;  %v2576_v46 = vld [vmem:[%s6529_s15 + $0x7d8] sm:$0xff] }
 0x405   : > { %4550 = vmatmul.mubr.bf16.vlgmr.msra.gmra.mrb[16].mxu0 %v6642_v26 }
 0x406   : > { %4714 = vmatmul.mubr.bf16.vlgmr.msra.gmra.mrb[16].mxu1 %v6642_v26  ;;  %4559 = vmatpush1.bf16.msra.mxu0 %v3101_v63  ;;  %v3230_v63 = vunpack.c.l.s8.bf16 %v2526_v51 }
 0x407   : > { %4590 = vmatprep.mubr.bf16.mxu0 %v6650_v31  ;;  %4723 = vmatpush1.bf16.msra.mxu1 %v3103_v0  ;;  %v2525_v0 = vld [vmem:[%s6529_s15 + $0x640] sm:$0xff] }
 0x408   : > { %4754 = vmatprep.mubr.bf16.mxu1 %v6650_v31  ;;  %4560 = vmatprep.subr.bf16.mxu0 %v3118_v1  ;;  %v3232_v1 = vunpack.c.l.s8.bf16 %v2528_v52 }
 0x409   : > { %4724 = vmatprep.subr.bf16.mxu1 %v3120_v4  ;;  %v3229_v4 = vunpack.c.l.s8.bf16 %v2525_v0 }
 0x40a   : > { %4561 = vmatpush1.bf16.msra.mxu0 %v3117_v3  ;;  %v3246_v3 = vunpack.c.h.s8.bf16 %v2526_v51 }
 0x40b   : > { %4725 = vmatpush1.bf16.msra.mxu1 %v3119_v59  ;;  %4562 = vmatprep.subr.bf16.mxu0 %v3134_v56  ;;  %v3248_v59 = vunpack.c.h.s8.bf16 %v2528_v52  ;;  %v2542_v56 = vld [vmem:[%s6529_s15 + $0x6c8] sm:$0xff] }
 0x40c   : > { %4726 = vmatprep.subr.bf16.mxu1 %v3136_v7  ;;  %v3245_v7 = vunpack.c.h.s8.bf16 %v2525_v0  ;;  %v2592_v0 = vld [vmem:[%s6529_s15 + $0x858] sm:$0xff] }
 0x40e   : > { %4563 = vmatpush1.bf16.msra.mxu0 %v3133_v9  ;;  %v3262_v9 = vunpack.c.l.s8.bf16 %v2542_v56 }
 0x40f   : > { %4727 = vmatpush1.bf16.msra.mxu1 %v3135_v10  ;;  %4564 = vmatprep.subr.bf16.mxu0 %v3150_v16  ;;  %v2541_v10 = vld [vmem:[%s6529_s15 + $0x6c0] sm:$0xff]  ;;  %v3264_v16 = vunpack.c.l.s8.bf16 %v2544_v6 }
 0x410   : > { %4728 = vmatprep.subr.bf16.mxu1 %v3152_v17  ;;  %v2543_v17 = vld [vmem:[%s6529_s15 + $0x6d0] sm:$0xff]  ;;  %v3261_v20 = vunpack.c.l.s8.bf16 %v2541_v10 }
 0x411   : > { %v3263_v23 = vunpack.c.l.s8.bf16 %v2543_v17  ;;  %v3279_v32 = vunpack.c.h.s8.bf16 %v2543_v17 }
 0x412   : > { %4565 = vmatpush1.bf16.msra.mxu0 %v3149_v25  ;;  %v3278_v25 = vunpack.c.h.s8.bf16 %v2542_v56 }
 0x413   : > { %4729 = vmatpush1.bf16.msra.mxu1 %v3151_v62  ;;  %4566 = vmatprep.subr.bf16.mxu0 %v3166_v27  ;;  %v3280_v62 = vunpack.c.h.s8.bf16 %v2544_v6  ;;  %v2558_v27 = vld [vmem:[%s6529_s15 + $0x748] sm:$0xff] }
 0x414   : > { %4730 = vmatprep.subr.bf16.mxu1 %v3168_v30  ;;  %v3277_v30 = vunpack.c.h.s8.bf16 %v2541_v10  ;;  %v2608_v10 = vld [vmem:[%s6529_s15 + $0x8d8] sm:$0xff] }
 0x416   : > { %4567 = vmatpush1.bf16.msra.mxu0 %v3165_v15  ;;  %v3294_v15 = vunpack.c.l.s8.bf16 %v2558_v27 }
 0x417   : > { %4731 = vmatpush1.bf16.msra.mxu1 %v3167_v35  ;;  %4568 = vmatprep.subr.bf16.mxu0 %v3182_v36  ;;  %v2557_v35 = vld [vmem:[%s6529_s15 + $0x740] sm:$0xff]  ;;  %v3296_v36 = vunpack.c.l.s8.bf16 %v2560_v28 }
 0x418   : > { %4732 = vmatprep.subr.bf16.mxu1 %v3184_v37  ;;  %v2559_v37 = vld [vmem:[%s6529_s15 + $0x750] sm:$0xff]  ;;  %v3293_v39 = vunpack.c.l.s8.bf16 %v2557_v35 }
 0x419   : > { %v3295_v40 = vunpack.c.l.s8.bf16 %v2559_v37  ;;  %v3311_v47 = vunpack.c.h.s8.bf16 %v2559_v37 }
 0x41a   : > { %4569 = vmatpush1.bf16.msra.mxu0 %v3181_v42  ;;  %v3310_v42 = vunpack.c.h.s8.bf16 %v2558_v27 }
 0x41b   : > { %4733 = vmatpush1.bf16.msra.mxu1 %v3183_v43  ;;  %4570 = vmatprep.subr.bf16.mxu0 %v3198_v45  ;;  %v3312_v43 = vunpack.c.h.s8.bf16 %v2560_v28  ;;  %v2574_v45 = vld [vmem:[%s6529_s15 + $0x7c8] sm:$0xff] }
 0x41c   : > { %4734 = vmatprep.subr.bf16.mxu1 %v3200_v12  ;;  %v3309_v12 = vunpack.c.h.s8.bf16 %v2557_v35  ;;  %v2624_v35 = vld [vmem:[%s6529_s15 + $0x958] sm:$0xff] }
 0x41e   : > { %4571 = vmatpush1.bf16.msra.mxu0 %v3197_v48  ;;  %v3326_v48 = vunpack.c.l.s8.bf16 %v2574_v45 }
 0x41f   : > { %4735 = vmatpush1.bf16.msra.mxu1 %v3199_v49  ;;  %4572 = vmatprep.subr.bf16.mxu0 %v3214_v50  ;;  %v2573_v49 = vld [vmem:[%s6529_s15 + $0x7c0] sm:$0xff]  ;;  %v3328_v50 = vunpack.c.l.s8.bf16 %v2576_v46 }
 0x420   : > { %4736 = vmatprep.subr.bf16.mxu1 %v3216_v57  ;;  %v2575_v57 = vld [vmem:[%s6529_s15 + $0x7d0] sm:$0xff]  ;;  %v3325_v51 = vunpack.c.l.s8.bf16 %v2573_v49 }
 0x421   : > { %v3327_v52 = vunpack.c.l.s8.bf16 %v2575_v57  ;;  %v3343_v2 = vunpack.c.h.s8.bf16 %v2575_v57 }
 0x422   : > { %4573 = vmatpush1.bf16.msra.mxu0 %v3213_v54  ;;  %v3342_v54 = vunpack.c.h.s8.bf16 %v2574_v45 }
 0x423   : > { %4737 = vmatpush1.bf16.msra.mxu1 %v3215_v53  ;;  %4574 = vmatprep.subr.bf16.mxu0 %v3230_v63  ;;  %v3344_v53 = vunpack.c.h.s8.bf16 %v2576_v46  ;;  %v2590_v63 = vld [vmem:[%s6529_s15 + $0x848] sm:$0xff] }
 0x424   : > { %4738 = vmatprep.subr.bf16.mxu1 %v3232_v1  ;;  %v3341_v1 = vunpack.c.h.s8.bf16 %v2573_v49  ;;  %v2640_v49 = vld [vmem:[%s6529_s15 + $0x9d8] sm:$0xff] }
 0x426   : > { %4575 = vmatpush1.bf16.msra.mxu0 %v3229_v4  ;;  %v3358_v4 = vunpack.c.l.s8.bf16 %v2590_v63 }
 0x427   : > { %4739 = vmatpush1.bf16.msra.mxu1 %v3231_v5  ;;  %4576 = vmatprep.subr.bf16.mxu0 %v3246_v3  ;;  %v2589_v5 = vld [vmem:[%s6529_s15 + $0x840] sm:$0xff]  ;;  %v3360_v3 = vunpack.c.l.s8.bf16 %v2592_v0 }
 0x428   : > { %4740 = vmatprep.subr.bf16.mxu1 %v3248_v59  ;;  %v2591_v59 = vld [vmem:[%s6529_s15 + $0x850] sm:$0xff]  ;;  %v3357_v56 = vunpack.c.l.s8.bf16 %v2589_v5 }
 0x429   : > { %v3359_v6 = vunpack.c.l.s8.bf16 %v2591_v59  ;;  %v3375_v17 = vunpack.c.h.s8.bf16 %v2591_v59 }
 0x42a   : > { %4577 = vmatpush1.bf16.msra.mxu0 %v3245_v7  ;;  %v3374_v7 = vunpack.c.h.s8.bf16 %v2590_v63 }
 0x42b   : > { %4741 = vmatpush1.bf16.msra.mxu1 %v3247_v8  ;;  %4578 = vmatprep.subr.bf16.mxu0 %v3262_v9  ;;  %v2606_v8 = vld [vmem:[%s6529_s15 + $0x8c8] sm:$0xff]  ;;  %v3376_v9 = vunpack.c.h.s8.bf16 %v2592_v0 }
 0x42c   : > { %4742 = vmatprep.subr.bf16.mxu1 %v3264_v16  ;;  %v3373_v16 = vunpack.c.h.s8.bf16 %v2589_v5  ;;  %v2656_v5 = vld [vmem:[%s6529_s15 + $0xa58] sm:$0xff] }
 0x42e   : > { %4579 = vmatpush1.bf16.msra.mxu0 %v3261_v20  ;;  %v3390_v20 = vunpack.c.l.s8.bf16 %v2606_v8 }
 0x42f   : > { %4743 = vmatpush1.bf16.msra.mxu1 %v3263_v23  ;;  %4580 = vmatprep.subr.bf16.mxu0 %v3278_v25  ;;  %v2605_v23 = vld [vmem:[%s6529_s15 + $0x8c0] sm:$0xff]  ;;  %v3392_v25 = vunpack.c.l.s8.bf16 %v2608_v10 }
 0x430   : > { %4744 = vmatprep.subr.bf16.mxu1 %v3280_v62  ;;  %v2607_v62 = vld [vmem:[%s6529_s15 + $0x8d0] sm:$0xff]  ;;  %v3389_v27 = vunpack.c.l.s8.bf16 %v2605_v23 }
 0x431   : > { %v3391_v28 = vunpack.c.l.s8.bf16 %v2607_v62  ;;  %v3407_v37 = vunpack.c.h.s8.bf16 %v2607_v62 }
 0x432   : > { %4581 = vmatpush1.bf16.msra.mxu0 %v3277_v30  ;;  %v3406_v30 = vunpack.c.h.s8.bf16 %v2606_v8  ;;  %v2655_v8 = vld [vmem:[%s6529_s15 + $0xa50] sm:$0xff] }
 0x433   : > { %4745 = vmatpush1.bf16.msra.mxu1 %v3279_v32  ;;  %4582 = vmatprep.subr.bf16.mxu0 %v3294_v15  ;;  %v3408_v32 = vunpack.c.h.s8.bf16 %v2608_v10  ;;  %v2622_v15 = vld [vmem:[%s6529_s15 + $0x948] sm:$0xff]  ;;  %v3487_v10 = vunpack.c.l.s8.bf16 %v2655_v8  ;;  %v3503_v62 = vunpack.c.h.s8.bf16 %v2655_v8 }
 0x434   : > { %4746 = vmatprep.subr.bf16.mxu1 %v3296_v36  ;;  %v3405_v36 = vunpack.c.h.s8.bf16 %v2605_v23  ;;  %v2672_v23 = vld [vmem:[%s6529_s15 + $0xad8] sm:$0xff] }
 0x436   : > { %4583 = vmatpush1.bf16.msra.mxu0 %v3293_v39  ;;  %v3422_v39 = vunpack.c.l.s8.bf16 %v2622_v15 }
 0x437   : > { %4747 = vmatpush1.bf16.msra.mxu1 %v3295_v40  ;;  %4584 = vmatprep.subr.bf16.mxu0 %v3310_v42  ;;  %v2621_v40 = vld [vmem:[%s6529_s15 + $0x940] sm:$0xff]  ;;  %v3424_v42 = vunpack.c.l.s8.bf16 %v2624_v35 }
 0x438   : > { %4748 = vmatprep.subr.bf16.mxu1 %v3312_v43  ;;  %v2623_v43 = vld [vmem:[%s6529_s15 + $0x950] sm:$0xff]  ;;  %v3421_v45 = vunpack.c.l.s8.bf16 %v2621_v40 }
 0x439   : > { %v3423_v46 = vunpack.c.l.s8.bf16 %v2623_v43  ;;  %v3439_v57 = vunpack.c.h.s8.bf16 %v2623_v43 }
 0x43a   : > { %4585 = vmatpush1.bf16.msra.mxu0 %v3309_v12  ;;  %v3438_v12 = vunpack.c.h.s8.bf16 %v2622_v15 }
 0x43b   : > { %4749 = vmatpush1.bf16.msra.mxu1 %v3311_v47  ;;  %4586 = vmatprep.subr.bf16.mxu0 %v3326_v48  ;;  %v3440_v47 = vunpack.c.h.s8.bf16 %v2624_v35  ;;  %v2638_v48 = vld [vmem:[%s6529_s15 + $0x9c8] sm:$0xff] }
 0x43c   : > { %4750 = vmatprep.subr.bf16.mxu1 %v3328_v50  ;;  %v3437_v50 = vunpack.c.h.s8.bf16 %v2621_v40  ;;  %v2688_v40 = vld [vmem:[%s6529_s15 + $0xb58] sm:$0xff] }
 0x43e   : > { %4587 = vmatpush1.bf16.msra.mxu0 %v3325_v51  ;;  %v3454_v51 = vunpack.c.l.s8.bf16 %v2638_v48 }
 0x43f   : > { %4751 = vmatpush1.bf16.msra.mxu1 %v3327_v52  ;;  %4588 = vmatprep.subr.bf16.mxu0 %v3342_v54  ;;  %v2637_v52 = vld [vmem:[%s6529_s15 + $0x9c0] sm:$0xff]  ;;  %v3456_v54 = vunpack.c.l.s8.bf16 %v2640_v49 }
 0x440   : > { %4752 = vmatprep.subr.bf16.mxu1 %v3344_v53  ;;  %v2639_v53 = vld [vmem:[%s6529_s15 + $0x9d0] sm:$0xff]  ;;  %v3453_v63 = vunpack.c.l.s8.bf16 %v2637_v52 }
 0x441   : > { %v3455_v0 = vunpack.c.l.s8.bf16 %v2639_v53  ;;  %v3471_v59 = vunpack.c.h.s8.bf16 %v2639_v53 }
 0x442   : > { %4589 = vmatpush1.bf16.msra.mxu0 %v3341_v1  ;;  %v3470_v1 = vunpack.c.h.s8.bf16 %v2638_v48 }
 0x443   : > { %4753 = vmatpush1.bf16.msra.mxu1 %v3343_v2  ;;  %4599 = vmatprep.subr.bf16.mxu0 %v3358_v4  ;;  %v3472_v2 = vunpack.c.h.s8.bf16 %v2640_v49  ;;  %v2654_v4 = vld [vmem:[%s6529_s15 + $0xa48] sm:$0xff] }
 0x444   : > { %4763 = vmatprep.subr.bf16.mxu1 %v3360_v3  ;;  %v3469_v3 = vunpack.c.h.s8.bf16 %v2637_v52  ;;  %v2704_v52 = vld [vmem:[%s6529_s15 + $0xbd8] sm:$0xff] }
 0x445   : > { %4591 = vmatmul.mubr.bf16.vlgmr.msra.gmra.mrb[16].mxu0 %v6692_v13 }
 0x446   : > { %4755 = vmatmul.mubr.bf16.vlgmr.msra.gmra.mrb[16].mxu1 %v6692_v13  ;;  %4600 = vmatpush1.bf16.msra.mxu0 %v3357_v56  ;;  %v3486_v56 = vunpack.c.l.s8.bf16 %v2654_v4 }
 0x447   : > { %4631 = vmatprep.mubr.bf16.mxu0 %v6746_v24  ;;  %4764 = vmatpush1.bf16.msra.mxu1 %v3359_v6  ;;  %v2653_v6 = vld [vmem:[%s6529_s15 + $0xa40] sm:$0xff] }
 0x448   : > { %4795 = vmatprep.mubr.bf16.mxu1 %v6746_v24  ;;  %4601 = vmatprep.subr.bf16.mxu0 %v3374_v7  ;;  %v3488_v7 = vunpack.c.l.s8.bf16 %v2656_v5 }
 0x449   : > { %4765 = vmatprep.subr.bf16.mxu1 %v3376_v9  ;;  %v3485_v9 = vunpack.c.l.s8.bf16 %v2653_v6 }
 0x44a   : > { %4602 = vmatpush1.bf16.msra.mxu0 %v3373_v16  ;;  %v3502_v16 = vunpack.c.h.s8.bf16 %v2654_v4 }
 0x44b   : > { %4766 = vmatpush1.bf16.msra.mxu1 %v3375_v17  ;;  %4603 = vmatprep.subr.bf16.mxu0 %v3390_v20  ;;  %v3504_v17 = vunpack.c.h.s8.bf16 %v2656_v5  ;;  %v2670_v20 = vld [vmem:[%s6529_s15 + $0xac8] sm:$0xff] }
 0x44c   : > { %4767 = vmatprep.subr.bf16.mxu1 %v3392_v25  ;;  %v3501_v25 = vunpack.c.h.s8.bf16 %v2653_v6  ;;  %v2720_v6 = vld [vmem:[%s6529_s15 + $0xc58] sm:$0xff] }
 0x44e   : > { %4604 = vmatpush1.bf16.msra.mxu0 %v3389_v27  ;;  %v3518_v27 = vunpack.c.l.s8.bf16 %v2670_v20 }
 0x44f   : > { %4768 = vmatpush1.bf16.msra.mxu1 %v3391_v28  ;;  %4605 = vmatprep.subr.bf16.mxu0 %v3406_v30  ;;  %v2669_v28 = vld [vmem:[%s6529_s15 + $0xac0] sm:$0xff]  ;;  %v3520_v30 = vunpack.c.l.s8.bf16 %v2672_v23 }
 0x450   : > { %4769 = vmatprep.subr.bf16.mxu1 %v3408_v32  ;;  %v2671_v32 = vld [vmem:[%s6529_s15 + $0xad0] sm:$0xff]  ;;  %v3517_v15 = vunpack.c.l.s8.bf16 %v2669_v28 }
 0x451   : > { %v3519_v35 = vunpack.c.l.s8.bf16 %v2671_v32  ;;  %v3535_v43 = vunpack.c.h.s8.bf16 %v2671_v32 }
 0x452   : > { %4606 = vmatpush1.bf16.msra.mxu0 %v3405_v36  ;;  %v3534_v36 = vunpack.c.h.s8.bf16 %v2670_v20 }
 0x453   : > { %4770 = vmatpush1.bf16.msra.mxu1 %v3407_v37  ;;  %4607 = vmatprep.subr.bf16.mxu0 %v3422_v39  ;;  %v3536_v37 = vunpack.c.h.s8.bf16 %v2672_v23  ;;  %v2686_v39 = vld [vmem:[%s6529_s15 + $0xb48] sm:$0xff] }
 0x454   : > { %4771 = vmatprep.subr.bf16.mxu1 %v3424_v42  ;;  %v3533_v42 = vunpack.c.h.s8.bf16 %v2669_v28  ;;  %v2736_v28 = vld [vmem:[%s6529_s15 + $0xcd8] sm:$0xff] }
 0x456   : > { %4608 = vmatpush1.bf16.msra.mxu0 %v3421_v45  ;;  %v3550_v45 = vunpack.c.l.s8.bf16 %v2686_v39 }
 0x457   : > { %4772 = vmatpush1.bf16.msra.mxu1 %v3423_v46  ;;  %4609 = vmatprep.subr.bf16.mxu0 %v3438_v12  ;;  %v2685_v46 = vld [vmem:[%s6529_s15 + $0xb40] sm:$0xff]  ;;  %v3552_v12 = vunpack.c.l.s8.bf16 %v2688_v40 }
 0x458   : > { %4773 = vmatprep.subr.bf16.mxu1 %v3440_v47  ;;  %v2687_v47 = vld [vmem:[%s6529_s15 + $0xb50] sm:$0xff]  ;;  %v3549_v48 = vunpack.c.l.s8.bf16 %v2685_v46 }
 0x459   : > { %v3551_v49 = vunpack.c.l.s8.bf16 %v2687_v47  ;;  %v3567_v53 = vunpack.c.h.s8.bf16 %v2687_v47 }
 0x45a   : > { %4610 = vmatpush1.bf16.msra.mxu0 %v3437_v50  ;;  %v3566_v50 = vunpack.c.h.s8.bf16 %v2686_v39 }
 0x45b   : > { %4774 = vmatpush1.bf16.msra.mxu1 %v3439_v57  ;;  %4611 = vmatprep.subr.bf16.mxu0 %v3454_v51  ;;  %v3568_v57 = vunpack.c.h.s8.bf16 %v2688_v40  ;;  %v2702_v51 = vld [vmem:[%s6529_s15 + $0xbc8] sm:$0xff] }
 0x45c   : > { %4775 = vmatprep.subr.bf16.mxu1 %v3456_v54  ;;  %v3565_v54 = vunpack.c.h.s8.bf16 %v2685_v46  ;;  %v2752_v46 = vld [vmem:[%s6529_s15 + $0xd58] sm:$0xff] }
 0x45e   : > { %4612 = vmatpush1.bf16.msra.mxu0 %v3453_v63  ;;  %v3582_v63 = vunpack.c.l.s8.bf16 %v2702_v51 }
 0x45f   : > { %4776 = vmatpush1.bf16.msra.mxu1 %v3455_v0  ;;  %4613 = vmatprep.subr.bf16.mxu0 %v3470_v1  ;;  %v2701_v0 = vld [vmem:[%s6529_s15 + $0xbc0] sm:$0xff]  ;;  %v3584_v1 = vunpack.c.l.s8.bf16 %v2704_v52 }
 0x460   : > { %4777 = vmatprep.subr.bf16.mxu1 %v3472_v2  ;;  %v2703_v2 = vld [vmem:[%s6529_s15 + $0xbd0] sm:$0xff]  ;;  %v3581_v4 = vunpack.c.l.s8.bf16 %v2701_v0 }
 0x461   : > { %v3583_v5 = vunpack.c.l.s8.bf16 %v2703_v2  ;;  %v3599_v8 = vunpack.c.h.s8.bf16 %v2703_v2 }
 0x462   : > { %4614 = vmatpush1.bf16.msra.mxu0 %v3469_v3  ;;  %v3598_v3 = vunpack.c.h.s8.bf16 %v2702_v51 }
 0x463   : > { %4778 = vmatpush1.bf16.msra.mxu1 %v3471_v59  ;;  %4615 = vmatprep.subr.bf16.mxu0 %v3486_v56  ;;  %v3600_v59 = vunpack.c.h.s8.bf16 %v2704_v52  ;;  %v2718_v56 = vld [vmem:[%s6529_s15 + $0xc48] sm:$0xff] }
 0x464   : > { %4779 = vmatprep.subr.bf16.mxu1 %v3488_v7  ;;  %v3597_v7 = vunpack.c.h.s8.bf16 %v2701_v0  ;;  %v2768_v0 = vld [vmem:[%s6529_s15 + $0xdd8] sm:$0xff] }
 0x466   : > { %4616 = vmatpush1.bf16.msra.mxu0 %v3485_v9  ;;  %v3614_v9 = vunpack.c.l.s8.bf16 %v2718_v56 }
 0x467   : > { %4780 = vmatpush1.bf16.msra.mxu1 %v3487_v10  ;;  %4617 = vmatprep.subr.bf16.mxu0 %v3502_v16  ;;  %v2717_v10 = vld [vmem:[%s6529_s15 + $0xc40] sm:$0xff]  ;;  %v3616_v16 = vunpack.c.l.s8.bf16 %v2720_v6 }
 0x468   : > { %4781 = vmatprep.subr.bf16.mxu1 %v3504_v17  ;;  %v2719_v17 = vld [vmem:[%s6529_s15 + $0xc50] sm:$0xff]  ;;  %v3613_v20 = vunpack.c.l.s8.bf16 %v2717_v10 }
 0x469   : > { %v3615_v23 = vunpack.c.l.s8.bf16 %v2719_v17  ;;  %v3631_v32 = vunpack.c.h.s8.bf16 %v2719_v17 }
 0x46a   : > { %4618 = vmatpush1.bf16.msra.mxu0 %v3501_v25  ;;  %v3630_v25 = vunpack.c.h.s8.bf16 %v2718_v56  ;;  %v2767_v56 = vld [vmem:[%s6529_s15 + $0xdd0] sm:$0xff] }
 0x46b   : > { %4782 = vmatpush1.bf16.msra.mxu1 %v3503_v62  ;;  %4619 = vmatprep.subr.bf16.mxu0 %v3518_v27  ;;  %v2734_v62 = vld [vmem:[%s6529_s15 + $0xcc8] sm:$0xff]  ;;  %v3632_v27 = vunpack.c.h.s8.bf16 %v2720_v6 }
 0x46c   : > { %4783 = vmatprep.subr.bf16.mxu1 %v3520_v30  ;;  %v3629_v30 = vunpack.c.h.s8.bf16 %v2717_v10 }
 0x46e   : > { %4620 = vmatpush1.bf16.msra.mxu0 %v3517_v15  ;;  %v3646_v15 = vunpack.c.l.s8.bf16 %v2734_v62 }
 0x46f   : > { %4784 = vmatpush1.bf16.msra.mxu1 %v3519_v35  ;;  %4621 = vmatprep.subr.bf16.mxu0 %v3534_v36  ;;  %v2733_v35 = vld [vmem:[%s6529_s15 + $0xcc0] sm:$0xff]  ;;  %v3648_v36 = vunpack.c.l.s8.bf16 %v2736_v28 }
 0x470   : > { %4785 = vmatprep.subr.bf16.mxu1 %v3536_v37  ;;  %v2735_v37 = vld [vmem:[%s6529_s15 + $0xcd0] sm:$0xff]  ;;  %v3645_v39 = vunpack.c.l.s8.bf16 %v2733_v35 }
 0x471   : > { %v3647_v40 = vunpack.c.l.s8.bf16 %v2735_v37  ;;  %v3663_v47 = vunpack.c.h.s8.bf16 %v2735_v37  ;;  %v2783_v37 = vld [vmem:[%s6529_s15 + $0xe50] sm:$0xff] }
 0x472   : > { %4622 = vmatpush1.bf16.msra.mxu0 %v3533_v42  ;;  %v3662_v42 = vunpack.c.h.s8.bf16 %v2734_v62  ;;  %v3728_v62 = vunpack.c.h.s8.bf16 %v2768_v0 }
 0x473   : > { %4786 = vmatpush1.bf16.msra.mxu1 %v3535_v43  ;;  %4623 = vmatprep.subr.bf16.mxu0 %v3550_v45  ;;  %v3664_v43 = vunpack.c.h.s8.bf16 %v2736_v28  ;;  %v2750_v45 = vld [vmem:[%s6529_s15 + $0xd48] sm:$0xff]  ;;  %v2784_v28 = vld [vmem:[%s6529_s15 + $0xe58] sm:$0xff] }
 0x474   : > { %4787 = vmatprep.subr.bf16.mxu1 %v3552_v12  ;;  %v3661_v12 = vunpack.c.h.s8.bf16 %v2733_v35  ;;  %v2781_v35 = vld [vmem:[%s6529_s15 + $0xe40] sm:$0xff] }
 0x476   : > { %4624 = vmatpush1.bf16.msra.mxu0 %v3549_v48  ;;  %v3678_v48 = vunpack.c.l.s8.bf16 %v2750_v45 }
 0x477   : > { %4788 = vmatpush1.bf16.msra.mxu1 %v3551_v49  ;;  %4625 = vmatprep.subr.bf16.mxu0 %v3566_v50  ;;  %v2749_v49 = vld [vmem:[%s6529_s15 + $0xd40] sm:$0xff]  ;;  %v3680_v50 = vunpack.c.l.s8.bf16 %v2752_v46 }
 0x478   : > { %4789 = vmatprep.subr.bf16.mxu1 %v3568_v57  ;;  %v2751_v57 = vld [vmem:[%s6529_s15 + $0xd50] sm:$0xff]  ;;  %v3677_v51 = vunpack.c.l.s8.bf16 %v2749_v49 }
 0x479   : > { %v3679_v52 = vunpack.c.l.s8.bf16 %v2751_v57  ;;  %v3695_v2 = vunpack.c.h.s8.bf16 %v2751_v57  ;;  %v2799_v57 = vld [vmem:[%s6529_s15 + $0xed0] sm:$0xff] }
 0x47a   : > { %4626 = vmatpush1.bf16.msra.mxu0 %v3565_v54  ;;  %v3694_v54 = vunpack.c.h.s8.bf16 %v2750_v45  ;;  %v2798_v45 = vld [vmem:[%s6529_s15 + $0xec8] sm:$0xff] }
 0x47b   : > { %4790 = vmatpush1.bf16.msra.mxu1 %v3567_v53  ;;  %4627 = vmatprep.subr.bf16.mxu0 %v3582_v63  ;;  %v3696_v53 = vunpack.c.h.s8.bf16 %v2752_v46  ;;  %v2766_v63 = vld [vmem:[%s6529_s15 + $0xdc8] sm:$0xff]  ;;  %v2800_v46 = vld [vmem:[%s6529_s15 + $0xed8] sm:$0xff] }
 0x47c   : > { %4791 = vmatprep.subr.bf16.mxu1 %v3584_v1  ;;  %v3693_v1 = vunpack.c.h.s8.bf16 %v2749_v49  ;;  %v2797_v49 = vld [vmem:[%s6529_s15 + $0xec0] sm:$0xff] }
 0x47e   : > { %4628 = vmatpush1.bf16.msra.mxu0 %v3581_v4  ;;  %v3710_v4 = vunpack.c.l.s8.bf16 %v2766_v63 }
 0x47f   : > { %4792 = vmatpush1.bf16.msra.mxu1 %v3583_v5  ;;  %4629 = vmatprep.subr.bf16.mxu0 %v3598_v3  ;;  %v2765_v5 = vld [vmem:[%s6529_s15 + $0xdc0] sm:$0xff] }
 0x480   : > { %4793 = vmatprep.subr.bf16.mxu1 %v3600_v59  ;;  %v3712_v59 = vunpack.c.l.s8.bf16 %v2768_v0  ;;  %v3709_v10 = vunpack.c.l.s8.bf16 %v2765_v5  ;;  %v2816_v0 = vld [vmem:[%s6529_s15 + $0xf58] sm:$0xff] }
 0x482   : > { %4630 = vmatpush1.bf16.msra.mxu0 %v3597_v7 }
 0x483   : > { %4794 = vmatpush1.bf16.msra.mxu1 %v3599_v8  ;;  %4640 = vmatprep.subr.bf16.mxu0 %v3614_v9 }
 0x484   : > { %4804 = vmatprep.subr.bf16.mxu1 %v3616_v16 }
 0x485   : > { %4632 = vmatmul.mubr.bf16.vlgmr.msra.gmra.mrb[16].mxu0 %v6748_v29 }
 0x486   : > { %4796 = vmatmul.mubr.bf16.vlgmr.msra.gmra.mrb[16].mxu1 %v6748_v29  ;;  %4641 = vmatpush1.bf16.msra.mxu0 %v3613_v20  ;;  %v3711_v20 = vunpack.c.l.s8.bf16 %v2767_v56 }
 0x487   : > { %4672 = vmatprep.mubr.bf16.mxu0 %v6754_v34  ;;  %4805 = vmatpush1.bf16.msra.mxu1 %v3615_v23  ;;  %v3726_v23 = vunpack.c.h.s8.bf16 %v2766_v63  ;;  %v2814_v63 = vld [vmem:[%s6529_s15 + $0xf48] sm:$0xff] }
 0x488   : > { %4836 = vmatprep.mubr.bf16.mxu1 %v6754_v34  ;;  %4642 = vmatprep.subr.bf16.mxu0 %v3630_v25 }
 0x489   : > { %4806 = vmatprep.subr.bf16.mxu1 %v3632_v27  ;;  %v2782_v27 = vld [vmem:[%s6529_s15 + $0xe48] sm:$0xff] }
 0x48a   : > { %4643 = vmatpush1.bf16.msra.mxu0 %v3629_v30  ;;  %v3725_v30 = vunpack.c.h.s8.bf16 %v2765_v5  ;;  %v2813_v5 = vld [vmem:[%s6529_s15 + $0xf40] sm:$0xff] }
 0x48b   : > { %4807 = vmatpush1.bf16.msra.mxu1 %v3631_v32  ;;  %4644 = vmatprep.subr.bf16.mxu0 %v3646_v15  ;;  %v3727_v32 = vunpack.c.h.s8.bf16 %v2767_v56  ;;  %v3742_v15 = vunpack.c.l.s8.bf16 %v2782_v27  ;;  %v2815_v56 = vld [vmem:[%s6529_s15 + $0xf50] sm:$0xff] }
 0x48c   : > { %4808 = vmatprep.subr.bf16.mxu1 %v3648_v36  ;;  %v3744_v36 = vunpack.c.l.s8.bf16 %v2784_v28 }
 0x48e   : > { %4645 = vmatpush1.bf16.msra.mxu0 %v3645_v39  ;;  %v3741_v39 = vunpack.c.l.s8.bf16 %v2781_v35 }
 0x48f   : > { %4809 = vmatpush1.bf16.msra.mxu1 %v3647_v40  ;;  %4646 = vmatprep.subr.bf16.mxu0 %v3662_v42  ;;  %v3743_v40 = vunpack.c.l.s8.bf16 %v2783_v37  ;;  %v3758_v42 = vunpack.c.h.s8.bf16 %v2782_v27 }
 0x490   : > { %4810 = vmatprep.subr.bf16.mxu1 %v3664_v43  ;;  %v3760_v43 = vunpack.c.h.s8.bf16 %v2784_v28  ;;  %v2829_v28 = vld [vmem:[%s6529_s15 + $0xfc0] sm:$0xff] }
 0x492   : > { %4647 = vmatpush1.bf16.msra.mxu0 %v3661_v12  ;;  %v3757_v12 = vunpack.c.h.s8.bf16 %v2781_v35 }
 0x493   : > { %4811 = vmatpush1.bf16.msra.mxu1 %v3663_v47  ;;  %4648 = vmatprep.subr.bf16.mxu0 %v3678_v48  ;;  %v3759_v47 = vunpack.c.h.s8.bf16 %v2783_v37  ;;  %v3774_v48 = vunpack.c.l.s8.bf16 %v2798_v45 }
 0x494   : > { %4812 = vmatprep.subr.bf16.mxu1 %v3680_v50  ;;  %v3776_v50 = vunpack.c.l.s8.bf16 %v2800_v46 }
 0x496   : > { %4649 = vmatpush1.bf16.msra.mxu0 %v3677_v51  ;;  %v3773_v51 = vunpack.c.l.s8.bf16 %v2797_v49 }
 0x497   : > { %4813 = vmatpush1.bf16.msra.mxu1 %v3679_v52  ;;  %4650 = vmatprep.subr.bf16.mxu0 %v3694_v54  ;;  %v3775_v52 = vunpack.c.l.s8.bf16 %v2799_v57  ;;  %v3790_v54 = vunpack.c.h.s8.bf16 %v2798_v45 }
 0x498   : > { %v7072_v3 = vpop.f32.mrb[12].mxu0  ;;  %4814 = vmatprep.subr.bf16.mxu1 %v3696_v53  ;;  %v3792_v53 = vunpack.c.h.s8.bf16 %v2800_v46  ;;  %v2337_v46 = vld [vmem:[%s6529_s15 + $0x60] sm:$0xff] }
 0x499   : > { %v7075_v6 = vpop.f32.mrb[12].mxu1  ;;  %v7077_v7 = vpop.f32.mrb[13].mxu0 }
 0x49a   : > { %v7079_v8 = vpop.f32.mrb[13].mxu1  ;;  %v4350_v9 = vpop.f32.mrb[14].mxu0  ;;  %4651 = vmatpush1.bf16.msra.mxu0 %v3693_v1  ;;  %v3789_v1 = vunpack.c.h.s8.bf16 %v2797_v49 }
 0x49b   : > { %v4514_v16 = vpop.f32.mrb[14].mxu1  ;;  %4815 = vmatpush1.bf16.msra.mxu1 %v3695_v2  ;;  %v4351_v17 = vpop.f32.mrb[15].mxu0  ;;  %4652 = vmatprep.subr.bf16.mxu0 %v3710_v4  ;;  %v3791_v2 = vunpack.c.h.s8.bf16 %v2799_v57  ;;  %v3806_v4 = vunpack.c.l.s8.bf16 %v2814_v63  ;;  %v3805_v9 = vunpack.c.l.s8.bf16 %v2813_v5  ;;  %v2354_v57 = vld [vmem:[%s6529_s15 + $0xe8] sm:$0xff] }
 0x49c   : > { %v4515_v25 = vpop.f32.mrb[15].mxu1  ;;  %4816 = vmatprep.subr.bf16.mxu1 %v3712_v59  ;;  %v3808_v59 = vunpack.c.l.s8.bf16 %v2816_v0  ;;  %v3822_v16 = vunpack.c.h.s8.bf16 %v2814_v63  ;;  %v3824_v17 = vunpack.c.h.s8.bf16 %v2816_v0  ;;  %v2882_v63 = vunpack.c.l.s8.bf16 %v2354_v57  ;;  %v2353_v0 = vld [vmem:[%s6529_s15 + $0xe0] sm:$0xff] }
 0x49d   : > { %v3821_v25 = vunpack.c.h.s8.bf16 %v2813_v5 }
 0x49e   : > { %4653 = vmatpush1.bf16.msra.mxu0 %v3709_v10  ;;  %v3807_v10 = vunpack.c.l.s8.bf16 %v2815_v56 }
 0x49f   : > { %4817 = vmatpush1.bf16.msra.mxu1 %v3711_v20  ;;  %4654 = vmatprep.subr.bf16.mxu0 %v3726_v23  ;;  %v2830_v20 = vld [vmem:[%s6529_s15 + $0xfc8] sm:$0xff]  ;;  %v2832_v23 = vld [vmem:[%s6529_s15 + $0xfd8] sm:$0xff] }
 0x4a0   : > { %4818 = vmatprep.subr.bf16.mxu1 %v3728_v62  ;;  %v3823_v62 = vunpack.c.h.s8.bf16 %v2815_v56  ;;  %v3838_v27 = vunpack.c.l.s8.bf16 %v2830_v20  ;;  %v3856_v37 = vunpack.c.h.s8.bf16 %v2832_v23 }
 0x4a2   : > { %4655 = vmatpush1.bf16.msra.mxu0 %v3725_v30  ;;  %v3840_v30 = vunpack.c.l.s8.bf16 %v2832_v23 }
 0x4a3   : > { %4819 = vmatpush1.bf16.msra.mxu1 %v3727_v32  ;;  %4656 = vmatprep.subr.bf16.mxu0 %v3742_v15  ;;  %v2831_v32 = vld [vmem:[%s6529_s15 + $0xfd0] sm:$0xff]  ;;  %v3837_v15 = vunpack.c.l.s8.bf16 %v2829_v28 }
 0x4a4   : > { %4820 = vmatprep.subr.bf16.mxu1 %v3744_v36  ;;  %v3839_v35 = vunpack.c.l.s8.bf16 %v2831_v32  ;;  %v3854_v36 = vunpack.c.h.s8.bf16 %v2830_v20  ;;  %v2369_v20 = vld [vmem:[%s6529_s15 + $0x160] sm:$0xff] }
 0x4a6   : > { %4657 = vmatpush1.bf16.msra.mxu0 %v3741_v39  ;;  %v2338_v39 = vld [vmem:[%s6529_s15 + $0x68] sm:$0xff] }
 0x4a7   : > { %4821 = vmatpush1.bf16.msra.mxu1 %v3743_v40  ;;  %4658 = vmatprep.subr.bf16.mxu0 %v3758_v42  ;;  %v2340_v40 = vld [vmem:[%s6529_s15 + $0x78] sm:$0xff]  ;;  %v3853_v42 = vunpack.c.h.s8.bf16 %v2829_v28  ;;  %v2850_v45 = vunpack.c.l.s8.bf16 %v2338_v39 }
 0x4a8   : > { %4822 = vmatprep.subr.bf16.mxu1 %v3760_v43  ;;  %v3855_v43 = vunpack.c.h.s8.bf16 %v2831_v32  ;;  %v2386_v32 = vld [vmem:[%s6529_s15 + $0x1e8] sm:$0xff] }
 0x4aa   : > { %4659 = vmatpush1.bf16.msra.mxu0 %v3757_v12  ;;  %v2852_v12 = vunpack.c.l.s8.bf16 %v2340_v40 }
 0x4ab   : > { %4823 = vmatpush1.bf16.msra.mxu1 %v3759_v47  ;;  %4660 = vmatprep.subr.bf16.mxu0 %v3774_v48  ;;  %v2339_v47 = vld [vmem:[%s6529_s15 + $0x70] sm:$0xff]  ;;  %v2849_v48 = vunpack.c.l.s8.bf16 %v2337_v46 }
 0x4ac   : > { %4824 = vmatprep.subr.bf16.mxu1 %v3776_v50  ;;  %v2851_v49 = vunpack.c.l.s8.bf16 %v2339_v47  ;;  %v2866_v50 = vunpack.c.h.s8.bf16 %v2338_v39  ;;  %v2385_v39 = vld [vmem:[%s6529_s15 + $0x1e0] sm:$0xff] }
 0x4ae   : > { %4661 = vmatpush1.bf16.msra.mxu0 %v3773_v51  ;;  %v2868_v51 = vunpack.c.h.s8.bf16 %v2340_v40 }
 0x4af   : > { %4825 = vmatpush1.bf16.msra.mxu1 %v3775_v52  ;;  %4662 = vmatprep.subr.bf16.mxu0 %v3790_v54  ;;  %v2356_v52 = vld [vmem:[%s6529_s15 + $0xf8] sm:$0xff]  ;;  %v2865_v54 = vunpack.c.h.s8.bf16 %v2337_v46  ;;  %v2962_v46 = vunpack.c.h.s8.bf16 %v2386_v32 }
 0x4b0   : > { %4826 = vmatprep.subr.bf16.mxu1 %v3792_v53  ;;  %v2867_v53 = vunpack.c.h.s8.bf16 %v2339_v47  ;;  %v2900_v56 = vunpack.c.h.s8.bf16 %v2356_v52  ;;  %v2402_v47 = vld [vmem:[%s6529_s15 + $0x268] sm:$0xff] }
 0x4b2   : > { %4663 = vmatpush1.bf16.msra.mxu0 %v3789_v1  ;;  %v2884_v1 = vunpack.c.l.s8.bf16 %v2356_v52 }
 0x4b3   : > { %4827 = vmatpush1.bf16.msra.mxu1 %v3791_v2  ;;  %4664 = vmatprep.subr.bf16.mxu0 %v3806_v4  ;;  %v2355_v2 = vld [vmem:[%s6529_s15 + $0xf0] sm:$0xff]  ;;  %v2881_v4 = vunpack.c.l.s8.bf16 %v2353_v0 }
 0x4b4   : > { %4828 = vmatprep.subr.bf16.mxu1 %v3808_v59  ;;  %v2883_v5 = vunpack.c.l.s8.bf16 %v2355_v2  ;;  %v2898_v59 = vunpack.c.h.s8.bf16 %v2354_v57  ;;  %v2978_v57 = vunpack.c.l.s8.bf16 %v2402_v47 }
 0x4b6   : > { %4665 = vmatpush1.bf16.msra.mxu0 %v3805_v9  ;;  %v2370_v9 = vld [vmem:[%s6529_s15 + $0x168] sm:$0xff] }
 0x4b7   : > { %4829 = vmatpush1.bf16.msra.mxu1 %v3807_v10  ;;  %4666 = vmatprep.subr.bf16.mxu0 %v3822_v16  ;;  %v2372_v10 = vld [vmem:[%s6529_s15 + $0x178] sm:$0xff]  ;;  %v2897_v16 = vunpack.c.h.s8.bf16 %v2353_v0  ;;  %v2930_v28 = vunpack.c.h.s8.bf16 %v2370_v9  ;;  %v2994_v0 = vunpack.c.h.s8.bf16 %v2402_v47  ;;  %v2449_v47 = vld [vmem:[%s6529_s15 + $0x3e0] sm:$0xff] }
 0x4b8   : > { %4830 = vmatprep.subr.bf16.mxu1 %v3824_v17  ;;  %v2914_v17 = vunpack.c.l.s8.bf16 %v2370_v9  ;;  %v2916_v23 = vunpack.c.l.s8.bf16 %v2372_v10  ;;  %v2417_v9 = vld [vmem:[%s6529_s15 + $0x2e0] sm:$0xff] }
 0x4ba   : > { %4667 = vmatpush1.bf16.msra.mxu0 %v3821_v25  ;;  %v2371_v25 = vld [vmem:[%s6529_s15 + $0x170] sm:$0xff] }
 0x4bb   : > { %4831 = vmatpush1.bf16.msra.mxu1 %v3823_v62  ;;  %4668 = vmatprep.subr.bf16.mxu0 %v3838_v27  ;;  %v2913_v62 = vunpack.c.l.s8.bf16 %v2369_v20  ;;  %v2915_v27 = vunpack.c.l.s8.bf16 %v2371_v25 }
 0x4bc   : > { %4832 = vmatprep.subr.bf16.mxu1 %v3840_v30  ;;  %v2932_v30 = vunpack.c.h.s8.bf16 %v2372_v10 }
 0x4be   : > { %4669 = vmatpush1.bf16.msra.mxu0 %v3837_v15  ;;  %v2388_v15 = vld [vmem:[%s6529_s15 + $0x1f8] sm:$0xff] }
 0x4bf   : > { %4833 = vmatpush1.bf16.msra.mxu1 %v3839_v35  ;;  %4670 = vmatprep.subr.bf16.mxu0 %v3854_v36  ;;  %v2929_v35 = vunpack.c.h.s8.bf16 %v2369_v20  ;;  %v2931_v36 = vunpack.c.h.s8.bf16 %v2371_v25  ;;  %v2948_v40 = vunpack.c.l.s8.bf16 %v2388_v15  ;;  %v2434_v25 = vld [vmem:[%s6529_s15 + $0x368] sm:$0xff] }
 0x4c0   : > { %4834 = vmatprep.subr.bf16.mxu1 %v3856_v37  ;;  %v2946_v37 = vunpack.c.l.s8.bf16 %v2386_v32  ;;  %v2433_v32 = vld [vmem:[%s6529_s15 + $0x360] sm:$0xff] }
 0x4c2   : > { %4671 = vmatpush1.bf16.msra.mxu0 %v3853_v42  ;;  %v2387_v42 = vld [vmem:[%s6529_s15 + $0x1f0] sm:$0xff] }
 0x4c3   : > { %4835 = vmatpush1.bf16.msra.mxu1 %v3855_v43  ;;  %4845 = vmatprep.subr.bf16.mxu0 %v2850_v45  ;;  %v2945_v43 = vunpack.c.l.s8.bf16 %v2385_v39  ;;  %v2947_v45 = vunpack.c.l.s8.bf16 %v2387_v42 }
 0x4c4   : > { %5009 = vmatprep.subr.bf16.mxu1 %v2852_v12  ;;  %v2964_v12 = vunpack.c.h.s8.bf16 %v2388_v15 }
 0x4c5   : > { %4673 = vmatmul.mubr.bf16.vlgmr.msra.gmra.mrb[16].mxu0 %v6795_v33 }
 0x4c6   : > { %4837 = vmatmul.mubr.bf16.vlgmr.msra.gmra.mrb[16].mxu1 %v6795_v33  ;;  %4846 = vmatpush1.bf16.msra.mxu0 %v2849_v48  ;;  %v2404_v48 = vld [vmem:[%s6529_s15 + $0x278] sm:$0xff] }
 0x4c7   : > { %4877 = vmatprep.mubr.bf16.mxu0 %v6640_v21  ;;  %5010 = vmatpush1.bf16.msra.mxu1 %v2851_v49  ;;  %v2961_v49 = vunpack.c.h.s8.bf16 %v2385_v39  ;;  %v2980_v52 = vunpack.c.l.s8.bf16 %v2404_v48  ;;  %v3058_v39 = vunpack.c.h.s8.bf16 %v2434_v25 }
 0x4c8   : > { %5041 = vmatprep.mubr.bf16.mxu1 %v6640_v21  ;;  %4847 = vmatprep.subr.bf16.mxu0 %v2866_v50  ;;  %v2899_v21 = vunpack.c.h.s8.bf16 %v2355_v2  ;;  %v2963_v50 = vunpack.c.h.s8.bf16 %v2387_v42  ;;  %v2418_v2 = vld [vmem:[%s6529_s15 + $0x2e8] sm:$0xff] }
 0x4c9   : > { %5011 = vmatprep.subr.bf16.mxu1 %v2868_v51  ;;  %v2401_v51 = vld [vmem:[%s6529_s15 + $0x260] sm:$0xff]  ;;  %v3026_v20 = vunpack.c.h.s8.bf16 %v2418_v2  ;;  %v2450_v42 = vld [vmem:[%s6529_s15 + $0x3e8] sm:$0xff] }
 0x4ca   : > { %4848 = vmatpush1.bf16.msra.mxu0 %v2865_v54  ;;  %v2403_v54 = vld [vmem:[%s6529_s15 + $0x270] sm:$0xff] }
 0x4cb   : > { %5012 = vmatpush1.bf16.msra.mxu1 %v2867_v53  ;;  %4849 = vmatprep.subr.bf16.mxu0 %v2882_v63  ;;  %v2977_v53 = vunpack.c.l.s8.bf16 %v2401_v51  ;;  %v2979_v63 = vunpack.c.l.s8.bf16 %v2403_v54 }
 0x4cc   : > { %5013 = vmatprep.subr.bf16.mxu1 %v2884_v1  ;;  %v2996_v1 = vunpack.c.h.s8.bf16 %v2404_v48 }
 0x4ce   : > { %4850 = vmatpush1.bf16.msra.mxu0 %v2881_v4  ;;  %v2420_v4 = vld [vmem:[%s6529_s15 + $0x2f8] sm:$0xff] }
 0x4cf   : > { %5014 = vmatpush1.bf16.msra.mxu1 %v2883_v5  ;;  %4851 = vmatprep.subr.bf16.mxu0 %v2898_v59  ;;  %v2993_v5 = vunpack.c.h.s8.bf16 %v2401_v51  ;;  %v2995_v59 = vunpack.c.h.s8.bf16 %v2403_v54  ;;  %v3012_v10 = vunpack.c.l.s8.bf16 %v2420_v4  ;;  %v3090_v51 = vunpack.c.h.s8.bf16 %v2450_v42  ;;  %v2466_v54 = vld [vmem:[%s6529_s15 + $0x468] sm:$0xff] }
 0x4d0   : > { %5015 = vmatprep.subr.bf16.mxu1 %v2900_v56  ;;  %v3010_v56 = vunpack.c.l.s8.bf16 %v2418_v2  ;;  %v2465_v2 = vld [vmem:[%s6529_s15 + $0x460] sm:$0xff] }
 0x4d2   : > { %4852 = vmatpush1.bf16.msra.mxu0 %v2897_v16  ;;  %v2419_v16 = vld [vmem:[%s6529_s15 + $0x2f0] sm:$0xff] }
 0x4d3   : > { %5016 = vmatpush1.bf16.msra.mxu1 %v2899_v21  ;;  %4853 = vmatprep.subr.bf16.mxu0 %v2914_v17  ;;  %v3009_v21 = vunpack.c.l.s8.bf16 %v2417_v9  ;;  %v3011_v17 = vunpack.c.l.s8.bf16 %v2419_v16 }
 0x4d4   : > { %5017 = vmatprep.subr.bf16.mxu1 %v2916_v23  ;;  %v3028_v23 = vunpack.c.h.s8.bf16 %v2420_v4 }
 0x4d6   : > { %4854 = vmatpush1.bf16.msra.mxu0 %v2913_v62  ;;  %v2436_v62 = vld [vmem:[%s6529_s15 + $0x378] sm:$0xff] }
 0x4d7   : > { %5018 = vmatpush1.bf16.msra.mxu1 %v2915_v27  ;;  %4855 = vmatprep.subr.bf16.mxu0 %v2930_v28  ;;  %v3025_v27 = vunpack.c.h.s8.bf16 %v2417_v9  ;;  %v3027_v28 = vunpack.c.h.s8.bf16 %v2419_v16  ;;  %v3044_v15 = vunpack.c.l.s8.bf16 %v2436_v62  ;;  %v3122_v9 = vunpack.c.h.s8.bf16 %v2466_v54 }
 0x4d8   : > { %5019 = vmatprep.subr.bf16.mxu1 %v2932_v30  ;;  %v3042_v30 = vunpack.c.l.s8.bf16 %v2434_v25  ;;  %v2481_v25 = vld [vmem:[%s6529_s15 + $0x4e0] sm:$0xff] }
 0x4da   : > { %4856 = vmatpush1.bf16.msra.mxu0 %v2929_v35  ;;  %v2435_v35 = vld [vmem:[%s6529_s15 + $0x370] sm:$0xff] }
 0x4db   : > { %5020 = vmatpush1.bf16.msra.mxu1 %v2931_v36  ;;  %4857 = vmatprep.subr.bf16.mxu0 %v2946_v37  ;;  %v3041_v36 = vunpack.c.l.s8.bf16 %v2433_v32  ;;  %v3043_v37 = vunpack.c.l.s8.bf16 %v2435_v35 }
 0x4dc   : > { %5021 = vmatprep.subr.bf16.mxu1 %v2948_v40  ;;  %v3060_v40 = vunpack.c.h.s8.bf16 %v2436_v62 }
 0x4de   : > { %4858 = vmatpush1.bf16.msra.mxu0 %v2945_v43  ;;  %v2452_v43 = vld [vmem:[%s6529_s15 + $0x3f8] sm:$0xff] }
 0x4df   : > { %5022 = vmatpush1.bf16.msra.mxu1 %v2947_v45  ;;  %4859 = vmatprep.subr.bf16.mxu0 %v2962_v46  ;;  %v3057_v45 = vunpack.c.h.s8.bf16 %v2433_v32  ;;  %v3059_v46 = vunpack.c.h.s8.bf16 %v2435_v35  ;;  %v3076_v48 = vunpack.c.l.s8.bf16 %v2452_v43  ;;  %v2500_v35 = vld [vmem:[%s6529_s15 + $0x578] sm:$0xff] }
 0x4e0   : > { %5023 = vmatprep.subr.bf16.mxu1 %v2964_v12  ;;  %v3074_v12 = vunpack.c.l.s8.bf16 %v2450_v42  ;;  %v2499_v42 = vld [vmem:[%s6529_s15 + $0x570] sm:$0xff] }
 0x4e2   : > { %4860 = vmatpush1.bf16.msra.mxu0 %v2961_v49  ;;  %v2451_v49 = vld [vmem:[%s6529_s15 + $0x3f0] sm:$0xff] }
 0x4e3   : > { %5024 = vmatpush1.bf16.msra.mxu1 %v2963_v50  ;;  %4861 = vmatprep.subr.bf16.mxu0 %v2978_v57  ;;  %v3073_v50 = vunpack.c.l.s8.bf16 %v2449_v47  ;;  %v3075_v57 = vunpack.c.l.s8.bf16 %v2451_v49 }
 0x4e4   : > { %5025 = vmatprep.subr.bf16.mxu1 %v2980_v52  ;;  %v3092_v52 = vunpack.c.h.s8.bf16 %v2452_v43 }
 0x4e6   : > { %4862 = vmatpush1.bf16.msra.mxu0 %v2977_v53  ;;  %v2468_v53 = vld [vmem:[%s6529_s15 + $0x478] sm:$0xff] }
 0x4e7   : > { %5026 = vmatpush1.bf16.msra.mxu1 %v2979_v63  ;;  %4863 = vmatprep.subr.bf16.mxu0 %v2994_v0  ;;  %v3089_v63 = vunpack.c.h.s8.bf16 %v2449_v47  ;;  %v3091_v0 = vunpack.c.h.s8.bf16 %v2451_v49  ;;  %v3108_v4 = vunpack.c.l.s8.bf16 %v2468_v53  ;;  %v3124_v16 = vunpack.c.h.s8.bf16 %v2468_v53  ;;  %v2514_v47 = vld [vmem:[%s6529_s15 + $0x5e8] sm:$0xff] }
 0x4e8   : > { %5027 = vmatprep.subr.bf16.mxu1 %v2996_v1  ;;  %v3106_v1 = vunpack.c.l.s8.bf16 %v2466_v54  ;;  %v2515_v54 = vld [vmem:[%s6529_s15 + $0x5f0] sm:$0xff] }
 0x4ea   : > { %4864 = vmatpush1.bf16.msra.mxu0 %v2993_v5  ;;  %v2467_v5 = vld [vmem:[%s6529_s15 + $0x470] sm:$0xff] }
 0x4eb   : > { %5028 = vmatpush1.bf16.msra.mxu1 %v2995_v59  ;;  %4865 = vmatprep.subr.bf16.mxu0 %v3010_v56  ;;  %v3105_v59 = vunpack.c.l.s8.bf16 %v2465_v2  ;;  %v3107_v56 = vunpack.c.l.s8.bf16 %v2467_v5 }
 0x4ec   : > { %5029 = vmatprep.subr.bf16.mxu1 %v3012_v10  ;;  %v2482_v10 = vld [vmem:[%s6529_s15 + $0x4e8] sm:$0xff] }
 0x4ee   : > { %4866 = vmatpush1.bf16.msra.mxu0 %v3009_v21  ;;  %v2484_v21 = vld [vmem:[%s6529_s15 + $0x4f8] sm:$0xff] }
 0x4ef   : > { %5030 = vmatpush1.bf16.msra.mxu1 %v3011_v17  ;;  %4867 = vmatprep.subr.bf16.mxu0 %v3026_v20  ;;  %v3121_v17 = vunpack.c.h.s8.bf16 %v2465_v2  ;;  %v3123_v20 = vunpack.c.h.s8.bf16 %v2467_v5  ;;  %v3140_v62 = vunpack.c.l.s8.bf16 %v2484_v21  ;;  %v3156_v32 = vunpack.c.h.s8.bf16 %v2484_v21  ;;  %v2530_v2 = vld [vmem:[%s6529_s15 + $0x668] sm:$0xff] }
 0x4f0   : > { %5031 = vmatprep.subr.bf16.mxu1 %v3028_v23  ;;  %v3138_v23 = vunpack.c.l.s8.bf16 %v2482_v10 }
 0x4f2   : > { %4868 = vmatpush1.bf16.msra.mxu0 %v3025_v27  ;;  %v2483_v27 = vld [vmem:[%s6529_s15 + $0x4f0] sm:$0xff] }
 0x4f3   : > { %5032 = vmatpush1.bf16.msra.mxu1 %v3027_v28  ;;  %4869 = vmatprep.subr.bf16.mxu0 %v3042_v30  ;;  %v3137_v28 = vunpack.c.l.s8.bf16 %v2481_v25  ;;  %v3154_v30 = vunpack.c.h.s8.bf16 %v2482_v10 }
 0x4f4   : > { %5033 = vmatprep.subr.bf16.mxu1 %v3044_v15  ;;  %v2498_v15 = vld [vmem:[%s6529_s15 + $0x568] sm:$0xff] }
 0x4f6   : > { %4870 = vmatpush1.bf16.msra.mxu0 %v3041_v36  ;;  %v3153_v36 = vunpack.c.h.s8.bf16 %v2481_v25  ;;  %v2546_v25 = vld [vmem:[%s6529_s15 + $0x6e8] sm:$0xff] }
 0x4f7   : > { %5034 = vmatpush1.bf16.msra.mxu1 %v3043_v37  ;;  %4871 = vmatprep.subr.bf16.mxu0 %v3058_v39  ;;  %v3170_v37 = vunpack.c.l.s8.bf16 %v2498_v15  ;;  %v2497_v39 = vld [vmem:[%s6529_s15 + $0x560] sm:$0xff] }
 0x4f8   : > { %5035 = vmatprep.subr.bf16.mxu1 %v3060_v40  ;;  %v3172_v40 = vunpack.c.l.s8.bf16 %v2500_v35  ;;  %v3169_v43 = vunpack.c.l.s8.bf16 %v2497_v39  ;;  %v3185_v49 = vunpack.c.h.s8.bf16 %v2497_v39  ;;  %v2562_v39 = vld [vmem:[%s6529_s15 + $0x768] sm:$0xff] }
 0x4fa   : > { %4872 = vmatpush1.bf16.msra.mxu0 %v3057_v45  ;;  %v3171_v45 = vunpack.c.l.s8.bf16 %v2499_v42 }
 0x4fb   : > { %5036 = vmatpush1.bf16.msra.mxu1 %v3059_v46  ;;  %4873 = vmatprep.subr.bf16.mxu0 %v3074_v12  ;;  %v3186_v46 = vunpack.c.h.s8.bf16 %v2498_v15  ;;  %v3188_v12 = vunpack.c.h.s8.bf16 %v2500_v35  ;;  %v2547_v15 = vld [vmem:[%s6529_s15 + $0x6f0] sm:$0xff] }
 0x4fc   : > { %5037 = vmatprep.subr.bf16.mxu1 %v3076_v48  ;;  %v2516_v48 = vld [vmem:[%s6529_s15 + $0x5f8] sm:$0xff] }
 0x4fe   : > { %4874 = vmatpush1.bf16.msra.mxu0 %v3073_v50  ;;  %v3187_v50 = vunpack.c.h.s8.bf16 %v2499_v42 }
 0x4ff   : > { %5038 = vmatpush1.bf16.msra.mxu1 %v3075_v57  ;;  %4875 = vmatprep.subr.bf16.mxu0 %v3090_v51  ;;  %v3202_v57 = vunpack.c.l.s8.bf16 %v2514_v47  ;;  %v2513_v51 = vld [vmem:[%s6529_s15 + $0x5e0] sm:$0xff] }
 0x500   : > { %5039 = vmatprep.subr.bf16.mxu1 %v3092_v52  ;;  %v3204_v52 = vunpack.c.l.s8.bf16 %v2516_v48  ;;  %v3201_v53 = vunpack.c.l.s8.bf16 %v2513_v51  ;;  %v3217_v5 = vunpack.c.h.s8.bf16 %v2513_v51  ;;  %v2578_v51 = vld [vmem:[%s6529_s15 + $0x7e8] sm:$0xff] }
 0x502   : > { %4876 = vmatpush1.bf16.msra.mxu0 %v3089_v63  ;;  %v3203_v63 = vunpack.c.l.s8.bf16 %v2515_v54 }
 0x503   : > { %5040 = vmatpush1.bf16.msra.mxu1 %v3091_v0  ;;  %4886 = vmatprep.subr.bf16.mxu0 %v3106_v1  ;;  %v3218_v0 = vunpack.c.h.s8.bf16 %v2514_v47  ;;  %v3220_v1 = vunpack.c.h.s8.bf16 %v2516_v48  ;;  %v2563_v47 = vld [vmem:[%s6529_s15 + $0x770] sm:$0xff] }
 0x504   : > { %5050 = vmatprep.subr.bf16.mxu1 %v3108_v4  ;;  %v2532_v4 = vld [vmem:[%s6529_s15 + $0x678] sm:$0xff] }
 0x505   : > { %4878 = vmatmul.mubr.bf16.vlgmr.msra.gmra.mrb[20].mxu0 %v6642_v26  ;;  %v3236_v10 = vunpack.c.l.s8.bf16 %v2532_v4 }
 0x506   : > { %5042 = vmatmul.mubr.bf16.vlgmr.msra.gmra.mrb[20].mxu1 %v6642_v26  ;;  %4887 = vmatpush1.bf16.msra.mxu0 %v3105_v59  ;;  %v3139_v26 = vunpack.c.l.s8.bf16 %v2483_v27  ;;  %v3219_v59 = vunpack.c.h.s8.bf16 %v2515_v54 }
 0x507   : > { %4918 = vmatprep.mubr.bf16.mxu0 %v6650_v31  ;;  %5051 = vmatpush1.bf16.msra.mxu1 %v3107_v56  ;;  %v3234_v56 = vunpack.c.l.s8.bf16 %v2530_v2 }
 0x508   : > { %5082 = vmatprep.mubr.bf16.mxu1 %v6650_v31  ;;  %4888 = vmatprep.subr.bf16.mxu0 %v3122_v9  ;;  %v3155_v31 = vunpack.c.h.s8.bf16 %v2483_v27  ;;  %v2529_v9 = vld [vmem:[%s6529_s15 + $0x660] sm:$0xff] }
 0x509   : > { %5052 = vmatprep.subr.bf16.mxu1 %v3124_v16  ;;  %v2531_v16 = vld [vmem:[%s6529_s15 + $0x670] sm:$0xff]  ;;  %v3233_v21 = vunpack.c.l.s8.bf16 %v2529_v9  ;;  %v3249_v27 = vunpack.c.h.s8.bf16 %v2529_v9  ;;  %v2594_v9 = vld [vmem:[%s6529_s15 + $0x868] sm:$0xff] }
 0x50a   : > { %4889 = vmatpush1.bf16.msra.mxu0 %v3121_v17  ;;  %v3235_v17 = vunpack.c.l.s8.bf16 %v2531_v16 }
 0x50b   : > { %5053 = vmatpush1.bf16.msra.mxu1 %v3123_v20  ;;  %4890 = vmatprep.subr.bf16.mxu0 %v3138_v23  ;;  %v3250_v20 = vunpack.c.h.s8.bf16 %v2530_v2  ;;  %v3252_v23 = vunpack.c.h.s8.bf16 %v2532_v4  ;;  %v2579_v2 = vld [vmem:[%s6529_s15 + $0x7f0] sm:$0xff] }
 0x50c   : > { %5054 = vmatprep.subr.bf16.mxu1 %v3140_v62  ;;  %v2548_v62 = vld [vmem:[%s6529_s15 + $0x6f8] sm:$0xff] }
 0x50e   : > { %4891 = vmatpush1.bf16.msra.mxu0 %v3137_v28  ;;  %v3251_v28 = vunpack.c.h.s8.bf16 %v2531_v16 }
 0x50f   : > { %5055 = vmatpush1.bf16.msra.mxu1 %v3139_v26  ;;  %4892 = vmatprep.subr.bf16.mxu0 %v3154_v30  ;;  %v3266_v26 = vunpack.c.l.s8.bf16 %v2546_v25  ;;  %v2545_v30 = vld [vmem:[%s6529_s15 + $0x6e0] sm:$0xff] }
 0x510   : > { %5056 = vmatprep.subr.bf16.mxu1 %v3156_v32  ;;  %v3268_v32 = vunpack.c.l.s8.bf16 %v2548_v62  ;;  %v3265_v35 = vunpack.c.l.s8.bf16 %v2545_v30  ;;  %v3281_v42 = vunpack.c.h.s8.bf16 %v2545_v30 }
 0x512   : > { %4893 = vmatpush1.bf16.msra.mxu0 %v3153_v36  ;;  %v3267_v36 = vunpack.c.l.s8.bf16 %v2547_v15 }
 0x513   : > { %5057 = vmatpush1.bf16.msra.mxu1 %v3155_v31  ;;  %4894 = vmatprep.subr.bf16.mxu0 %v3170_v37  ;;  %v3282_v31 = vunpack.c.h.s8.bf16 %v2546_v25  ;;  %v3284_v37 = vunpack.c.h.s8.bf16 %v2548_v62  ;;  %v2595_v25 = vld [vmem:[%s6529_s15 + $0x870] sm:$0xff] }
 0x514   : > { %5058 = vmatprep.subr.bf16.mxu1 %v3172_v40  ;;  %v2564_v40 = vld [vmem:[%s6529_s15 + $0x778] sm:$0xff] }
 0x516   : > { %4895 = vmatpush1.bf16.msra.mxu0 %v3169_v43  ;;  %v3283_v43 = vunpack.c.h.s8.bf16 %v2547_v15 }
 0x517   : > { %5059 = vmatpush1.bf16.msra.mxu1 %v3171_v45  ;;  %4896 = vmatprep.subr.bf16.mxu0 %v3186_v46  ;;  %v3298_v45 = vunpack.c.l.s8.bf16 %v2562_v39  ;;  %v2561_v46 = vld [vmem:[%s6529_s15 + $0x760] sm:$0xff] }
 0x518   : > { %5060 = vmatprep.subr.bf16.mxu1 %v3188_v12  ;;  %v3300_v12 = vunpack.c.l.s8.bf16 %v2564_v40  ;;  %v3297_v48 = vunpack.c.l.s8.bf16 %v2561_v46  ;;  %v3313_v54 = vunpack.c.h.s8.bf16 %v2561_v46  ;;  %v2628_v46 = vld [vmem:[%s6529_s15 + $0x978] sm:$0xff] }
 0x51a   : > { %4897 = vmatpush1.bf16.msra.mxu0 %v3185_v49  ;;  %v3299_v49 = vunpack.c.l.s8.bf16 %v2563_v47 }
 0x51b   : > { %5061 = vmatpush1.bf16.msra.mxu1 %v3187_v50  ;;  %4898 = vmatprep.subr.bf16.mxu0 %v3202_v57  ;;  %v3314_v50 = vunpack.c.h.s8.bf16 %v2562_v39  ;;  %v3316_v57 = vunpack.c.h.s8.bf16 %v2564_v40  ;;  %v2611_v39 = vld [vmem:[%s6529_s15 + $0x8f0] sm:$0xff] }
 0x51c   : > { %5062 = vmatprep.subr.bf16.mxu1 %v3204_v52  ;;  %v2580_v52 = vld [vmem:[%s6529_s15 + $0x7f8] sm:$0xff] }
 0x51e   : > { %4899 = vmatpush1.bf16.msra.mxu0 %v3201_v53  ;;  %v3315_v53 = vunpack.c.h.s8.bf16 %v2563_v47 }
 0x51f   : > { %5063 = vmatpush1.bf16.msra.mxu1 %v3203_v63  ;;  %4900 = vmatprep.subr.bf16.mxu0 %v3218_v0  ;;  %v3330_v63 = vunpack.c.l.s8.bf16 %v2578_v51  ;;  %v2577_v0 = vld [vmem:[%s6529_s15 + $0x7e0] sm:$0xff] }
 0x520   : > { %5064 = vmatprep.subr.bf16.mxu1 %v3220_v1  ;;  %v3332_v1 = vunpack.c.l.s8.bf16 %v2580_v52  ;;  %v3329_v4 = vunpack.c.l.s8.bf16 %v2577_v0  ;;  %v3345_v16 = vunpack.c.h.s8.bf16 %v2577_v0 }
 0x522   : > { %4901 = vmatpush1.bf16.msra.mxu0 %v3217_v5  ;;  %v3331_v5 = vunpack.c.l.s8.bf16 %v2579_v2 }
 0x523   : > { %5065 = vmatpush1.bf16.msra.mxu1 %v3219_v59  ;;  %4902 = vmatprep.subr.bf16.mxu0 %v3234_v56  ;;  %v3346_v59 = vunpack.c.h.s8.bf16 %v2578_v51  ;;  %v3348_v56 = vunpack.c.h.s8.bf16 %v2580_v52 }
 0x524   : > { %5066 = vmatprep.subr.bf16.mxu1 %v3236_v10  ;;  %v2596_v10 = vld [vmem:[%s6529_s15 + $0x878] sm:$0xff] }
 0x525   : > { %v3380_v30 = vunpack.c.h.s8.bf16 %v2596_v10 }
 0x526   : > { %4903 = vmatpush1.bf16.msra.mxu0 %v3233_v21  ;;  %v3347_v21 = vunpack.c.h.s8.bf16 %v2579_v2 }
 0x527   : > { %5067 = vmatpush1.bf16.msra.mxu1 %v3235_v17  ;;  %4904 = vmatprep.subr.bf16.mxu0 %v3250_v20  ;;  %v3362_v17 = vunpack.c.l.s8.bf16 %v2594_v9  ;;  %v2593_v20 = vld [vmem:[%s6529_s15 + $0x860] sm:$0xff] }
 0x528   : > { %5068 = vmatprep.subr.bf16.mxu1 %v3252_v23  ;;  %v3364_v23 = vunpack.c.l.s8.bf16 %v2596_v10  ;;  %v3361_v62 = vunpack.c.l.s8.bf16 %v2593_v20  ;;  %v3377_v15 = vunpack.c.h.s8.bf16 %v2593_v20 }
 0x52a   : > { %4905 = vmatpush1.bf16.msra.mxu0 %v3249_v27  ;;  %v3363_v27 = vunpack.c.l.s8.bf16 %v2595_v25 }
 0x52b   : > { %5069 = vmatpush1.bf16.msra.mxu1 %v3251_v28  ;;  %4906 = vmatprep.subr.bf16.mxu0 %v3266_v26  ;;  %v3378_v28 = vunpack.c.h.s8.bf16 %v2594_v9  ;;  %v2610_v26 = vld [vmem:[%s6529_s15 + $0x8e8] sm:$0xff] }
 0x52c   : > { %5070 = vmatprep.subr.bf16.mxu1 %v3268_v32  ;;  %v2612_v32 = vld [vmem:[%s6529_s15 + $0x8f8] sm:$0xff] }
 0x52e   : > { %4907 = vmatpush1.bf16.msra.mxu0 %v3265_v35  ;;  %v3379_v35 = vunpack.c.h.s8.bf16 %v2595_v25 }
 0x52f   : > { %5071 = vmatpush1.bf16.msra.mxu1 %v3267_v36  ;;  %4908 = vmatprep.subr.bf16.mxu0 %v3282_v31  ;;  %v3394_v36 = vunpack.c.l.s8.bf16 %v2610_v26  ;;  %v2609_v31 = vld [vmem:[%s6529_s15 + $0x8e0] sm:$0xff] }
 0x530   : > { %5072 = vmatprep.subr.bf16.mxu1 %v3284_v37  ;;  %v3396_v37 = vunpack.c.l.s8.bf16 %v2612_v32  ;;  %v3393_v40 = vunpack.c.l.s8.bf16 %v2609_v31 }
 0x532   : > { %4909 = vmatpush1.bf16.msra.mxu0 %v3281_v42  ;;  %v3410_v42 = vunpack.c.h.s8.bf16 %v2610_v26 }
 0x533   : > { %5073 = vmatpush1.bf16.msra.mxu1 %v3283_v43  ;;  %4910 = vmatprep.subr.bf16.mxu0 %v3298_v45  ;;  %v3412_v43 = vunpack.c.h.s8.bf16 %v2612_v32  ;;  %v2626_v45 = vld [vmem:[%s6529_s15 + $0x968] sm:$0xff] }
 0x534   : > { %5074 = vmatprep.subr.bf16.mxu1 %v3300_v12  ;;  %v3409_v12 = vunpack.c.h.s8.bf16 %v2609_v31  ;;  %v3426_v47 = vunpack.c.l.s8.bf16 %v2626_v45  ;;  %v3442_v52 = vunpack.c.h.s8.bf16 %v2626_v45 }
 0x536   : > { %4911 = vmatpush1.bf16.msra.mxu0 %v3297_v48  ;;  %v2625_v48 = vld [vmem:[%s6529_s15 + $0x960] sm:$0xff] }
 0x537   : > { %5075 = vmatpush1.bf16.msra.mxu1 %v3299_v49  ;;  %4912 = vmatprep.subr.bf16.mxu0 %v3314_v50  ;;  %v3428_v49 = vunpack.c.l.s8.bf16 %v2628_v46  ;;  %v2627_v50 = vld [vmem:[%s6529_s15 + $0x970] sm:$0xff]  ;;  %v3441_v0 = vunpack.c.h.s8.bf16 %v2625_v48 }
 0x538   : > { %5076 = vmatprep.subr.bf16.mxu1 %v3316_v57  ;;  %v3425_v57 = vunpack.c.l.s8.bf16 %v2625_v48  ;;  %v3427_v51 = vunpack.c.l.s8.bf16 %v2627_v50 }
 0x53a   : > { %4913 = vmatpush1.bf16.msra.mxu0 %v3313_v54  ;;  %v3444_v54 = vunpack.c.h.s8.bf16 %v2628_v46 }
 0x53b   : > { %5077 = vmatpush1.bf16.msra.mxu1 %v3315_v53  ;;  %4914 = vmatprep.subr.bf16.mxu0 %v3330_v63  ;;  %v2642_v53 = vld [vmem:[%s6529_s15 + $0x9e8] sm:$0xff]  ;;  %v2644_v63 = vld [vmem:[%s6529_s15 + $0x9f8] sm:$0xff] }
 0x53c   : > { %5078 = vmatprep.subr.bf16.mxu1 %v3332_v1  ;;  %v3443_v1 = vunpack.c.h.s8.bf16 %v2627_v50  ;;  %v3458_v2 = vunpack.c.l.s8.bf16 %v2642_v53  ;;  %v3474_v10 = vunpack.c.h.s8.bf16 %v2642_v53 }
 0x53e   : > { %4915 = vmatpush1.bf16.msra.mxu0 %v3329_v4  ;;  %v2641_v4 = vld [vmem:[%s6529_s15 + $0x9e0] sm:$0xff] }
 0x53f   : > { %5079 = vmatpush1.bf16.msra.mxu1 %v3331_v5  ;;  %4916 = vmatprep.subr.bf16.mxu0 %v3346_v59  ;;  %v3460_v5 = vunpack.c.l.s8.bf16 %v2644_v63  ;;  %v2643_v59 = vld [vmem:[%s6529_s15 + $0x9f0] sm:$0xff]  ;;  %v3473_v20 = vunpack.c.h.s8.bf16 %v2641_v4 }
 0x540   : > { %5080 = vmatprep.subr.bf16.mxu1 %v3348_v56  ;;  %v3457_v56 = vunpack.c.l.s8.bf16 %v2641_v4  ;;  %v3459_v9 = vunpack.c.l.s8.bf16 %v2643_v59 }
 0x542   : > { %4917 = vmatpush1.bf16.msra.mxu0 %v3345_v16  ;;  %v3476_v16 = vunpack.c.h.s8.bf16 %v2644_v63 }
 0x543   : > { %5081 = vmatpush1.bf16.msra.mxu1 %v3347_v21  ;;  %4927 = vmatprep.subr.bf16.mxu0 %v3362_v17  ;;  %v2658_v21 = vld [vmem:[%s6529_s15 + $0xa68] sm:$0xff]  ;;  %v2660_v17 = vld [vmem:[%s6529_s15 + $0xa78] sm:$0xff] }
 0x544   : > { %5091 = vmatprep.subr.bf16.mxu1 %v3364_v23  ;;  %v3475_v23 = vunpack.c.h.s8.bf16 %v2643_v59  ;;  %v3490_v25 = vunpack.c.l.s8.bf16 %v2658_v21  ;;  %v3506_v32 = vunpack.c.h.s8.bf16 %v2658_v21 }
 0x545   : > { %4919 = vmatmul.mubr.bf16.vlgmr.msra.gmra.mrb[20].mxu0 %v6692_v13 }
 0x546   : > { %5083 = vmatmul.mubr.bf16.vlgmr.msra.gmra.mrb[20].mxu1 %v6692_v13  ;;  %4928 = vmatpush1.bf16.msra.mxu0 %v3361_v62  ;;  %v3395_v13 = vunpack.c.l.s8.bf16 %v2611_v39  ;;  %v2657_v62 = vld [vmem:[%s6529_s15 + $0xa60] sm:$0xff] }
 0x547   : > { %4959 = vmatprep.mubr.bf16.mxu0 %v6746_v24  ;;  %5092 = vmatpush1.bf16.msra.mxu1 %v3363_v27  ;;  %v3492_v27 = vunpack.c.l.s8.bf16 %v2660_v17  ;;  %v3489_v26 = vunpack.c.l.s8.bf16 %v2657_v62  ;;  %v3505_v31 = vunpack.c.h.s8.bf16 %v2657_v62 }
 0x548   : > { %5123 = vmatprep.mubr.bf16.mxu1 %v6746_v24  ;;  %4929 = vmatprep.subr.bf16.mxu0 %v3378_v28  ;;  %v3411_v24 = vunpack.c.h.s8.bf16 %v2611_v39  ;;  %v2659_v28 = vld [vmem:[%s6529_s15 + $0xa70] sm:$0xff] }
 0x549   : > { %5093 = vmatprep.subr.bf16.mxu1 %v3380_v30  ;;  %v3491_v30 = vunpack.c.l.s8.bf16 %v2659_v28 }
 0x54a   : > { %4930 = vmatpush1.bf16.msra.mxu0 %v3377_v15  ;;  %v3508_v15 = vunpack.c.h.s8.bf16 %v2660_v17 }
 0x54b   : > { %5094 = vmatpush1.bf16.msra.mxu1 %v3379_v35  ;;  %4931 = vmatprep.subr.bf16.mxu0 %v3394_v36  ;;  %v2674_v35 = vld [vmem:[%s6529_s15 + $0xae8] sm:$0xff]  ;;  %v2676_v36 = vld [vmem:[%s6529_s15 + $0xaf8] sm:$0xff] }
 0x54c   : > { %5095 = vmatprep.subr.bf16.mxu1 %v3396_v37  ;;  %v3507_v37 = vunpack.c.h.s8.bf16 %v2659_v28  ;;  %v3522_v39 = vunpack.c.l.s8.bf16 %v2674_v35  ;;  %v3538_v46 = vunpack.c.h.s8.bf16 %v2674_v35 }
 0x54e   : > { %4932 = vmatpush1.bf16.msra.mxu0 %v3393_v40  ;;  %v2673_v40 = vld [vmem:[%s6529_s15 + $0xae0] sm:$0xff] }
 0x54f   : > { %5096 = vmatpush1.bf16.msra.mxu1 %v3395_v13  ;;  %4933 = vmatprep.subr.bf16.mxu0 %v3410_v42  ;;  %v3524_v13 = vunpack.c.l.s8.bf16 %v2676_v36  ;;  %v2675_v42 = vld [vmem:[%s6529_s15 + $0xaf0] sm:$0xff]  ;;  %v3537_v48 = vunpack.c.h.s8.bf16 %v2673_v40 }
 0x550   : > { %5097 = vmatprep.subr.bf16.mxu1 %v3412_v43  ;;  %v3521_v43 = vunpack.c.l.s8.bf16 %v2673_v40  ;;  %v3523_v45 = vunpack.c.l.s8.bf16 %v2675_v42  ;;  %v7224_v40 = vld [vmem:[%s323_s30] sm:$0xff] }
 0x552   : > { %4934 = vmatpush1.bf16.msra.mxu0 %v3409_v12  ;;  %v3540_v12 = vunpack.c.h.s8.bf16 %v2676_v36 }
 0x553   : > { %5098 = vmatpush1.bf16.msra.mxu1 %v3411_v24  ;;  %4935 = vmatprep.subr.bf16.mxu0 %v3426_v47  ;;  %v2690_v24 = vld [vmem:[%s6529_s15 + $0xb68] sm:$0xff]  ;;  %v2692_v47 = vld [vmem:[%s6529_s15 + $0xb78] sm:$0xff] }
 0x554   : > { %5099 = vmatprep.subr.bf16.mxu1 %v3428_v49  ;;  %v3539_v49 = vunpack.c.h.s8.bf16 %v2675_v42  ;;  %v3554_v50 = vunpack.c.l.s8.bf16 %v2690_v24  ;;  %v3570_v63 = vunpack.c.h.s8.bf16 %v2690_v24 }
 0x556   : > { %4936 = vmatpush1.bf16.msra.mxu0 %v3425_v57  ;;  %v2689_v57 = vld [vmem:[%s6529_s15 + $0xb60] sm:$0xff] }
 0x557   : > { %5100 = vmatpush1.bf16.msra.mxu1 %v3427_v51  ;;  %4937 = vmatprep.subr.bf16.mxu0 %v3442_v52  ;;  %v3556_v51 = vunpack.c.l.s8.bf16 %v2692_v47  ;;  %v2691_v52 = vld [vmem:[%s6529_s15 + $0xb70] sm:$0xff]  ;;  %v3569_v4 = vunpack.c.h.s8.bf16 %v2689_v57 }
 0x558   : > { %5101 = vmatprep.subr.bf16.mxu1 %v3444_v54  ;;  %v3553_v54 = vunpack.c.l.s8.bf16 %v2689_v57  ;;  %v3555_v53 = vunpack.c.l.s8.bf16 %v2691_v52  ;;  %v2739_v57 = vld [vmem:[%s6529_s15 + $0xcf0] sm:$0xff] }
 0x55a   : > { %4938 = vmatpush1.bf16.msra.mxu0 %v3441_v0  ;;  %v3572_v0 = vunpack.c.h.s8.bf16 %v2692_v47  ;;  %v2737_v47 = vld [vmem:[%s6529_s15 + $0xce0] sm:$0xff] }
 0x55b   : > { %5102 = vmatpush1.bf16.msra.mxu1 %v3443_v1  ;;  %4939 = vmatprep.subr.bf16.mxu0 %v3458_v2  ;;  %v2706_v1 = vld [vmem:[%s6529_s15 + $0xbe8] sm:$0xff]  ;;  %v2708_v2 = vld [vmem:[%s6529_s15 + $0xbf8] sm:$0xff] }
 0x55c   : > { %5103 = vmatprep.subr.bf16.mxu1 %v3460_v5  ;;  %v3571_v5 = vunpack.c.h.s8.bf16 %v2691_v52  ;;  %v3586_v59 = vunpack.c.l.s8.bf16 %v2706_v1  ;;  %v3602_v17 = vunpack.c.h.s8.bf16 %v2706_v1  ;;  %v5288_v52 = vrot.slane %v7224_v40, %v6679_v22 }
 0x55d   : > { %v5292_v1 = vrot.slane %v7224_v40, %v6628_v61 }
 0x55e   : > { %4940 = vmatpush1.bf16.msra.mxu0 %v3457_v56  ;;  %v2705_v56 = vld [vmem:[%s6529_s15 + $0xbe0] sm:$0xff] }
 0x55f   : > { %5104 = vmatpush1.bf16.msra.mxu1 %v3459_v9  ;;  %4941 = vmatprep.subr.bf16.mxu0 %v3474_v10  ;;  %v3588_v9 = vunpack.c.l.s8.bf16 %v2708_v2  ;;  %v2707_v10 = vld [vmem:[%s6529_s15 + $0xbf0] sm:$0xff]  ;;  %v3601_v62 = vunpack.c.h.s8.bf16 %v2705_v56 }
 0x560   : > { %5105 = vmatprep.subr.bf16.mxu1 %v3476_v16  ;;  %v3585_v16 = vunpack.c.l.s8.bf16 %v2705_v56  ;;  %v3587_v21 = vunpack.c.l.s8.bf16 %v2707_v10  ;;  %v3665_v56 = vunpack.c.h.s8.bf16 %v2737_v47 }
 0x562   : > { %4942 = vmatpush1.bf16.msra.mxu0 %v3473_v20  ;;  %v3604_v20 = vunpack.c.h.s8.bf16 %v2708_v2 }
 0x563   : > { %5106 = vmatpush1.bf16.msra.mxu1 %v3475_v23  ;;  %4943 = vmatprep.subr.bf16.mxu0 %v3490_v25  ;;  %v2722_v23 = vld [vmem:[%s6529_s15 + $0xc68] sm:$0xff]  ;;  %v2724_v25 = vld [vmem:[%s6529_s15 + $0xc78] sm:$0xff] }
 0x564   : > { %5107 = vmatprep.subr.bf16.mxu1 %v3492_v27  ;;  %v3603_v27 = vunpack.c.h.s8.bf16 %v2707_v10  ;;  %v3618_v28 = vunpack.c.l.s8.bf16 %v2722_v23  ;;  %v3636_v42 = vunpack.c.h.s8.bf16 %v2724_v25 }
 0x566   : > { %4944 = vmatpush1.bf16.msra.mxu0 %v3489_v26  ;;  %v2721_v26 = vld [vmem:[%s6529_s15 + $0xc60] sm:$0xff] }
 0x567   : > { %5108 = vmatpush1.bf16.msra.mxu1 %v3491_v30  ;;  %4945 = vmatprep.subr.bf16.mxu0 %v3506_v32  ;;  %v3620_v30 = vunpack.c.l.s8.bf16 %v2724_v25  ;;  %v2723_v32 = vld [vmem:[%s6529_s15 + $0xc70] sm:$0xff]  ;;  %v3617_v35 = vunpack.c.l.s8.bf16 %v2721_v26 }
 0x568   : > { %5109 = vmatprep.subr.bf16.mxu1 %v3508_v15  ;;  %v7216_v15 = vld [vmem:[%s314_s10] sm:$0xff]  ;;  %v3619_v36 = vunpack.c.l.s8.bf16 %v2723_v32 }
 0x56a   : > { %4946 = vmatpush1.bf16.msra.mxu0 %v3505_v31  ;;  %v5180_v31 = vrot.slane %v7216_v15, %v6620_v58 }
 0x56b   : > { %5110 = vmatpush1.bf16.msra.mxu1 %v3507_v37  ;;  %4947 = vmatprep.subr.bf16.mxu0 %v3522_v39  ;;  %v3634_v37 = vunpack.c.h.s8.bf16 %v2722_v23  ;;  %v2738_v39 = vld [vmem:[%s6529_s15 + $0xce8] sm:$0xff] }
 0x56c   : > { %5111 = vmatprep.subr.bf16.mxu1 %v3524_v13  ;;  %v5188_v13 = vrot.slane %v7216_v15, %v6679_v22  ;;  %v3650_v24 = vunpack.c.l.s8.bf16 %v2738_v39 }
 0x56e   : > { %4948 = vmatpush1.bf16.msra.mxu0 %v3521_v43  ;;  %v2740_v43 = vld [vmem:[%s6529_s15 + $0xcf8] sm:$0xff] }
 0x56f   : > { %5112 = vmatpush1.bf16.msra.mxu1 %v3523_v45  ;;  %4949 = vmatprep.subr.bf16.mxu0 %v3538_v46  ;;  %v5184_v45 = vrot.slane %v7216_v15, %v6625_v60  ;;  %v3633_v46 = vunpack.c.h.s8.bf16 %v2721_v26  ;;  %v3668_v2 = vunpack.c.h.s8.bf16 %v2740_v43 }
 0x570   : > { %5113 = vmatprep.subr.bf16.mxu1 %v3540_v12  ;;  %v3635_v12 = vunpack.c.h.s8.bf16 %v2723_v32  ;;  %v7261_v32 = vld [vmem:[%s323_s30 + $0x8] sm:$0xff] }
 0x572   : > { %4950 = vmatpush1.bf16.msra.mxu0 %v3537_v48  ;;  %v5257_v48 = vmul.f32 %v5180_v31, %v6920_v11  ;;  %v5258_v11 = vmul.f32 %v5184_v45, %v6925_v18  ;;  %v2754_v18 = vld [vmem:[%s6529_s15 + $0xd68] sm:$0xff] }
 0x573   : > { %5114 = vmatpush1.bf16.msra.mxu1 %v3539_v49  ;;  %4951 = vmatprep.subr.bf16.mxu0 %v3554_v50  ;;  %v5280_v49 = vrot.slane %v7224_v40, %v6620_v58  ;;  %v5192_v50 = vrot.slane %v7216_v15, %v6628_v61  ;;  %v3682_v10 = vunpack.c.l.s8.bf16 %v2754_v18  ;;  %v3698_v26 = vunpack.c.h.s8.bf16 %v2754_v18 }
 0x574   : > { %5115 = vmatprep.subr.bf16.mxu1 %v3556_v51  ;;  %v5259_v51 = vmul.f32 %v5188_v13, %v6922_v14 }
 0x575   : > { %v5260_v14 = vmul.f32 %v5192_v50, %v6927_v19 }
 0x576   : > { %4952 = vmatpush1.bf16.msra.mxu0 %v3553_v54  ;;  %v5284_v54 = vrot.slane %v7224_v40, %v6625_v60 }
 0x577   : > { %5116 = vmatpush1.bf16.msra.mxu1 %v3555_v53  ;;  %4953 = vmatprep.subr.bf16.mxu0 %v3570_v63  ;;  %v3649_v53 = vunpack.c.l.s8.bf16 %v2737_v47  ;;  %v3666_v63 = vunpack.c.h.s8.bf16 %v2738_v39  ;;  %v5360_v19 = vadd.f32 %v5292_v1, %v5260_v14 }
 0x578   : > { %5117 = vmatprep.subr.bf16.mxu1 %v3572_v0  ;;  %v5357_v0 = vadd.f32 %v5280_v49, %v5257_v48  ;;  %v5320_v48 = vrot.slane %v7261_v32, %v6679_v22  ;;  %v5316_v49 = vrot.slane %v7261_v32, %v6625_v60 }
 0x57a   : > { %4954 = vmatpush1.bf16.msra.mxu0 %v3569_v4  ;;  %v5359_v4 = vadd.f32 %v5288_v52, %v5259_v51  ;;  %v5324_v52 = vrot.slane %v7261_v32, %v6628_v61 }
 0x57b   : > { %5118 = vmatpush1.bf16.msra.mxu1 %v3571_v5  ;;  %4955 = vmatprep.subr.bf16.mxu0 %v3586_v59  ;;  %v2756_v5 = vld [vmem:[%s6529_s15 + $0xd78] sm:$0xff]  ;;  %v5358_v59 = vadd.f32 %v5284_v54, %v5258_v11 }
 0x57c   : > { %5119 = vmatprep.subr.bf16.mxu1 %v3588_v9  ;;  %v3667_v9 = vunpack.c.h.s8.bf16 %v2739_v57  ;;  %v5375_v23 = vmul.f32 0.5, %v5359_v4 }
 0x57d   : > { %v5374_v25 = vmul.f32 0.5, %v5358_v59  ;;  %v2786_v59 = vld [vmem:[%s6529_s15 + $0xe68] sm:$0xff] }
 0x57e   : > { %4956 = vmatpush1.bf16.msra.mxu0 %v3585_v16  ;;  %v2753_v16 = vld [vmem:[%s6529_s15 + $0xd60] sm:$0xff] }
 0x57f   : > { %5120 = vmatpush1.bf16.msra.mxu1 %v3587_v21  ;;  %4957 = vmatprep.subr.bf16.mxu0 %v3602_v17  ;;  %v5373_v21 = vmul.f32 0.5, %v5357_v0  ;;  %v3684_v17 = vunpack.c.l.s8.bf16 %v2756_v5 }
 0x580   : > { %5121 = vmatprep.subr.bf16.mxu1 %v3604_v20  ;;  %v2755_v20 = vld [vmem:[%s6529_s15 + $0xd70] sm:$0xff] }
 0x581   : > { %6042 = vtanh.f32 %v5373_v21 }
 0x582   : > { %4958 = vmatpush1.bf16.msra.mxu0 %v3601_v62  ;;  %v3681_v62 = vunpack.c.l.s8.bf16 %v2753_v16  ;;  %6044 = vtanh.f32 %v5375_v23 }
 0x583   : > { %5122 = vmatpush1.bf16.msra.mxu1 %v3603_v27  ;;  %4968 = vmatprep.subr.bf16.mxu0 %v3618_v28  ;;  %v7257_v27 = vld [vmem:[%s314_s10 + $0x8] sm:$0xff]  ;;  %v3683_v28 = vunpack.c.l.s8.bf16 %v2755_v20  ;;  %6046 = vtanh.f32 %v5374_v25 }
 0x584   : > { %5132 = vmatprep.subr.bf16.mxu1 %v3620_v30  ;;  %v5376_v30 = vmul.f32 0.5, %v5360_v19  ;;  %v5212_v31 = vrot.slane %v7257_v27, %v6620_v58  ;;  %v5220_v39 = vrot.slane %v7257_v27, %v6679_v22  ;;  %v5216_v13 = vrot.slane %v7257_v27, %v6625_v60 }
 0x585   : > { %4960 = vmatmul.mubr.bf16.vlgmr.msra.gmra.mrb[20].mxu0 %v6748_v29  ;;  %v5224_v45 = vrot.slane %v7257_v27, %v6628_v61 }
 0x586   : > { %5124 = vmatmul.mubr.bf16.vlgmr.msra.gmra.mrb[20].mxu1 %v6748_v29  ;;  %4969 = vmatpush1.bf16.msra.mxu0 %v3617_v35  ;;  %v3652_v29 = vunpack.c.l.s8.bf16 %v2740_v43  ;;  %v3700_v35 = vunpack.c.h.s8.bf16 %v2756_v5  ;;  %v5312_v43 = vrot.slane %v7261_v32, %v6620_v58  ;;  %6048 = vtanh.f32 %v5376_v30 }
 0x587   : > { %5000 = vmatprep.mubr.bf16.mxu0 %v6754_v34  ;;  %5133 = vmatpush1.bf16.msra.mxu1 %v3619_v36  ;;  %v2770_v36 = vld [vmem:[%s6529_s15 + $0xde8] sm:$0xff] }
 0x588   : > { %5164 = vmatprep.mubr.bf16.mxu1 %v6754_v34  ;;  %4970 = vmatprep.subr.bf16.mxu0 %v3634_v37  ;;  %v3651_v34 = vunpack.c.l.s8.bf16 %v2739_v57  ;;  %v7267_v37 = vld [vmem:[%s6529_s15 + $0xdf8] sm:$0xff] }
 0x589   : > { %5134 = vmatprep.subr.bf16.mxu1 %v3636_v42  ;;  %v3697_v42 = vunpack.c.h.s8.bf16 %v2753_v16  ;;  %v3716_v50 = vunpack.c.l.s8.bf16 %v7267_v37  ;;  %v3732_v5 = vunpack.c.h.s8.bf16 %v7267_v37 }
 0x58a   : > { %4971 = vmatpush1.bf16.msra.mxu0 %v3633_v46  ;;  %v3699_v46 = vunpack.c.h.s8.bf16 %v2755_v20  ;;  %v2785_v20 = vld [vmem:[%s6529_s15 + $0xe60] sm:$0xff] }
 0x58b   : > { %5135 = vmatpush1.bf16.msra.mxu1 %v3635_v12  ;;  %4972 = vmatprep.subr.bf16.mxu0 %v3650_v24  ;;  %v3714_v12 = vunpack.c.l.s8.bf16 %v2770_v36  ;;  %v2769_v24 = vld [vmem:[%s6529_s15 + $0xde0] sm:$0xff]  ;;  %v3745_v30 = vunpack.c.l.s8.bf16 %v2785_v20 }
 0x58c   : > { %5136 = vmatprep.subr.bf16.mxu1 %v3652_v29  ;;  %v2771_v29 = vld [vmem:[%s6529_s15 + $0xdf0] sm:$0xff]  ;;  %v3713_v22 = vunpack.c.l.s8.bf16 %v2769_v24  ;;  %v3729_v16 = vunpack.c.h.s8.bf16 %v2769_v24 }
 0x58d   : > { %v3715_v1 = vunpack.c.l.s8.bf16 %v2771_v29  ;;  %v3731_v19 = vunpack.c.h.s8.bf16 %v2771_v29 }
 0x58e   : > { %4973 = vmatpush1.bf16.msra.mxu0 %v3649_v53 }
 0x58f   : > { %5137 = vmatpush1.bf16.msra.mxu1 %v3651_v34  ;;  %4974 = vmatprep.subr.bf16.mxu0 %v3666_v63 }
 0x590   : > { %5138 = vmatprep.subr.bf16.mxu1 %v3668_v2  ;;  %v3730_v2 = vunpack.c.h.s8.bf16 %v2770_v36 }
 0x592   : > { %4975 = vmatpush1.bf16.msra.mxu0 %v3665_v56 }
 0x593   : > { %5139 = vmatpush1.bf16.msra.mxu1 %v3667_v9  ;;  %4976 = vmatprep.subr.bf16.mxu0 %v3682_v10  ;;  %v2788_v9 = vld [vmem:[%s6529_s15 + $0xe78] sm:$0xff]  ;;  %v6043_v10 = vpop.eup %6042 }
 0x594   : > { %5140 = vmatprep.subr.bf16.mxu1 %v3684_v17  ;;  %v6045_v21 = vpop.eup %6044  ;;  %v3746_v17 = vunpack.c.l.s8.bf16 %v2786_v59  ;;  %v3748_v25 = vunpack.c.l.s8.bf16 %v2788_v9 }
 0x595   : > { %v6047_v23 = vpop.eup %6046 }
 0x596   : > { %4977 = vmatpush1.bf16.msra.mxu0 %v3681_v62  ;;  %v2787_v62 = vld [vmem:[%s6529_s15 + $0xe70] sm:$0xff]  ;;  %v5390_v37 = vsub.f32 1.0, %v6047_v23 }
 0x597   : > { %5141 = vmatpush1.bf16.msra.mxu1 %v3683_v28  ;;  %4978 = vmatprep.subr.bf16.mxu0 %v3698_v26  ;;  %v6049_v28 = vpop.eup %6048  ;;  %v5389_v26 = vsub.f32 1.0, %v6043_v10  ;;  %v3747_v36 = vunpack.c.l.s8.bf16 %v2787_v62 }
 0x598   : > { %v4674_v47 = vpop.f32.mrb[16].mxu0  ;;  %5142 = vmatprep.subr.bf16.mxu1 %v3700_v35  ;;  %v5391_v35 = vsub.f32 1.0, %v6045_v21  ;;  %v5398_v29 = vmul.f32 0.5, %v5390_v37 }
 0x599   : > { %v5265_v58 = vmul.f32 %v5212_v31, %v4674_v47  ;;  %v4838_v57 = vpop.f32.mrb[16].mxu1  ;;  %v4676_v51 = vpop.f32.mrb[17].mxu0  ;;  %v3762_v31 = vunpack.c.h.s8.bf16 %v2786_v59  ;;  %v3763_v47 = vunpack.c.h.s8.bf16 %v2787_v62  ;;  %v2833_v62 = vld [vmem:[%s6529_s15 + $0xfe0] sm:$0xff] }
 0x59a   : > { %v5267_v11 = vmul.f32 %v5220_v39, %v4838_v57  ;;  %v5266_v54 = vmul.f32 %v5216_v13, %v4676_v51  ;;  %v4840_v53 = vpop.f32.mrb[17].mxu1  ;;  %v4678_v34 = vpop.f32.mrb[18].mxu0  ;;  %4979 = vmatpush1.bf16.msra.mxu0 %v3697_v42  ;;  %v3764_v39 = vunpack.c.h.s8.bf16 %v2788_v9  ;;  %v2802_v13 = vld [vmem:[%s6529_s15 + $0xee8] sm:$0xff]  ;;  %v5392_v42 = vsub.f32 1.0, %v6049_v28  ;;  %v2803_v51 = vld [vmem:[%s6529_s15 + $0xef0] sm:$0xff] }
 0x59b   : > { %v5365_v60 = vadd.f32 %v5312_v43, %v5265_v58  ;;  %v5268_v63 = vmul.f32 %v5224_v45, %v4840_v53  ;;  %v4842_v0 = vpop.f32.mrb[18].mxu1  ;;  %5143 = vmatpush1.bf16.msra.mxu1 %v3699_v46  ;;  %v4679_v14 = vpop.f32.mrb[19].mxu0  ;;  %4980 = vmatprep.subr.bf16.mxu0 %v3714_v12  ;;  %v2804_v43 = vld [vmem:[%s6529_s15 + $0xef8] sm:$0xff]  ;;  %v5397_v45 = vmul.f32 0.5, %v5389_v26  ;;  %v3761_v46 = vunpack.c.h.s8.bf16 %v2785_v20  ;;  %v2835_v26 = vld [vmem:[%s6529_s15 + $0xff0] sm:$0xff] }
 0x59c   : > { %v5367_v61 = vadd.f32 %v5320_v48, %v5267_v11  ;;  %v5366_v18 = vadd.f32 %v5316_v49, %v5266_v54  ;;  %v4843_v4 = vpop.f32.mrb[19].mxu1  ;;  %5144 = vmatprep.subr.bf16.mxu1 %v3716_v50  ;;  %v5399_v24 = vmul.f32 0.5, %v5391_v35  ;;  %v3778_v48 = vunpack.c.l.s8.bf16 %v2802_v13  ;;  %v2801_v49 = vld [vmem:[%s6529_s15 + $0xee0] sm:$0xff] }
 0x59d   : > { %6050 = vtanh.f32 %v5365_v60  ;;  %v5368_v56 = vadd.f32 %v5324_v52, %v5268_v63  ;;  %v3780_v57 = vunpack.c.l.s8.bf16 %v2804_v43  ;;  %v5400_v11 = vmul.f32 0.5, %v5392_v42 }
 0x59e   : > { %6052 = vtanh.f32 %v5367_v61  ;;  %4981 = vmatpush1.bf16.msra.mxu0 %v3713_v22  ;;  %v3777_v22 = vunpack.c.l.s8.bf16 %v2801_v49  ;;  %v3779_v63 = vunpack.c.l.s8.bf16 %v2803_v51  ;;  %v3794_v0 = vunpack.c.h.s8.bf16 %v2802_v13 }
 0x59f   : > { %6054 = vtanh.f32 %v5366_v18  ;;  %5145 = vmatpush1.bf16.msra.mxu1 %v3715_v1  ;;  %4982 = vmatprep.subr.bf16.mxu0 %v3730_v2  ;;  %v3796_v14 = vunpack.c.h.s8.bf16 %v2804_v43  ;;  %v2818_v1 = vld [vmem:[%s6529_s15 + $0xf68] sm:$0xff]  ;;  %v2820_v2 = vld [vmem:[%s6529_s15 + $0xf78] sm:$0xff]  ;;  %v3793_v61 = vunpack.c.h.s8.bf16 %v2801_v49  ;;  %v3795_v18 = vunpack.c.h.s8.bf16 %v2803_v51 }
 0x5a0   : > { %6056 = vtanh.f32 %v5368_v56  ;;  %5146 = vmatprep.subr.bf16.mxu1 %v3732_v5  ;;  %v3810_v4 = vunpack.c.l.s8.bf16 %v2818_v1  ;;  %v2817_v5 = vld [vmem:[%s6529_s15 + $0xf60] sm:$0xff]  ;;  %v3812_v59 = vunpack.c.l.s8.bf16 %v2820_v2  ;;  %v2819_v56 = vld [vmem:[%s6529_s15 + $0xf70] sm:$0xff]  ;;  %v3828_v21 = vunpack.c.h.s8.bf16 %v2820_v2 }
 0x5a1   : > { %v3809_v9 = vunpack.c.l.s8.bf16 %v2817_v5  ;;  %v3811_v10 = vunpack.c.l.s8.bf16 %v2819_v56  ;;  %v3825_v20 = vunpack.c.h.s8.bf16 %v2817_v5  ;;  %v3827_v23 = vunpack.c.h.s8.bf16 %v2819_v56 }
 0x5a2   : > { %4983 = vmatpush1.bf16.msra.mxu0 %v3729_v16  ;;  %v3826_v16 = vunpack.c.h.s8.bf16 %v2818_v1  ;;  %v3843_v35 = vunpack.c.l.s8.bf16 %v2835_v26  ;;  %v3857_v37 = vunpack.c.h.s8.bf16 %v2833_v62  ;;  %v5196_v13 = vrot.slane %v7216_v15, %v6721_v38 }
 0x5a3   : > { %5147 = vmatpush1.bf16.msra.mxu1 %v3731_v19  ;;  %4984 = vmatprep.subr.bf16.mxu0 %v3746_v17  ;;  %v2834_v19 = vld [vmem:[%s6529_s15 + $0xfe8] sm:$0xff]  ;;  %v2836_v17 = vld [vmem:[%s6529_s15 + $0xff8] sm:$0xff]  ;;  %v5204_v42 = vrot.slane %v7216_v15, %v6783_v55  ;;  %v5200_v43 = vrot.slane %v7216_v15, %v6726_v41 }
 0x5a4   : > { %5148 = vmatprep.subr.bf16.mxu1 %v3748_v25  ;;  %v3842_v25 = vunpack.c.l.s8.bf16 %v2834_v19  ;;  %v3844_v28 = vunpack.c.l.s8.bf16 %v2836_v17 }
 0x5a6   : > { %4985 = vmatpush1.bf16.msra.mxu0 %v3745_v30  ;;  %v3841_v30 = vunpack.c.l.s8.bf16 %v2833_v62 }
 0x5a7   : > { %v6051_v12 = vpop.eup %6050  ;;  %5149 = vmatpush1.bf16.msra.mxu1 %v3747_v36  ;;  %4986 = vmatprep.subr.bf16.mxu0 %v3762_v31  ;;  %v3858_v36 = vunpack.c.h.s8.bf16 %v2834_v19  ;;  %v3860_v31 = vunpack.c.h.s8.bf16 %v2836_v17 }
 0x5a8   : > { %v6053_v50 = vpop.eup %6052  ;;  %v5413_v58 = vmul.f32 %v6051_v12, %v5397_v45  ;;  %5150 = vmatprep.subr.bf16.mxu1 %v3764_v39  ;;  %v3859_v39 = vunpack.c.h.s8.bf16 %v2835_v26  ;;  %v5208_v45 = vrot.slane %v7216_v15, %v6729_v44  ;;  %v5296_v12 = vrot.slane %v7224_v40, %v6721_v38 }
 0x5a9   : > { %v6055_v52 = vpop.eup %6054  ;;  %v5415_v54 = vmul.f32 %v6053_v50, %v5399_v24  ;;  %v5263_v24 = vmul.f32 %v5204_v42, %v7075_v6  ;;  %v5308_v15 = vrot.slane %v7224_v40, %v6729_v44 }
 0x5aa   : > { %v6057_v53 = vpop.eup %6056  ;;  %5421 = vst [vmem:[%s7307_s20] sm:$0xff] %v5413_v58  ;;  %v5414_v34 = vmul.f32 %v6055_v52, %v5398_v29  ;;  %4987 = vmatpush1.bf16.msra.mxu0 %v3761_v46  ;;  %v5261_v46 = vmul.f32 %v5196_v13, %v7072_v3  ;;  %v5264_v49 = vmul.f32 %v5208_v45, %v7079_v8 }
 0x5ab   : > { %5423 = vst [vmem:[%s7307_s20 + $0x10] sm:$0xff] %v5415_v54  ;;  %v5416_v60 = vmul.f32 %v6057_v53, %v5400_v11  ;;  %5151 = vmatpush1.bf16.msra.mxu1 %v3763_v47  ;;  %4988 = vmatprep.subr.bf16.mxu0 %v3778_v48  ;;  %v5262_v47 = vmul.f32 %v5200_v43, %v7077_v7 }
 0x5ac   : > { %5422 = vst [vmem:[%s7307_s20 + $0x8] sm:$0xff] %v5414_v34  ;;  %5152 = vmatprep.subr.bf16.mxu1 %v3780_v57  ;;  %v5300_v48 = vrot.slane %v7224_v40, %v6726_v41  ;;  %v5361_v50 = vadd.f32 %v5296_v12, %v5261_v46  ;;  %v5364_v58 = vadd.f32 %v5308_v15, %v5264_v49 }
 0x5ad   : > { %5424 = vst [vmem:[%s7307_s20 + $0x18] sm:$0xff] %v5416_v60  ;;  %v5228_v7 = vrot.slane %v7257_v27, %v6721_v38  ;;  %v5236_v11 = vrot.slane %v7257_v27, %v6783_v55  ;;  %v5232_v8 = vrot.slane %v7257_v27, %v6726_v41  ;;  %v5240_v54 = vrot.slane %v7257_v27, %v6729_v44 }
 0x5ae   : > { %4989 = vmatpush1.bf16.msra.mxu0 %v3777_v22  ;;  %v5362_v29 = vadd.f32 %v5300_v48, %v5262_v47  ;;  %v5377_v57 = vmul.f32 0.5, %v5361_v50  ;;  %v5380_v52 = vmul.f32 0.5, %v5364_v58  ;;  %v5336_v34 = vrot.slane %v7261_v32, %v6783_v55 }
 0x5af   : > { %5153 = vmatpush1.bf16.msra.mxu1 %v3779_v63  ;;  %4990 = vmatprep.subr.bf16.mxu0 %v3794_v0  ;;  %v5332_v22 = vrot.slane %v7261_v32, %v6726_v41 }
 0x5b0   : > { %5154 = vmatprep.subr.bf16.mxu1 %v3796_v14  ;;  %v5378_v6 = vmul.f32 0.5, %v5362_v29  ;;  %6058 = vtanh.f32 %v5377_v57  ;;  %v5340_v14 = vrot.slane %v7261_v32, %v6729_v44 }
 0x5b2   : > { %4991 = vmatpush1.bf16.msra.mxu0 %v3793_v61 }
 0x5b3   : > { %5155 = vmatpush1.bf16.msra.mxu1 %v3795_v18  ;;  %4992 = vmatprep.subr.bf16.mxu0 %v3810_v4 }
 0x5b4   : > { %5156 = vmatprep.subr.bf16.mxu1 %v3812_v59 }
 0x5b6   : > { %4993 = vmatpush1.bf16.msra.mxu0 %v3809_v9 }
 0x5b7   : > { %5157 = vmatpush1.bf16.msra.mxu1 %v3811_v10  ;;  %4994 = vmatprep.subr.bf16.mxu0 %v3826_v16 }
 0x5b8   : > { %5158 = vmatprep.subr.bf16.mxu1 %v3828_v21 }
 0x5ba   : > { %4995 = vmatpush1.bf16.msra.mxu0 %v3825_v20  ;;  %v6059_v41 = vpop.eup %6058 }
 0x5bb   : > { %5159 = vmatpush1.bf16.msra.mxu1 %v3827_v23  ;;  %4996 = vmatprep.subr.bf16.mxu0 %v3842_v25 }
 0x5bc   : > { %5160 = vmatprep.subr.bf16.mxu1 %v3844_v28 }
 0x5be   : > { %4997 = vmatpush1.bf16.msra.mxu0 %v3841_v30 }
 0x5bf   : > { %5161 = vmatpush1.bf16.msra.mxu1 %v3843_v35  ;;  %4998 = vmatprep.subr.bf16.mxu0 %v3858_v36 }
 0x5c0   : > { %5162 = vmatprep.subr.bf16.mxu1 %v3860_v31 }
 0x5c2   : > { %4999 = vmatpush1.bf16.msra.mxu0 %v3857_v37 }
 0x5c3   : > { %5163 = vmatpush1.bf16.msra.mxu1 %v3859_v39 }
 0x5c5   : > { %5001 = vmatmul.mubr.bf16.vlgmr.msra.gmra.mrb[20].mxu0 %v6795_v33 }
 0x5c6   : > { %5165 = vmatmul.mubr.bf16.vlgmr.msra.gmra.mrb[20].mxu1 %v6795_v33  ;;  %v5304_v33 = vrot.slane %v7224_v40, %v6783_v55  ;;  %v5328_v40 = vrot.slane %v7261_v32, %v6721_v38  ;;  %v5393_v32 = vsub.f32 1.0, %v6059_v41 }
 0x5c8   : > { %v5363_v3 = vadd.f32 %v5304_v33, %v5263_v24  ;;  %v5401_v20 = vmul.f32 0.5, %v5393_v32 }
 0x5ca   : > { %v5379_v51 = vmul.f32 0.5, %v5363_v3 }
 0x5cc   : > { %6060 = vtanh.f32 %v5379_v51 }
 0x5cd   : > { %6062 = vtanh.f32 %v5378_v6 }
 0x5ce   : > { %6064 = vtanh.f32 %v5380_v52 }
 0x5d6   : > { %v6061_v10 = vpop.eup %6060 }
 0x5d7   : > { %v6063_v16 = vpop.eup %6062  ;;  %v5395_v21 = vsub.f32 1.0, %v6061_v10 }
 0x5d8   : > { %v6065_v44 = vpop.eup %6064  ;;  %v5394_v19 = vsub.f32 1.0, %v6063_v16 }
 0x5d9   : > { %v5396_v17 = vsub.f32 1.0, %v6065_v44  ;;  %v5403_v25 = vmul.f32 0.5, %v5395_v21 }
 0x5da   : > { %v5402_v28 = vmul.f32 0.5, %v5394_v19 }
 0x5db   : > { %v5404_v35 = vmul.f32 0.5, %v5396_v17 }
 0x698   : > { %v5002_v53 = vpop.f32.mrb[20].mxu0 }
 0x699   : > { %v5269_v60 = vmul.f32 %v5228_v7, %v5002_v53  ;;  %v5166_v63 = vpop.f32.mrb[20].mxu1  ;;  %v5004_v0 = vpop.f32.mrb[21].mxu0 }
 0x69a   : > { %v5271_v1 = vmul.f32 %v5236_v11, %v5166_v63  ;;  %v5270_v2 = vmul.f32 %v5232_v8, %v5004_v0  ;;  %v5168_v38 = vpop.f32.mrb[21].mxu1  ;;  %v5006_v61 = vpop.f32.mrb[22].mxu0 }
 0x69b   : > { %v5369_v18 = vadd.f32 %v5328_v40, %v5269_v60  ;;  %v5272_v27 = vmul.f32 %v5240_v54, %v5168_v38  ;;  %v5170_v4 = vpop.f32.mrb[22].mxu1  ;;  %v5007_v5 = vpop.f32.mrb[23].mxu0 }
 0x69c   : > { %v5371_v59 = vadd.f32 %v5336_v34, %v5271_v1  ;;  %v5370_v56 = vadd.f32 %v5332_v22, %v5270_v2  ;;  %v5171_v55 = vpop.f32.mrb[23].mxu1 }
 0x69d   : > { %6066 = vtanh.f32 %v5369_v18  ;;  %v5372_v9 = vadd.f32 %v5340_v14, %v5272_v27 }
 0x69e   : > { %6068 = vtanh.f32 %v5371_v59 }
 0x69f   : > { %6070 = vtanh.f32 %v5370_v56 }
 0x6a0   : > { %6072 = vtanh.f32 %v5372_v9 }
 0x6a7   : > { %v6067_v23 = vpop.eup %6066 }
 0x6a8   : > { %v6069_v62 = vpop.eup %6068  ;;  %v5417_v26 = vmul.f32 %v6067_v23, %v5401_v20 }
 0x6a9   : > { %v6071_v30 = vpop.eup %6070  ;;  %v5419_v36 = vmul.f32 %v6069_v62, %v5403_v25 }
 0x6aa   : > { %v6073_v31 = vpop.eup %6072  ;;  %5425 = vst [vmem:[%s7307_s20 + $0x20] sm:$0xff] %v5417_v26  ;;  %v5418_v37 = vmul.f32 %v6071_v30, %v5402_v28 }
 0x6ab   : > { %5427 = vst [vmem:[%s7307_s20 + $0x30] sm:$0xff] %v5419_v36  ;;  %v5420_v39 = vmul.f32 %v6073_v31, %v5404_v35 }
 0x6ac   : > { %5426 = vst [vmem:[%s7307_s20 + $0x28] sm:$0xff] %v5418_v37 }
 0x6ad   : > { %5428 = vst [vmem:[%s7307_s20 + $0x38] sm:$0xff] %v5420_v39 }
 0x6ae PF: > { %s7419_s12 = sld [smem:[#allocation12_spill]]  ;;  %p15_p1 = scmp.ge.s32.totalorder %s6332_s26, 10  }
 0x6af   : > { %s7420_s21 = smov %s6255_s22  ;;  %s7421_s22 = smov %s6259_s23 }
 0x6b0   : > { %s7423_s24 = smov %s6332_s26  ;;  %17 = sbr.rel (!%p15_p1) target bundleno = 5 (0x5), region = 113 }
 0x6b4   : > { %s7422_s23 = smov %s7419_s12 }
 0x6b7   :  { %5451 = vsyncpa [#allocation3], 1 }
 0x6b8   :  { %5453 = vsyncpa [#allocation3 + $0x1], 1 }
 0x6b9   :  { %5454 = vsyncpa [#allocation5], 1 }

// kernel: recurrent_voxel_head_forward.3
= control target key start
LH: loop header
LB: loop body
LE: loop exit
PB: predicated region body
PF: predicated region fallthrough
CT: control target
= control target key end

     0   :  { %s8150_s24 = smov 0   ;;  %s9842_s0 = inlined_call_operand.vmem [shape: bf16[2,3,10,8,512], index: 0, kind: input, shape index: {}]   ;;  %s9843_s1 = inlined_call_operand.vmem [shape: bf16[9,512,128], index: 1, kind: input, shape index: {}]   ;;  %s9844_s2 = inlined_call_operand.vmem [shape: f32[1,128], index: 2, kind: input, shape index: {}]   ;;  %s9845_s3 = inlined_call_operand.vmem [shape: bf16[128,512], index: 3, kind: input, shape index: {}]   ;;  %s9846_s4 = inlined_call_operand.vmem [shape: f32[1,512], index: 4, kind: input, shape index: {}]   ;;  %s9847_s5 = inlined_call_operand.vmem [shape: bf16[128,128], index: 5, kind: input, shape index: {}]   ;;  %s9848_s6 = inlined_call_operand.vmem [shape: f32[1,128], index: 6, kind: input, shape index: {}]   ;;  %s9849_s7 = inlined_call_operand.vmem [shape: f32[2,4,64,128], index: 7, kind: output, shape index: {}]  }
   0x1 LB: > { %s5546_s25 = sadd.s32 4294967295, %s8107_s24   ;;  %p5550_p0 = scmp.ge.s32.totalorder %s8107_s24, 1  ;;  %s8107_s24 = sphi %s8150_s24, %s17_s24  }
   0x2   : > { %p237_p1 = scmp.lt.s32.totalorder %s8107_s24, 3 }
   0x4   : > { %p238_p2 = pnand %p5550_p0, %p237_p1 }
   0x5   : > { %v7569_v0 = vld [vmem:[%s9843_s1 + $0x140] sm:$0xff] (!%p238_p2)   ;;  %v7573_v4 = vld [vmem:[%s9843_s1 + $0x148] sm:$0xff] (!%p238_p2)   ;;  %v7577_v8 = vld [vmem:[%s9843_s1 + $0x150] sm:$0xff] (!%p238_p2)   ;;  %p269_p3 = scmp.lt.s32.totalorder (!%p238_p2), %s5546_s25, 1 }
   0x6   : > { %241 = sbr.rel (%p238_p2) target bundleno = 1045 (0x415), region = 48  ;;  %v7570_v1 = vld [vmem:[%s9843_s1 + $0x1c0] sm:$0xff] (!%p238_p2)   ;;  %6695 = vmatprep.subr.bf16.mxu0 (!%p238_p2), %v7569_v0  ;;  %v7574_v5 = vld [vmem:[%s9843_s1 + $0x1c8] sm:$0xff] (!%p238_p2)   ;;  %v7578_v9 = vld [vmem:[%s9843_s1 + $0x1d0] sm:$0xff] (!%p238_p2)  }
   0x7   : > { %v7571_v2 = vld [vmem:[%s9843_s1 + $0x100] sm:$0xff] (!%p238_p2)   ;;  %6735 = vmatprep.subr.bf16.mxu1 (!%p238_p2), %v7570_v1  ;;  %v7575_v6 = vld [vmem:[%s9843_s1 + $0x108] sm:$0xff] (!%p238_p2)   ;;  %v7579_v10 = vld [vmem:[%s9843_s1 + $0x110] sm:$0xff] (!%p238_p2)  }
   0x8   : > { %v7572_v3 = vld [vmem:[%s9843_s1 + $0x180] sm:$0xff] (!%p238_p2)   ;;  %6696 = vmatpush3.bf16.msra.mxu0 (!%p238_p2), %v7571_v2  ;;  %v7576_v7 = vld [vmem:[%s9843_s1 + $0x188] sm:$0xff] (!%p238_p2)   ;;  %v7580_v11 = vld [vmem:[%s9843_s1 + $0x190] sm:$0xff] (!%p238_p2)  }
   0x9   : > { %6736 = vmatpush3.bf16.msra.mxu1 (!%p238_p2), %v7572_v3  ;;  %6697 = vmatprep.subr.bf16.mxu0 (!%p238_p2), %v7573_v4  ;;  %v7581_v12 = vld [vmem:[%s9843_s1 + $0x158] sm:$0xff] (!%p238_p2)   ;;  %v7585_v16 = vld [vmem:[%s9843_s1 + $0x160] sm:$0xff] (!%p238_p2)   ;;  %v7589_v20 = vld [vmem:[%s9843_s1 + $0x168] sm:$0xff] (!%p238_p2)  }
   0xa   : > { %6737 = vmatprep.subr.bf16.mxu1 (!%p238_p2), %v7574_v5  ;;  %v7582_v13 = vld [vmem:[%s9843_s1 + $0x1d8] sm:$0xff] (!%p238_p2)   ;;  %v7586_v17 = vld [vmem:[%s9843_s1 + $0x1e0] sm:$0xff] (!%p238_p2)   ;;  %v7590_v21 = vld [vmem:[%s9843_s1 + $0x1e8] sm:$0xff] (!%p238_p2)  }
   0xb   : > { %v7583_v14 = vld [vmem:[%s9843_s1 + $0x118] sm:$0xff] (!%p238_p2)   ;;  %v7587_v18 = vld [vmem:[%s9843_s1 + $0x120] sm:$0xff] (!%p238_p2)   ;;  %v7591_v22 = vld [vmem:[%s9843_s1 + $0x128] sm:$0xff] (!%p238_p2)  }
   0xc   : > { %6698 = vmatpush3.bf16.msra.mxu0 (!%p238_p2), %v7575_v6  ;;  %v7584_v15 = vld [vmem:[%s9843_s1 + $0x198] sm:$0xff] (!%p238_p2)   ;;  %v7588_v19 = vld [vmem:[%s9843_s1 + $0x1a0] sm:$0xff] (!%p238_p2)   ;;  %v7592_v23 = vld [vmem:[%s9843_s1 + $0x1a8] sm:$0xff] (!%p238_p2)  }
   0xd   : > { %6738 = vmatpush3.bf16.msra.mxu1 %v7576_v7  ;;  %6699 = vmatprep.subr.bf16.mxu0 %v7577_v8  ;;  %s9851_s25 = smov (!%p269_p3, %s5546_s25), 1  ;;  %v7593_v24 = vld [vmem:[%s9843_s1 + $0x170] sm:$0xff]   ;;  %v7597_v28 = vld [vmem:[%s9843_s1 + $0x178] sm:$0xff]   ;;  %v7607_v36 = vld [vmem:[%s9843_s1 + $0x40] sm:$0xff]  }
   0xe   : > { %6739 = vmatprep.subr.bf16.mxu1 %v7578_v9  ;;  %v7594_v25 = vld [vmem:[%s9843_s1 + $0x1f0] sm:$0xff]   ;;  %s7559_s13 = smul.u32 480, %s9851_s25  ;;  %v7598_v29 = vld [vmem:[%s9843_s1 + $0x1f8] sm:$0xff]   ;;  %v7608_v37 = vld [vmem:[%s9843_s1 + $0xc0] sm:$0xff]  }
   0xf   : > { %v7595_v26 = vld [vmem:[%s9843_s1 + $0x130] sm:$0xff]   ;;  %v7599_v30 = vld [vmem:[%s9843_s1 + $0x138] sm:$0xff]   ;;  %v7609_v38 = vld [vmem:[%s9843_s1] sm:$0xff]  }
  0x10   : > { %6700 = vmatpush3.bf16.msra.mxu0 %v7579_v10  ;;  %v7596_v27 = vld [vmem:[%s9843_s1 + $0x1b0] sm:$0xff]   ;;  %s8258_s26 = scalar_lea.vmem %s9842_s0, %s7559_s13  ;;  %v7600_v31 = vld [vmem:[%s9843_s1 + $0x1b8] sm:$0xff]   ;;  %v7610_v39 = vld [vmem:[%s9843_s1 + $0x80] sm:$0xff]  }
  0x11   : > { %6740 = vmatpush3.bf16.msra.mxu1 %v7580_v11  ;;  %6701 = vmatprep.subr.bf16.mxu0 %v7581_v12  ;;  %v7601_v32 = vld [vmem:[%s8258_s26 + $0xa0] ss:$16 sps:$4 sm:$0xff]   ;;  %v7603_v33 = vld [vmem:[%s8258_s26 + $0xa4] ss:$16 sps:$4 sm:$0xff]   ;;  %v7604_v34 = vld [vmem:[%s8258_s26 + $0xa8] ss:$16 sps:$4 sm:$0xff]  }
  0x12   : > { %6741 = vmatprep.subr.bf16.mxu1 %v7582_v13  ;;  %v7606_v35 = vld [vmem:[%s8258_s26 + $0xac] ss:$16 sps:$4 sm:$0xff]   ;;  %746 = vmatprep.mubr.bf16.mxu0 %v7603_v33  ;;  %v7615_v44 = vld [vmem:[%s8258_s26 + $0xc4] ss:$16 sps:$4 sm:$0xff]   ;;  %v7619_v46 = vld [vmem:[%s8258_s26 + $0xc0] ss:$16 sps:$4 sm:$0xff]  }
  0x13   : > { %811 = vmatprep.mubr.bf16.mxu1 %v7606_v35  ;;  %v7611_v40 = vld [vmem:[%s9843_s1 + $0x48] sm:$0xff]   ;;  %v7621_v48 = vld [vmem:[%s9843_s1 + $0x50] sm:$0xff]   ;;  %v7625_v52 = vld [vmem:[%s9843_s1 + $0x58] sm:$0xff]  }
  0x14   : > { %6702 = vmatpush3.bf16.msra.mxu0 %v7583_v14  ;;  %v7612_v41 = vld [vmem:[%s9843_s1 + $0xc8] sm:$0xff]   ;;  %v7622_v49 = vld [vmem:[%s9843_s1 + $0xd0] sm:$0xff]   ;;  %v7626_v53 = vld [vmem:[%s9843_s1 + $0xd8] sm:$0xff]  }
  0x15   : > { %6742 = vmatpush3.bf16.msra.mxu1 %v7584_v15  ;;  %6703 = vmatprep.subr.bf16.mxu0 %v7585_v16  ;;  %v7613_v42 = vld [vmem:[%s9843_s1 + $0x8] sm:$0xff]   ;;  %v7623_v50 = vld [vmem:[%s9843_s1 + $0x10] sm:$0xff]   ;;  %v7627_v54 = vld [vmem:[%s9843_s1 + $0x18] sm:$0xff]  }
  0x16   : > { %6743 = vmatprep.subr.bf16.mxu1 %v7586_v17  ;;  %v7614_v43 = vld [vmem:[%s9843_s1 + $0x88] sm:$0xff]   ;;  %v7624_v51 = vld [vmem:[%s9843_s1 + $0x90] sm:$0xff]   ;;  %v7628_v55 = vld [vmem:[%s9843_s1 + $0x98] sm:$0xff]  }
  0x17   : > { %v7617_v45 = vld [vmem:[%s8258_s26 + $0xcc] ss:$16 sps:$4 sm:$0xff]   ;;  %v7620_v47 = vld [vmem:[%s8258_s26 + $0xc8] ss:$16 sps:$4 sm:$0xff]   ;;  %v7629_v56 = vld [vmem:[%s8258_s26 + $0xe4] ss:$16 sps:$4 sm:$0xff]  }
  0x18   : > { %6704 = vmatpush3.bf16.msra.mxu0 %v7587_v18  ;;  %v7631_v57 = vld [vmem:[%s8258_s26 + $0xec] ss:$16 sps:$4 sm:$0xff]   ;;  %v7633_v58 = vld [vmem:[%s8258_s26 + $0xe0] ss:$16 sps:$4 sm:$0xff]   ;;  %v7634_v59 = vld [vmem:[%s8258_s26 + $0xe8] ss:$16 sps:$4 sm:$0xff]  }
  0x19   : > { %6744 = vmatpush3.bf16.msra.mxu1 %v7588_v19  ;;  %6705 = vmatprep.subr.bf16.mxu0 %v7589_v20  ;;  %v7635_v60 = vld [vmem:[%s9843_s1 + $0x60] sm:$0xff]   ;;  %v7639_v0 = vld [vmem:[%s9843_s1 + $0x68] sm:$0xff]   ;;  %v7649_v8 = vld [vmem:[%s9843_s1 + $0x70] sm:$0xff]  }
  0x1a   : > { %6745 = vmatprep.subr.bf16.mxu1 %v7590_v21  ;;  %v7636_v61 = vld [vmem:[%s9843_s1 + $0xe0] sm:$0xff]   ;;  %v7640_v1 = vld [vmem:[%s9843_s1 + $0xe8] sm:$0xff]   ;;  %v7650_v9 = vld [vmem:[%s9843_s1 + $0xf0] sm:$0xff]  }
  0x1b   : > { %v7637_v62 = vld [vmem:[%s9843_s1 + $0x20] sm:$0xff]   ;;  %v7641_v2 = vld [vmem:[%s9843_s1 + $0x28] sm:$0xff]   ;;  %v7651_v10 = vld [vmem:[%s9843_s1 + $0x30] sm:$0xff]  }
  0x1c   : > { %6706 = vmatpush3.bf16.msra.mxu0 %v7591_v22  ;;  %v7638_v63 = vld [vmem:[%s9843_s1 + $0xa0] sm:$0xff]   ;;  %v7642_v3 = vld [vmem:[%s9843_s1 + $0xa8] sm:$0xff]   ;;  %v7652_v11 = vld [vmem:[%s9843_s1 + $0xb0] sm:$0xff]  }
  0x1d   : > { %6746 = vmatpush3.bf16.msra.mxu1 %v7592_v23  ;;  %6707 = vmatprep.subr.bf16.mxu0 %v7593_v24  ;;  %v7643_v4 = vld [vmem:[%s8258_s26 + $0x104] ss:$16 sps:$4 sm:$0xff]   ;;  %v7645_v5 = vld [vmem:[%s8258_s26 + $0x10c] ss:$16 sps:$4 sm:$0xff]   ;;  %v7647_v6 = vld [vmem:[%s8258_s26 + $0x100] ss:$16 sps:$4 sm:$0xff]  }
  0x1e   : > { %6747 = vmatprep.subr.bf16.mxu1 %v7594_v25  ;;  %v7648_v7 = vld [vmem:[%s8258_s26 + $0x108] ss:$16 sps:$4 sm:$0xff]   ;;  %v280_v16 = vld [vmem:[%s8258_s26] sm:$0xff]  ;;  %v8380_v17 = vld [vmem:[%s8258_s26 + $0x10] sm:$0xff] }
  0x1f   : > { %v7653_v12 = vld [vmem:[%s9843_s1 + $0x78] sm:$0xff]   ;;  %v281_v18 = vld [vmem:[%s8258_s26 + $0x8] sm:$0xff]  ;;  %v5682_v20 = vcombine.low %v280_v16, %v8380_v17  ;;  %v5683_v21 = vcombine.high %v280_v16, %v8380_v17  ;;  %v7661_v24 = vld [vmem:[%s9843_s1 + $0x240] sm:$0xff]  }
  0x20   : > { %6708 = vmatpush3.bf16.msra.mxu0 %v7595_v26  ;;  %v7654_v13 = vld [vmem:[%s9843_s1 + $0xf8] sm:$0xff]   ;;  %v7662_v25 = vld [vmem:[%s9843_s1 + $0x2c0] sm:$0xff]   ;;  %v8418_v33 = vld [vmem:[%s8258_s26 + $0x30] sm:$0xff] }
  0x21   : > { %6748 = vmatpush3.bf16.msra.mxu1 %v7596_v27  ;;  %6709 = vmatprep.subr.bf16.mxu0 %v7597_v28  ;;  %v7655_v14 = vld [vmem:[%s9843_s1 + $0x38] sm:$0xff]   ;;  %v7663_v26 = vld [vmem:[%s9843_s1 + $0x200] sm:$0xff]   ;;  %v7665_v28 = vld [vmem:[%s9843_s1 + $0x248] sm:$0xff]  }
  0x22   : > { %6749 = vmatprep.subr.bf16.mxu1 %v7598_v29  ;;  %v7656_v15 = vld [vmem:[%s9843_s1 + $0xb8] sm:$0xff]   ;;  %v7664_v27 = vld [vmem:[%s9843_s1 + $0x280] sm:$0xff]   ;;  %v7666_v29 = vld [vmem:[%s9843_s1 + $0x2c8] sm:$0xff]  }
  0x23   : > { %v8384_v19 = vld [vmem:[%s8258_s26 + $0x18] sm:$0xff]  ;;  %v7699_v16 = vld [vmem:[%s9843_s1 + $0x230] sm:$0xff]  }
  0x24   : > { %6710 = vmatpush3.bf16.msra.mxu0 %v7599_v30  ;;  %v5684_v22 = vcombine.low %v281_v18, %v8384_v19  ;;  %v5685_v23 = vcombine.high %v281_v18, %v8384_v19  ;;  %v7667_v30 = vld [vmem:[%s9843_s1 + $0x208] sm:$0xff]   ;;  %v7700_v18 = vld [vmem:[%s9843_s1 + $0x2b0] sm:$0xff]  }
  0x25   : > { %6750 = vmatpush3.bf16.msra.mxu1 %v7600_v31  ;;  %6775 = vmatprep.subr.bf16.mxu0 %v7607_v36  ;;  %v7668_v31 = vld [vmem:[%s9843_s1 + $0x288] sm:$0xff]   ;;  %v8426_v36 = vld [vmem:[%s8258_s26 + $0x38] sm:$0xff] }
  0x26   : > { %6815 = vmatprep.subr.bf16.mxu1 %v7608_v37 }
  0x27   : > { %747 = vmatmul.mubr.bf16.vlgmr.msra.gmra.mrb[0].mxu0 %v7601_v32  ;;  %v8415_v32 = vld [vmem:[%s8258_s26 + $0x20] sm:$0xff] }
  0x28   : > { %812 = vmatmul.mubr.bf16.vlgmr.msra.gmra.mrb[0].mxu1 %v7604_v34  ;;  %6776 = vmatpush3.bf16.msra.mxu0 %v7609_v38  ;;  %v8421_v34 = vld [vmem:[%s8258_s26 + $0x28] sm:$0xff]  ;;  %v5687_v35 = vcombine.high %v8415_v32, %v8418_v33  ;;  %v5686_v37 = vcombine.low %v8415_v32, %v8418_v33  ;;  %v5938_v38 = vcombine.low %v8380_v17, %v8415_v32 }
  0x29   : > { %6816 = vmatpush3.bf16.msra.mxu1 %v7610_v39  ;;  %6777 = vmatprep.subr.bf16.mxu0 %v7611_v40  ;;  %v5689_v39 = vcombine.high %v8421_v34, %v8426_v36  ;;  %v5688_v40 = vcombine.low %v8421_v34, %v8426_v36 }
  0x2a   : > { %6817 = vmatprep.subr.bf16.mxu1 %v7612_v41  ;;  %754 = vmatprep.mubr.bf16.mxu0 %v7615_v44  ;;  %v7673_v41 = vld [vmem:[%s9843_s1 + $0x250] sm:$0xff]  }
  0x2b   : > { %819 = vmatprep.mubr.bf16.mxu1 %v7617_v45  ;;  %v7675_v44 = vld [vmem:[%s9843_s1 + $0x210] sm:$0xff]  }
  0x2c   : > { %6778 = vmatpush3.bf16.msra.mxu0 %v7613_v42  ;;  %v5940_v42 = vcombine.low %v8384_v19, %v8421_v34  ;;  %v7676_v45 = vld [vmem:[%s9843_s1 + $0x290] sm:$0xff]  }
  0x2d   : > { %6818 = vmatpush3.bf16.msra.mxu1 %v7614_v43  ;;  %6779 = vmatprep.subr.bf16.mxu0 %v7621_v48  ;;  %v7674_v43 = vld [vmem:[%s9843_s1 + $0x2d0] sm:$0xff]   ;;  %v7679_v48 = vld [vmem:[%s9843_s1 + $0x218] sm:$0xff]  }
  0x2e   : > { %6819 = vmatprep.subr.bf16.mxu1 %v7622_v49  ;;  %v7680_v49 = vld [vmem:[%s9843_s1 + $0x298] sm:$0xff]  }
  0x2f   : > { %755 = vmatmul.mubr.bf16.gmra.mrb[4].mxu0 %v7619_v46  ;;  %v7677_v46 = vld [vmem:[%s9843_s1 + $0x258] sm:$0xff]  }
  0x30   : > { %820 = vmatmul.mubr.bf16.gmra.mrb[4].mxu1 %v7620_v47  ;;  %6780 = vmatpush3.bf16.msra.mxu0 %v7623_v50  ;;  %v7678_v47 = vld [vmem:[%s9843_s1 + $0x2d8] sm:$0xff]   ;;  %v8463_v50 = vld [vmem:[%s8258_s26 + $0x40] sm:$0xff] }
  0x31   : > { %6820 = vmatpush3.bf16.msra.mxu1 %v7624_v51  ;;  %6781 = vmatprep.subr.bf16.mxu0 %v7625_v52  ;;  %v8466_v51 = vld [vmem:[%s8258_s26 + $0x50] sm:$0xff] }
  0x32   : > { %6821 = vmatprep.subr.bf16.mxu1 %v7626_v53  ;;  %762 = vmatprep.mubr.bf16.mxu0 %v7629_v56  ;;  %v5691_v52 = vcombine.high %v8463_v50, %v8466_v51  ;;  %v8471_v53 = vld [vmem:[%s8258_s26 + $0x48] sm:$0xff]  ;;  %v5942_v56 = vcombine.low %v8418_v33, %v8463_v50 }
  0x33   : > { %827 = vmatprep.mubr.bf16.mxu1 %v7631_v57 }
  0x34   : > { %6782 = vmatpush3.bf16.msra.mxu0 %v7627_v54  ;;  %v8474_v54 = vld [vmem:[%s8258_s26 + $0x58] sm:$0xff] }
  0x35   : > { %6822 = vmatpush3.bf16.msra.mxu1 %v7628_v55  ;;  %6783 = vmatprep.subr.bf16.mxu0 %v7635_v60  ;;  %v5690_v55 = vcombine.low %v8463_v50, %v8466_v51  ;;  %v5693_v57 = vcombine.high %v8471_v53, %v8474_v54  ;;  %v5944_v60 = vcombine.low %v8426_v36, %v8471_v53 }
  0x36   : > { %6823 = vmatprep.subr.bf16.mxu1 %v7636_v61  ;;  %v7686_v61 = vld [vmem:[%s9843_s1 + $0x2e0] sm:$0xff]  }
  0x37   : > { %763 = vmatmul.mubr.bf16.gmra.mrb[8].mxu0 %v7633_v58  ;;  %v5692_v58 = vcombine.low %v8471_v53, %v8474_v54 }
  0x38   : > { %828 = vmatmul.mubr.bf16.gmra.mrb[8].mxu1 %v7634_v59  ;;  %6784 = vmatpush3.bf16.msra.mxu0 %v7637_v62  ;;  %v7685_v59 = vld [vmem:[%s9843_s1 + $0x260] sm:$0xff]  }
  0x39   : > { %6824 = vmatpush3.bf16.msra.mxu1 %v7638_v63  ;;  %6785 = vmatprep.subr.bf16.mxu0 %v7639_v0  ;;  %v7687_v62 = vld [vmem:[%s9843_s1 + $0x220] sm:$0xff]   ;;  %v7689_v0 = vld [vmem:[%s9843_s1 + $0x268] sm:$0xff]  }
  0x3a   : > { %6825 = vmatprep.subr.bf16.mxu1 %v7640_v1  ;;  %770 = vmatprep.mubr.bf16.mxu0 %v7643_v4  ;;  %v7688_v63 = vld [vmem:[%s9843_s1 + $0x2a0] sm:$0xff]   ;;  %v7690_v1 = vld [vmem:[%s9843_s1 + $0x2e8] sm:$0xff]  }
  0x3b   : > { %835 = vmatprep.mubr.bf16.mxu1 %v7645_v5  ;;  %v8511_v4 = vld [vmem:[%s8258_s26 + $0x60] sm:$0xff]  ;;  %v8514_v5 = vld [vmem:[%s8258_s26 + $0x70] sm:$0xff] }
  0x3c   : > { %6786 = vmatpush3.bf16.msra.mxu0 %v7641_v2  ;;  %v7691_v2 = vld [vmem:[%s9843_s1 + $0x228] sm:$0xff]  }
  0x3d   : > { %6826 = vmatpush3.bf16.msra.mxu1 %v7642_v3  ;;  %6787 = vmatprep.subr.bf16.mxu0 %v7649_v8  ;;  %v7692_v3 = vld [vmem:[%s9843_s1 + $0x2a8] sm:$0xff]   ;;  %v5946_v8 = vcombine.low %v8466_v51, %v8511_v4 }
  0x3e   : > { %6827 = vmatprep.subr.bf16.mxu1 %v7650_v9  ;;  %v5695_v9 = vcombine.high %v8511_v4, %v8514_v5 }
  0x3f   : > { %771 = vmatmul.mubr.bf16.gmra.mrb[12].mxu0 %v7647_v6  ;;  %v8517_v6 = vld [vmem:[%s8258_s26 + $0x68] sm:$0xff] }
  0x40   : > { %836 = vmatmul.mubr.bf16.gmra.mrb[12].mxu1 %v7648_v7  ;;  %6788 = vmatpush3.bf16.msra.mxu0 %v7651_v10  ;;  %v8520_v7 = vld [vmem:[%s8258_s26 + $0x78] sm:$0xff] }
  0x41   : > { %6828 = vmatpush3.bf16.msra.mxu1 %v7652_v11  ;;  %6789 = vmatprep.subr.bf16.mxu0 %v7653_v12  ;;  %v5697_v10 = vcombine.high %v8517_v6, %v8520_v7  ;;  %v5694_v11 = vcombine.low %v8511_v4, %v8514_v5  ;;  %v5696_v12 = vcombine.low %v8517_v6, %v8520_v7 }
  0x42   : > { %6829 = vmatprep.subr.bf16.mxu1 %v7654_v13  ;;  %1148 = vmatprep.mubr.bf16.mxu0 %v5683_v21  ;;  %v7697_v13 = vld [vmem:[%s9843_s1 + $0x270] sm:$0xff]   ;;  %v7702_v21 = vld [vmem:[%s9843_s1 + $0x2f8] sm:$0xff]  }
  0x43   : > { %1213 = vmatprep.mubr.bf16.mxu1 %v5685_v23  ;;  %v7704_v23 = vld [vmem:[%s9843_s1 + $0x2b8] sm:$0xff]  }
  0x44   : > { %6790 = vmatpush3.bf16.msra.mxu0 %v7655_v14  ;;  %v7698_v14 = vld [vmem:[%s9843_s1 + $0x2f0] sm:$0xff]  }
  0x45   : > { %6830 = vmatpush3.bf16.msra.mxu1 %v7656_v15  ;;  %6855 = vmatprep.subr.bf16.mxu0 %v7661_v24  ;;  %v5948_v15 = vcombine.low %v8474_v54, %v8517_v6  ;;  %v7705_v24 = vld [vmem:[%s8258_s26 + $0x140] ss:$16 sps:$4 sm:$0xff]  }
  0x46   : > { %6895 = vmatprep.subr.bf16.mxu1 %v7662_v25  ;;  %v7707_v25 = vld [vmem:[%s8258_s26 + $0x144] ss:$16 sps:$4 sm:$0xff]  }
  0x47   : > { %1149 = vmatmul.mubr.bf16.vlgmr.msra.gmra.mrb[16].mxu0 %v5682_v20  ;;  %v7701_v20 = vld [vmem:[%s9843_s1 + $0x278] sm:$0xff]  }
  0x48   : > { %1214 = vmatmul.mubr.bf16.vlgmr.msra.gmra.mrb[16].mxu1 %v5684_v22  ;;  %6856 = vmatpush3.bf16.msra.mxu0 %v7663_v26  ;;  %v7703_v22 = vld [vmem:[%s9843_s1 + $0x238] sm:$0xff]  }
  0x49   : > { %6896 = vmatpush3.bf16.msra.mxu1 %v7664_v27  ;;  %6857 = vmatprep.subr.bf16.mxu0 %v7665_v28  ;;  %v7708_v26 = vld [vmem:[%s8258_s26 + $0x148] ss:$16 sps:$4 sm:$0xff]   ;;  %v7710_v27 = vld [vmem:[%s8258_s26 + $0x14c] ss:$16 sps:$4 sm:$0xff]   ;;  %v7711_v28 = vld [vmem:[%s9843_s1 + $0x340] sm:$0xff]  }
  0x4a   : > { %6897 = vmatprep.subr.bf16.mxu1 %v7666_v29  ;;  %1156 = vmatprep.mubr.bf16.mxu0 %v5687_v35  ;;  %v7712_v29 = vld [vmem:[%s9843_s1 + $0x3c0] sm:$0xff]   ;;  %v7715_v35 = vld [vmem:[%s9843_s1 + $0x348] sm:$0xff]  }
  0x4b   : > { %1221 = vmatprep.mubr.bf16.mxu1 %v5689_v39  ;;  %v7717_v39 = vld [vmem:[%s9843_s1 + $0x308] sm:$0xff]  }
  0x4c   : > { %6858 = vmatpush3.bf16.msra.mxu0 %v7667_v30  ;;  %v7713_v30 = vld [vmem:[%s9843_s1 + $0x300] sm:$0xff]  }
  0x4d   : > { %6898 = vmatpush3.bf16.msra.mxu1 %v7668_v31  ;;  %6859 = vmatprep.subr.bf16.mxu0 %v7673_v41  ;;  %v7714_v31 = vld [vmem:[%s9843_s1 + $0x380] sm:$0xff]  }
  0x4e   : > { %6899 = vmatprep.subr.bf16.mxu1 %v7674_v43  ;;  %v8587_v41 = vld [vmem:[%s8258_s26 + $0x160] sm:$0xff]  ;;  %v5736_v43 = vld [vmem:[%s8258_s26 + $0x170] sm:$0xff] }
  0x4f   : > { %1157 = vmatmul.mubr.bf16.gmra.mrb[20].mxu0 %v5686_v37  ;;  %v7716_v37 = vld [vmem:[%s9843_s1 + $0x3c8] sm:$0xff]  }
  0x50   : > { %1222 = vmatmul.mubr.bf16.gmra.mrb[20].mxu1 %v5688_v40  ;;  %6860 = vmatpush3.bf16.msra.mxu0 %v7675_v44  ;;  %v7718_v40 = vld [vmem:[%s9843_s1 + $0x388] sm:$0xff]  }
  0x51   : > { %6900 = vmatpush3.bf16.msra.mxu1 %v7676_v45  ;;  %6861 = vmatprep.subr.bf16.mxu0 %v7677_v46  ;;  %v8591_v44 = vld [vmem:[%s8258_s26 + $0x168] sm:$0xff]  ;;  %v5737_v45 = vld [vmem:[%s8258_s26 + $0x178] sm:$0xff]  ;;  %v5815_v46 = vcombine.high %v8587_v41, %v5736_v43 }
  0x52   : > { %6901 = vmatprep.subr.bf16.mxu1 %v7678_v47  ;;  %1164 = vmatprep.mubr.bf16.mxu0 %v5691_v52  ;;  %v5817_v47 = vcombine.high %v8591_v44, %v5737_v45  ;;  %v7723_v52 = vld [vmem:[%s9843_s1 + $0x350] sm:$0xff]  }
  0x53   : > { %1229 = vmatprep.mubr.bf16.mxu1 %v5693_v57  ;;  %v7725_v57 = vld [vmem:[%s9843_s1 + $0x310] sm:$0xff]  }
  0x54   : > { %6862 = vmatpush3.bf16.msra.mxu0 %v7679_v48  ;;  %v5814_v48 = vcombine.low %v8587_v41, %v5736_v43  ;;  %v5941_v43 = vcombine.high %v8384_v19, %v8421_v34  ;;  %v7766_v19 = vld [vmem:[%s9843_s1 + $0x488] sm:$0xff]   ;;  %v7771_v34 = vld [vmem:[%s9843_s1 + $0x450] sm:$0xff]  }
  0x55   : > { %6902 = vmatpush3.bf16.msra.mxu1 %v7680_v49  ;;  %6863 = vmatprep.subr.bf16.mxu0 %v7685_v59  ;;  %v5816_v49 = vcombine.low %v8591_v44, %v5737_v45  ;;  %v7727_v59 = vld [vmem:[%s9843_s1 + $0x358] sm:$0xff]   ;;  %v7750_v45 = vld [vmem:[%s9843_s1 + $0x3b0] sm:$0xff]  }
  0x56   : > { %6903 = vmatprep.subr.bf16.mxu1 %v7686_v61  ;;  %v7728_v61 = vld [vmem:[%s9843_s1 + $0x3d8] sm:$0xff]  }
  0x57   : > { %1165 = vmatmul.mubr.bf16.gmra.mrb[24].mxu0 %v5690_v55  ;;  %v7724_v55 = vld [vmem:[%s9843_s1 + $0x3d0] sm:$0xff]  }
  0x58   : > { %1230 = vmatmul.mubr.bf16.gmra.mrb[24].mxu1 %v5692_v58  ;;  %6864 = vmatpush3.bf16.msra.mxu0 %v7687_v62  ;;  %v7726_v58 = vld [vmem:[%s9843_s1 + $0x390] sm:$0xff]   ;;  %v7729_v62 = vld [vmem:[%s9843_s1 + $0x318] sm:$0xff]  }
  0x59   : > { %6904 = vmatpush3.bf16.msra.mxu1 %v7688_v63  ;;  %6865 = vmatprep.subr.bf16.mxu0 %v7689_v0  ;;  %v7730_v63 = vld [vmem:[%s9843_s1 + $0x398] sm:$0xff]   ;;  %v8623_v0 = vld [vmem:[%s8258_s26 + $0x180] sm:$0xff] }
  0x5a   : > { %6905 = vmatprep.subr.bf16.mxu1 %v7690_v1  ;;  %1172 = vmatprep.mubr.bf16.mxu0 %v5695_v9  ;;  %v5740_v1 = vld [vmem:[%s8258_s26 + $0x190] sm:$0xff]  ;;  %v5741_v9 = vld [vmem:[%s8258_s26 + $0x198] sm:$0xff] }
  0x5b   : > { %1237 = vmatprep.mubr.bf16.mxu1 %v5697_v10  ;;  %v5818_v10 = vcombine.low %v8623_v0, %v5740_v1 }
  0x5c   : > { %6866 = vmatpush3.bf16.msra.mxu0 %v7691_v2  ;;  %v8627_v2 = vld [vmem:[%s8258_s26 + $0x188] sm:$0xff] }
  0x5d   : > { %6906 = vmatpush3.bf16.msra.mxu1 %v7692_v3  ;;  %6867 = vmatprep.subr.bf16.mxu0 %v7697_v13  ;;  %v5819_v3 = vcombine.high %v8623_v0, %v5740_v1  ;;  %v7735_v13 = vld [vmem:[%s9843_s1 + $0x360] sm:$0xff]   ;;  %v5949_v1 = vcombine.high %v8474_v54, %v8517_v6  ;;  %v7790_v54 = vld [vmem:[%s9843_s1 + $0x4a8] sm:$0xff]  }
  0x5e   : > { %6907 = vmatprep.subr.bf16.mxu1 %v7698_v14  ;;  %v7736_v14 = vld [vmem:[%s9843_s1 + $0x3e0] sm:$0xff]  }
  0x5f   : > { %1173 = vmatmul.mubr.bf16.gmra.mrb[28].mxu0 %v5694_v11  ;;  %v5821_v11 = vcombine.high %v8627_v2, %v5741_v9  ;;  %v5872_v6 = vld [vmem:[%s8258_s26 + $0x80] sm:$0xff] }
  0x60   : > { %1238 = vmatmul.mubr.bf16.gmra.mrb[28].mxu1 %v5696_v12  ;;  %6868 = vmatpush3.bf16.msra.mxu0 %v7699_v16  ;;  %v5820_v12 = vcombine.low %v8627_v2, %v5741_v9  ;;  %v7737_v16 = vld [vmem:[%s9843_s1 + $0x320] sm:$0xff]   ;;  %v7775_v9 = vld [vmem:[%s9843_s1 + $0x458] sm:$0xff]  }
  0x61   : > { %6908 = vmatpush3.bf16.msra.mxu1 %v7700_v18  ;;  %6869 = vmatprep.subr.bf16.mxu0 %v7701_v20  ;;  %v7738_v18 = vld [vmem:[%s9843_s1 + $0x3a0] sm:$0xff]   ;;  %v7739_v20 = vld [vmem:[%s9843_s1 + $0x368] sm:$0xff]  }
  0x62   : > { %6909 = vmatprep.subr.bf16.mxu1 %v7702_v21  ;;  %1632 = vmatprep.mubr.bf16.mxu0 %v7707_v25  ;;  %v7740_v21 = vld [vmem:[%s9843_s1 + $0x3e8] sm:$0xff]   ;;  %v5744_v25 = vld [vmem:[%s8258_s26 + $0x1b0] sm:$0xff] }
  0x63   : > { %1697 = vmatprep.mubr.bf16.mxu1 %v7710_v27  ;;  %v8664_v27 = vld [vmem:[%s8258_s26 + $0x1a8] sm:$0xff] }
  0x64   : > { %6870 = vmatpush3.bf16.msra.mxu0 %v7703_v22  ;;  %v7741_v22 = vld [vmem:[%s9843_s1 + $0x328] sm:$0xff]  }
  0x65   : > { %6910 = vmatpush3.bf16.msra.mxu1 %v7704_v23  ;;  %6935 = vmatprep.subr.bf16.mxu0 %v7711_v28  ;;  %v7742_v23 = vld [vmem:[%s9843_s1 + $0x3a8] sm:$0xff]   ;;  %v5745_v28 = vld [vmem:[%s8258_s26 + $0x1b8] sm:$0xff] }
  0x66   : > { %6975 = vmatprep.subr.bf16.mxu1 %v7712_v29 }
  0x67   : > { %1633 = vmatmul.mubr.bf16.vlgmr.msra.gmra.mrb[32].mxu0 %v7705_v24  ;;  %v8659_v24 = vld [vmem:[%s8258_s26 + $0x1a0] sm:$0xff] }
  0x68   : > { %1698 = vmatmul.mubr.bf16.vlgmr.msra.gmra.mrb[32].mxu1 %v7708_v26  ;;  %6936 = vmatpush3.bf16.msra.mxu0 %v7713_v30  ;;  %v5823_v26 = vcombine.high %v8659_v24, %v5744_v25  ;;  %v5822_v29 = vcombine.low %v8659_v24, %v5744_v25  ;;  %v5825_v30 = vcombine.high %v8664_v27, %v5745_v28  ;;  %v7803_v25 = vld [vmem:[%s8258_s26 + $0xb0] ss:$16 sps:$4 sm:$0xff]  }
  0x69   : > { %6976 = vmatpush3.bf16.msra.mxu1 %v7714_v31  ;;  %6937 = vmatprep.subr.bf16.mxu0 %v7715_v35  ;;  %v5824_v31 = vcombine.low %v8664_v27, %v5745_v28  ;;  %v7747_v35 = vld [vmem:[%s9843_s1 + $0x370] sm:$0xff]   ;;  %v7806_v28 = vld [vmem:[%s8258_s26 + $0xb8] ss:$16 sps:$4 sm:$0xff]  }
  0x6a   : > { %6977 = vmatprep.subr.bf16.mxu1 %v7716_v37  ;;  %1640 = vmatprep.mubr.bf16.mxu0 %v5815_v46  ;;  %v7748_v37 = vld [vmem:[%s9843_s1 + $0x3f0] sm:$0xff]   ;;  %v7751_v46 = vld [vmem:[%s9843_s1 + $0x378] sm:$0xff]  }
  0x6b   : > { %1705 = vmatprep.mubr.bf16.mxu1 %v5817_v47  ;;  %v7752_v47 = vld [vmem:[%s9843_s1 + $0x3f8] sm:$0xff]  }
  0x6c   : > { %6938 = vmatpush3.bf16.msra.mxu0 %v7717_v39  ;;  %v5939_v39 = vcombine.high %v8380_v17, %v8415_v32  ;;  %v7764_v17 = vld [vmem:[%s9843_s1 + $0x4c8] sm:$0xff]  }
  0x6d   : > { %6978 = vmatpush3.bf16.msra.mxu1 %v7718_v40  ;;  %6939 = vmatprep.subr.bf16.mxu0 %v7723_v52  ;;  %v7749_v40 = vld [vmem:[%s9843_s1 + $0x330] sm:$0xff]   ;;  %v7759_v52 = vld [vmem:[%s9843_s1 + $0x440] sm:$0xff]   ;;  %v7765_v32 = vld [vmem:[%s9843_s1 + $0x408] sm:$0xff]  }
  0x6e   : > { %6979 = vmatprep.subr.bf16.mxu1 %v7724_v55  ;;  %v7760_v55 = vld [vmem:[%s9843_s1 + $0x4c0] sm:$0xff]  }
  0x6f   : > { %1641 = vmatmul.mubr.bf16.gmra.mrb[36].mxu0 %v5814_v48  ;;  %v7753_v48 = vld [vmem:[%s9843_s1 + $0x338] sm:$0xff]  }
  0x70   : > { %1706 = vmatmul.mubr.bf16.gmra.mrb[36].mxu1 %v5816_v49  ;;  %6940 = vmatpush3.bf16.msra.mxu0 %v7725_v57  ;;  %v7754_v49 = vld [vmem:[%s9843_s1 + $0x3b8] sm:$0xff]   ;;  %v5943_v57 = vcombine.high %v8418_v33, %v8463_v50 }
  0x71   : > { %6980 = vmatpush3.bf16.msra.mxu1 %v7726_v58  ;;  %6941 = vmatprep.subr.bf16.mxu0 %v7727_v59  ;;  %v7761_v58 = vld [vmem:[%s9843_s1 + $0x400] sm:$0xff]   ;;  %v5945_v59 = vcombine.high %v8426_v36, %v8471_v53  ;;  %v7776_v33 = vld [vmem:[%s9843_s1 + $0x4d8] sm:$0xff]  }
  0x72   : > { %6981 = vmatprep.subr.bf16.mxu1 %v7728_v61  ;;  %1648 = vmatprep.mubr.bf16.mxu0 %v5819_v3  ;;  %v7762_v61 = vld [vmem:[%s9843_s1 + $0x480] sm:$0xff]   ;;  %v7774_v3 = vld [vmem:[%s9843_s1 + $0x490] sm:$0xff]   ;;  %v7777_v50 = vld [vmem:[%s9843_s1 + $0x418] sm:$0xff]  }
  0x73   : > { %1713 = vmatprep.mubr.bf16.mxu1 %v5821_v11  ;;  %v7778_v36 = vld [vmem:[%s9843_s1 + $0x498] sm:$0xff]   ;;  %v7783_v53 = vld [vmem:[%s9843_s1 + $0x460] sm:$0xff]   ;;  %v7787_v11 = vld [vmem:[%s9843_s1 + $0x468] sm:$0xff]  }
  0x74   : > { %6942 = vmatpush3.bf16.msra.mxu0 %v7729_v62  ;;  %v7763_v62 = vld [vmem:[%s9843_s1 + $0x448] sm:$0xff]  }
  0x75   : > { %6982 = vmatpush3.bf16.msra.mxu1 %v7730_v63  ;;  %6943 = vmatprep.subr.bf16.mxu0 %v7735_v13  ;;  %v7773_v63 = vld [vmem:[%s9843_s1 + $0x410] sm:$0xff]  }
  0x76   : > { %6983 = vmatprep.subr.bf16.mxu1 %v7736_v14 }
  0x77   : > { %1649 = vmatmul.mubr.bf16.gmra.mrb[40].mxu0 %v5818_v10  ;;  %v7786_v10 = vld [vmem:[%s9843_s1 + $0x4a0] sm:$0xff]  }
  0x78   : > { %1714 = vmatmul.mubr.bf16.gmra.mrb[40].mxu1 %v5820_v12  ;;  %6944 = vmatpush3.bf16.msra.mxu0 %v7737_v16  ;;  %v5950_v12 = vcombine.low %v8514_v5, %v5872_v6  ;;  %v7795_v16 = vld [vmem:[%s9843_s1 + $0x470] sm:$0xff]  }
  0x79   : > { %6984 = vmatpush3.bf16.msra.mxu1 %v7738_v18  ;;  %6945 = vmatprep.subr.bf16.mxu0 %v7739_v20  ;;  %v7796_v18 = vld [vmem:[%s9843_s1 + $0x4f0] sm:$0xff]   ;;  %v7799_v20 = vld [vmem:[%s9843_s1 + $0x478] sm:$0xff]  }
  0x7a   : > { %6985 = vmatprep.subr.bf16.mxu1 %v7740_v21  ;;  %1656 = vmatprep.mubr.bf16.mxu0 %v5823_v26  ;;  %v7800_v21 = vld [vmem:[%s9843_s1 + $0x4f8] sm:$0xff]   ;;  %v7805_v26 = vld [vmem:[%s8258_s26 + $0xb4] ss:$16 sps:$4 sm:$0xff]  }
  0x7b   : > { %1721 = vmatprep.mubr.bf16.mxu1 %v5825_v30  ;;  %v7809_v30 = vld [vmem:[%s9843_s1 + $0x540] sm:$0xff]  }
  0x7c   : > { %6946 = vmatpush3.bf16.msra.mxu0 %v7741_v22  ;;  %v7801_v22 = vld [vmem:[%s9843_s1 + $0x438] sm:$0xff]  }
  0x7d   : > { %6986 = vmatpush3.bf16.msra.mxu1 %v7742_v23  ;;  %6947 = vmatprep.subr.bf16.mxu0 %v7747_v35  ;;  %v7802_v23 = vld [vmem:[%s9843_s1 + $0x4b8] sm:$0xff]   ;;  %v7811_v35 = vld [vmem:[%s9843_s1 + $0x500] sm:$0xff]  }
  0x7e   : > { %6987 = vmatprep.subr.bf16.mxu1 %v7748_v37  ;;  %v7812_v37 = vld [vmem:[%s9843_s1 + $0x580] sm:$0xff]  }
  0x7f   : > { %1657 = vmatmul.mubr.bf16.gmra.mrb[44].mxu0 %v5822_v29  ;;  %v7808_v29 = vld [vmem:[%s8258_s26 + $0xbc] ss:$16 sps:$4 sm:$0xff]  }
  0x80   : > { %1722 = vmatmul.mubr.bf16.gmra.mrb[44].mxu1 %v5824_v31  ;;  %6948 = vmatpush3.bf16.msra.mxu0 %v7749_v40  ;;  %v7810_v31 = vld [vmem:[%s9843_s1 + $0x5c0] sm:$0xff]   ;;  %v7814_v40 = vld [vmem:[%s9843_s1 + $0x5c8] sm:$0xff]  }
  0x81   : > { %6988 = vmatpush3.bf16.msra.mxu1 %v7750_v45  ;;  %2124 = vmatprep.mubr.bf16.mxu0 %v5939_v39  ;;  %v7813_v39 = vld [vmem:[%s9843_s1 + $0x548] sm:$0xff]  }
  0x82   : > { %6949 = vmatprep.subr.bf16.mxu0 %v7751_v46  ;;  %2189 = vmatprep.mubr.bf16.mxu1 %v5941_v43  ;;  %v7815_v43 = vld [vmem:[%s9843_s1 + $0x508] sm:$0xff]   ;;  %v7817_v46 = vld [vmem:[%s8258_s26 + $0xd4] ss:$16 sps:$4 sm:$0xff]  }
  0x83   : > { %6989 = vmatprep.subr.bf16.mxu1 %v7752_v47  ;;  %v7816_v45 = vld [vmem:[%s9843_s1 + $0x588] sm:$0xff]  }
  0x84   : > { %6950 = vmatpush3.bf16.msra.mxu0 %v7753_v48  ;;  %v7819_v47 = vld [vmem:[%s8258_s26 + $0xdc] ss:$16 sps:$4 sm:$0xff]   ;;  %v7821_v48 = vld [vmem:[%s8258_s26 + $0xd0] ss:$16 sps:$4 sm:$0xff]  }
  0x85   : > { %6990 = vmatpush3.bf16.msra.mxu1 %v7754_v49  ;;  %7015 = vmatprep.subr.bf16.mxu0 %v7759_v52  ;;  %v7822_v49 = vld [vmem:[%s8258_s26 + $0xd8] ss:$16 sps:$4 sm:$0xff]   ;;  %v7823_v52 = vld [vmem:[%s9843_s1 + $0x550] sm:$0xff]  }
  0x86   : > { %7055 = vmatprep.subr.bf16.mxu1 %v7760_v55  ;;  %v7824_v55 = vld [vmem:[%s9843_s1 + $0x5d0] sm:$0xff]  }
  0x87   : > { %2125 = vmatmul.mubr.bf16.vlgmr.msra.gmra.mrb[48].mxu0 %v5938_v38  ;;  %v7772_v38 = vld [vmem:[%s9843_s1 + $0x4d0] sm:$0xff]  }
  0x88   : > { %2190 = vmatmul.mubr.bf16.vlgmr.msra.gmra.mrb[48].mxu1 %v5940_v42  ;;  %7016 = vmatpush3.bf16.msra.mxu0 %v7761_v58  ;;  %v5947_v42 = vcombine.high %v8466_v51, %v8511_v4  ;;  %v7788_v51 = vld [vmem:[%s9843_s1 + $0x4e8] sm:$0xff]   ;;  %v7826_v58 = vld [vmem:[%s9843_s1 + $0x590] sm:$0xff]  }
  0x89   : > { %7056 = vmatpush3.bf16.msra.mxu1 %v7762_v61  ;;  %2132 = vmatprep.mubr.bf16.mxu0 %v5943_v57  ;;  %v7789_v4 = vld [vmem:[%s9843_s1 + $0x428] sm:$0xff]   ;;  %v7825_v57 = vld [vmem:[%s9843_s1 + $0x510] sm:$0xff]   ;;  %v7828_v61 = vld [vmem:[%s9843_s1 + $0x5d8] sm:$0xff]  }
  0x8a   : > { %7017 = vmatprep.subr.bf16.mxu0 %v7763_v62  ;;  %2197 = vmatprep.mubr.bf16.mxu1 %v5945_v59  ;;  %v7827_v59 = vld [vmem:[%s9843_s1 + $0x558] sm:$0xff]  }
  0x8b   : > { %7057 = vmatprep.subr.bf16.mxu1 %v7764_v17  ;;  %v7829_v62 = vld [vmem:[%s9843_s1 + $0x518] sm:$0xff]  }
  0x8c   : > { %7018 = vmatpush3.bf16.msra.mxu0 %v7765_v32  ;;  %v7830_v17 = vld [vmem:[%s9843_s1 + $0x598] sm:$0xff]   ;;  %v7831_v32 = vld [vmem:[%s8258_s26 + $0xf4] ss:$16 sps:$4 sm:$0xff]  }
  0x8d   : > { %7058 = vmatpush3.bf16.msra.mxu1 %v7766_v19  ;;  %7019 = vmatprep.subr.bf16.mxu0 %v7771_v34  ;;  %v7833_v19 = vld [vmem:[%s8258_s26 + $0xfc] ss:$16 sps:$4 sm:$0xff]   ;;  %v7835_v34 = vld [vmem:[%s8258_s26 + $0xf0] ss:$16 sps:$4 sm:$0xff]  }
  0x8e   : > { %7059 = vmatprep.subr.bf16.mxu1 %v7772_v38  ;;  %v7836_v38 = vld [vmem:[%s8258_s26 + $0xf8] ss:$16 sps:$4 sm:$0xff]  }
  0x8f   : > { %2133 = vmatmul.mubr.bf16.gmra.mrb[52].mxu0 %v5942_v56  ;;  %v7784_v56 = vld [vmem:[%s9843_s1 + $0x4e0] sm:$0xff]  }
  0x90   : > { %2198 = vmatmul.mubr.bf16.gmra.mrb[52].mxu1 %v5944_v60  ;;  %7020 = vmatpush3.bf16.msra.mxu0 %v7773_v63  ;;  %v7785_v60 = vld [vmem:[%s9843_s1 + $0x420] sm:$0xff]  }
  0x91   : > { %7060 = vmatpush3.bf16.msra.mxu1 %v7774_v3  ;;  %2140 = vmatprep.mubr.bf16.mxu0 %v5947_v42  ;;  %v7837_v42 = vld [vmem:[%s9843_s1 + $0x560] sm:$0xff]  }
  0x92   : > { %7021 = vmatprep.subr.bf16.mxu0 %v7775_v9  ;;  %2205 = vmatprep.mubr.bf16.mxu1 %v5949_v1  ;;  %v7838_v63 = vld [vmem:[%s9843_s1 + $0x5e0] sm:$0xff]   ;;  %v7841_v9 = vld [vmem:[%s9843_s1 + $0x568] sm:$0xff]  }
  0x93   : > { %7061 = vmatprep.subr.bf16.mxu1 %v7776_v33  ;;  %v7839_v1 = vld [vmem:[%s9843_s1 + $0x520] sm:$0xff]   ;;  %v7842_v33 = vld [vmem:[%s9843_s1 + $0x5e8] sm:$0xff]  }
  0x94   : > { %7022 = vmatpush3.bf16.msra.mxu0 %v7777_v50  ;;  %v7840_v3 = vld [vmem:[%s9843_s1 + $0x5a0] sm:$0xff]   ;;  %v7843_v50 = vld [vmem:[%s9843_s1 + $0x528] sm:$0xff]  }
  0x95   : > { %7062 = vmatpush3.bf16.msra.mxu1 %v7778_v36  ;;  %7023 = vmatprep.subr.bf16.mxu0 %v7783_v53  ;;  %v7844_v36 = vld [vmem:[%s9843_s1 + $0x5a8] sm:$0xff]   ;;  %v7845_v53 = vld [vmem:[%s8258_s26 + $0x114] ss:$16 sps:$4 sm:$0xff]  }
  0x96   : > { %7063 = vmatprep.subr.bf16.mxu1 %v7784_v56  ;;  %v7847_v56 = vld [vmem:[%s8258_s26 + $0x11c] ss:$16 sps:$4 sm:$0xff]  }
  0x97   : > { %2141 = vmatmul.mubr.bf16.gmra.mrb[56].mxu0 %v5946_v8  ;;  %v5951_v8 = vcombine.high %v8514_v5, %v5872_v6  ;;  %v7797_v5 = vld [vmem:[%s9843_s1 + $0x430] sm:$0xff]   ;;  %v7855_v6 = vld [vmem:[%s9843_s1 + $0x578] sm:$0xff]  }
  0x98   : > { %2206 = vmatmul.mubr.bf16.gmra.mrb[56].mxu1 %v5948_v15  ;;  %7024 = vmatpush3.bf16.msra.mxu0 %v7785_v60  ;;  %v5873_v15 = vld [vmem:[%s8258_s26 + $0x88] sm:$0xff]  ;;  %v7849_v60 = vld [vmem:[%s8258_s26 + $0x110] ss:$16 sps:$4 sm:$0xff]  }
  0x99   : > { %7064 = vmatpush3.bf16.msra.mxu1 %v7786_v10  ;;  %7025 = vmatprep.subr.bf16.mxu0 %v7787_v11  ;;  %v5953_v13 = vcombine.high %v8520_v7, %v5873_v15  ;;  %v5952_v14 = vcombine.low %v8520_v7, %v5873_v15  ;;  %v7798_v7 = vld [vmem:[%s9843_s1 + $0x4b0] sm:$0xff]   ;;  %v7850_v10 = vld [vmem:[%s8258_s26 + $0x118] ss:$16 sps:$4 sm:$0xff]  }
  0x9a   : > { %7065 = vmatprep.subr.bf16.mxu1 %v7788_v51  ;;  %2148 = vmatprep.mubr.bf16.mxu0 %v5951_v8  ;;  %v7851_v11 = vld [vmem:[%s9843_s1 + $0x570] sm:$0xff]   ;;  %v7856_v8 = vld [vmem:[%s9843_s1 + $0x5f8] sm:$0xff]  }
  0x9b   : > { %2213 = vmatprep.mubr.bf16.mxu1 %v5953_v13  ;;  %v7852_v51 = vld [vmem:[%s9843_s1 + $0x5f0] sm:$0xff]   ;;  %v7857_v15 = vld [vmem:[%s9843_s1 + $0x538] sm:$0xff]  }
  0x9c   : > { %7026 = vmatpush3.bf16.msra.mxu0 %v7789_v4  ;;  %v7853_v4 = vld [vmem:[%s9843_s1 + $0x530] sm:$0xff]  }
  0x9d   : > { %7066 = vmatpush3.bf16.msra.mxu1 %v7790_v54  ;;  %7027 = vmatprep.subr.bf16.mxu0 %v7795_v16  ;;  %v7854_v54 = vld [vmem:[%s9843_s1 + $0x5b0] sm:$0xff]  }
  0x9e   : > { %7067 = vmatprep.subr.bf16.mxu1 %v7796_v18  ;;  %v6114_v13 = vld [vmem:[%s8258_s26 + $0x150] sm:$0xff] }
  0x9f   : > { %2149 = vmatmul.mubr.bf16.gmra.mrb[60].mxu0 %v5950_v12  ;;  %v7858_v12 = vld [vmem:[%s9843_s1 + $0x5b8] sm:$0xff]   ;;  %v6194_v16 = vcombine.low %v6114_v13, %v8587_v41  ;;  %v6195_v18 = vcombine.high %v6114_v13, %v8587_v41  ;;  %v7866_v41 = vld [vmem:[%s9843_s1 + $0x680] sm:$0xff]   ;;  %v7904_v13 = vld [vmem:[%s9843_s1 + $0x6b0] sm:$0xff]  }
  0xa0   : > { %2214 = vmatmul.mubr.bf16.gmra.mrb[60].mxu1 %v5952_v14  ;;  %7028 = vmatpush3.bf16.msra.mxu0 %v7797_v5  ;;  %v6115_v14 = vld [vmem:[%s8258_s26 + $0x158] sm:$0xff] }
  0xa1   : > { %7068 = vmatpush3.bf16.msra.mxu1 %v7798_v7  ;;  %7029 = vmatprep.subr.bf16.mxu0 %v7799_v20  ;;  %v6196_v5 = vcombine.low %v6115_v14, %v8591_v44  ;;  %v6197_v7 = vcombine.high %v6115_v14, %v8591_v44  ;;  %v7863_v20 = vld [vmem:[%s9843_s1 + $0x640] sm:$0xff]   ;;  %v7867_v44 = vld [vmem:[%s9843_s1 + $0x648] sm:$0xff]  }
  0xa2   : > { %7069 = vmatprep.subr.bf16.mxu1 %v7800_v21  ;;  %2616 = vmatprep.mubr.bf16.mxu0 %v7805_v26  ;;  %v7864_v21 = vld [vmem:[%s9843_s1 + $0x6c0] sm:$0xff]   ;;  %v7870_v26 = vld [vmem:[%s9843_s1 + $0x688] sm:$0xff]  }
  0xa3   : > { %2681 = vmatprep.mubr.bf16.mxu1 %v7808_v29 }
  0xa4   : > { %7030 = vmatpush3.bf16.msra.mxu0 %v7801_v22  ;;  %v7865_v22 = vld [vmem:[%s9843_s1 + $0x600] sm:$0xff]  }
  0xa5   : > { %7070 = vmatpush3.bf16.msra.mxu1 %v7802_v23  ;;  %7095 = vmatprep.subr.bf16.mxu0 %v7809_v30  ;;  %v7868_v23 = vld [vmem:[%s9843_s1 + $0x6c8] sm:$0xff]   ;;  %v6119_v30 = vld [vmem:[%s8258_s26 + $0x178] sm:$0xff] }
  0xa6   : > { %7135 = vmatprep.subr.bf16.mxu1 %v7810_v31 }
  0xa7   : > { %2617 = vmatmul.mubr.bf16.vlgmr.msra.gmra.mrb[64].mxu0 %v7803_v25  ;;  %v7869_v25 = vld [vmem:[%s9843_s1 + $0x608] sm:$0xff]  }
  0xa8   : > { %2682 = vmatmul.mubr.bf16.vlgmr.msra.gmra.mrb[64].mxu1 %v7806_v28  ;;  %7096 = vmatpush3.bf16.msra.mxu0 %v7811_v35  ;;  %v6118_v28 = vld [vmem:[%s8258_s26 + $0x170] sm:$0xff]  ;;  %v6201_v35 = vcombine.high %v6119_v30, %v8627_v2 }
  0xa9   : > { %7136 = vmatpush3.bf16.msra.mxu1 %v7812_v37  ;;  %7097 = vmatprep.subr.bf16.mxu0 %v7813_v39  ;;  %v6199_v29 = vcombine.high %v6118_v28, %v8623_v0  ;;  %v6198_v31 = vcombine.low %v6118_v28, %v8623_v0  ;;  %v6200_v37 = vcombine.low %v6119_v30, %v8627_v2  ;;  %v7875_v39 = vld [vmem:[%s9843_s1 + $0x650] sm:$0xff]  }
  0xaa   : > { %7137 = vmatprep.subr.bf16.mxu1 %v7814_v40  ;;  %2624 = vmatprep.mubr.bf16.mxu0 %v7817_v46  ;;  %v7876_v40 = vld [vmem:[%s9843_s1 + $0x6d0] sm:$0xff]   ;;  %v7881_v46 = vld [vmem:[%s9843_s1 + $0x618] sm:$0xff]  }
  0xab   : > { %2689 = vmatprep.mubr.bf16.mxu1 %v7819_v47  ;;  %v7877_v0 = vld [vmem:[%s9843_s1 + $0x610] sm:$0xff]   ;;  %v7882_v47 = vld [vmem:[%s9843_s1 + $0x698] sm:$0xff]  }
  0xac   : > { %7098 = vmatpush3.bf16.msra.mxu0 %v7815_v43  ;;  %v7878_v2 = vld [vmem:[%s9843_s1 + $0x690] sm:$0xff]   ;;  %v7879_v43 = vld [vmem:[%s9843_s1 + $0x658] sm:$0xff]  }
  0xad   : > { %7138 = vmatpush3.bf16.msra.mxu1 %v7816_v45  ;;  %7099 = vmatprep.subr.bf16.mxu0 %v7823_v52  ;;  %v7880_v45 = vld [vmem:[%s9843_s1 + $0x6d8] sm:$0xff]   ;;  %v7911_v28 = vld [vmem:[%s8258_s26 + $0x24] ss:$16 sps:$4 sm:$0xff]  }
  0xae   : > { %7139 = vmatprep.subr.bf16.mxu1 %v7824_v55 }
  0xaf   : > { %2625 = vmatmul.mubr.bf16.gmra.mrb[68].mxu0 %v7821_v48  ;;  %v6122_v48 = vld [vmem:[%s8258_s26 + $0x190] sm:$0xff] }
  0xb0   : > { %2690 = vmatmul.mubr.bf16.gmra.mrb[68].mxu1 %v7822_v49  ;;  %7100 = vmatpush3.bf16.msra.mxu0 %v7825_v57  ;;  %v6123_v49 = vld [vmem:[%s8258_s26 + $0x198] sm:$0xff]  ;;  %v6203_v52 = vcombine.high %v6122_v48, %v8659_v24  ;;  %v6202_v57 = vcombine.low %v6122_v48, %v8659_v24  ;;  %v7890_v24 = vld [vmem:[%s9843_s1 + $0x6a0] sm:$0xff]   ;;  %v7919_v48 = vld [vmem:[%s9843_s1 + $0x748] sm:$0xff]  }
  0xb1   : > { %7140 = vmatpush3.bf16.msra.mxu1 %v7826_v58  ;;  %7101 = vmatprep.subr.bf16.mxu0 %v7827_v59  ;;  %v6205_v55 = vcombine.high %v6123_v49, %v8664_v27  ;;  %v6204_v58 = vcombine.low %v6123_v49, %v8664_v27  ;;  %v7887_v59 = vld [vmem:[%s9843_s1 + $0x660] sm:$0xff]  }
  0xb2   : > { %7141 = vmatprep.subr.bf16.mxu1 %v7828_v61  ;;  %2632 = vmatprep.mubr.bf16.mxu0 %v7831_v32  ;;  %v7888_v61 = vld [vmem:[%s9843_s1 + $0x6e0] sm:$0xff]  }
  0xb3   : > { %2697 = vmatprep.mubr.bf16.mxu1 %v7833_v19  ;;  %v7892_v19 = vld [vmem:[%s9843_s1 + $0x6e8] sm:$0xff]  }
  0xb4   : > { %7102 = vmatpush3.bf16.msra.mxu0 %v7829_v62  ;;  %v7889_v62 = vld [vmem:[%s9843_s1 + $0x620] sm:$0xff]  }
  0xb5   : > { %7142 = vmatpush3.bf16.msra.mxu1 %v7830_v17  ;;  %7103 = vmatprep.subr.bf16.mxu0 %v7837_v42  ;;  %v7891_v17 = vld [vmem:[%s9843_s1 + $0x668] sm:$0xff]  }
  0xb6   : > { %7143 = vmatprep.subr.bf16.mxu1 %v7838_v63 }
  0xb7   : > { %2633 = vmatmul.mubr.bf16.gmra.mrb[72].mxu0 %v7835_v34 }
  0xb8   : > { %2698 = vmatmul.mubr.bf16.gmra.mrb[72].mxu1 %v7836_v38  ;;  %7104 = vmatpush3.bf16.msra.mxu0 %v7839_v1  ;;  %v7893_v38 = vld [vmem:[%s9843_s1 + $0x628] sm:$0xff]  }
  0xb9   : > { %7144 = vmatpush3.bf16.msra.mxu1 %v7840_v3  ;;  %7105 = vmatprep.subr.bf16.mxu0 %v7841_v9  ;;  %v7894_v1 = vld [vmem:[%s9843_s1 + $0x6a8] sm:$0xff]  }
  0xba   : > { %7145 = vmatprep.subr.bf16.mxu1 %v7842_v33  ;;  %2640 = vmatprep.mubr.bf16.mxu0 %v7845_v53  ;;  %v7895_v33 = vld [vmem:[%s8258_s26 + $0x1b4] ss:$16 sps:$4 sm:$0xff]   ;;  %v7897_v53 = vld [vmem:[%s8258_s26 + $0x1bc] ss:$16 sps:$4 sm:$0xff]  }
  0xbb   : > { %2705 = vmatprep.mubr.bf16.mxu1 %v7847_v56 }
  0xbc   : > { %7106 = vmatpush3.bf16.msra.mxu0 %v7843_v50 }
  0xbd   : > { %7146 = vmatpush3.bf16.msra.mxu1 %v7844_v36  ;;  %7107 = vmatprep.subr.bf16.mxu0 %v7851_v11  ;;  %v7899_v11 = vld [vmem:[%s8258_s26 + $0x1b0] ss:$16 sps:$4 sm:$0xff]  }
  0xbe   : > { %7147 = vmatprep.subr.bf16.mxu1 %v7852_v51  ;;  %v7900_v51 = vld [vmem:[%s8258_s26 + $0x1b8] ss:$16 sps:$4 sm:$0xff]  }
  0xbf   : > { %2641 = vmatmul.mubr.bf16.gmra.mrb[76].mxu0 %v7849_v60 }
  0xc0   : > { %2706 = vmatmul.mubr.bf16.gmra.mrb[76].mxu1 %v7850_v10  ;;  %7108 = vmatpush3.bf16.msra.mxu0 %v7853_v4 }
  0xc1   : > { %7148 = vmatpush3.bf16.msra.mxu1 %v7854_v54  ;;  %7109 = vmatprep.subr.bf16.mxu0 %v7855_v6  ;;  %v7901_v54 = vld [vmem:[%s9843_s1 + $0x670] sm:$0xff]  }
  0xc2   : > { %7149 = vmatprep.subr.bf16.mxu1 %v7856_v8  ;;  %3108 = vmatprep.mubr.bf16.mxu0 %v6195_v18  ;;  %v7902_v6 = vld [vmem:[%s9843_s1 + $0x6f0] sm:$0xff]  }
  0xc3   : > { %3173 = vmatprep.mubr.bf16.mxu1 %v6197_v7 }
  0xc4   : > { %7110 = vmatpush3.bf16.msra.mxu0 %v7857_v15  ;;  %v7903_v15 = vld [vmem:[%s9843_s1 + $0x630] sm:$0xff]  }
  0xc5   : > { %7150 = vmatpush3.bf16.msra.mxu1 %v7858_v12  ;;  %7175 = vmatprep.subr.bf16.mxu0 %v7863_v20 }
  0xc6   : > { %7215 = vmatprep.subr.bf16.mxu1 %v7864_v21  ;;  %v7907_v21 = vld [vmem:[%s9843_s1 + $0x638] sm:$0xff]  }
  0xc7   : > { %3109 = vmatmul.mubr.bf16.vlgmr.msra.gmra.mrb[80].mxu0 %v6194_v16  ;;  %v7905_v16 = vld [vmem:[%s9843_s1 + $0x678] sm:$0xff]  }
  0xc8   : > { %3174 = vmatmul.mubr.bf16.vlgmr.msra.gmra.mrb[80].mxu1 %v6196_v5  ;;  %7176 = vmatpush3.bf16.msra.mxu0 %v7865_v22  ;;  %v7906_v5 = vld [vmem:[%s9843_s1 + $0x6f8] sm:$0xff]  }
  0xc9   : > { %7216 = vmatpush3.bf16.msra.mxu1 %v7866_v41  ;;  %7177 = vmatprep.subr.bf16.mxu0 %v7867_v44  ;;  %v7908_v44 = vld [vmem:[%s9843_s1 + $0x6b8] sm:$0xff]  }
  0xca   : > { %7217 = vmatprep.subr.bf16.mxu1 %v7868_v23  ;;  %3116 = vmatprep.mubr.bf16.mxu0 %v6199_v29 }
  0xcb   : > { %3181 = vmatprep.mubr.bf16.mxu1 %v6201_v35  ;;  %v7912_v35 = vld [vmem:[%s8258_s26 + $0x28] ss:$16 sps:$4 sm:$0xff]  }
  0xcc   : > { %7178 = vmatpush3.bf16.msra.mxu0 %v7869_v25 }
  0xcd   : > { %7218 = vmatpush3.bf16.msra.mxu1 %v7870_v26  ;;  %7179 = vmatprep.subr.bf16.mxu0 %v7875_v39  ;;  %v7909_v26 = vld [vmem:[%s8258_s26 + $0x20] ss:$16 sps:$4 sm:$0xff]   ;;  %v7914_v39 = vld [vmem:[%s8258_s26 + $0x2c] ss:$16 sps:$4 sm:$0xff]  }
  0xce   : > { %7219 = vmatprep.subr.bf16.mxu1 %v7876_v40  ;;  %v7915_v40 = vld [vmem:[%s9843_s1 + $0x740] sm:$0xff]  }
  0xcf   : > { %3117 = vmatmul.mubr.bf16.gmra.mrb[84].mxu0 %v6198_v31 }
  0xd0   : > { %3182 = vmatmul.mubr.bf16.gmra.mrb[84].mxu1 %v6200_v37  ;;  %7180 = vmatpush3.bf16.msra.mxu0 %v7877_v0 }
  0xd1   : > { %7220 = vmatpush3.bf16.msra.mxu1 %v7878_v2  ;;  %7181 = vmatprep.subr.bf16.mxu0 %v7879_v43  ;;  %v7916_v2 = vld [vmem:[%s9843_s1 + $0x7c0] sm:$0xff]  }
  0xd2   : > { %7221 = vmatprep.subr.bf16.mxu1 %v7880_v45  ;;  %3124 = vmatprep.mubr.bf16.mxu0 %v6203_v52  ;;  %v7917_v43 = vld [vmem:[%s9843_s1 + $0x700] sm:$0xff]   ;;  %v7920_v52 = vld [vmem:[%s9843_s1 + $0x7c8] sm:$0xff]  }
  0xd3   : > { %3189 = vmatprep.mubr.bf16.mxu1 %v6205_v55 }
  0xd4   : > { %7182 = vmatpush3.bf16.msra.mxu0 %v7881_v46  ;;  %v7918_v46 = vld [vmem:[%s9843_s1 + $0x780] sm:$0xff]  }
  0xd5   : > { %7222 = vmatpush3.bf16.msra.mxu1 %v7882_v47  ;;  %7183 = vmatprep.subr.bf16.mxu0 %v7887_v59 }
  0xd6   : > { %7223 = vmatprep.subr.bf16.mxu1 %v7888_v61 }
  0xd7   : > { %3125 = vmatmul.mubr.bf16.gmra.mrb[88].mxu0 %v6202_v57 }
  0xd8   : > { %3190 = vmatmul.mubr.bf16.gmra.mrb[88].mxu1 %v6204_v58  ;;  %7184 = vmatpush3.bf16.msra.mxu0 %v7889_v62  ;;  %v7921_v58 = vld [vmem:[%s9843_s1 + $0x708] sm:$0xff]  }
  0xd9   : > { %7224 = vmatpush3.bf16.msra.mxu1 %v7890_v24  ;;  %7185 = vmatprep.subr.bf16.mxu0 %v7891_v17  ;;  %v7922_v62 = vld [vmem:[%s9843_s1 + $0x788] sm:$0xff]   ;;  %v7923_v17 = vld [vmem:[%s8258_s26 + $0x44] ss:$16 sps:$4 sm:$0xff]  }
  0xda   : > { %7225 = vmatprep.subr.bf16.mxu1 %v7892_v19  ;;  %3132 = vmatprep.mubr.bf16.mxu0 %v7895_v33 }
  0xdb   : > { %3197 = vmatprep.mubr.bf16.mxu1 %v7897_v53 }
  0xdc   : > { %7186 = vmatpush3.bf16.msra.mxu0 %v7893_v38  ;;  %v7925_v38 = vld [vmem:[%s8258_s26 + $0x4c] ss:$16 sps:$4 sm:$0xff]  }
  0xdd   : > { %7226 = vmatpush3.bf16.msra.mxu1 %v7894_v1  ;;  %7187 = vmatprep.subr.bf16.mxu0 %v7901_v54 }
  0xde   : > { %7227 = vmatprep.subr.bf16.mxu1 %v7902_v6 }
  0xdf   : > { %3133 = vmatmul.mubr.bf16.gmra.mrb[92].mxu0 %v7899_v11  ;;  %v7934_v11 = vld [vmem:[%s9843_s1 + $0x7d8] sm:$0xff]  }
  0xe0   : > { %3198 = vmatmul.mubr.bf16.gmra.mrb[92].mxu1 %v7900_v51  ;;  %7188 = vmatpush3.bf16.msra.mxu0 %v7903_v15  ;;  %v7936_v15 = vld [vmem:[%s9843_s1 + $0x798] sm:$0xff]  }
  0xe1   : > { %7228 = vmatpush3.bf16.msra.mxu1 %v7904_v13  ;;  %7189 = vmatprep.subr.bf16.mxu0 %v7905_v16 }
  0xe2   : > { %7229 = vmatprep.subr.bf16.mxu1 %v7906_v5  ;;  %3600 = vmatprep.mubr.bf16.mxu0 %v7911_v28  ;;  %v7939_v5 = vld [vmem:[%s8258_s26 + $0x6c] ss:$16 sps:$4 sm:$0xff]   ;;  %v7945_v28 = vld [vmem:[%s9843_s1 + $0x720] sm:$0xff]  }
  0xe3   : > { %3665 = vmatprep.mubr.bf16.mxu1 %v7914_v39  ;;  %v7948_v39 = vld [vmem:[%s9843_s1 + $0x7e8] sm:$0xff]  }
  0xe4   : > { %7190 = vmatpush3.bf16.msra.mxu0 %v7907_v21 }
  0xe5   : > { %7230 = vmatpush3.bf16.msra.mxu1 %v7908_v44  ;;  %7255 = vmatprep.subr.bf16.mxu0 %v7915_v40 }
  0xe6   : > { %7295 = vmatprep.subr.bf16.mxu1 %v7916_v2  ;;  %v7949_v2 = vld [vmem:[%s9843_s1 + $0x728] sm:$0xff]  }
  0xe7   : > { %3601 = vmatmul.mubr.bf16.vlgmr.msra.gmra.mrb[96].mxu0 %v7909_v26 }
  0xe8   : > { %3666 = vmatmul.mubr.bf16.vlgmr.msra.gmra.mrb[96].mxu1 %v7912_v35  ;;  %7256 = vmatpush3.bf16.msra.mxu0 %v7917_v43  ;;  %v7947_v35 = vld [vmem:[%s9843_s1 + $0x768] sm:$0xff]  }
  0xe9   : > { %7296 = vmatpush3.bf16.msra.mxu1 %v7918_v46  ;;  %7257 = vmatprep.subr.bf16.mxu0 %v7919_v48  ;;  %v7950_v46 = vld [vmem:[%s9843_s1 + $0x7a8] sm:$0xff]  }
  0xea   : > { %7297 = vmatprep.subr.bf16.mxu1 %v7920_v52  ;;  %3608 = vmatprep.mubr.bf16.mxu0 %v7923_v17  ;;  %v7951_v52 = vld [vmem:[%s8258_s26 + $0x84] ss:$16 sps:$4 sm:$0xff]  }
  0xeb   : > { %3673 = vmatprep.mubr.bf16.mxu1 %v7925_v38 }
  0xec   : > { %7258 = vmatpush3.bf16.msra.mxu0 %v7921_v58 }
  0xed   : > { %7298 = vmatpush3.bf16.msra.mxu1 %v7922_v62 }
  0xfa   : > { %v6711_v27 = vpop.f32.mrb[0].mxu0 }
  0xfb   : > { %v6751_v32 = vpop.f32.mrb[0].mxu1  ;;  %v6712_v34 = vpop.f32.mrb[1].mxu0 }
  0xfc   : > { %v6713_v42 = vadd.f32 %v6712_v34, %v6711_v27  ;;  %v6752_v63 = vpop.f32.mrb[1].mxu1  ;;  %v6714_v9 = vpop.f32.mrb[2].mxu0 }
  0xfd   : > { %v6753_v3 = vadd.f32 %v6752_v63, %v6751_v32  ;;  %v6754_v50 = vpop.f32.mrb[2].mxu1  ;;  %v6715_v36 = vpop.f32.mrb[3].mxu0  ;;  %v7928_v63 = vld [vmem:[%s8258_s26 + $0x48] ss:$16 sps:$4 sm:$0xff]  }
  0xfe   : > { %v6716_v60 = vadd.f32 %v6715_v36, %v6714_v9  ;;  %v6755_v10 = vpop.f32.mrb[3].mxu1  ;;  %v7930_v9 = vld [vmem:[%s9843_s1 + $0x7d0] sm:$0xff]   ;;  %3674 = vmatmul.mubr.bf16.gmra.mrb[100].mxu1 %v7928_v63 }
  0xff   : > { %v9030_v56 = vadd.f32 %v6753_v3, %v6713_v42  ;;  %v6756_v4 = vadd.f32 %v6755_v10, %v6754_v50  ;;  %v7927_v42 = vld [vmem:[%s8258_s26 + $0x40] ss:$16 sps:$4 sm:$0xff]   ;;  %7299 = vmatprep.subr.bf16.mxu1 %v7930_v9  ;;  %3681 = vmatprep.mubr.bf16.mxu1 %v7939_v5  ;;  %v7961_v9 = vld [vmem:[%s9843_s1 + $0x778] sm:$0xff]  }
 0x100   : > { %v7929_v3 = vld [vmem:[%s9843_s1 + $0x750] sm:$0xff]   ;;  %3609 = vmatmul.mubr.bf16.gmra.mrb[100].mxu0 %v7927_v42  ;;  %v7968_v5 = vld [vmem:[%s8258_s26 + $0xc8] ss:$16 sps:$4 sm:$0xff]  }
 0x101   : > { %v9040_v8 = vadd.f32 %v6756_v4, %v6716_v60  ;;  %7259 = vmatprep.subr.bf16.mxu0 %v7929_v3  ;;  %v7931_v50 = vld [vmem:[%s9843_s1 + $0x710] sm:$0xff]   ;;  %v7933_v60 = vld [vmem:[%s9843_s1 + $0x758] sm:$0xff]  }
 0x102   : > { %v6717_v12 = vpop.f32.mrb[4].mxu0  ;;  %v7932_v36 = vld [vmem:[%s9843_s1 + $0x790] sm:$0xff]   ;;  %7260 = vmatpush3.bf16.msra.mxu0 %v7931_v50  ;;  %v7935_v4 = vld [vmem:[%s9843_s1 + $0x718] sm:$0xff]  }
 0x103   : > { %v6757_v14 = vpop.f32.mrb[4].mxu1  ;;  %v6718_v18 = vpop.f32.mrb[5].mxu0  ;;  %7300 = vmatpush3.bf16.msra.mxu1 %v7932_v36  ;;  %7261 = vmatprep.subr.bf16.mxu0 %v7933_v60  ;;  %v7959_v42 = vld [vmem:[%s9843_s1 + $0x730] sm:$0xff]  }
 0x104   : > { %v6719_v7 = vadd.f32 %v6718_v18, %v6717_v12  ;;  %v6758_v20 = vpop.f32.mrb[5].mxu1  ;;  %v6720_v41 = vpop.f32.mrb[6].mxu0  ;;  %7301 = vmatprep.subr.bf16.mxu1 %v7934_v11  ;;  %v7960_v3 = vld [vmem:[%s9843_s1 + $0x7b0] sm:$0xff]   ;;  %v7963_v11 = vld [vmem:[%s9843_s1 + $0x738] sm:$0xff]  }
 0x105   : > { %v6759_v22 = vadd.f32 %v6758_v20, %v6757_v14  ;;  %v6760_v23 = vpop.f32.mrb[6].mxu1  ;;  %v6721_v25 = vpop.f32.mrb[7].mxu0  ;;  %v7937_v14 = vld [vmem:[%s8258_s26 + $0x64] ss:$16 sps:$4 sm:$0xff]  }
 0x106   : > { %v6722_v30 = vadd.f32 %v6721_v25, %v6720_v41  ;;  %v6761_v31 = vpop.f32.mrb[7].mxu1  ;;  %7262 = vmatpush3.bf16.msra.mxu0 %v7935_v4  ;;  %3616 = vmatprep.mubr.bf16.mxu0 %v7937_v14  ;;  %v7942_v41 = vld [vmem:[%s8258_s26 + $0x68] ss:$16 sps:$4 sm:$0xff]   ;;  %v7944_v25 = vld [vmem:[%s9843_s1 + $0x7e0] sm:$0xff]  }
 0x107   : > { %v9062_v29 = vadd.f32 %v6759_v22, %v6719_v7  ;;  %v6762_v37 = vadd.f32 %v6761_v31, %v6760_v23  ;;  %7302 = vmatpush3.bf16.msra.mxu1 %v7936_v15  ;;  %v7941_v22 = vld [vmem:[%s8258_s26 + $0x60] ss:$16 sps:$4 sm:$0xff]  }
 0x108   : > { %v7943_v23 = vld [vmem:[%s9843_s1 + $0x760] sm:$0xff]   ;;  %3617 = vmatmul.mubr.bf16.gmra.mrb[104].mxu0 %v7941_v22  ;;  %3682 = vmatmul.mubr.bf16.gmra.mrb[104].mxu1 %v7942_v41 }
 0x109   : > { %v9069_v0 = vadd.f32 %v6762_v37, %v6722_v30  ;;  %7263 = vmatprep.subr.bf16.mxu0 %v7943_v23  ;;  %7303 = vmatprep.subr.bf16.mxu1 %v7944_v25  ;;  %v7946_v30 = vld [vmem:[%s9843_s1 + $0x7a0] sm:$0xff]  }
 0x10a   : > { %v6723_v45 = vpop.f32.mrb[8].mxu0  ;;  %7264 = vmatpush3.bf16.msra.mxu0 %v7945_v28  ;;  %3624 = vmatprep.mubr.bf16.mxu0 %v7951_v52  ;;  %v7972_v41 = vld [vmem:[%s9843_s1 + $0x8c0] sm:$0xff]  }
 0x10b   : > { %v6763_v47 = vpop.f32.mrb[8].mxu1  ;;  %v6724_v49 = vpop.f32.mrb[9].mxu0  ;;  %7304 = vmatpush3.bf16.msra.mxu1 %v7946_v30  ;;  %7265 = vmatprep.subr.bf16.mxu0 %v7947_v35  ;;  %v7973_v23 = vld [vmem:[%s9843_s1 + $0x800] sm:$0xff]   ;;  %v7975_v35 = vld [vmem:[%s9843_s1 + $0x848] sm:$0xff]  }
 0x10c   : > { %v6725_v55 = vadd.f32 %v6724_v49, %v6723_v45  ;;  %v6764_v57 = vpop.f32.mrb[9].mxu1  ;;  %v6726_v61 = vpop.f32.mrb[10].mxu0  ;;  %7305 = vmatprep.subr.bf16.mxu1 %v7948_v39 }
 0x10d   : > { %v6765_v59 = vadd.f32 %v6764_v57, %v6763_v47  ;;  %v6766_v24 = vpop.f32.mrb[10].mxu1  ;;  %v6727_v27 = vpop.f32.mrb[11].mxu0 }
 0x10e   : > { %v6728_v19 = vadd.f32 %v6727_v27, %v6726_v61  ;;  %v6767_v34 = vpop.f32.mrb[11].mxu1  ;;  %7266 = vmatpush3.bf16.msra.mxu0 %v7949_v2  ;;  %v7955_v61 = vld [vmem:[%s8258_s26 + $0x80] ss:$16 sps:$4 sm:$0xff]   ;;  %v7956_v27 = vld [vmem:[%s8258_s26 + $0x88] ss:$16 sps:$4 sm:$0xff]  }
 0x10f   : > { %v9093_v32 = vadd.f32 %v6765_v59, %v6725_v55  ;;  %v6768_v1 = vadd.f32 %v6767_v34, %v6766_v24  ;;  %7306 = vmatpush3.bf16.msra.mxu1 %v7950_v46  ;;  %v7953_v59 = vld [vmem:[%s8258_s26 + $0x8c] ss:$16 sps:$4 sm:$0xff]  }
 0x110   : > { %3689 = vmatprep.mubr.bf16.mxu1 %v7953_v59  ;;  %3625 = vmatmul.mubr.bf16.gmra.mrb[108].mxu0 %v7955_v61  ;;  %v7983_v59 = vld [vmem:[%s8258_s26 + $0xe0] ss:$16 sps:$4 sm:$0xff]   ;;  %v7984_v61 = vld [vmem:[%s8258_s26 + $0xe8] ss:$16 sps:$4 sm:$0xff]  }
 0x111   : > { %v9104_v33 = vadd.f32 %v6768_v1, %v6728_v19  ;;  %v7957_v19 = vld [vmem:[%s9843_s1 + $0x770] sm:$0xff]   ;;  %3690 = vmatmul.mubr.bf16.gmra.mrb[108].mxu1 %v7956_v27 }
 0x112   : > { %v6729_v53 = vpop.f32.mrb[12].mxu0  ;;  %7267 = vmatprep.subr.bf16.mxu0 %v7957_v19  ;;  %v7986_v19 = vld [vmem:[%s9843_s1 + $0x8d0] sm:$0xff]  }
 0x113   : > { %v6769_v10 = vpop.f32.mrb[12].mxu1  ;;  %v6730_v51 = vpop.f32.mrb[13].mxu0  ;;  %7268 = vmatpush3.bf16.msra.mxu0 %v7959_v42 }
 0x114   : > { %v6731_v54 = vadd.f32 %v6730_v51, %v6729_v53  ;;  %v6770_v6 = vpop.f32.mrb[13].mxu1  ;;  %v6732_v13 = vpop.f32.mrb[14].mxu0  ;;  %v7962_v53 = vld [vmem:[%s9843_s1 + $0x7f8] sm:$0xff]   ;;  %7269 = vmatprep.subr.bf16.mxu0 %v7961_v9 }
 0x115   : > { %v6771_v12 = vadd.f32 %v6770_v6, %v6769_v10  ;;  %v6772_v16 = vpop.f32.mrb[14].mxu1  ;;  %v6733_v18 = vpop.f32.mrb[15].mxu0 }
 0x116   : > { %v6734_v20 = vadd.f32 %v6733_v18, %v6732_v13  ;;  %v6773_v21 = vpop.f32.mrb[15].mxu1  ;;  %v7967_v13 = vld [vmem:[%s8258_s26 + $0xc4] ss:$16 sps:$4 sm:$0xff]  }
 0x117   : > { %v9126_v7 = vadd.f32 %v6771_v12, %v6731_v54  ;;  %v6774_v44 = vadd.f32 %v6773_v21, %v6772_v16  ;;  %v7964_v54 = vld [vmem:[%s9843_s1 + $0x7b8] sm:$0xff]   ;;  %7270 = vmatpush3.bf16.msra.mxu0 %v7963_v11  ;;  %v7965_v12 = vld [vmem:[%s8258_s26 + $0xc0] ss:$16 sps:$4 sm:$0xff]   ;;  %4092 = vmatprep.mubr.bf16.mxu0 %v7967_v13 }
 0x118   : > { %v7992_v11 = vld [vmem:[%s9843_s1 + $0x898] sm:$0xff]   ;;  %v7997_v13 = vld [vmem:[%s8258_s26 + $0x100] ss:$16 sps:$4 sm:$0xff]  }
 0x119   : > { %v9136_v26 = vadd.f32 %v6774_v44, %v6734_v20  ;;  %v7970_v20 = vld [vmem:[%s8258_s26 + $0xcc] ss:$16 sps:$4 sm:$0xff]  }
 0x11a   : > { %v6791_v31 = vpop.f32.mrb[16].mxu0  ;;  %4157 = vmatprep.mubr.bf16.mxu1 %v7970_v20  ;;  %4093 = vmatmul.mubr.bf16.vlgmr.msra.gmra.mrb[112].mxu0 %v7965_v12  ;;  %v7995_v12 = vld [vmem:[%s8258_s26 + $0x10c] ss:$16 sps:$4 sm:$0xff]   ;;  %v7999_v20 = vld [vmem:[%s9843_s1 + $0x860] sm:$0xff]  }
 0x11b   : > { %v6831_v37 = vpop.f32.mrb[16].mxu1  ;;  %v6792_v40 = vpop.f32.mrb[17].mxu0 }
 0x11c   : > { %v6793_v43 = vadd.f32 %v6792_v40, %v6791_v31  ;;  %v6832_v45 = vpop.f32.mrb[17].mxu1  ;;  %v6794_v48 = vpop.f32.mrb[18].mxu0  ;;  %v7976_v40 = vld [vmem:[%s9843_s1 + $0x8c8] sm:$0xff]  }
 0x11d   : > { %v6833_v47 = vadd.f32 %v6832_v45, %v6831_v37  ;;  %v6834_v49 = vpop.f32.mrb[18].mxu1  ;;  %v6795_v57 = vpop.f32.mrb[19].mxu0  ;;  %v7977_v45 = vld [vmem:[%s9843_s1 + $0x808] sm:$0xff]  }
 0x11e   : > { %v1151_v55 = vadd.f32 %v6793_v43, %v9030_v56  ;;  %v6835_v58 = vpop.f32.mrb[19].mxu1  ;;  %v6796_v62 = vadd.f32 %v6795_v57, %v6794_v48  ;;  %v7958_v56 = vld [vmem:[%s9843_s1 + $0x7f0] sm:$0xff]   ;;  %v7981_v57 = vld [vmem:[%s8258_s26 + $0xec] ss:$16 sps:$4 sm:$0xff]  }
 0x11f   : > { %v6836_v24 = vadd.f32 %v6835_v58, %v6834_v49  ;;  %7307 = vmatprep.subr.bf16.mxu1 %v7958_v56 }
 0x120   : > { %v9161_v17 = vadd.f32 %v6833_v47, %v1151_v55  ;;  %v1154_v34 = vadd.f32 %v6796_v62, %v9040_v8  ;;  %7308 = vmatpush3.bf16.msra.mxu1 %v7960_v3  ;;  %v7978_v47 = vld [vmem:[%s9843_s1 + $0x888] sm:$0xff]   ;;  %v7985_v62 = vld [vmem:[%s9843_s1 + $0x850] sm:$0xff]   ;;  %v7989_v3 = vld [vmem:[%s9843_s1 + $0x858] sm:$0xff]  }
 0x121   : > { %7309 = vmatprep.subr.bf16.mxu1 %v7962_v53 }
 0x122   : > { %v6797_v38 = vpop.f32.mrb[20].mxu0  ;;  %v9173_v63 = vadd.f32 %v6836_v24, %v1154_v34 }
 0x123   : > { %v6837_v1 = vpop.f32.mrb[20].mxu1  ;;  %v6798_v8 = vpop.f32.mrb[21].mxu0 }
 0x124   : > { %v6799_v50 = vadd.f32 %v6798_v8, %v6797_v38  ;;  %v6838_v36 = vpop.f32.mrb[21].mxu1  ;;  %v6800_v10 = vpop.f32.mrb[22].mxu0  ;;  %7310 = vmatpush3.bf16.msra.mxu1 %v7964_v54  ;;  %v7988_v38 = vld [vmem:[%s9843_s1 + $0x890] sm:$0xff]  }
 0x125   : > { %v6839_v60 = vadd.f32 %v6838_v36, %v6837_v1  ;;  %v6840_v4 = vpop.f32.mrb[22].mxu1  ;;  %v6801_v6 = vpop.f32.mrb[23].mxu0  ;;  %7375 = vmatprep.subr.bf16.mxu1 %v7972_v41 }
 0x126   : > { %v1159_v51 = vadd.f32 %v6799_v50, %v9062_v29  ;;  %v6841_v15 = vpop.f32.mrb[23].mxu1  ;;  %v6802_v16 = vadd.f32 %v6801_v6, %v6800_v10  ;;  %v7971_v29 = vld [vmem:[%s9843_s1 + $0x840] sm:$0xff]   ;;  %v7990_v50 = vld [vmem:[%s9843_s1 + $0x8d8] sm:$0xff]  }
 0x127   : > { %v6842_v18 = vadd.f32 %v6841_v15, %v6840_v4  ;;  %4158 = vmatmul.mubr.bf16.vlgmr.msra.gmra.mrb[112].mxu1 %v7968_v5  ;;  %7335 = vmatprep.subr.bf16.mxu0 %v7971_v29  ;;  %v7998_v5 = vld [vmem:[%s8258_s26 + $0x108] ss:$16 sps:$4 sm:$0xff]  }
 0x128   : > { %v9193_v14 = vadd.f32 %v6839_v60, %v1159_v51  ;;  %v1162_v21 = vadd.f32 %v6802_v16, %v9069_v0  ;;  %v7974_v0 = vld [vmem:[%s9843_s1 + $0x880] sm:$0xff]   ;;  %7336 = vmatpush3.bf16.msra.mxu0 %v7973_v23  ;;  %4165 = vmatprep.mubr.bf16.mxu1 %v7981_v57  ;;  %v7991_v60 = vld [vmem:[%s9843_s1 + $0x818] sm:$0xff]  }
 0x129   : > { %7376 = vmatpush3.bf16.msra.mxu1 %v7974_v0  ;;  %7337 = vmatprep.subr.bf16.mxu0 %v7975_v35  ;;  %v8002_v0 = vld [vmem:[%s9843_s1 + $0x8a0] sm:$0xff]   ;;  %v8009_v57 = vld [vmem:[%s8258_s26 + $0x12c] ss:$16 sps:$4 sm:$0xff]  }
 0x12a   : > { %v6803_v22 = vpop.f32.mrb[24].mxu0  ;;  %v9207_v25 = vadd.f32 %v6842_v18, %v1162_v21  ;;  %7377 = vmatprep.subr.bf16.mxu1 %v7976_v40 }
 0x12b   : > { %v6843_v44 = vpop.f32.mrb[24].mxu1  ;;  %v6804_v28 = vpop.f32.mrb[25].mxu0 }
 0x12c   : > { %v6805_v30 = vadd.f32 %v6804_v28, %v6803_v22  ;;  %v6844_v31 = vpop.f32.mrb[25].mxu1  ;;  %v6806_v39 = vpop.f32.mrb[26].mxu0  ;;  %7338 = vmatpush3.bf16.msra.mxu0 %v7977_v45  ;;  %v8000_v22 = vld [vmem:[%s9843_s1 + $0x8e0] sm:$0xff]  }
 0x12d   : > { %v6845_v37 = vadd.f32 %v6844_v31, %v6843_v44  ;;  %v6846_v43 = vpop.f32.mrb[26].mxu1  ;;  %v6807_v46 = vpop.f32.mrb[27].mxu0  ;;  %7378 = vmatpush3.bf16.msra.mxu1 %v7978_v47  ;;  %7339 = vmatprep.subr.bf16.mxu0 %v7985_v62  ;;  %v8003_v31 = vld [vmem:[%s9843_s1 + $0x868] sm:$0xff]  }
 0x12e   : > { %v1167_v2 = vadd.f32 %v6805_v30, %v9093_v32  ;;  %v6808_v49 = vadd.f32 %v6807_v46, %v6806_v39  ;;  %v6847_v52 = vpop.f32.mrb[27].mxu1  ;;  %v7979_v32 = vld [vmem:[%s8258_s26 + $0xe4] ss:$16 sps:$4 sm:$0xff]   ;;  %7379 = vmatprep.subr.bf16.mxu1 %v7986_v19  ;;  %v8004_v39 = vld [vmem:[%s9843_s1 + $0x8e8] sm:$0xff]  }
 0x12f   : > { %v6848_v55 = vadd.f32 %v6847_v52, %v6846_v43  ;;  %4100 = vmatprep.mubr.bf16.mxu0 %v7979_v32  ;;  %4166 = vmatmul.mubr.bf16.gmra.mrb[116].mxu1 %v7984_v61  ;;  %v8005_v43 = vld [vmem:[%s9843_s1 + $0x828] sm:$0xff]  }
 0x130   : > { %v9225_v48 = vadd.f32 %v6845_v37, %v1167_v2  ;;  %v1170_v58 = vadd.f32 %v6808_v49, %v9104_v33  ;;  %4101 = vmatmul.mubr.bf16.gmra.mrb[116].mxu0 %v7983_v59  ;;  %v7987_v33 = vld [vmem:[%s9843_s1 + $0x810] sm:$0xff]   ;;  %4173 = vmatprep.mubr.bf16.mxu1 %v7995_v12  ;;  %v8006_v47 = vld [vmem:[%s9843_s1 + $0x8a8] sm:$0xff]  }
 0x131   : > { %7340 = vmatpush3.bf16.msra.mxu0 %v7987_v33  ;;  %7380 = vmatpush3.bf16.msra.mxu1 %v7988_v38  ;;  %v8007_v49 = vld [vmem:[%s8258_s26 + $0x124] ss:$16 sps:$4 sm:$0xff]   ;;  %v8012_v59 = vld [vmem:[%s8258_s26 + $0x128] ss:$16 sps:$4 sm:$0xff]  }
 0x132   : > { %v9235_v24 = vadd.f32 %v6848_v55, %v1170_v58  ;;  %v6809_v27 = vpop.f32.mrb[28].mxu0  ;;  %7341 = vmatprep.subr.bf16.mxu0 %v7989_v3  ;;  %7381 = vmatprep.subr.bf16.mxu1 %v7990_v50  ;;  %v8011_v58 = vld [vmem:[%s8258_s26 + $0x120] ss:$16 sps:$4 sm:$0xff]   ;;  %v8023_v12 = vld [vmem:[%s8258_s26 + $0x164] ss:$16 sps:$4 sm:$0xff]  }
 0x133   : > { %v6849_v34 = vpop.f32.mrb[28].mxu1  ;;  %v6810_v56 = vpop.f32.mrb[29].mxu0  ;;  %v8015_v33 = vld [vmem:[%s9843_s1 + $0x830] sm:$0xff]  }
 0x134   : > { %v6811_v42 = vadd.f32 %v6810_v56, %v6809_v27  ;;  %v6850_v1 = vpop.f32.mrb[29].mxu1  ;;  %v6812_v9 = vpop.f32.mrb[30].mxu0  ;;  %v8014_v27 = vld [vmem:[%s9843_s1 + $0x8f0] sm:$0xff]  }
 0x135   : > { %v6851_v8 = vadd.f32 %v6850_v1, %v6849_v34  ;;  %v6852_v53 = vpop.f32.mrb[30].mxu1  ;;  %v6813_v10 = vpop.f32.mrb[31].mxu0  ;;  %7342 = vmatpush3.bf16.msra.mxu0 %v7991_v60  ;;  %7382 = vmatpush3.bf16.msra.mxu1 %v7992_v11  ;;  %v8017_v1 = vld [vmem:[%s9843_s1 + $0x878] sm:$0xff]  }
 0x136   : > { %v1175_v36 = vadd.f32 %v6811_v42, %v9126_v7  ;;  %v6814_v4 = vadd.f32 %v6813_v10, %v6812_v9  ;;  %v6853_v54 = vpop.f32.mrb[31].mxu1  ;;  %v7993_v7 = vld [vmem:[%s8258_s26 + $0x104] ss:$16 sps:$4 sm:$0xff]   ;;  %7343 = vmatprep.subr.bf16.mxu0 %v7999_v20  ;;  %7383 = vmatprep.subr.bf16.mxu1 %v8000_v22  ;;  %v8018_v9 = vld [vmem:[%s9843_s1 + $0x8f8] sm:$0xff]  }
 0x137   : > { %v6854_v6 = vadd.f32 %v6853_v54, %v6852_v53  ;;  %4108 = vmatprep.mubr.bf16.mxu0 %v7993_v7  ;;  %4174 = vmatmul.mubr.bf16.gmra.mrb[120].mxu1 %v7998_v5  ;;  %v8019_v53 = vld [vmem:[%s9843_s1 + $0x838] sm:$0xff]   ;;  %v8021_v54 = vld [vmem:[%s8258_s26 + $0x160] ss:$16 sps:$4 sm:$0xff]  }
 0x138   : > { %v9259_v51 = vadd.f32 %v6851_v8, %v1175_v36  ;;  %v1178_v16 = vadd.f32 %v6814_v4, %v9136_v26  ;;  %4109 = vmatmul.mubr.bf16.gmra.mrb[120].mxu0 %v7997_v13  ;;  %v8001_v26 = vld [vmem:[%s9843_s1 + $0x820] sm:$0xff]   ;;  %4181 = vmatprep.mubr.bf16.mxu1 %v8009_v57  ;;  %v8020_v11 = vld [vmem:[%s9843_s1 + $0x8b8] sm:$0xff]  }
 0x139   : > { %7344 = vmatpush3.bf16.msra.mxu0 %v8001_v26  ;;  %7384 = vmatpush3.bf16.msra.mxu1 %v8002_v0  ;;  %v8026_v5 = vld [vmem:[%s8258_s26 + $0x16c] ss:$16 sps:$4 sm:$0xff]  }
 0x13a   : > { %v6871_v15 = vpop.f32.mrb[32].mxu0  ;;  %v9269_v29 = vadd.f32 %v6854_v6, %v1178_v16  ;;  %7345 = vmatprep.subr.bf16.mxu0 %v8003_v31  ;;  %7385 = vmatprep.subr.bf16.mxu1 %v8004_v39 }
 0x13b   : > { %v6911_v18 = vpop.f32.mrb[32].mxu1  ;;  %v6872_v21 = vpop.f32.mrb[33].mxu0  ;;  %4116 = vmatprep.mubr.bf16.mxu0 %v8007_v49 }
 0x13c   : > { %v6873_v41 = vadd.f32 %v6872_v21, %v6871_v15  ;;  %v6912_v44 = vpop.f32.mrb[33].mxu1  ;;  %v6874_v28 = vpop.f32.mrb[34].mxu0 }
 0x13d   : > { %v6913_v23 = vadd.f32 %v6912_v44, %v6911_v18  ;;  %v6914_v30 = vpop.f32.mrb[34].mxu1  ;;  %v6875_v37 = vpop.f32.mrb[35].mxu0  ;;  %7346 = vmatpush3.bf16.msra.mxu0 %v8005_v43  ;;  %7386 = vmatpush3.bf16.msra.mxu1 %v8006_v47  ;;  %v8024_v18 = vld [vmem:[%s8258_s26 + $0x168] ss:$16 sps:$4 sm:$0xff]   ;;  %v8035_v47 = vld [vmem:[%s8258_s26 + $0x1ac] ss:$16 sps:$4 sm:$0xff]  }
 0x13e   : > { %v6876_v40 = vadd.f32 %v6875_v37, %v6874_v28  ;;  %v6915_v2 = vpop.f32.mrb[35].mxu1  ;;  %7387 = vmatprep.subr.bf16.mxu1 %v8014_v27  ;;  %v8032_v37 = vld [vmem:[%s8258_s26 + $0x188] ss:$16 sps:$4 sm:$0xff]  }
 0x13f   : > { %v1700_v35 = vadd.f32 %v6913_v23, %v6873_v41  ;;  %v6916_v46 = vadd.f32 %v6915_v2, %v6914_v30  ;;  %4182 = vmatmul.mubr.bf16.gmra.mrb[124].mxu1 %v8012_v59  ;;  %v8027_v41 = vld [vmem:[%s8258_s26 + $0x184] ss:$16 sps:$4 sm:$0xff]   ;;  %v8029_v23 = vld [vmem:[%s8258_s26 + $0x18c] ss:$16 sps:$4 sm:$0xff]   ;;  %v8038_v27 = vld [vmem:[%s8258_s26 + $0x1a8] ss:$16 sps:$4 sm:$0xff]  }
 0x140   : > { %4117 = vmatmul.mubr.bf16.gmra.mrb[124].mxu0 %v8011_v58  ;;  %4649 = vmatprep.mubr.bf16.mxu1 %v8026_v5  ;;  %v8033_v2 = vld [vmem:[%s8258_s26 + $0x1a4] ss:$16 sps:$4 sm:$0xff]  }
 0x141   : > { %v9290_v45 = vadd.f32 %v1700_v35, %v9161_v17  ;;  %v1703_v52 = vadd.f32 %v6916_v46, %v6876_v40  ;;  %v8013_v17 = vld [vmem:[%s9843_s1 + $0x870] sm:$0xff]   ;;  %4584 = vmatprep.mubr.bf16.mxu0 %v8023_v12 }
 0x142   : > { %v6877_v32 = vpop.f32.mrb[36].mxu0  ;;  %7347 = vmatprep.subr.bf16.mxu0 %v8013_v17  ;;  %v8031_v35 = vld [vmem:[%s8258_s26 + $0x180] ss:$16 sps:$4 sm:$0xff]  }
 0x143   : > { %v6917_v55 = vpop.f32.mrb[36].mxu1  ;;  %v9303_v61 = vadd.f32 %v1703_v52, %v9173_v63  ;;  %v6878_v62 = vpop.f32.mrb[37].mxu0  ;;  %v8016_v63 = vld [vmem:[%s9843_s1 + $0x8b0] sm:$0xff]   ;;  %7348 = vmatpush3.bf16.msra.mxu0 %v8015_v33 }
 0x144   : > { %v6879_v19 = vadd.f32 %v6878_v62, %v6877_v32  ;;  %v6918_v34 = vpop.f32.mrb[37].mxu1  ;;  %v6880_v38 = vpop.f32.mrb[38].mxu0  ;;  %7388 = vmatpush3.bf16.msra.mxu1 %v8016_v63  ;;  %7349 = vmatprep.subr.bf16.mxu0 %v8017_v1  ;;  %v8037_v62 = vld [vmem:[%s8258_s26 + $0x1a0] ss:$16 sps:$4 sm:$0xff]  }
 0x145   : > { %v6919_v56 = vadd.f32 %v6918_v34, %v6917_v55  ;;  %v6920_v42 = vpop.f32.mrb[38].mxu1  ;;  %v6881_v8 = vpop.f32.mrb[39].mxu0  ;;  %7389 = vmatprep.subr.bf16.mxu1 %v8018_v9 }
 0x146   : > { %v6882_v50 = vadd.f32 %v6881_v8, %v6880_v38  ;;  %v6921_v36 = vpop.f32.mrb[39].mxu1 }
 0x147   : > { %v1708_v3 = vadd.f32 %v6919_v56, %v6879_v19  ;;  %v6922_v10 = vadd.f32 %v6921_v36, %v6920_v42  ;;  %7350 = vmatpush3.bf16.msra.mxu0 %v8019_v53  ;;  %v8039_v19 = vld [vmem:[%s8258_s26 + $0x1c4] ss:$16 sps:$4 sm:$0xff]   ;;  %v8041_v56 = vld [vmem:[%s8258_s26 + $0x1cc] ss:$16 sps:$4 sm:$0xff]  }
 0x148   : > { %7390 = vmatpush3.bf16.msra.mxu1 %v8020_v11  ;;  %v8043_v11 = vld [vmem:[%s8258_s26 + $0x1c0] ss:$16 sps:$4 sm:$0xff]  }
 0x149   : > { %v9324_v60 = vadd.f32 %v1708_v3, %v9193_v14  ;;  %v1711_v7 = vadd.f32 %v6922_v10, %v6882_v50 }
 0x14a   : > { %v6883_v4 = vpop.f32.mrb[40].mxu0  ;;  %4585 = vmatmul.mubr.bf16.vlgmr.msra.gmra.mrb[128].mxu0 %v8021_v54  ;;  %v8044_v54 = vld [vmem:[%s8258_s26 + $0x1c8] ss:$16 sps:$4 sm:$0xff]   ;;  %s6694_s26 = sshll.u32 %s9851_s25, 8 }
 0x14b   : > { %v6923_v6 = vpop.f32.mrb[40].mxu1  ;;  %v6884_v15 = vpop.f32.mrb[41].mxu0  ;;  %v9334_v20 = vadd.f32 %v1711_v7, %v9207_v25  ;;  %4650 = vmatmul.mubr.bf16.vlgmr.msra.gmra.mrb[128].mxu1 %v8024_v18  ;;  %4592 = vmatprep.mubr.bf16.mxu0 %v8027_v41  ;;  %s9773_s27 = scalar_lea.vmem %s9849_s7, %s6694_s26 }
 0x14c   : > { %v6885_v13 = vadd.f32 %v6884_v15, %v6883_v4  ;;  %v6924_v14 = vpop.f32.mrb[41].mxu1  ;;  %v6886_v16 = vpop.f32.mrb[42].mxu0  ;;  %4657 = vmatprep.mubr.bf16.mxu1 %v8029_v23 }
 0x14d   : > { %v6925_v21 = vadd.f32 %v6924_v14, %v6923_v6  ;;  %v6926_v22 = vpop.f32.mrb[42].mxu1  ;;  %v6887_v44 = vpop.f32.mrb[43].mxu0 }
 0x14e   : > { %v6927_v26 = vpop.f32.mrb[43].mxu1  ;;  %v6888_v0 = vadd.f32 %v6887_v44, %v6886_v16 }
 0x14f   : > { %v1716_v28 = vadd.f32 %v6925_v21, %v6885_v13  ;;  %v6928_v30 = vadd.f32 %v6927_v26, %v6926_v22 }
 0x151   : > { %v9339_v25 = vadd.f32 %v1716_v28, %v9225_v48  ;;  %v1719_v31 = vadd.f32 %v6928_v30, %v6888_v0 }
 0x152   : > { %v6889_v40 = vpop.f32.mrb[44].mxu0  ;;  %4593 = vmatmul.mubr.bf16.gmra.mrb[132].mxu0 %v8031_v35 }
 0x153   : > { %v9344_v39 = vadd.f32 %v1719_v31, %v9235_v24  ;;  %v6929_v43 = vpop.f32.mrb[44].mxu1  ;;  %v6890_v46 = vpop.f32.mrb[45].mxu0  ;;  %4658 = vmatmul.mubr.bf16.gmra.mrb[132].mxu1 %v8032_v37  ;;  %4600 = vmatprep.mubr.bf16.mxu0 %v8033_v2 }
 0x154   : > { %v6891_v49 = vadd.f32 %v6890_v46, %v6889_v40  ;;  %v6930_v52 = vpop.f32.mrb[45].mxu1  ;;  %v6892_v32 = vpop.f32.mrb[46].mxu0  ;;  %4665 = vmatprep.mubr.bf16.mxu1 %v8035_v47 }
 0x155   : > { %v6931_v55 = vadd.f32 %v6930_v52, %v6929_v43  ;;  %v6932_v48 = vpop.f32.mrb[46].mxu1  ;;  %v6893_v57 = vpop.f32.mrb[47].mxu0 }
 0x156   : > { %v6894_v58 = vadd.f32 %v6893_v57, %v6892_v32  ;;  %v6933_v59 = vpop.f32.mrb[47].mxu1 }
 0x157   : > { %v1724_v24 = vadd.f32 %v6931_v55, %v6891_v49  ;;  %v6934_v17 = vadd.f32 %v6933_v59, %v6932_v48 }
 0x159   : > { %v9352_v34 = vadd.f32 %v1724_v24, %v9259_v51  ;;  %v1727_v33 = vadd.f32 %v6934_v17, %v6894_v58 }
 0x15a   : > { %v6951_v63 = vpop.f32.mrb[48].mxu0  ;;  %4601 = vmatmul.mubr.bf16.gmra.mrb[136].mxu0 %v8037_v62 }
 0x15b   : > { %v9356_v38 = vadd.f32 %v1727_v33, %v9269_v29  ;;  %v6991_v42 = vpop.f32.mrb[48].mxu1  ;;  %v6952_v1 = vpop.f32.mrb[49].mxu0  ;;  %4666 = vmatmul.mubr.bf16.gmra.mrb[136].mxu1 %v8038_v27  ;;  %4608 = vmatprep.mubr.bf16.mxu0 %v8039_v19 }
 0x15c   : > { %v6953_v3 = vadd.f32 %v6952_v1, %v6951_v63  ;;  %v6992_v8 = vpop.f32.mrb[49].mxu1  ;;  %v6954_v9 = vpop.f32.mrb[50].mxu0  ;;  %4673 = vmatprep.mubr.bf16.mxu1 %v8041_v56 }
 0x15d   : > { %v6993_v50 = vadd.f32 %v6992_v8, %v6991_v42  ;;  %v6994_v36 = vpop.f32.mrb[50].mxu1  ;;  %v6955_v53 = vpop.f32.mrb[51].mxu0 }
 0x15e   : > { %v6956_v51 = vadd.f32 %v6955_v53, %v6954_v9  ;;  %v6995_v10 = vpop.f32.mrb[51].mxu1 }
 0x15f   : > { %v2192_v29 = vadd.f32 %v6993_v50, %v6953_v3  ;;  %v6996_v4 = vadd.f32 %v6995_v10, %v6994_v36 }
 0x161   : > { %v9361_v7 = vadd.f32 %v2192_v29, %v9290_v45  ;;  %v2195_v6 = vadd.f32 %v6996_v4, %v6956_v51 }
 0x162   : > { %v6957_v15 = vpop.f32.mrb[52].mxu0  ;;  %4609 = vmatmul.mubr.bf16.gmra.mrb[140].mxu0 %v8043_v11 }
 0x163   : > { %v9364_v12 = vadd.f32 %v2195_v6, %v9303_v61  ;;  %v6997_v13 = vpop.f32.mrb[52].mxu1  ;;  %v6958_v14 = vpop.f32.mrb[53].mxu0  ;;  %4674 = vmatmul.mubr.bf16.gmra.mrb[140].mxu1 %v8044_v54 }
 0x164   : > { %v6959_v16 = vadd.f32 %v6958_v14, %v6957_v15  ;;  %v6998_v18 = vpop.f32.mrb[53].mxu1  ;;  %v6960_v5 = vpop.f32.mrb[54].mxu0 }
 0x165   : > { %v6999_v21 = vadd.f32 %v6998_v18, %v6997_v13  ;;  %v7000_v22 = vpop.f32.mrb[54].mxu1  ;;  %v6961_v41 = vpop.f32.mrb[55].mxu0 }
 0x166   : > { %v6962_v44 = vadd.f32 %v6961_v41, %v6960_v5  ;;  %v7001_v26 = vpop.f32.mrb[55].mxu1 }
 0x167   : > { %v2200_v23 = vadd.f32 %v6999_v21, %v6959_v16  ;;  %v7002_v45 = vadd.f32 %v7001_v26, %v7000_v22 }
 0x169   : > { %v9367_v28 = vadd.f32 %v2200_v23, %v9324_v60  ;;  %v2203_v0 = vadd.f32 %v7002_v45, %v6962_v44 }
 0x16a   : > { %v6963_v61 = vpop.f32.mrb[56].mxu0 }
 0x16b   : > { %v9370_v30 = vadd.f32 %v2203_v0, %v9334_v20  ;;  %v7003_v31 = vpop.f32.mrb[56].mxu1  ;;  %v6964_v35 = vpop.f32.mrb[57].mxu0 }
 0x16c   : > { %v6965_v37 = vadd.f32 %v6964_v35, %v6963_v61  ;;  %v7004_v40 = vpop.f32.mrb[57].mxu1  ;;  %v6966_v2 = vpop.f32.mrb[58].mxu0 }
 0x16d   : > { %v7005_v43 = vadd.f32 %v7004_v40, %v7003_v31  ;;  %v7006_v46 = vpop.f32.mrb[58].mxu1  ;;  %v6967_v47 = vpop.f32.mrb[59].mxu0  ;;  %v8048_v31 = vld [vmem:[%s9845_s3 + $0x8] ss:$16 sps:$4 sm:$0xff]   ;;  %v8050_v40 = vld [vmem:[%s9845_s3 + $0xc] ss:$16 sps:$4 sm:$0xff]  }
 0x16e   : > { %v6968_v49 = vadd.f32 %v6967_v47, %v6966_v2  ;;  %v7007_v52 = vpop.f32.mrb[59].mxu1  ;;  %5004 = vmatprep.subr.bf16.mxu1 %v8050_v40 }
 0x16f   : > { %v2208_v32 = vadd.f32 %v7005_v43, %v6965_v37  ;;  %v7008_v55 = vadd.f32 %v7007_v52, %v7006_v46  ;;  %5005 = vmatpush1.bf16.msra.mxu1 %v8048_v31 }
 0x171   : > { %v9373_v60 = vadd.f32 %v2208_v32, %v9339_v25  ;;  %v2211_v48 = vadd.f32 %v7008_v55, %v6968_v49 }
 0x172   : > { %v6969_v57 = vpop.f32.mrb[60].mxu0 }
 0x173   : > { %v9376_v20 = vadd.f32 %v2211_v48, %v9344_v39  ;;  %v7009_v58 = vpop.f32.mrb[60].mxu1  ;;  %v6970_v59 = vpop.f32.mrb[61].mxu0 }
 0x174   : > { %v6971_v24 = vadd.f32 %v6970_v59, %v6969_v57  ;;  %v7010_v17 = vpop.f32.mrb[61].mxu1  ;;  %v6972_v62 = vpop.f32.mrb[62].mxu0  ;;  %v8051_v57 = vld [vmem:[%s9845_s3 + $0x20] ss:$16 sps:$4 sm:$0xff]  }
 0x175   : > { %v7011_v27 = vadd.f32 %v7010_v17, %v7009_v58  ;;  %v7012_v19 = vpop.f32.mrb[62].mxu1  ;;  %v6973_v33 = vpop.f32.mrb[63].mxu0  ;;  %v8056_v17 = vld [vmem:[%s9845_s3 + $0x2c] ss:$16 sps:$4 sm:$0xff]  }
 0x176   : > { %v6974_v56 = vadd.f32 %v6973_v33, %v6972_v62  ;;  %v7013_v63 = vpop.f32.mrb[63].mxu1  ;;  %5006 = vmatprep.subr.bf16.mxu1 %v8056_v17  ;;  %v8059_v33 = vld [vmem:[%s9845_s3 + $0x44] ss:$16 sps:$4 sm:$0xff]   ;;  %v8090_v17 = vld [vmem:[%s9845_s3 + $0xe8] ss:$16 sps:$4 sm:$0xff]  }
 0x177   : > { %v2216_v42 = vadd.f32 %v7011_v27, %v6971_v24  ;;  %v7014_v1 = vadd.f32 %v7013_v63, %v7012_v19  ;;  %v8054_v24 = vld [vmem:[%s9845_s3 + $0x28] ss:$16 sps:$4 sm:$0xff]   ;;  %v8057_v19 = vld [vmem:[%s9845_s3 + $0x40] ss:$16 sps:$4 sm:$0xff]  }
 0x178   : > { %5007 = vmatpush1.bf16.msra.mxu1 %v8054_v24  ;;  %v8087_v24 = vld [vmem:[%s9845_s3 + $0xe0] ss:$16 sps:$4 sm:$0xff]  }
 0x179   : > { %v9379_v25 = vadd.f32 %v2216_v42, %v9352_v34  ;;  %v2219_v3 = vadd.f32 %v7014_v1, %v6974_v56  ;;  %v8060_v42 = vld [vmem:[%s9845_s3 + $0x48] ss:$16 sps:$4 sm:$0xff]   ;;  %v8062_v1 = vld [vmem:[%s9845_s3 + $0x4c] ss:$16 sps:$4 sm:$0xff]  }
 0x17a   : > { %v7031_v39 = vpop.f32.mrb[64].mxu0  ;;  %5008 = vmatprep.subr.bf16.mxu1 %v8062_v1  ;;  %v8109_v1 = vmov 0  }
 0x17b   : > { %v9382_v8 = vadd.f32 %v2219_v3, %v9356_v38  ;;  %v7071_v9 = vpop.f32.mrb[64].mxu1  ;;  %v7032_v50 = vpop.f32.mrb[65].mxu0  ;;  %4963 = vmatprep.mubr.bf16.mxu0 %v8109_v1  ;;  %5036 = vmatprep.mubr.bf16.mxu1 %v8109_v1 }
 0x17c   : > { %v7033_v36 = vadd.f32 %v7032_v50, %v7031_v39  ;;  %v7072_v53 = vpop.f32.mrb[65].mxu1  ;;  %v7034_v51 = vpop.f32.mrb[66].mxu0  ;;  %5009 = vmatpush1.bf16.msra.mxu1 %v8060_v42 }
 0x17d   : > { %v7073_v10 = vadd.f32 %v7072_v53, %v7071_v9  ;;  %v7074_v11 = vpop.f32.mrb[66].mxu1  ;;  %v7035_v29 = vpop.f32.mrb[67].mxu0  ;;  %v8068_v9 = vld [vmem:[%s9845_s3 + $0x6c] ss:$16 sps:$4 sm:$0xff]   ;;  %v8063_v53 = vld [vmem:[%s9845_s3 + $0x60] ss:$16 sps:$4 sm:$0xff]  }
 0x17e   : > { %v7036_v4 = vadd.f32 %v7035_v29, %v7034_v51  ;;  %v7075_v54 = vpop.f32.mrb[67].mxu1  ;;  %5010 = vmatprep.subr.bf16.mxu1 %v8068_v9 }
 0x17f   : > { %v2684_v6 = vadd.f32 %v7073_v10, %v7033_v36  ;;  %v7076_v15 = vadd.f32 %v7075_v54, %v7074_v11 }
 0x181   : > { %v9385_v34 = vadd.f32 %v2684_v6, %v9361_v7  ;;  %v2687_v13 = vadd.f32 %v7076_v15, %v7036_v4  ;;  %v8045_v7 = vld [vmem:[%s9845_s3] ss:$16 sps:$4 sm:$0xff]  }
 0x182   : > { %v7037_v14 = vpop.f32.mrb[68].mxu0 }
 0x183   : > { %v9388_v38 = vadd.f32 %v2687_v13, %v9364_v12  ;;  %v7077_v16 = vpop.f32.mrb[68].mxu1  ;;  %v7038_v18 = vpop.f32.mrb[69].mxu0  ;;  %v8047_v12 = vld [vmem:[%s9845_s3 + $0x4] ss:$16 sps:$4 sm:$0xff]  }
 0x184   : > { %v7078_v5 = vpop.f32.mrb[69].mxu1  ;;  %v7039_v21 = vadd.f32 %v7038_v18, %v7037_v14  ;;  %v7040_v41 = vpop.f32.mrb[70].mxu0  ;;  %4931 = vmatprep.subr.bf16.mxu0 %v8047_v12  ;;  %v8071_v13 = vld [vmem:[%s9845_s3 + $0x84] ss:$16 sps:$4 sm:$0xff]   ;;  %v8074_v14 = vld [vmem:[%s9845_s3 + $0x8c] ss:$16 sps:$4 sm:$0xff]  }
 0x185   : > { %v7079_v22 = vadd.f32 %v7078_v5, %v7077_v16  ;;  %v7080_v44 = vpop.f32.mrb[70].mxu1  ;;  %v7041_v26 = vpop.f32.mrb[71].mxu0  ;;  %4932 = vmatpush1.bf16.msra.mxu0 %v8045_v7  ;;  %v8069_v5 = vld [vmem:[%s9845_s3 + $0x80] ss:$16 sps:$4 sm:$0xff]  }
 0x186   : > { %v7081_v23 = vpop.f32.mrb[71].mxu1  ;;  %v7042_v0 = vadd.f32 %v7041_v26, %v7040_v41  ;;  %v8080_v26 = vld [vmem:[%s9845_s3 + $0xac] ss:$16 sps:$4 sm:$0xff]  }
 0x187   : > { %v2692_v45 = vadd.f32 %v7079_v22, %v7039_v21  ;;  %v7082_v61 = vadd.f32 %v7081_v23, %v7080_v44  ;;  %v8072_v21 = vld [vmem:[%s9845_s3 + $0x88] ss:$16 sps:$4 sm:$0xff]   ;;  %v8077_v44 = vld [vmem:[%s9845_s3 + $0xa4] ss:$16 sps:$4 sm:$0xff]  }
 0x189   : > { %v9400_v35 = vadd.f32 %v2692_v45, %v9367_v28  ;;  %v2695_v37 = vadd.f32 %v7082_v61, %v7042_v0  ;;  %v8075_v45 = vld [vmem:[%s9845_s3 + $0xa0] ss:$16 sps:$4 sm:$0xff]  }
 0x18a   : > { %v7043_v43 = vpop.f32.mrb[72].mxu0 }
 0x18b   : > { %v9406_v2 = vadd.f32 %v2695_v37, %v9370_v30  ;;  %v7083_v46 = vpop.f32.mrb[72].mxu1  ;;  %v7044_v47 = vpop.f32.mrb[73].mxu0  ;;  %v8053_v30 = vld [vmem:[%s9845_s3 + $0x24] ss:$16 sps:$4 sm:$0xff]  }
 0x18c   : > { %v7045_v49 = vadd.f32 %v7044_v47, %v7043_v43  ;;  %v7084_v52 = vpop.f32.mrb[73].mxu1  ;;  %v7046_v32 = vpop.f32.mrb[74].mxu0  ;;  %4933 = vmatprep.subr.bf16.mxu0 %v8053_v30  ;;  %v8084_v47 = vld [vmem:[%s9845_s3 + $0xc8] ss:$16 sps:$4 sm:$0xff]   ;;  %v8092_v30 = vld [vmem:[%s9845_s3 + $0xec] ss:$16 sps:$4 sm:$0xff]  }
 0x18d   : > { %v7085_v28 = vadd.f32 %v7084_v52, %v7083_v46  ;;  %v7086_v55 = vpop.f32.mrb[74].mxu1  ;;  %v7047_v48 = vpop.f32.mrb[75].mxu0  ;;  %4934 = vmatpush1.bf16.msra.mxu0 %v8051_v57  ;;  %v8081_v46 = vld [vmem:[%s9845_s3 + $0xc0] ss:$16 sps:$4 sm:$0xff]   ;;  %v8089_v57 = vld [vmem:[%s9845_s3 + $0xe4] ss:$16 sps:$4 sm:$0xff]  }
 0x18e   : > { %v7048_v58 = vadd.f32 %v7047_v48, %v7046_v32  ;;  %v7087_v59 = vpop.f32.mrb[75].mxu1  ;;  %4935 = vmatprep.subr.bf16.mxu0 %v8059_v33  ;;  %v8086_v32 = vld [vmem:[%s9845_s3 + $0xcc] ss:$16 sps:$4 sm:$0xff]  }
 0x18f   : > { %v2700_v62 = vadd.f32 %v7085_v28, %v7045_v49  ;;  %v7088_v27 = vadd.f32 %v7087_v59, %v7086_v55 }
 0x191   : > { %v9427_v56 = vadd.f32 %v2700_v62, %v9373_v60  ;;  %v2703_v63 = vadd.f32 %v7088_v27, %v7048_v58  ;;  %4936 = vmatpush1.bf16.msra.mxu0 %v8057_v19  ;;  %v8065_v60 = vld [vmem:[%s9845_s3 + $0x64] ss:$16 sps:$4 sm:$0xff]  }
 0x192   : > { %v7049_v39 = vpop.f32.mrb[76].mxu0  ;;  %4937 = vmatprep.subr.bf16.mxu0 %v8065_v60 }
 0x193   : > { %v9436_v3 = vadd.f32 %v2703_v63, %v9376_v20  ;;  %v7089_v50 = vpop.f32.mrb[76].mxu1  ;;  %v7050_v36 = vpop.f32.mrb[77].mxu0  ;;  %v8066_v20 = vld [vmem:[%s9845_s3 + $0x68] ss:$16 sps:$4 sm:$0xff]  }
 0x194   : > { %v7051_v51 = vadd.f32 %v7050_v36, %v7049_v39  ;;  %v7090_v10 = vpop.f32.mrb[77].mxu1  ;;  %v7052_v11 = vpop.f32.mrb[78].mxu0  ;;  %5011 = vmatpush1.bf16.msra.mxu1 %v8066_v20 }
 0x195   : > { %v7091_v29 = vadd.f32 %v7090_v10, %v7089_v50  ;;  %v7092_v4 = vpop.f32.mrb[78].mxu1  ;;  %v7053_v54 = vpop.f32.mrb[79].mxu0  ;;  %4938 = vmatpush1.bf16.msra.mxu0 %v8063_v53  ;;  %5012 = vmatprep.subr.bf16.mxu1 %v8074_v14 }
 0x196   : > { %v7054_v6 = vadd.f32 %v7053_v54, %v7052_v11  ;;  %v7093_v15 = vpop.f32.mrb[79].mxu1  ;;  %4939 = vmatprep.subr.bf16.mxu0 %v8071_v13 }
 0x197   : > { %v2708_v16 = vadd.f32 %v7091_v29, %v7051_v51  ;;  %v7094_v18 = vadd.f32 %v7093_v15, %v7092_v4 }
 0x198   : > { %5013 = vmatpush1.bf16.msra.mxu1 %v8072_v21 }
 0x199   : > { %v9463_v22 = vadd.f32 %v2708_v16, %v9379_v25  ;;  %v2711_v41 = vadd.f32 %v7094_v18, %v7054_v6  ;;  %4940 = vmatpush1.bf16.msra.mxu0 %v8069_v5  ;;  %v8078_v25 = vld [vmem:[%s9845_s3 + $0xa8] ss:$16 sps:$4 sm:$0xff]   ;;  %5014 = vmatprep.subr.bf16.mxu1 %v8080_v26 }
 0x19a   : > { %4941 = vmatprep.subr.bf16.mxu0 %v8077_v44  ;;  %v7111_v0 = vpop.f32.mrb[80].mxu0 }
 0x19b   : > { %v9472_v23 = vadd.f32 %v2711_v41, %v9382_v8  ;;  %v7151_v61 = vpop.f32.mrb[80].mxu1  ;;  %v7112_v7 = vpop.f32.mrb[81].mxu0  ;;  %v8083_v8 = vld [vmem:[%s9845_s3 + $0xc4] ss:$16 sps:$4 sm:$0xff]  }
 0x19c   : > { %v7152_v12 = vpop.f32.mrb[81].mxu1  ;;  %5015 = vmatpush1.bf16.msra.mxu1 %v8078_v25  ;;  %v7113_v31 = vadd.f32 %v7112_v7, %v7111_v0  ;;  %v7114_v40 = vpop.f32.mrb[82].mxu0 }
 0x19d   : > { %4942 = vmatpush1.bf16.msra.mxu0 %v8075_v45  ;;  %v7153_v37 = vadd.f32 %v7152_v12, %v7151_v61  ;;  %v7154_v43 = vpop.f32.mrb[82].mxu1  ;;  %v7115_v49 = vpop.f32.mrb[83].mxu0  ;;  %5016 = vmatprep.subr.bf16.mxu1 %v8086_v32 }
 0x19e   : > { %v7155_v52 = vpop.f32.mrb[83].mxu1  ;;  %4943 = vmatprep.subr.bf16.mxu0 %v8083_v8  ;;  %v7116_v55 = vadd.f32 %v7115_v49, %v7114_v40  ;;  %v9533_v49 = vld [vmem:[%s9847_s5] sm:$0xff]  }
 0x19f   : > { %v3176_v28 = vadd.f32 %v7153_v37, %v7113_v31  ;;  %v7156_v48 = vadd.f32 %v7155_v52, %v7154_v43 }
 0x1a0   : > { %5017 = vmatpush1.bf16.msra.mxu1 %v8084_v47 }
 0x1a1   : > { %4944 = vmatpush1.bf16.msra.mxu0 %v8081_v46  ;;  %v9499_v58 = vadd.f32 %v3176_v28, %v9385_v34  ;;  %v3179_v59 = vadd.f32 %v7156_v48, %v7116_v55  ;;  %5018 = vmatprep.subr.bf16.mxu1 %v8092_v30 }
 0x1a2   : > { %4945 = vmatprep.subr.bf16.mxu0 %v8089_v57  ;;  %v7117_v27 = vpop.f32.mrb[84].mxu0 }
 0x1a3   : > { %v9508_v62 = vadd.f32 %v3179_v59, %v9388_v38  ;;  %v7157_v19 = vpop.f32.mrb[84].mxu1  ;;  %v7118_v34 = vpop.f32.mrb[85].mxu0 }
 0x1a4   : > { %v7119_v33 = vadd.f32 %v7118_v34, %v7117_v27  ;;  %v7158_v63 = vpop.f32.mrb[85].mxu1  ;;  %v7120_v42 = vpop.f32.mrb[86].mxu0  ;;  %5019 = vmatpush1.bf16.msra.mxu1 %v8090_v17 }
 0x1a5   : > { %4946 = vmatpush1.bf16.msra.mxu0 %v8087_v24  ;;  %v7159_v39 = vadd.f32 %v7158_v63, %v7157_v19  ;;  %v7160_v60 = vpop.f32.mrb[86].mxu1  ;;  %v7121_v9 = vpop.f32.mrb[87].mxu0  ;;  %7487 = vmatprep.subr.bf16.mxu1 %v9533_v49 }
 0x1a6   : > { %v7122_v50 = vadd.f32 %v7121_v9, %v7120_v42  ;;  %v7161_v36 = vpop.f32.mrb[87].mxu1  ;;  %7463 = vmatprep.subr.bf16.mxu0 %v9533_v49 }
 0x1a7   : > { %v3184_v38 = vadd.f32 %v7159_v39, %v7119_v33  ;;  %v7162_v53 = vadd.f32 %v7161_v36, %v7160_v60 }
 0x1a9   : > { %v9513_v20 = vadd.f32 %v3184_v38, %v9400_v35  ;;  %v3187_v51 = vadd.f32 %v7162_v53, %v7122_v50 }
 0x1aa   : > { %v7123_v11 = vpop.f32.mrb[88].mxu0 }
 0x1ab   : > { %v9516_v10 = vadd.f32 %v3187_v51, %v9406_v2  ;;  %v7163_v29 = vpop.f32.mrb[88].mxu1  ;;  %v7124_v4 = vpop.f32.mrb[89].mxu0 }
 0x1ac   : > { %v7164_v54 = vpop.f32.mrb[89].mxu1  ;;  %v7125_v6 = vadd.f32 %v7124_v4, %v7123_v11  ;;  %v7126_v13 = vpop.f32.mrb[90].mxu0 }
 0x1ad   : > { %v7165_v15 = vadd.f32 %v7164_v54, %v7163_v29  ;;  %v7166_v14 = vpop.f32.mrb[90].mxu1  ;;  %v7127_v16 = vpop.f32.mrb[91].mxu0 }
 0x1ae   : > { %v7167_v18 = vpop.f32.mrb[91].mxu1  ;;  %v7128_v21 = vadd.f32 %v7127_v16, %v7126_v13 }
 0x1af   : > { %v3192_v5 = vadd.f32 %v7165_v15, %v7125_v6  ;;  %v7168_v41 = vadd.f32 %v7167_v18, %v7166_v14 }
 0x1b1   : > { %v9519_v35 = vadd.f32 %v3192_v5, %v9427_v56  ;;  %v3195_v44 = vadd.f32 %v7168_v41, %v7128_v21 }
 0x1b2   : > { %v7129_v26 = vpop.f32.mrb[92].mxu0 }
 0x1b3   : > { %v9522_v2 = vadd.f32 %v3195_v44, %v9436_v3  ;;  %v7169_v45 = vpop.f32.mrb[92].mxu1  ;;  %v7130_v25 = vpop.f32.mrb[93].mxu0 }
 0x1b4   : > { %v7170_v0 = vpop.f32.mrb[93].mxu1  ;;  %v7131_v61 = vadd.f32 %v7130_v25, %v7129_v26  ;;  %v7132_v12 = vpop.f32.mrb[94].mxu0 }
 0x1b5   : > { %v7171_v7 = vadd.f32 %v7170_v0, %v7169_v45  ;;  %v7172_v8 = vpop.f32.mrb[94].mxu1  ;;  %v7133_v31 = vpop.f32.mrb[95].mxu0 }
 0x1b6   : > { %v7173_v37 = vpop.f32.mrb[95].mxu1  ;;  %v7134_v43 = vadd.f32 %v7133_v31, %v7132_v12 }
 0x1b7   : > { %v3200_v40 = vadd.f32 %v7171_v7, %v7131_v61  ;;  %v7174_v46 = vadd.f32 %v7173_v37, %v7172_v8 }
 0x1b9   : > { %v9525_v56 = vadd.f32 %v3200_v40, %v9463_v22  ;;  %v3203_v47 = vadd.f32 %v7174_v46, %v7134_v43 }
 0x1ba   : > { %v7191_v52 = vpop.f32.mrb[96].mxu0 }
 0x1bb   : > { %v9528_v3 = vadd.f32 %v3203_v47, %v9472_v23  ;;  %v7192_v32 = vpop.f32.mrb[97].mxu0  ;;  %v7231_v28 = vpop.f32.mrb[96].mxu1 }
 0x1bc   : > { %v7193_v55 = vadd.f32 %v7192_v32, %v7191_v52  ;;  %v7194_v48 = vpop.f32.mrb[98].mxu0  ;;  %v7232_v22 = vpop.f32.mrb[97].mxu1 }
 0x1bd   : > { %v7195_v57 = vpop.f32.mrb[99].mxu0  ;;  %v7233_v30 = vadd.f32 %v7232_v22, %v7231_v28  ;;  %v7234_v59 = vpop.f32.mrb[98].mxu1 }
 0x1be   : > { %v7196_v23 = vadd.f32 %v7195_v57, %v7194_v48  ;;  %v7235_v24 = vpop.f32.mrb[99].mxu1 }
 0x1bf   : > { %v3668_v17 = vadd.f32 %v7233_v30, %v7193_v55  ;;  %v7236_v27 = vadd.f32 %v7235_v24, %v7234_v59 }
 0x1c1   : > { %v9538_v19 = vadd.f32 %v3668_v17, %v9499_v58  ;;  %v3671_v34 = vadd.f32 %v7236_v27, %v7196_v23 }
 0x1c3   : > { %v9541_v33 = vadd.f32 %v3671_v34, %v9508_v62 }
 0x1d1   : > { %v7237_v42 = vpop.f32.mrb[100].mxu1 }
 0x1d2   : > { %v7238_v9 = vpop.f32.mrb[101].mxu1 }
 0x1d3   : > { %v7197_v63 = vpop.f32.mrb[100].mxu0  ;;  %v7239_v36 = vadd.f32 %v7238_v9, %v7237_v42  ;;  %v7240_v38 = vpop.f32.mrb[102].mxu1 }
 0x1d4   : > { %v7198_v39 = vpop.f32.mrb[101].mxu0  ;;  %v7241_v11 = vpop.f32.mrb[103].mxu1 }
 0x1d5   : > { %v7199_v60 = vadd.f32 %v7198_v39, %v7197_v63  ;;  %v7200_v50 = vpop.f32.mrb[102].mxu0  ;;  %v7242_v4 = vadd.f32 %v7241_v11, %v7240_v38 }
 0x1d6   : > { %v7201_v53 = vpop.f32.mrb[103].mxu0 }
 0x1d7   : > { %v7202_v51 = vadd.f32 %v7201_v53, %v7200_v50  ;;  %v3676_v29 = vadd.f32 %v7239_v36, %v7199_v60 }
 0x1d9   : > { %v9544_v58 = vadd.f32 %v3676_v29, %v9513_v20  ;;  %v3679_v54 = vadd.f32 %v7242_v4, %v7202_v51 }
 0x1db   : > { %v9547_v62 = vadd.f32 %v3679_v54, %v9516_v10  ;;  %v7203_v6 = vpop.f32.mrb[104].mxu0  ;;  %v7243_v15 = vpop.f32.mrb[104].mxu1 }
 0x1dc   : > { %v7204_v13 = vpop.f32.mrb[105].mxu0  ;;  %v7244_v14 = vpop.f32.mrb[105].mxu1 }
 0x1dd   : > { %v7205_v16 = vadd.f32 %v7204_v13, %v7203_v6  ;;  %v7245_v18 = vadd.f32 %v7244_v14, %v7243_v15  ;;  %v7206_v5 = vpop.f32.mrb[106].mxu0  ;;  %v7246_v21 = vpop.f32.mrb[106].mxu1 }
 0x1de   : > { %v7207_v41 = vpop.f32.mrb[107].mxu0  ;;  %v7247_v44 = vpop.f32.mrb[107].mxu1 }
 0x1df   : > { %v3684_v26 = vadd.f32 %v7245_v18, %v7205_v16  ;;  %v7208_v45 = vadd.f32 %v7207_v41, %v7206_v5  ;;  %v7248_v25 = vadd.f32 %v7247_v44, %v7246_v21 }
 0x1e1   : > { %v9550_v20 = vadd.f32 %v3684_v26, %v9519_v35  ;;  %v3687_v0 = vadd.f32 %v7248_v25, %v7208_v45 }
 0x1e3   : > { %v9553_v10 = vadd.f32 %v3687_v0, %v9522_v2  ;;  %v7209_v61 = vpop.f32.mrb[108].mxu0 }
 0x1e4   : > { %v7249_v7 = vpop.f32.mrb[108].mxu1  ;;  %v7210_v12 = vpop.f32.mrb[109].mxu0 }
 0x1e5   : > { %v7211_v8 = vadd.f32 %v7210_v12, %v7209_v61  ;;  %v7250_v31 = vpop.f32.mrb[109].mxu1  ;;  %v7212_v37 = vpop.f32.mrb[110].mxu0 }
 0x1e6   : > { %v7251_v40 = vadd.f32 %v7250_v31, %v7249_v7  ;;  %v7252_v43 = vpop.f32.mrb[110].mxu1  ;;  %v7213_v46 = vpop.f32.mrb[111].mxu0 }
 0x1e7   : > { %v7214_v47 = vadd.f32 %v7213_v46, %v7212_v37  ;;  %v7253_v52 = vpop.f32.mrb[111].mxu1 }
 0x1e8   : > { %v3692_v32 = vadd.f32 %v7251_v40, %v7211_v8  ;;  %v7254_v28 = vadd.f32 %v7253_v52, %v7252_v43 }
 0x1ea   : > { %v9556_v35 = vadd.f32 %v3692_v32, %v9525_v56  ;;  %v3695_v55 = vadd.f32 %v7254_v28, %v7214_v47 }
 0x1ec   : > { %v9559_v2 = vadd.f32 %v3695_v55, %v9528_v3 }
 0x1ed   : > { %v7271_v48 = vpop.f32.mrb[112].mxu0 }
 0x1ee   : > { %v7272_v57 = vpop.f32.mrb[113].mxu0 }
 0x1ef   : > { %v7273_v30 = vadd.f32 %v7272_v57, %v7271_v48  ;;  %v7274_v23 = vpop.f32.mrb[114].mxu0 }
 0x1f0   : > { %v7275_v27 = vpop.f32.mrb[115].mxu0 }
 0x1f1   : > { %v7276_v34 = vadd.f32 %v7275_v27, %v7274_v23 }
 0x1fa   : > { %v7311_v22 = vpop.f32.mrb[112].mxu1 }
 0x1fb   : > { %v7312_v59 = vpop.f32.mrb[113].mxu1 }
 0x1fc   : > { %v7313_v24 = vadd.f32 %v7312_v59, %v7311_v22  ;;  %v7314_v17 = vpop.f32.mrb[114].mxu1 }
 0x1fd   : > { %v7315_v63 = vpop.f32.mrb[115].mxu1 }
 0x1fe   : > { %v4160_v42 = vadd.f32 %v7313_v24, %v7273_v30  ;;  %v7316_v39 = vadd.f32 %v7315_v63, %v7314_v17 }
 0x200   : > { %v9562_v56 = vadd.f32 %v4160_v42, %v9538_v19  ;;  %v4163_v60 = vadd.f32 %v7316_v39, %v7276_v34 }
 0x202   : > { %v9565_v3 = vadd.f32 %v4163_v60, %v9541_v33  ;;  %v7317_v50 = vpop.f32.mrb[116].mxu1 }
 0x203   : > { %v7277_v9 = vpop.f32.mrb[116].mxu0  ;;  %v7318_v38 = vpop.f32.mrb[117].mxu1 }
 0x204   : > { %v7278_v36 = vpop.f32.mrb[117].mxu0  ;;  %v7319_v51 = vadd.f32 %v7318_v38, %v7317_v50  ;;  %v7320_v29 = vpop.f32.mrb[118].mxu1 }
 0x205   : > { %v7279_v53 = vadd.f32 %v7278_v36, %v7277_v9  ;;  %v7280_v11 = vpop.f32.mrb[118].mxu0  ;;  %v7321_v54 = vpop.f32.mrb[119].mxu1 }
 0x206   : > { %v7281_v4 = vpop.f32.mrb[119].mxu0  ;;  %v7322_v13 = vadd.f32 %v7321_v54, %v7320_v29 }
 0x207   : > { %v4168_v6 = vadd.f32 %v7319_v51, %v7279_v53  ;;  %v7282_v15 = vadd.f32 %v7281_v4, %v7280_v11 }
 0x209   : > { %v9568_v19 = vadd.f32 %v4168_v6, %v9544_v58  ;;  %v4171_v14 = vadd.f32 %v7322_v13, %v7282_v15 }
 0x20a   : > { %v7323_v18 = vpop.f32.mrb[120].mxu1 }
 0x20b   : > { %v9571_v33 = vadd.f32 %v4171_v14, %v9547_v62  ;;  %v7283_v16 = vpop.f32.mrb[120].mxu0  ;;  %v7324_v41 = vpop.f32.mrb[121].mxu1 }
 0x20c   : > { %v7284_v5 = vpop.f32.mrb[121].mxu0  ;;  %v7325_v26 = vadd.f32 %v7324_v41, %v7323_v18  ;;  %v7326_v45 = vpop.f32.mrb[122].mxu1 }
 0x20d   : > { %v7285_v21 = vadd.f32 %v7284_v5, %v7283_v16  ;;  %v7286_v44 = vpop.f32.mrb[122].mxu0  ;;  %v7327_v61 = vpop.f32.mrb[123].mxu1 }
 0x20e   : > { %v7287_v25 = vpop.f32.mrb[123].mxu0  ;;  %v7328_v12 = vadd.f32 %v7327_v61, %v7326_v45  ;;  %v9598_v61 = vld [vmem:[%s9847_s5 + $0x8] sm:$0xff]  }
 0x20f   : > { %v7288_v0 = vadd.f32 %v7287_v25, %v7286_v44  ;;  %v4176_v7 = vadd.f32 %v7325_v26, %v7285_v21 }
 0x211   : > { %v9574_v58 = vadd.f32 %v4176_v7, %v9550_v20  ;;  %v4179_v8 = vadd.f32 %v7328_v12, %v7288_v0 }
 0x212   : > { %v7329_v37 = vpop.f32.mrb[124].mxu1 }
 0x213   : > { %v9577_v62 = vadd.f32 %v4179_v8, %v9553_v10  ;;  %v7289_v31 = vpop.f32.mrb[124].mxu0  ;;  %v7330_v46 = vpop.f32.mrb[125].mxu1 }
 0x214   : > { %v7290_v40 = vpop.f32.mrb[125].mxu0  ;;  %v7331_v52 = vadd.f32 %v7330_v46, %v7329_v37  ;;  %v7332_v32 = vpop.f32.mrb[126].mxu1 }
 0x215   : > { %v7291_v43 = vadd.f32 %v7290_v40, %v7289_v31  ;;  %v7292_v47 = vpop.f32.mrb[126].mxu0  ;;  %v7333_v48 = vpop.f32.mrb[127].mxu1 }
 0x216   : > { %v7293_v28 = vpop.f32.mrb[127].mxu0  ;;  %v7334_v57 = vadd.f32 %v7333_v48, %v7332_v32 }
 0x217   : > { %v7294_v55 = vadd.f32 %v7293_v28, %v7292_v47  ;;  %v4184_v22 = vadd.f32 %v7331_v52, %v7291_v43  ;;  %v9612_v28 = vld [vmem:[%s9847_s5 + $0x10] sm:$0xff]  }
 0x219   : > { %v9580_v20 = vadd.f32 %v4184_v22, %v9556_v35  ;;  %v4187_v30 = vadd.f32 %v7334_v57, %v7294_v55  ;;  %v9588_v35 = vld [vmem:[%s9844_s2] ss:$0 sm:$0xff] }
 0x21b   : > { %v9583_v10 = vadd.f32 %v4187_v30, %v9559_v2 }
 0x21d   : > { %v7351_v59 = vpop.f32.mrb[128].mxu0 }
 0x21e   : > { %v7391_v23 = vpop.f32.mrb[128].mxu1  ;;  %v7352_v24 = vpop.f32.mrb[129].mxu0 }
 0x21f   : > { %v7353_v17 = vadd.f32 %v7352_v24, %v7351_v59  ;;  %v7392_v27 = vpop.f32.mrb[129].mxu1  ;;  %v7354_v34 = vpop.f32.mrb[130].mxu0 }
 0x220   : > { %v7393_v63 = vadd.f32 %v7392_v27, %v7391_v23  ;;  %v7394_v42 = vpop.f32.mrb[130].mxu1  ;;  %v7355_v39 = vpop.f32.mrb[131].mxu0 }
 0x221   : > { %v7356_v60 = vadd.f32 %v7355_v39, %v7354_v34  ;;  %v7395_v9 = vpop.f32.mrb[131].mxu1 }
 0x222   : > { %v4652_v50 = vadd.f32 %v7393_v63, %v7353_v17  ;;  %v7396_v36 = vadd.f32 %v7395_v9, %v7394_v42  ;;  %v9622_v17 = vld [vmem:[%s9847_s5 + $0x18] sm:$0xff]  }
 0x224   : > { %v4682_v2 = vadd.f32 %v4652_v50, %v9562_v56  ;;  %v4655_v38 = vadd.f32 %v7396_v36, %v7356_v60 }
 0x225   : > { %v7357_v53 = vpop.f32.mrb[132].mxu0 }
 0x226   : > { %v4697_v51 = vadd.f32 %v9588_v35, %v4682_v2  ;;  %v4683_v11 = vadd.f32 %v4655_v38, %v9565_v3  ;;  %v7397_v29 = vpop.f32.mrb[132].mxu1  ;;  %v7358_v4 = vpop.f32.mrb[133].mxu0 }
 0x227   : > { %v7359_v54 = vadd.f32 %v7358_v4, %v7357_v53  ;;  %v7398_v6 = vpop.f32.mrb[133].mxu1  ;;  %v7360_v15 = vpop.f32.mrb[134].mxu0 }
 0x228   : > { %v4698_v13 = vadd.f32 %v9588_v35, %v4683_v11  ;;  %v7399_v14 = vadd.f32 %v7398_v6, %v7397_v29  ;;  %v7400_v16 = vpop.f32.mrb[134].mxu1  ;;  %v7361_v18 = vpop.f32.mrb[135].mxu0  ;;  %v4705_v41 = vmax.f32 %v4697_v51, 0.0 }
 0x229   : > { %v7362_v5 = vadd.f32 %v7361_v18, %v7360_v15  ;;  %v7401_v21 = vpop.f32.mrb[135].mxu1 }
 0x22a   : > { %v4706_v56 = vmax.f32 %v4698_v13, 0.0  ;;  %v4660_v44 = vadd.f32 %v7399_v14, %v7359_v54  ;;  %v7402_v26 = vadd.f32 %v7401_v21, %v7400_v16  ;;  %v4751_v21 = vlaneseq }
 0x22c   : > { %v4713_v45 = vpack.c.bf16 %v4706_v56, %v4705_v41  ;;  %v4684_v25 = vadd.f32 %v4660_v44, %v9568_v19  ;;  %v4663_v3 = vadd.f32 %v7402_v26, %v7362_v5  ;;  %v9644_v5 = vld [vmem:[%s9847_s5 + $0x20] sm:$0xff]   ;;  %v4752_v41 = vshrl.u32 %v4751_v21, 7 }
 0x22d   : > { %v7363_v0 = vpop.f32.mrb[136].mxu0  ;;  %v4749_v26 = vld [vmem:[%s9846_s4] sm:$0xf] }
 0x22e   : > { %v4685_v7 = vadd.f32 %v4663_v3, %v9571_v33  ;;  %v7403_v12 = vpop.f32.mrb[136].mxu1  ;;  %4964 = vmatmul.mubr.bf16.vlgmr.msra.gmra.mrb[144].mxu0 %v4713_v45  ;;  %5037 = vmatmul.mubr.bf16.vlgmr.msra.gmra.mrb[144].mxu1 %v4713_v45  ;;  %v7364_v8 = vpop.f32.mrb[137].mxu0  ;;  %v4699_v31 = vadd.f32 %v9588_v35, %v4684_v25  ;;  %v4753_v56 = vsub.s32 0, %v4752_v41  ;;  %v4761_v44 = vsub.s32 2, %v4752_v41 }
 0x22f   : > { %v7365_v37 = vadd.f32 %v7364_v8, %v7363_v0  ;;  %v7404_v40 = vpop.f32.mrb[137].mxu1  ;;  %v7366_v43 = vpop.f32.mrb[138].mxu0  ;;  %4973 = vmatprep.mubr.bf16.mxu0 %v8109_v1  ;;  %5046 = vmatprep.mubr.bf16.mxu1 %v8109_v1  ;;  %v4757_v45 = vsub.s32 1, %v4752_v41  ;;  %v4765_v25 = vsub.s32 3, %v4752_v41 }
 0x230   : > { %v7405_v19 = vadd.f32 %v7404_v40, %v7403_v12  ;;  %v7406_v46 = vpop.f32.mrb[138].mxu1  ;;  %v7367_v47 = vpop.f32.mrb[139].mxu0  ;;  %v4700_v52 = vadd.f32 %v9588_v35, %v4685_v7  ;;  %7464 = vmatpush3.bf16.msra.mxu0 %v9533_v49  ;;  %7488 = vmatpush3.bf16.msra.mxu1 %v9533_v49  ;;  %v4707_v22 = vmax.f32 %v4699_v31, 0.0  ;;  %v9682_v3 = vrot.slane %v4749_v26, %v4753_v56 }
 0x231   : > { %v7368_v33 = vadd.f32 %v7367_v47, %v7366_v43  ;;  %v7407_v32 = vpop.f32.mrb[139].mxu1  ;;  %7465 = vmatprep.subr.bf16.mxu0 %v9598_v61  ;;  %7489 = vmatprep.subr.bf16.mxu1 %v9598_v61  ;;  %v9684_v0 = vrot.slane %v4749_v26, %v4761_v44  ;;  %v9686_v7 = vrot.slane %v4749_v26, %v4757_v45 }
 0x232   : > { %v4668_v55 = vadd.f32 %v7405_v19, %v7365_v37  ;;  %v7408_v48 = vadd.f32 %v7407_v32, %v7406_v46  ;;  %v4708_v57 = vmax.f32 %v4700_v52, 0.0  ;;  %v9688_v12 = vrot.slane %v4749_v26, %v4765_v25 }
 0x234   : > { %v4686_v30 = vadd.f32 %v4668_v55, %v9574_v58  ;;  %v4671_v59 = vadd.f32 %v7408_v48, %v7368_v33  ;;  %v4714_v23 = vpack.c.bf16 %v4708_v57, %v4707_v22  ;;  %7466 = vmatpush3.bf16.msra.mxu0 %v9598_v61  ;;  %7490 = vmatpush3.bf16.msra.mxu1 %v9598_v61 }
 0x235   : > { %v7369_v24 = vpop.f32.mrb[140].mxu0  ;;  %7467 = vmatprep.subr.bf16.mxu0 %v9612_v28  ;;  %7491 = vmatprep.subr.bf16.mxu1 %v9612_v28 }
 0x236   : > { %v4687_v27 = vadd.f32 %v4671_v59, %v9577_v62  ;;  %v7409_v34 = vpop.f32.mrb[140].mxu1  ;;  %4974 = vmatmul.mubr.bf16.gmra.mrb[148].mxu0 %v4714_v23  ;;  %5047 = vmatmul.mubr.bf16.gmra.mrb[148].mxu1 %v4714_v23  ;;  %v7370_v58 = vpop.f32.mrb[141].mxu0  ;;  %v4701_v63 = vadd.f32 %v9588_v35, %v4686_v30 }
 0x237   : > { %v7371_v42 = vadd.f32 %v7370_v58, %v7369_v24  ;;  %v7410_v39 = vpop.f32.mrb[141].mxu1  ;;  %v7372_v60 = vpop.f32.mrb[142].mxu0  ;;  %4983 = vmatprep.mubr.bf16.mxu0 %v8109_v1  ;;  %5056 = vmatprep.mubr.bf16.mxu1 %v8109_v1 }
 0x238   : > { %v7411_v9 = vadd.f32 %v7410_v39, %v7409_v34  ;;  %v7412_v50 = vpop.f32.mrb[142].mxu1  ;;  %v7373_v36 = vpop.f32.mrb[143].mxu0  ;;  %v4702_v2 = vadd.f32 %v9588_v35, %v4687_v27  ;;  %7468 = vmatpush3.bf16.msra.mxu0 %v9612_v28  ;;  %7492 = vmatpush3.bf16.msra.mxu1 %v9612_v28  ;;  %v4709_v11 = vmax.f32 %v4701_v63, 0.0 }
 0x239   : > { %v7374_v62 = vadd.f32 %v7373_v36, %v7372_v60  ;;  %v7413_v38 = vpop.f32.mrb[143].mxu1  ;;  %7469 = vmatprep.subr.bf16.mxu0 %v9622_v17  ;;  %7493 = vmatprep.subr.bf16.mxu1 %v9622_v17 }
 0x23a   : > { %v4676_v53 = vadd.f32 %v7411_v9, %v7371_v42  ;;  %v7414_v51 = vadd.f32 %v7413_v38, %v7412_v50  ;;  %v4710_v29 = vmax.f32 %v4702_v2, 0.0 }
 0x23c   : > { %v4688_v4 = vadd.f32 %v4676_v53, %v9580_v20  ;;  %v4679_v54 = vadd.f32 %v7414_v51, %v7374_v62  ;;  %v4715_v6 = vpack.c.bf16 %v4710_v29, %v4709_v11  ;;  %7470 = vmatpush3.bf16.msra.mxu0 %v9622_v17  ;;  %7494 = vmatpush3.bf16.msra.mxu1 %v9622_v17 }
 0x23d   : > { %7471 = vmatprep.subr.bf16.mxu0 %v9644_v5  ;;  %7495 = vmatprep.subr.bf16.mxu1 %v9644_v5 }
 0x23e   : > { %v4689_v15 = vadd.f32 %v4679_v54, %v9583_v10  ;;  %4984 = vmatmul.mubr.bf16.gmra.mrb[152].mxu0 %v4715_v6  ;;  %5057 = vmatmul.mubr.bf16.gmra.mrb[152].mxu1 %v4715_v6  ;;  %v4703_v13 = vadd.f32 %v9588_v35, %v4688_v4  ;;  %v9662_v10 = vld [vmem:[%s9847_s5 + $0x30] sm:$0xff]  }
 0x23f   : > { %4993 = vmatprep.mubr.bf16.mxu0 %v8109_v1  ;;  %5066 = vmatprep.mubr.bf16.mxu1 %v8109_v1  ;;  %v9653_v1 = vld [vmem:[%s9847_s5 + $0x28] sm:$0xff]  }
 0x240   : > { %v4704_v14 = vadd.f32 %v9588_v35, %v4689_v15  ;;  %v4711_v16 = vmax.f32 %v4703_v13, 0.0  ;;  %7472 = vmatpush3.bf16.msra.mxu0 %v9644_v5  ;;  %7496 = vmatpush3.bf16.msra.mxu1 %v9644_v5  ;;  %v9671_v35 = vld [vmem:[%s9847_s5 + $0x38] sm:$0xff]  }
 0x241   : > { %7473 = vmatprep.subr.bf16.mxu0 %v9653_v1  ;;  %7497 = vmatprep.subr.bf16.mxu1 %v9653_v1 }
 0x242   : > { %v4712_v20 = vmax.f32 %v4704_v14, 0.0 }
 0x244   : > { %v4716_v18 = vpack.c.bf16 %v4712_v20, %v4711_v16  ;;  %7474 = vmatpush3.bf16.msra.mxu0 %v9653_v1  ;;  %7498 = vmatpush3.bf16.msra.mxu1 %v9653_v1 }
 0x245   : > { %7475 = vmatprep.subr.bf16.mxu0 %v9662_v10  ;;  %7499 = vmatprep.subr.bf16.mxu1 %v9662_v10 }
 0x246   : > { %4994 = vmatmul.mubr.bf16.gmra.mrb[156].mxu0 %v4716_v18  ;;  %5067 = vmatmul.mubr.bf16.gmra.mrb[156].mxu1 %v4716_v18 }
 0x248   : > { %7476 = vmatpush3.bf16.msra.mxu0 %v9662_v10  ;;  %7500 = vmatpush3.bf16.msra.mxu1 %v9662_v10 }
 0x249   : > { %7477 = vmatprep.subr.bf16.mxu0 %v9671_v35  ;;  %7501 = vmatprep.subr.bf16.mxu1 %v9671_v35 }
 0x24c   : > { %7478 = vmatpush3.bf16.msra.mxu0 %v9671_v35  ;;  %7502 = vmatpush3.bf16.msra.mxu1 %v9671_v35 }
 0x24d   : > { %7511 = vmatprep.subr.bf16.mxu0 %v9533_v49  ;;  %7535 = vmatprep.subr.bf16.mxu1 %v9533_v49 }
 0x301   : > { %v4965_v8 = vpop.f32.mrb[144].mxu0  ;;  %v5038_v31 = vpop.f32.mrb[144].mxu1 }
 0x302   : > { %v4966_v37 = vadd.f32 %v4965_v8, %v9682_v3  ;;  %v5039_v40 = vadd.f32 %v5038_v31, %v9684_v0  ;;  %v4967_v43 = vpop.f32.mrb[145].mxu0  ;;  %v5040_v19 = vpop.f32.mrb[145].mxu1 }
 0x303   : > { %v4968_v46 = vadd.f32 %v4967_v43, %v9686_v7  ;;  %v5041_v47 = vadd.f32 %v5040_v19, %v9688_v12  ;;  %v4969_v52 = vpop.f32.mrb[146].mxu0  ;;  %v5042_v33 = vpop.f32.mrb[146].mxu1 }
 0x304   : > { %v4970_v32 = vadd.f32 %v4969_v52, %v9682_v3  ;;  %v5043_v55 = vadd.f32 %v5042_v33, %v9684_v0  ;;  %v4971_v48 = vpop.f32.mrb[147].mxu0  ;;  %v5044_v22 = vpop.f32.mrb[147].mxu1  ;;  %v5077_v59 = vmax.f32 %v4966_v37, 0.0  ;;  %v5079_v23 = vmax.f32 %v5039_v40, 0.0 }
 0x305   : > { %v4972_v57 = vadd.f32 %v4971_v48, %v9686_v7  ;;  %v5045_v30 = vadd.f32 %v5044_v22, %v9688_v12  ;;  %v5078_v34 = vmax.f32 %v4968_v46, 0.0  ;;  %v5080_v58 = vmax.f32 %v5041_v47, 0.0 }
 0x306   : > { %v5081_v24 = vmax.f32 %v4970_v32, 0.0  ;;  %v5083_v27 = vmax.f32 %v5043_v55, 0.0 }
 0x307   : > { %v5082_v63 = vmax.f32 %v4972_v57, 0.0  ;;  %v5084_v42 = vmax.f32 %v5045_v30, 0.0 }
 0x308   : > { %v5109_v39 = vpack.c.bf16 %v5081_v24, %v5077_v59  ;;  %v9698_v60 = vpack.c.bf16 %v5083_v27, %v5079_v23 }
 0x309   : > { %v5110_v9 = vpack.c.bf16 %v5082_v63, %v5078_v34  ;;  %v9700_v50 = vpack.c.bf16 %v5084_v42, %v5080_v58  ;;  %v4975_v36 = vpop.f32.mrb[148].mxu0  ;;  %v5048_v2 = vpop.f32.mrb[148].mxu1 }
 0x30a   : > { %v4976_v62 = vadd.f32 %v4975_v36, %v9682_v3  ;;  %v5049_v38 = vadd.f32 %v5048_v2, %v9684_v0  ;;  %v4977_v53 = vpop.f32.mrb[149].mxu0  ;;  %v5050_v51 = vpop.f32.mrb[149].mxu1  ;;  %7479 = vmatprep.mubr.bf16.mxu0 %v5109_v39 }
 0x30b   : > { %v4978_v11 = vadd.f32 %v4977_v53, %v9686_v7  ;;  %v5051_v29 = vadd.f32 %v5050_v51, %v9688_v12  ;;  %v4979_v4 = vpop.f32.mrb[150].mxu0  ;;  %v5052_v54 = vpop.f32.mrb[150].mxu1  ;;  %7503 = vmatprep.mubr.bf16.mxu1 %v5110_v9 }
 0x30c   : > { %v4980_v6 = vadd.f32 %v4979_v4, %v9682_v3  ;;  %v5053_v15 = vadd.f32 %v5052_v54, %v9684_v0  ;;  %v4981_v13 = vpop.f32.mrb[151].mxu0  ;;  %v5054_v14 = vpop.f32.mrb[151].mxu1  ;;  %v5085_v18 = vmax.f32 %v4976_v62, 0.0  ;;  %v5087_v21 = vmax.f32 %v5049_v38, 0.0 }
 0x30d   : > { %v4982_v16 = vadd.f32 %v4981_v13, %v9686_v7  ;;  %v5055_v20 = vadd.f32 %v5054_v14, %v9688_v12  ;;  %v5086_v44 = vmax.f32 %v4978_v11, 0.0  ;;  %v5088_v26 = vmax.f32 %v5051_v29, 0.0 }
 0x30e   : > { %v5089_v41 = vmax.f32 %v4980_v6, 0.0  ;;  %v5091_v56 = vmax.f32 %v5053_v15, 0.0 }
 0x30f   : > { %v5090_v45 = vmax.f32 %v4982_v16, 0.0  ;;  %v5092_v25 = vmax.f32 %v5055_v20, 0.0 }
 0x310   : > { %v5113_v8 = vpack.c.bf16 %v5089_v41, %v5085_v18  ;;  %v9710_v31 = vpack.c.bf16 %v5091_v56, %v5087_v21 }
 0x311   : > { %v5114_v37 = vpack.c.bf16 %v5090_v45, %v5086_v44  ;;  %v9712_v40 = vpack.c.bf16 %v5092_v25, %v5088_v26  ;;  %v4985_v43 = vpop.f32.mrb[152].mxu0  ;;  %v5058_v19 = vpop.f32.mrb[152].mxu1 }
 0x312   : > { %v4986_v46 = vadd.f32 %v4985_v43, %v9682_v3  ;;  %v5059_v47 = vadd.f32 %v5058_v19, %v9684_v0  ;;  %v4987_v52 = vpop.f32.mrb[153].mxu0  ;;  %v5060_v33 = vpop.f32.mrb[153].mxu1  ;;  %7480 = vmatmul.mubr.bf16.vlgmr.msra.gmra.mrb[160].mxu0 %v5113_v8 }
 0x313   : > { %v4988_v32 = vadd.f32 %v4987_v52, %v9686_v7  ;;  %v5061_v55 = vadd.f32 %v5060_v33, %v9688_v12  ;;  %7512 = vmatpush3.bf16.msra.mxu0 %v9533_v49  ;;  %v4989_v48 = vpop.f32.mrb[154].mxu0  ;;  %v5062_v22 = vpop.f32.mrb[154].mxu1  ;;  %7504 = vmatmul.mubr.bf16.vlgmr.msra.gmra.mrb[160].mxu1 %v5114_v37 }
 0x314   : > { %v4990_v57 = vadd.f32 %v4989_v48, %v9682_v3  ;;  %v5063_v30 = vadd.f32 %v5062_v22, %v9684_v0  ;;  %7536 = vmatpush3.bf16.msra.mxu1 %v9533_v49  ;;  %v4991_v59 = vpop.f32.mrb[155].mxu0  ;;  %v5064_v23 = vpop.f32.mrb[155].mxu1  ;;  %7513 = vmatprep.subr.bf16.mxu0 %v9598_v61  ;;  %v5093_v34 = vmax.f32 %v4986_v46, 0.0  ;;  %v5095_v58 = vmax.f32 %v5059_v47, 0.0 }
 0x315   : > { %v4992_v24 = vadd.f32 %v4991_v59, %v9686_v7  ;;  %v5065_v27 = vadd.f32 %v5064_v23, %v9688_v12  ;;  %7537 = vmatprep.subr.bf16.mxu1 %v9598_v61  ;;  %v5094_v39 = vmax.f32 %v4988_v32, 0.0  ;;  %v5096_v9 = vmax.f32 %v5061_v55, 0.0 }
 0x316   : > { %v5097_v63 = vmax.f32 %v4990_v57, 0.0  ;;  %v5099_v42 = vmax.f32 %v5063_v30, 0.0 }
 0x317   : > { %v5098_v36 = vmax.f32 %v4992_v24, 0.0  ;;  %v5100_v2 = vmax.f32 %v5065_v27, 0.0  ;;  %7514 = vmatpush3.bf16.msra.mxu0 %v9598_v61 }
 0x318   : > { %v5117_v49 = vpack.c.bf16 %v5097_v63, %v5093_v34  ;;  %v5119_v62 = vpack.c.bf16 %v5099_v42, %v5095_v58  ;;  %7538 = vmatpush3.bf16.msra.mxu1 %v9598_v61  ;;  %7515 = vmatprep.subr.bf16.mxu0 %v9612_v28 }
 0x319   : > { %v5118_v38 = vpack.c.bf16 %v5098_v36, %v5094_v39  ;;  %v5120_v53 = vpack.c.bf16 %v5100_v2, %v5096_v9  ;;  %v4995_v51 = vpop.f32.mrb[156].mxu0  ;;  %v5068_v11 = vpop.f32.mrb[156].mxu1  ;;  %7539 = vmatprep.subr.bf16.mxu1 %v9612_v28 }
 0x31a   : > { %v4996_v29 = vadd.f32 %v4995_v51, %v9682_v3  ;;  %v5069_v4 = vadd.f32 %v5068_v11, %v9684_v0  ;;  %v4997_v54 = vpop.f32.mrb[157].mxu0  ;;  %v5070_v6 = vpop.f32.mrb[157].mxu1  ;;  %7483 = vmatprep.mubr.bf16.mxu0 %v5117_v49 }
 0x31b   : > { %v4998_v15 = vadd.f32 %v4997_v54, %v9686_v7  ;;  %v5071_v13 = vadd.f32 %v5070_v6, %v9688_v12  ;;  %7516 = vmatpush3.bf16.msra.mxu0 %v9612_v28  ;;  %v4999_v61 = vpop.f32.mrb[158].mxu0  ;;  %v5072_v14 = vpop.f32.mrb[158].mxu1  ;;  %7507 = vmatprep.mubr.bf16.mxu1 %v5118_v38 }
 0x31c   : > { %v5000_v16 = vadd.f32 %v4999_v61, %v9682_v3  ;;  %v5073_v20 = vadd.f32 %v5072_v14, %v9684_v0  ;;  %7540 = vmatpush3.bf16.msra.mxu1 %v9612_v28  ;;  %v5001_v18 = vpop.f32.mrb[159].mxu0  ;;  %v5074_v21 = vpop.f32.mrb[159].mxu1  ;;  %7517 = vmatprep.subr.bf16.mxu0 %v9622_v17  ;;  %v5101_v44 = vmax.f32 %v4996_v29, 0.0  ;;  %v5103_v26 = vmax.f32 %v5069_v4, 0.0 }
 0x31d   : > { %v5002_v41 = vadd.f32 %v5001_v18, %v9686_v7  ;;  %v5075_v56 = vadd.f32 %v5074_v21, %v9688_v12  ;;  %7541 = vmatprep.subr.bf16.mxu1 %v9622_v17  ;;  %v5102_v8 = vmax.f32 %v4998_v15, 0.0  ;;  %v5104_v3 = vmax.f32 %v5071_v13, 0.0 }
 0x31e   : > { %v5105_v45 = vmax.f32 %v5000_v16, 0.0  ;;  %v5107_v25 = vmax.f32 %v5073_v20, 0.0 }
 0x31f   : > { %v5106_v37 = vmax.f32 %v5002_v41, 0.0  ;;  %v5108_v0 = vmax.f32 %v5075_v56, 0.0  ;;  %7518 = vmatpush3.bf16.msra.mxu0 %v9622_v17 }
 0x320   : > { %v5121_v28 = vpack.c.bf16 %v5105_v45, %v5101_v44  ;;  %v5123_v43 = vpack.c.bf16 %v5107_v25, %v5103_v26  ;;  %7542 = vmatpush3.bf16.msra.mxu1 %v9622_v17  ;;  %7519 = vmatprep.subr.bf16.mxu0 %v9644_v5  ;;  %v9768_v17 = vld [vmem:[%s9848_s6] ss:$0 sm:$0xff] }
 0x321   : > { %v5122_v7 = vpack.c.bf16 %v5106_v37, %v5102_v8  ;;  %v5124_v12 = vpack.c.bf16 %v5108_v0, %v5104_v3  ;;  %7543 = vmatprep.subr.bf16.mxu1 %v9644_v5 }
 0x322   : > { %7484 = vmatmul.mubr.bf16.gmra.mrb[164].mxu0 %v5121_v28 }
 0x323   : > { %7520 = vmatpush3.bf16.msra.mxu0 %v9644_v5  ;;  %7508 = vmatmul.mubr.bf16.gmra.mrb[164].mxu1 %v5122_v7 }
 0x324   : > { %7527 = vmatprep.mubr.bf16.mxu0 %v9698_v60  ;;  %7544 = vmatpush3.bf16.msra.mxu1 %v9644_v5 }
 0x325   : > { %7551 = vmatprep.mubr.bf16.mxu1 %v9700_v50  ;;  %7521 = vmatprep.subr.bf16.mxu0 %v9653_v1 }
 0x326   : > { %7545 = vmatprep.subr.bf16.mxu1 %v9653_v1 }
 0x327   : > { %7522 = vmatpush3.bf16.msra.mxu0 %v9653_v1 }
 0x328   : > { %7546 = vmatpush3.bf16.msra.mxu1 %v9653_v1  ;;  %7523 = vmatprep.subr.bf16.mxu0 %v9662_v10 }
 0x329   : > { %7547 = vmatprep.subr.bf16.mxu1 %v9662_v10 }
 0x32b   : > { %7524 = vmatpush3.bf16.msra.mxu0 %v9662_v10 }
 0x32c   : > { %7548 = vmatpush3.bf16.msra.mxu1 %v9662_v10  ;;  %7525 = vmatprep.subr.bf16.mxu0 %v9671_v35 }
 0x32d   : > { %7549 = vmatprep.subr.bf16.mxu1 %v9671_v35 }
 0x32f   : > { %7526 = vmatpush3.bf16.msra.mxu0 %v9671_v35 }
 0x330   : > { %7550 = vmatpush3.bf16.msra.mxu1 %v9671_v35 }
 0x332   : > { %7528 = vmatmul.mubr.bf16.vlgmr.msra.gmra.mrb[168].mxu0 %v9710_v31 }
 0x333   : > { %7531 = vmatprep.mubr.bf16.mxu0 %v5119_v62  ;;  %7552 = vmatmul.mubr.bf16.vlgmr.msra.gmra.mrb[168].mxu1 %v9712_v40 }
 0x334   : > { %7555 = vmatprep.mubr.bf16.mxu1 %v5120_v53 }
 0x33a   : > { %7532 = vmatmul.mubr.bf16.gmra.mrb[172].mxu0 %v5123_v43 }
 0x33b   : > { %7556 = vmatmul.mubr.bf16.gmra.mrb[172].mxu1 %v5124_v12 }
 0x3e5   : > { %v7481_v5 = vpop.f32.mrb[160].mxu0 }
 0x3e6   : > { %v5239_v1 = vadd.f32 %v7481_v5, %v9768_v17  ;;  %v5230_v10 = vpop.f32.mrb[161].mxu0  ;;  %v7505_v35 = vpop.f32.mrb[160].mxu1 }
 0x3e7   : > { %v5231_v60 = vadd.f32 %v9768_v17, %v5230_v10  ;;  %v5312_v50 = vadd.f32 %v7505_v35, %v9768_v17  ;;  %v7482_v31 = vpop.f32.mrb[162].mxu0  ;;  %v5303_v40 = vpop.f32.mrb[161].mxu1 }
 0x3e8   : > { %5263 = vst [vmem:[%s9773_s27 + $0x10] sm:$0xff] %v5239_v1  ;;  %v5242_v19 = vadd.f32 %v7482_v31, %v9768_v17  ;;  %v5304_v46 = vadd.f32 %v9768_v17, %v5303_v40  ;;  %v5233_v47 = vpop.f32.mrb[163].mxu0  ;;  %v7506_v52 = vpop.f32.mrb[162].mxu1 }
 0x3e9   : > { %5261 = vst [vmem:[%s9773_s27] sm:$0xff] %v5231_v60  ;;  %6670 = vst [vmem:[%s9773_s27 + $0x50] sm:$0xff] %v5312_v50  ;;  %v5234_v33 = vadd.f32 %v9768_v17, %v5233_v47  ;;  %v5315_v32 = vadd.f32 %v7506_v52, %v9768_v17  ;;  %v5306_v55 = vpop.f32.mrb[163].mxu1 }
 0x3ea   : > { %5264 = vst [vmem:[%s9773_s27 + $0x18] sm:$0xff] %v5242_v19  ;;  %6668 = vst [vmem:[%s9773_s27 + $0x40] sm:$0xff] %v5304_v46  ;;  %v5307_v48 = vadd.f32 %v9768_v17, %v5306_v55 }
 0x3eb   : > { %5262 = vst [vmem:[%s9773_s27 + $0x8] sm:$0xff] %v5234_v33  ;;  %6671 = vst [vmem:[%s9773_s27 + $0x58] sm:$0xff] %v5315_v32 }
 0x3ec   : > { %6669 = vst [vmem:[%s9773_s27 + $0x48] sm:$0xff] %v5307_v48 }
 0x3f5   : > { %v7485_v22 = vpop.f32.mrb[164].mxu0 }
 0x3f6   : > { %v5255_v57 = vadd.f32 %v7485_v22, %v9768_v17  ;;  %v5246_v30 = vpop.f32.mrb[165].mxu0  ;;  %v7509_v59 = vpop.f32.mrb[164].mxu1 }
 0x3f7   : > { %v5247_v23 = vadd.f32 %v9768_v17, %v5246_v30  ;;  %v5328_v24 = vadd.f32 %v7509_v59, %v9768_v17  ;;  %v7486_v27 = vpop.f32.mrb[166].mxu0  ;;  %v5319_v34 = vpop.f32.mrb[165].mxu1 }
 0x3f8   : > { %5267 = vst [vmem:[%s9773_s27 + $0x30] sm:$0xff] %v5255_v57  ;;  %v5258_v58 = vadd.f32 %v7486_v27, %v9768_v17  ;;  %v5320_v63 = vadd.f32 %v9768_v17, %v5319_v34  ;;  %v5249_v42 = vpop.f32.mrb[167].mxu0  ;;  %v7510_v39 = vpop.f32.mrb[166].mxu1 }
 0x3f9   : > { %5265 = vst [vmem:[%s9773_s27 + $0x20] sm:$0xff] %v5247_v23  ;;  %6674 = vst [vmem:[%s9773_s27 + $0x70] sm:$0xff] %v5328_v24  ;;  %v5250_v9 = vadd.f32 %v9768_v17, %v5249_v42  ;;  %v5331_v36 = vadd.f32 %v7510_v39, %v9768_v17  ;;  %v5322_v2 = vpop.f32.mrb[167].mxu1 }
 0x3fa   : > { %5268 = vst [vmem:[%s9773_s27 + $0x38] sm:$0xff] %v5258_v58  ;;  %6672 = vst [vmem:[%s9773_s27 + $0x60] sm:$0xff] %v5320_v63  ;;  %v5323_v49 = vadd.f32 %v9768_v17, %v5322_v2 }
 0x3fb   : > { %5266 = vst [vmem:[%s9773_s27 + $0x28] sm:$0xff] %v5250_v9  ;;  %6675 = vst [vmem:[%s9773_s27 + $0x78] sm:$0xff] %v5331_v36 }
 0x3fc   : > { %6673 = vst [vmem:[%s9773_s27 + $0x68] sm:$0xff] %v5323_v49 }
 0x405   : > { %v7529_v62 = vpop.f32.mrb[168].mxu0 }
 0x406   : > { %v5386_v38 = vadd.f32 %v7529_v62, %v9768_v17  ;;  %v5377_v53 = vpop.f32.mrb[169].mxu0  ;;  %v7553_v51 = vpop.f32.mrb[168].mxu1 }
 0x407   : > { %v5378_v11 = vadd.f32 %v9768_v17, %v5377_v53  ;;  %v5460_v29 = vadd.f32 %v7553_v51, %v9768_v17  ;;  %v7530_v4 = vpop.f32.mrb[170].mxu0  ;;  %v5451_v54 = vpop.f32.mrb[169].mxu1 }
 0x408   : > { %6678 = vst [vmem:[%s9773_s27 + $0x90] sm:$0xff] %v5386_v38  ;;  %v5389_v6 = vadd.f32 %v7530_v4, %v9768_v17  ;;  %v5452_v15 = vadd.f32 %v9768_v17, %v5451_v54  ;;  %v5380_v13 = vpop.f32.mrb[171].mxu0  ;;  %v7554_v61 = vpop.f32.mrb[170].mxu1 }
 0x409   : > { %6676 = vst [vmem:[%s9773_s27 + $0x80] sm:$0xff] %v5378_v11  ;;  %6686 = vst [vmem:[%s9773_s27 + $0xd0] sm:$0xff] %v5460_v29  ;;  %v5381_v14 = vadd.f32 %v9768_v17, %v5380_v13  ;;  %v5463_v16 = vadd.f32 %v7554_v61, %v9768_v17  ;;  %v5454_v20 = vpop.f32.mrb[171].mxu1 }
 0x40a   : > { %6679 = vst [vmem:[%s9773_s27 + $0x98] sm:$0xff] %v5389_v6  ;;  %6684 = vst [vmem:[%s9773_s27 + $0xc0] sm:$0xff] %v5452_v15  ;;  %v5455_v18 = vadd.f32 %v9768_v17, %v5454_v20 }
 0x40b   : > { %6677 = vst [vmem:[%s9773_s27 + $0x88] sm:$0xff] %v5381_v14  ;;  %6687 = vst [vmem:[%s9773_s27 + $0xd8] sm:$0xff] %v5463_v16 }
 0x40c   : > { %6685 = vst [vmem:[%s9773_s27 + $0xc8] sm:$0xff] %v5455_v18 }
 0x40d   : > { %v7533_v21 = vpop.f32.mrb[172].mxu0 }
 0x40e   : > { %v5402_v41 = vadd.f32 %v7533_v21, %v9768_v17  ;;  %v5393_v56 = vpop.f32.mrb[173].mxu0  ;;  %v7557_v44 = vpop.f32.mrb[172].mxu1 }
 0x40f   : > { %v5394_v26 = vadd.f32 %v9768_v17, %v5393_v56  ;;  %v5476_v45 = vadd.f32 %v7557_v44, %v9768_v17  ;;  %v7534_v25 = vpop.f32.mrb[174].mxu0  ;;  %v5467_v8 = vpop.f32.mrb[173].mxu1 }
 0x410   : > { %6682 = vst [vmem:[%s9773_s27 + $0xb0] sm:$0xff] %v5402_v41  ;;  %v5405_v3 = vadd.f32 %v7534_v25, %v9768_v17  ;;  %v5468_v37 = vadd.f32 %v9768_v17, %v5467_v8  ;;  %v5396_v0 = vpop.f32.mrb[175].mxu0  ;;  %v7558_v28 = vpop.f32.mrb[174].mxu1 }
 0x411   : > { %6680 = vst [vmem:[%s9773_s27 + $0xa0] sm:$0xff] %v5394_v26  ;;  %6690 = vst [vmem:[%s9773_s27 + $0xf0] sm:$0xff] %v5476_v45  ;;  %v5397_v43 = vadd.f32 %v9768_v17, %v5396_v0  ;;  %v5479_v7 = vadd.f32 %v7558_v28, %v9768_v17  ;;  %v5470_v12 = vpop.f32.mrb[175].mxu1 }
 0x412   : > { %6683 = vst [vmem:[%s9773_s27 + $0xb8] sm:$0xff] %v5405_v3  ;;  %6688 = vst [vmem:[%s9773_s27 + $0xe0] sm:$0xff] %v5468_v37  ;;  %v5471_v5 = vadd.f32 %v9768_v17, %v5470_v12 }
 0x413   : > { %6681 = vst [vmem:[%s9773_s27 + $0xa8] sm:$0xff] %v5397_v43  ;;  %6691 = vst [vmem:[%s9773_s27 + $0xf8] sm:$0xff] %v5479_v7 }
 0x414   : > { %6689 = vst [vmem:[%s9773_s27 + $0xe8] sm:$0xff] %v5471_v5 }
 0x415 PF: > { %s17_s24 = sadd.s32 1, %s8107_s24  }
 0x416   : > { %p14_p4 = scmp.ge.s32.totalorder %s17_s24, 4  }
 0x418   :  { %16 = sbr.rel (!%p14_p4) target bundleno = 1 (0x1), region = 97 }

</bundles_post_ra>
